<compile_context>
chip_gen: v5e
topology: v5e:2x2
jax: 0.10.0
libtpu: 0.0.40
codegen_flags: <defaults>
</compile_context>

<pallas_src>
import functools

import numpy as np
import jax
import jax.numpy as jnp
from jax import lax
from jax.experimental import pallas as pl
from jax.experimental.pallas import tpu as pltpu

LEAKY_SLOPE = 0.2
BN_EPS = 1e-5
KSIZE = 4                      # conv kernel size (kw in the PyTorch module)
PADW = 2                       # int(np.ceil((4 - 1) / 2))


def _leaky(z):
    return jnp.where(z >= 0.0, z, LEAKY_SLOPE * z)


# -----------------------------------------------------------------------------
# Pallas kernels: direct (im2col-free) conv via tap-accumulation matmuls.
#
# Layout trick: per stride-phase the padded input is flattened to (PH*PW, Cin).
# Kernel tap (i, j) then reads one contiguous static slice of length
# m_acc = (Ho-1)*PW + Wo starting at q0 = (i//s)*PW + (j//s), and all taps share
# the same output-row index r = h*PW + w.  Rows with (r % PW) >= Wo are
# wrap-around junk: stripped by the wrapper, masked out of the BN statistics.
# -----------------------------------------------------------------------------
def _conv_bias_kernel(x_ref, w_ref, b_ref, o_ref, *, taps, m_acc, leaky):
    """out = [leaky_relu](conv(x) + b) for one batch element.

    x_ref: (n_phases, PH*PW, Cin) bf16    w_ref: (kh*kw, Cin, Cmm) bf16 (VMEM
    resident)    b_ref: (1, Cmm) f32      o_ref: (m_acc, Cout); Cout may be
    smaller than Cmm (the 1-channel head accumulates at 128 MXU lanes).
    """
    cmm = w_ref.shape[-1]
    acc = jnp.zeros((m_acc, cmm), jnp.float32)
    for t, (phase, q0) in enumerate(taps):          # static unroll: kh*kw = 16 taps
        a = x_ref[phase, pl.ds(q0, m_acc), :]
        acc = acc + jnp.dot(a, w_ref[t], preferred_element_type=jnp.float32)
    z = acc + b_ref[...]                            # f32 epilogue
    if leaky:
        z = _leaky(z)
    o_ref[...] = z[:, : o_ref.shape[-1]].astype(o_ref.dtype)


def _conv_stats_kernel(x_ref, w_ref, mask_ref, o_ref, s1_ref, s2_ref, *,
                       taps, m_acc):
    """Bias-free conv + fused per-channel sum / sum-of-squares (train-mode BN).

    mask_ref: (m_acc, 1) f32 - 1.0 on valid output rows, 0.0 on wrap-around
    rows, so the statistics come straight from the f32 accumulator with no
    extra HBM read of the activation.
    """
    cout = o_ref.shape[-1]
    acc = jnp.zeros((m_acc, cout), jnp.float32)
    for t, (phase, q0) in enumerate(taps):
        a = x_ref[phase, pl.ds(q0, m_acc), :]
        acc = acc + jnp.dot(a, w_ref[t], preferred_element_type=jnp.float32)
    o_ref[...] = acc.astype(o_ref.dtype)
    accv = acc * mask_ref[...]
    s1_ref[...] = jnp.sum(accv, axis=0, keepdims=True)        # (1, Cout)
    s2_ref[...] = jnp.sum(accv * acc, axis=0, keepdims=True)  # mask is 0/1


# -----------------------------------------------------------------------------
# Layer wrapper (input prep is one XLA-fused copy; all FLOPs are in Pallas)
# -----------------------------------------------------------------------------
def _prep_phases(x_nhwc, *, stride, affine=None):
    """Optionally apply the previous BN's folded affine + LeakyReLU, zero-pad
    the spatial dims, split into stride phases and flatten each phase's (H, W).

    Returns (phases (s*s, N, PH*PW, C) bf16, taps, m_acc, Ho, Wo, PW)."""
    if affine is not None:
        scale, shift = affine
        x_nhwc = _leaky(x_nhwc.astype(jnp.float32) * scale + shift)
    x = x_nhwc.astype(jnp.bfloat16)
    xp = jnp.pad(x, ((0, 0), (PADW, PADW), (PADW, PADW), (0, 0)))
    n, hp, wp, c = xp.shape
    ho = (hp - KSIZE) // stride + 1
    wo = (wp - KSIZE) // stride + 1
    ph_rows = ho + (KSIZE - 1) // stride
    pw_cols = wo + (KSIZE - 1) // stride
    phases = [xp[:, a::stride, b::stride, :][:, :ph_rows, :pw_cols, :]
              for a in range(stride) for b in range(stride)]
    phases = jnp.stack(phases, axis=0).reshape(stride * stride, n,
                                               ph_rows * pw_cols, c)
    taps = [((i % stride) * stride + (j % stride),         # phase index
             (i // stride) * pw_cols + (j // stride))      # flat start offset
            for i in range(KSIZE) for j in range(KSIZE)]
    m_acc = (ho - 1) * pw_cols + wo
    return phases, taps, m_acc, ho, wo, pw_cols


def _unflatten(out_flat, ho, wo, pw_cols):
    """(N, m_acc, C) -> (N, Ho, Wo, C), stripping wrap-around junk columns."""
    n, m_acc, c = out_flat.shape
    out = jnp.pad(out_flat, ((0, 0), (0, ho * pw_cols - m_acc), (0, 0)))
    return out.reshape(n, ho, pw_cols, c)[:, :, :wo, :]


def conv_layer(x_nhwc, w_hwio, bias, *, stride, affine=None, leaky=False,
               want_stats=False, out_dtype=jnp.bfloat16):
    """One fused discriminator layer:
       [prev BN affine + LeakyReLU, fused into input prep] -> Conv2d(k=4)
       -> [bias + LeakyReLU]  or  [fused per-channel stats for this layer's BN].
    """
    n = x_nhwc.shape[0]
    kh, kw, cin, cout = w_hwio.shape
    phases, taps, m_acc, ho, wo, pw_cols = _prep_phases(
        x_nhwc, stride=stride, affine=affine)
    n_ph, _, p_flat, _ = phases.shape
    w_taps = w_hwio.reshape(kh * kw, cin, cout).astype(jnp.bfloat16)

    # Grid over batch only: every ref fits comfortably in VMEM at these sizes and
    # the batch axis gives v7x's two TensorCores independent parallel blocks.
    # TODO(synk): for large images add an output-row grid axis (tile m_acc, keep
    # the weight index_map constant) and raise vmem_limit_bytes per generation
    # (16/32/32 MiB scoped defaults on v5e/v6e/v7x).
    grid = (n,)
    cparams = pltpu.CompilerParams(dimension_semantics=("parallel",))
    x_spec = pl.BlockSpec((n_ph, None, p_flat, cin), lambda b: (0, b, 0, 0))
    o_spec = pl.BlockSpec((None, m_acc, cout), lambda b: (b, 0, 0))

    if want_stats:
        mask = jnp.asarray(((np.arange(m_acc) % pw_cols) < wo)
                           .astype(np.float32).reshape(m_acc, 1))
        w_spec = pl.BlockSpec((kh * kw, cin, cout), lambda b: (0, 0, 0))
        s_spec = pl.BlockSpec((None, 1, cout), lambda b: (b, 0, 0))
        out_flat, s1, s2 = pl.pallas_call(
            functools.partial(_conv_stats_kernel, taps=taps, m_acc=m_acc),
            grid=grid,
            in_specs=[x_spec, w_spec,
                      pl.BlockSpec((m_acc, 1), lambda b: (0, 0))],
            out_specs=[o_spec, s_spec, s_spec],
            out_shape=[jax.ShapeDtypeStruct((n, m_acc, cout), out_dtype),
                       jax.ShapeDtypeStruct((n, 1, cout), jnp.float32),
                       jax.ShapeDtypeStruct((n, 1, cout), jnp.float32)],
            compiler_params=cparams,
        )(phases, w_taps, mask)
        out = _unflatten(out_flat, ho, wo, pw_cols)
        # Tiny cross-batch reduction of the fused partial sums (plain JAX).
        m_total = n * ho * wo
        sum1 = jnp.sum(s1, axis=(0, 1))
        sum2 = jnp.sum(s2, axis=(0, 1))
        mean = sum1 / m_total
        var = jnp.maximum(sum2 / m_total - mean * mean, 0.0)  # biased, PyTorch train
        return out, (mean, var)

    # Conv + bias (+ LeakyReLU).  Cout=1 head: 128 MXU lanes in the accumulator,
    # single true channel stored.
    cmm = cout if cout >= 8 else 128
    w_p = jnp.pad(w_taps, ((0, 0), (0, 0), (0, cmm - cout)))
    b_p = jnp.pad(bias.astype(jnp.float32).reshape(1, cout),
                  ((0, 0), (0, cmm - cout)))
    w_spec = pl.BlockSpec((kh * kw, cin, cmm), lambda b: (0, 0, 0))
    b_spec = pl.BlockSpec((1, cmm), lambda b: (0, 0))
    out_flat = pl.pallas_call(
        functools.partial(_conv_bias_kernel, taps=taps, m_acc=m_acc, leaky=leaky),
        grid=grid,
        in_specs=[x_spec, w_spec, b_spec],
        out_specs=o_spec,
        out_shape=jax.ShapeDtypeStruct((n, m_acc, cout), out_dtype),
        compiler_params=cparams,
    )(phases, w_p, b_p)
    return _unflatten(out_flat, ho, wo, pw_cols), None


# -----------------------------------------------------------------------------
# Model: parameter construction + forward
# -----------------------------------------------------------------------------
def init_nlayer_discriminator(key, input_nc, ndf=64, n_layers=3):
    """Deterministic synthetic parameters matching the PyTorch layer shapes."""
    use_bias = False  # norm_layer == BatchNorm2d => conv bias=False on BN convs
    cfgs = [(input_nc, ndf, 2, True, False, True)]
    nf_mult = 1
    for n in range(1, n_layers):
        nf_prev, nf_mult = nf_mult, min(2 ** n, 8)
        cfgs.append((ndf * nf_prev, ndf * nf_mult, 2, use_bias, True, True))
    nf_prev, nf_mult = nf_mult, min(2 ** n_layers, 8)
    cfgs.append((ndf * nf_prev, ndf * nf_mult, 1, use_bias, True, True))
    cfgs.append((ndf * nf_mult, 1, 1, True, False, False))

    params = []
    for (cin, cout, stride, has_bias, has_bn, has_leaky) in cfgs:
        key, kw_key, kb_key = jax.random.split(key, 3)
        params.append(dict(
            w=0.02 * jax.random.normal(kw_key, (KSIZE, KSIZE, cin, cout),
                                       jnp.float32),
            b=(0.02 * jax.random.normal(kb_key, (cout,), jnp.float32)
               if has_bias else None),
            gamma=jnp.ones((cout,), jnp.float32) if has_bn else None,
            beta=jnp.zeros((cout,), jnp.float32) if has_bn else None,
            stride=stride, has_bn=has_bn, has_leaky=has_leaky))
    return params


def nlayer_discriminator_forward(params, x_nchw):
    """Forward pass. Input NCHW (PyTorch convention); returns NCHW float32."""
    x = jnp.transpose(x_nchw, (0, 2, 3, 1)).astype(jnp.float32)   # NCHW -> NHWC
    pending = None      # previous layer's folded BN affine (+ LeakyReLU)
    n_total = len(params)
    for li, p in enumerate(params):
        last = li == n_total - 1
        if p["has_bn"]:
            x, (mean, var) = conv_layer(x, p["w"], None, stride=p["stride"],
                                        affine=pending, want_stats=True,
                                        out_dtype=jnp.bfloat16)
            scale = p["gamma"] / jnp.sqrt(var + BN_EPS)
            shift = p["beta"] - mean * scale
            pending = (scale, shift)   # applied inside the next layer's prep
        else:
            x, _ = conv_layer(x, p["w"], p["b"], stride=p["stride"],
                              affine=pending, leaky=p["has_leaky"],
                              out_dtype=jnp.float32 if last else jnp.bfloat16)
            pending = None
    return jnp.transpose(x, (0, 3, 1, 2)).astype(jnp.float32)     # NHWC -> NCHW


def _reference_forward(params, x_nchw):
    """Pure-JAX f32 reference (lax.conv) to sanity-check the Pallas path."""
    x = jnp.transpose(x_nchw, (0, 2, 3, 1)).astype(jnp.float32)
    for p in params:
        y = lax.conv_general_dilated(
            x, p["w"], window_strides=(p["stride"], p["stride"]),
            padding=[(PADW, PADW), (PADW, PADW)],
            dimension_numbers=("NHWC", "HWIO", "NHWC"),
            precision=lax.Precision.HIGHEST)
        if p["b"] is not None:
            y = y + p["b"]
        if p["has_bn"]:
            mean = jnp.mean(y, axis=(0, 1, 2))
            var = jnp.var(y, axis=(0, 1, 2))
            y = (y - mean) / jnp.sqrt(var + BN_EPS) * p["gamma"] + p["beta"]
        if p["has_leaky"]:
            y = _leaky(y)
        x = y
    return jnp.transpose(x, (0, 3, 1, 2))


# -----------------------------------------------------------------------------
# Main
# -----------------------------------------------------------------------------
if __name__ == "__main__":
    key = jax.random.PRNGKey(0)
    k_params, k_input = jax.random.split(key)

    # Small configuration consistent with the module: input_nc=4, ndf=16, n_layers=3.
    input_nc, ndf, n_layers = 4, 16, 3
    params = init_nlayer_discriminator(k_params, input_nc, ndf=ndf, n_layers=n_layers)
    x = jax.random.normal(k_input, (2, input_nc, 16, 16), dtype=jnp.float32)  # NCHW

    fwd = jax.jit(functools.partial(nlayer_discriminator_forward, params))
    out = jax.block_until_ready(fwd(x))

    # Expected PatchGAN output shape for 16x16 input: (2, 1, 5, 5)
    assert out.shape == (2, 1, 5, 5), out.shape
    assert out.dtype == jnp.float32
    assert bool(jnp.all(jnp.isfinite(out)))

    # Loose sanity check vs. a pure-JAX f32 reference (bf16 MXU operands -> no
    # bit-match; relative-to-max tolerance).
    ref = _reference_forward(params, x)
    rel_err = float(jnp.max(jnp.abs(out - ref)) / (jnp.max(jnp.abs(ref)) + 1e-6))
    assert rel_err < 0.1, f"rel_err={rel_err}"

    print("KERNEL_OK")
</pallas_src>

<mosaic_0001>
module attributes {stable_mosaic.version = 11 : i64} {
  func.func @_conv_bias_kernel(%arg0: i32, %arg1: memref<4x1x100x4xbf16, #tpu.memory_space<vmem>>, %arg2: memref<16x4x16xbf16, #tpu.memory_space<vmem>>, %arg3: memref<1x16xf32, #tpu.memory_space<vmem>>, %arg4: memref<1x89x16xbf16, #tpu.memory_space<vmem>>) attributes {dimension_semantics = [#tpu.dimension_semantics<parallel>], iteration_bounds = array<i64: 2>, scalar_prefetch = 0 : i64, scratch_operands = 0 : i64, tpu.core_type = #tpu.core_type<tc>, window_params = [{transform_indices = @transform_0, window_bounds = array<i64: 4, 1, 100, 4>}, {pipeline_mode = #tpu.pipeline_mode<synchronous>, transform_indices = @transform_1, window_bounds = array<i64: 16, 4, 16>}, {pipeline_mode = #tpu.pipeline_mode<synchronous>, transform_indices = @transform_2, window_bounds = array<i64: 1, 16>}, {transform_indices = @transform_3, window_bounds = array<i64: 1, 89, 16>}]} {
    %cst = arith.constant 0.000000e+00 : f32
    %0 = vector.broadcast %cst : f32 to vector<89x16xf32>
    %c0 = arith.constant 0 : index
    %c0_0 = arith.constant 0 : index
    %c0_1 = arith.constant 0 : index
    %c0_2 = arith.constant 0 : index
    %1 = vector.load %arg1[%c0, %c0_0, %c0_1, %c0_2] : memref<4x1x100x4xbf16, #tpu.memory_space<vmem>>, vector<1x1x89x4xbf16>
    %2 = vector.shape_cast %1 : vector<1x1x89x4xbf16> to vector<89x4xbf16>
    %c0_3 = arith.constant 0 : index
    %c0_4 = arith.constant 0 : index
    %c0_5 = arith.constant 0 : index
    %3 = vector.load %arg2[%c0_3, %c0_4, %c0_5] : memref<16x4x16xbf16, #tpu.memory_space<vmem>>, vector<1x4x16xbf16>
    %4 = vector.shape_cast %3 : vector<1x4x16xbf16> to vector<4x16xbf16>
    %cst_6 = arith.constant dense<0.000000e+00> : vector<89x16xf32>
    %5 = tpu.matmul %2, %4, %cst_6 {dimension_numbers = #tpu.dot_dimension_numbers<[1], [0], [0], [1], [0, 0, 1, 1], [], []>} : vector<89x4xbf16>, vector<4x16xbf16>, vector<89x16xf32> -> vector<89x16xf32>
    %6 = arith.addf %0, %5 : vector<89x16xf32>
    %c1 = arith.constant 1 : index
    %c0_7 = arith.constant 0 : index
    %c0_8 = arith.constant 0 : index
    %c0_9 = arith.constant 0 : index
    %7 = vector.load %arg1[%c1, %c0_7, %c0_8, %c0_9] : memref<4x1x100x4xbf16, #tpu.memory_space<vmem>>, vector<1x1x89x4xbf16>
    %8 = vector.shape_cast %7 : vector<1x1x89x4xbf16> to vector<89x4xbf16>
    %c1_10 = arith.constant 1 : index
    %c0_11 = arith.constant 0 : index
    %c0_12 = arith.constant 0 : index
    %9 = vector.load %arg2[%c1_10, %c0_11, %c0_12] : memref<16x4x16xbf16, #tpu.memory_space<vmem>>, vector<1x4x16xbf16>
    %10 = vector.shape_cast %9 : vector<1x4x16xbf16> to vector<4x16xbf16>
    %cst_13 = arith.constant dense<0.000000e+00> : vector<89x16xf32>
    %11 = tpu.matmul %8, %10, %cst_13 {dimension_numbers = #tpu.dot_dimension_numbers<[1], [0], [0], [1], [0, 0, 1, 1], [], []>} : vector<89x4xbf16>, vector<4x16xbf16>, vector<89x16xf32> -> vector<89x16xf32>
    %12 = arith.addf %6, %11 : vector<89x16xf32>
    %c0_14 = arith.constant 0 : index
    %c0_15 = arith.constant 0 : index
    %c1_16 = arith.constant 1 : index
    %c0_17 = arith.constant 0 : index
    %13 = vector.load %arg1[%c0_14, %c0_15, %c1_16, %c0_17] : memref<4x1x100x4xbf16, #tpu.memory_space<vmem>>, vector<1x1x89x4xbf16>
    %14 = vector.shape_cast %13 : vector<1x1x89x4xbf16> to vector<89x4xbf16>
    %c2 = arith.constant 2 : index
    %c0_18 = arith.constant 0 : index
    %c0_19 = arith.constant 0 : index
    %15 = vector.load %arg2[%c2, %c0_18, %c0_19] : memref<16x4x16xbf16, #tpu.memory_space<vmem>>, vector<1x4x16xbf16>
    %16 = vector.shape_cast %15 : vector<1x4x16xbf16> to vector<4x16xbf16>
    %cst_20 = arith.constant dense<0.000000e+00> : vector<89x16xf32>
    %17 = tpu.matmul %14, %16, %cst_20 {dimension_numbers = #tpu.dot_dimension_numbers<[1], [0], [0], [1], [0, 0, 1, 1], [], []>} : vector<89x4xbf16>, vector<4x16xbf16>, vector<89x16xf32> -> vector<89x16xf32>
    %18 = arith.addf %12, %17 : vector<89x16xf32>
    %c1_21 = arith.constant 1 : index
    %c0_22 = arith.constant 0 : index
    %c1_23 = arith.constant 1 : index
    %c0_24 = arith.constant 0 : index
    %19 = vector.load %arg1[%c1_21, %c0_22, %c1_23, %c0_24] : memref<4x1x100x4xbf16, #tpu.memory_space<vmem>>, vector<1x1x89x4xbf16>
    %20 = vector.shape_cast %19 : vector<1x1x89x4xbf16> to vector<89x4xbf16>
    %c3 = arith.constant 3 : index
    %c0_25 = arith.constant 0 : index
    %c0_26 = arith.constant 0 : index
    %21 = vector.load %arg2[%c3, %c0_25, %c0_26] : memref<16x4x16xbf16, #tpu.memory_space<vmem>>, vector<1x4x16xbf16>
    %22 = vector.shape_cast %21 : vector<1x4x16xbf16> to vector<4x16xbf16>
    %cst_27 = arith.constant dense<0.000000e+00> : vector<89x16xf32>
    %23 = tpu.matmul %20, %22, %cst_27 {dimension_numbers = #tpu.dot_dimension_numbers<[1], [0], [0], [1], [0, 0, 1, 1], [], []>} : vector<89x4xbf16>, vector<4x16xbf16>, vector<89x16xf32> -> vector<89x16xf32>
    %24 = arith.addf %18, %23 : vector<89x16xf32>
    %c2_28 = arith.constant 2 : index
    %c0_29 = arith.constant 0 : index
    %c0_30 = arith.constant 0 : index
    %c0_31 = arith.constant 0 : index
    %25 = vector.load %arg1[%c2_28, %c0_29, %c0_30, %c0_31] : memref<4x1x100x4xbf16, #tpu.memory_space<vmem>>, vector<1x1x89x4xbf16>
    %26 = vector.shape_cast %25 : vector<1x1x89x4xbf16> to vector<89x4xbf16>
    %c4 = arith.constant 4 : index
    %c0_32 = arith.constant 0 : index
    %c0_33 = arith.constant 0 : index
    %27 = vector.load %arg2[%c4, %c0_32, %c0_33] : memref<16x4x16xbf16, #tpu.memory_space<vmem>>, vector<1x4x16xbf16>
    %28 = vector.shape_cast %27 : vector<1x4x16xbf16> to vector<4x16xbf16>
    %cst_34 = arith.constant dense<0.000000e+00> : vector<89x16xf32>
    %29 = tpu.matmul %26, %28, %cst_34 {dimension_numbers = #tpu.dot_dimension_numbers<[1], [0], [0], [1], [0, 0, 1, 1], [], []>} : vector<89x4xbf16>, vector<4x16xbf16>, vector<89x16xf32> -> vector<89x16xf32>
    %30 = arith.addf %24, %29 : vector<89x16xf32>
    %c3_35 = arith.constant 3 : index
    %c0_36 = arith.constant 0 : index
    %c0_37 = arith.constant 0 : index
    %c0_38 = arith.constant 0 : index
    %31 = vector.load %arg1[%c3_35, %c0_36, %c0_37, %c0_38] : memref<4x1x100x4xbf16, #tpu.memory_space<vmem>>, vector<1x1x89x4xbf16>
    %32 = vector.shape_cast %31 : vector<1x1x89x4xbf16> to vector<89x4xbf16>
    %c5 = arith.constant 5 : index
    %c0_39 = arith.constant 0 : index
    %c0_40 = arith.constant 0 : index
    %33 = vector.load %arg2[%c5, %c0_39, %c0_40] : memref<16x4x16xbf16, #tpu.memory_space<vmem>>, vector<1x4x16xbf16>
    %34 = vector.shape_cast %33 : vector<1x4x16xbf16> to vector<4x16xbf16>
    %cst_41 = arith.constant dense<0.000000e+00> : vector<89x16xf32>
    %35 = tpu.matmul %32, %34, %cst_41 {dimension_numbers = #tpu.dot_dimension_numbers<[1], [0], [0], [1], [0, 0, 1, 1], [], []>} : vector<89x4xbf16>, vector<4x16xbf16>, vector<89x16xf32> -> vector<89x16xf32>
    %36 = arith.addf %30, %35 : vector<89x16xf32>
    %c2_42 = arith.constant 2 : index
    %c0_43 = arith.constant 0 : index
    %c1_44 = arith.constant 1 : index
    %c0_45 = arith.constant 0 : index
    %37 = vector.load %arg1[%c2_42, %c0_43, %c1_44, %c0_45] : memref<4x1x100x4xbf16, #tpu.memory_space<vmem>>, vector<1x1x89x4xbf16>
    %38 = vector.shape_cast %37 : vector<1x1x89x4xbf16> to vector<89x4xbf16>
    %c6 = arith.constant 6 : index
    %c0_46 = arith.constant 0 : index
    %c0_47 = arith.constant 0 : index
    %39 = vector.load %arg2[%c6, %c0_46, %c0_47] : memref<16x4x16xbf16, #tpu.memory_space<vmem>>, vector<1x4x16xbf16>
    %40 = vector.shape_cast %39 : vector<1x4x16xbf16> to vector<4x16xbf16>
    %cst_48 = arith.constant dense<0.000000e+00> : vector<89x16xf32>
    %41 = tpu.matmul %38, %40, %cst_48 {dimension_numbers = #tpu.dot_dimension_numbers<[1], [0], [0], [1], [0, 0, 1, 1], [], []>} : vector<89x4xbf16>, vector<4x16xbf16>, vector<89x16xf32> -> vector<89x16xf32>
    %42 = arith.addf %36, %41 : vector<89x16xf32>
    %c3_49 = arith.constant 3 : index
    %c0_50 = arith.constant 0 : index
    %c1_51 = arith.constant 1 : index
    %c0_52 = arith.constant 0 : index
    %43 = vector.load %arg1[%c3_49, %c0_50, %c1_51, %c0_52] : memref<4x1x100x4xbf16, #tpu.memory_space<vmem>>, vector<1x1x89x4xbf16>
    %44 = vector.shape_cast %43 : vector<1x1x89x4xbf16> to vector<89x4xbf16>
    %c7 = arith.constant 7 : index
    %c0_53 = arith.constant 0 : index
    %c0_54 = arith.constant 0 : index
    %45 = vector.load %arg2[%c7, %c0_53, %c0_54] : memref<16x4x16xbf16, #tpu.memory_space<vmem>>, vector<1x4x16xbf16>
    %46 = vector.shape_cast %45 : vector<1x4x16xbf16> to vector<4x16xbf16>
    %cst_55 = arith.constant dense<0.000000e+00> : vector<89x16xf32>
    %47 = tpu.matmul %44, %46, %cst_55 {dimension_numbers = #tpu.dot_dimension_numbers<[1], [0], [0], [1], [0, 0, 1, 1], [], []>} : vector<89x4xbf16>, vector<4x16xbf16>, vector<89x16xf32> -> vector<89x16xf32>
    %48 = arith.addf %42, %47 : vector<89x16xf32>
    %c0_56 = arith.constant 0 : index
    %c0_57 = arith.constant 0 : index
    %c10 = arith.constant 10 : index
    %c0_58 = arith.constant 0 : index
    %49 = vector.load %arg1[%c0_56, %c0_57, %c10, %c0_58] : memref<4x1x100x4xbf16, #tpu.memory_space<vmem>>, vector<1x1x89x4xbf16>
    %50 = vector.shape_cast %49 : vector<1x1x89x4xbf16> to vector<89x4xbf16>
    %c8 = arith.constant 8 : index
    %c0_59 = arith.constant 0 : index
    %c0_60 = arith.constant 0 : index
    %51 = vector.load %arg2[%c8, %c0_59, %c0_60] : memref<16x4x16xbf16, #tpu.memory_space<vmem>>, vector<1x4x16xbf16>
    %52 = vector.shape_cast %51 : vector<1x4x16xbf16> to vector<4x16xbf16>
    %cst_61 = arith.constant dense<0.000000e+00> : vector<89x16xf32>
    %53 = tpu.matmul %50, %52, %cst_61 {dimension_numbers = #tpu.dot_dimension_numbers<[1], [0], [0], [1], [0, 0, 1, 1], [], []>} : vector<89x4xbf16>, vector<4x16xbf16>, vector<89x16xf32> -> vector<89x16xf32>
    %54 = arith.addf %48, %53 : vector<89x16xf32>
    %c1_62 = arith.constant 1 : index
    %c0_63 = arith.constant 0 : index
    %c10_64 = arith.constant 10 : index
    %c0_65 = arith.constant 0 : index
    %55 = vector.load %arg1[%c1_62, %c0_63, %c10_64, %c0_65] : memref<4x1x100x4xbf16, #tpu.memory_space<vmem>>, vector<1x1x89x4xbf16>
    %56 = vector.shape_cast %55 : vector<1x1x89x4xbf16> to vector<89x4xbf16>
    %c9 = arith.constant 9 : index
    %c0_66 = arith.constant 0 : index
    %c0_67 = arith.constant 0 : index
    %57 = vector.load %arg2[%c9, %c0_66, %c0_67] : memref<16x4x16xbf16, #tpu.memory_space<vmem>>, vector<1x4x16xbf16>
    %58 = vector.shape_cast %57 : vector<1x4x16xbf16> to vector<4x16xbf16>
    %cst_68 = arith.constant dense<0.000000e+00> : vector<89x16xf32>
    %59 = tpu.matmul %56, %58, %cst_68 {dimension_numbers = #tpu.dot_dimension_numbers<[1], [0], [0], [1], [0, 0, 1, 1], [], []>} : vector<89x4xbf16>, vector<4x16xbf16>, vector<89x16xf32> -> vector<89x16xf32>
    %60 = arith.addf %54, %59 : vector<89x16xf32>
    %c0_69 = arith.constant 0 : index
    %c0_70 = arith.constant 0 : index
    %c11 = arith.constant 11 : index
    %c0_71 = arith.constant 0 : index
    %61 = vector.load %arg1[%c0_69, %c0_70, %c11, %c0_71] : memref<4x1x100x4xbf16, #tpu.memory_space<vmem>>, vector<1x1x89x4xbf16>
    %62 = vector.shape_cast %61 : vector<1x1x89x4xbf16> to vector<89x4xbf16>
    %c10_72 = arith.constant 10 : index
    %c0_73 = arith.constant 0 : index
    %c0_74 = arith.constant 0 : index
    %63 = vector.load %arg2[%c10_72, %c0_73, %c0_74] : memref<16x4x16xbf16, #tpu.memory_space<vmem>>, vector<1x4x16xbf16>
    %64 = vector.shape_cast %63 : vector<1x4x16xbf16> to vector<4x16xbf16>
    %cst_75 = arith.constant dense<0.000000e+00> : vector<89x16xf32>
    %65 = tpu.matmul %62, %64, %cst_75 {dimension_numbers = #tpu.dot_dimension_numbers<[1], [0], [0], [1], [0, 0, 1, 1], [], []>} : vector<89x4xbf16>, vector<4x16xbf16>, vector<89x16xf32> -> vector<89x16xf32>
    %66 = arith.addf %60, %65 : vector<89x16xf32>
    %c1_76 = arith.constant 1 : index
    %c0_77 = arith.constant 0 : index
    %c11_78 = arith.constant 11 : index
    %c0_79 = arith.constant 0 : index
    %67 = vector.load %arg1[%c1_76, %c0_77, %c11_78, %c0_79] : memref<4x1x100x4xbf16, #tpu.memory_space<vmem>>, vector<1x1x89x4xbf16>
    %68 = vector.shape_cast %67 : vector<1x1x89x4xbf16> to vector<89x4xbf16>
    %c11_80 = arith.constant 11 : index
    %c0_81 = arith.constant 0 : index
    %c0_82 = arith.constant 0 : index
    %69 = vector.load %arg2[%c11_80, %c0_81, %c0_82] : memref<16x4x16xbf16, #tpu.memory_space<vmem>>, vector<1x4x16xbf16>
    %70 = vector.shape_cast %69 : vector<1x4x16xbf16> to vector<4x16xbf16>
    %cst_83 = arith.constant dense<0.000000e+00> : vector<89x16xf32>
    %71 = tpu.matmul %68, %70, %cst_83 {dimension_numbers = #tpu.dot_dimension_numbers<[1], [0], [0], [1], [0, 0, 1, 1], [], []>} : vector<89x4xbf16>, vector<4x16xbf16>, vector<89x16xf32> -> vector<89x16xf32>
    %72 = arith.addf %66, %71 : vector<89x16xf32>
    %c2_84 = arith.constant 2 : index
    %c0_85 = arith.constant 0 : index
    %c10_86 = arith.constant 10 : index
    %c0_87 = arith.constant 0 : index
    %73 = vector.load %arg1[%c2_84, %c0_85, %c10_86, %c0_87] : memref<4x1x100x4xbf16, #tpu.memory_space<vmem>>, vector<1x1x89x4xbf16>
    %74 = vector.shape_cast %73 : vector<1x1x89x4xbf16> to vector<89x4xbf16>
    %c12 = arith.constant 12 : index
    %c0_88 = arith.constant 0 : index
    %c0_89 = arith.constant 0 : index
    %75 = vector.load %arg2[%c12, %c0_88, %c0_89] : memref<16x4x16xbf16, #tpu.memory_space<vmem>>, vector<1x4x16xbf16>
    %76 = vector.shape_cast %75 : vector<1x4x16xbf16> to vector<4x16xbf16>
    %cst_90 = arith.constant dense<0.000000e+00> : vector<89x16xf32>
    %77 = tpu.matmul %74, %76, %cst_90 {dimension_numbers = #tpu.dot_dimension_numbers<[1], [0], [0], [1], [0, 0, 1, 1], [], []>} : vector<89x4xbf16>, vector<4x16xbf16>, vector<89x16xf32> -> vector<89x16xf32>
    %78 = arith.addf %72, %77 : vector<89x16xf32>
    %c3_91 = arith.constant 3 : index
    %c0_92 = arith.constant 0 : index
    %c10_93 = arith.constant 10 : index
    %c0_94 = arith.constant 0 : index
    %79 = vector.load %arg1[%c3_91, %c0_92, %c10_93, %c0_94] : memref<4x1x100x4xbf16, #tpu.memory_space<vmem>>, vector<1x1x89x4xbf16>
    %80 = vector.shape_cast %79 : vector<1x1x89x4xbf16> to vector<89x4xbf16>
    %c13 = arith.constant 13 : index
    %c0_95 = arith.constant 0 : index
    %c0_96 = arith.constant 0 : index
    %81 = vector.load %arg2[%c13, %c0_95, %c0_96] : memref<16x4x16xbf16, #tpu.memory_space<vmem>>, vector<1x4x16xbf16>
    %82 = vector.shape_cast %81 : vector<1x4x16xbf16> to vector<4x16xbf16>
    %cst_97 = arith.constant dense<0.000000e+00> : vector<89x16xf32>
    %83 = tpu.matmul %80, %82, %cst_97 {dimension_numbers = #tpu.dot_dimension_numbers<[1], [0], [0], [1], [0, 0, 1, 1], [], []>} : vector<89x4xbf16>, vector<4x16xbf16>, vector<89x16xf32> -> vector<89x16xf32>
    %84 = arith.addf %78, %83 : vector<89x16xf32>
    %c2_98 = arith.constant 2 : index
    %c0_99 = arith.constant 0 : index
    %c11_100 = arith.constant 11 : index
    %c0_101 = arith.constant 0 : index
    %85 = vector.load %arg1[%c2_98, %c0_99, %c11_100, %c0_101] : memref<4x1x100x4xbf16, #tpu.memory_space<vmem>>, vector<1x1x89x4xbf16>
    %86 = vector.shape_cast %85 : vector<1x1x89x4xbf16> to vector<89x4xbf16>
    %c14 = arith.constant 14 : index
    %c0_102 = arith.constant 0 : index
    %c0_103 = arith.constant 0 : index
    %87 = vector.load %arg2[%c14, %c0_102, %c0_103] : memref<16x4x16xbf16, #tpu.memory_space<vmem>>, vector<1x4x16xbf16>
    %88 = vector.shape_cast %87 : vector<1x4x16xbf16> to vector<4x16xbf16>
    %cst_104 = arith.constant dense<0.000000e+00> : vector<89x16xf32>
    %89 = tpu.matmul %86, %88, %cst_104 {dimension_numbers = #tpu.dot_dimension_numbers<[1], [0], [0], [1], [0, 0, 1, 1], [], []>} : vector<89x4xbf16>, vector<4x16xbf16>, vector<89x16xf32> -> vector<89x16xf32>
    %90 = arith.addf %84, %89 : vector<89x16xf32>
    %c3_105 = arith.constant 3 : index
    %c0_106 = arith.constant 0 : index
    %c11_107 = arith.constant 11 : index
    %c0_108 = arith.constant 0 : index
    %91 = vector.load %arg1[%c3_105, %c0_106, %c11_107, %c0_108] : memref<4x1x100x4xbf16, #tpu.memory_space<vmem>>, vector<1x1x89x4xbf16>
    %92 = vector.shape_cast %91 : vector<1x1x89x4xbf16> to vector<89x4xbf16>
    %c15 = arith.constant 15 : index
    %c0_109 = arith.constant 0 : index
    %c0_110 = arith.constant 0 : index
    %93 = vector.load %arg2[%c15, %c0_109, %c0_110] : memref<16x4x16xbf16, #tpu.memory_space<vmem>>, vector<1x4x16xbf16>
    %94 = vector.shape_cast %93 : vector<1x4x16xbf16> to vector<4x16xbf16>
    %cst_111 = arith.constant dense<0.000000e+00> : vector<89x16xf32>
    %95 = tpu.matmul %92, %94, %cst_111 {dimension_numbers = #tpu.dot_dimension_numbers<[1], [0], [0], [1], [0, 0, 1, 1], [], []>} : vector<89x4xbf16>, vector<4x16xbf16>, vector<89x16xf32> -> vector<89x16xf32>
    %96 = arith.addf %90, %95 : vector<89x16xf32>
    %c0_112 = arith.constant 0 : index
    %c0_113 = arith.constant 0 : index
    %97 = vector.load %arg3[%c0_112, %c0_113] : memref<1x16xf32, #tpu.memory_space<vmem>>, vector<1x16xf32>
    %98 = vector.broadcast %97 : vector<1x16xf32> to vector<89x16xf32>
    %99 = arith.addf %96, %98 : vector<89x16xf32>
    %cst_114 = arith.constant 0.000000e+00 : f32
    %100 = vector.broadcast %cst_114 : f32 to vector<89x16xf32>
    %101 = arith.cmpf oge, %99, %100 : vector<89x16xf32>
    %cst_115 = arith.constant 2.000000e-01 : f32
    %102 = vector.broadcast %cst_115 : f32 to vector<89x16xf32>
    %103 = arith.mulf %102, %99 : vector<89x16xf32>
    %104 = arith.select %101, %99, %103 : vector<89x16xi1>, vector<89x16xf32>
    %105 = arith.truncf %104 : vector<89x16xf32> to vector<89x16xbf16>
    %c0_116 = arith.constant 0 : index
    %c0_117 = arith.constant 0 : index
    %c0_118 = arith.constant 0 : index
    %106 = vector.load %arg4[%c0_116, %c0_117, %c0_118] : memref<1x89x16xbf16, #tpu.memory_space<vmem>>, vector<1x89x16xbf16>
    %107 = vector.shape_cast %106 : vector<1x89x16xbf16> to vector<89x16xbf16>
    %108 = vector.shape_cast %105 : vector<89x16xbf16> to vector<1x89x16xbf16>
    tpu.vector_store %arg4[%c0_116, %c0_117, %c0_118], %108 {strides = array<i32>} : memref<1x89x16xbf16, #tpu.memory_space<vmem>>, vector<1x89x16xbf16>,
    return
  }
  func.func @transform_0(%arg0: i32) -> (i32, i32, i32, i32) {
    %c0_i32 = arith.constant 0 : i32
    %c0_i32_0 = arith.constant 0 : i32
    %c0_i32_1 = arith.constant 0 : i32
    %c0_i32_2 = arith.constant 0 : i32
    return %c0_i32, %arg0, %c0_i32_0, %c0_i32_1 : i32, i32, i32, i32
  }
  func.func @transform_1(%arg0: i32) -> (i32, i32, i32) {
    %c0_i32 = arith.constant 0 : i32
    %c0_i32_0 = arith.constant 0 : i32
    %c0_i32_1 = arith.constant 0 : i32
    %c0_i32_2 = arith.constant 0 : i32
    return %c0_i32, %c0_i32_0, %c0_i32_1 : i32, i32, i32
  }
  func.func @transform_2(%arg0: i32) -> (i32, i32) {
    %c0_i32 = arith.constant 0 : i32
    %c0_i32_0 = arith.constant 0 : i32
    %c0_i32_1 = arith.constant 0 : i32
    return %c0_i32, %c0_i32_0 : i32, i32
  }
  func.func @transform_3(%arg0: i32) -> (i32, i32, i32) {
    %c0_i32 = arith.constant 0 : i32
    %c0_i32_0 = arith.constant 0 : i32
    %c0_i32_1 = arith.constant 0 : i32
    return %arg0, %c0_i32, %c0_i32_0 : i32, i32, i32
  }
}

module attributes {stable_mosaic.version = 11 : i64} {
  func.func @_conv_stats_kernel(%arg0: i32, %arg1: memref<4x1x36x16xbf16, #tpu.memory_space<vmem>>, %arg2: memref<16x16x32xbf16, #tpu.memory_space<vmem>>, %arg3: memref<29x1xf32, #tpu.memory_space<vmem>>, %arg4: memref<1x29x32xbf16, #tpu.memory_space<vmem>>, %arg5: memref<1x1x32xf32, #tpu.memory_space<vmem>>, %arg6: memref<1x1x32xf32, #tpu.memory_space<vmem>>) attributes {dimension_semantics = [#tpu.dimension_semantics<parallel>], iteration_bounds = array<i64: 2>, scalar_prefetch = 0 : i64, scratch_operands = 0 : i64, tpu.core_type = #tpu.core_type<tc>, window_params = [{transform_indices = @transform_0, window_bounds = array<i64: 4, 1, 36, 16>}, {pipeline_mode = #tpu.pipeline_mode<synchronous>, transform_indices = @transform_1, window_bounds = array<i64: 16, 16, 32>}, {pipeline_mode = #tpu.pipeline_mode<synchronous>, transform_indices = @transform_2, window_bounds = array<i64: 29, 1>}, {transform_indices = @transform_3, window_bounds = array<i64: 1, 29, 32>}, {transform_indices = @transform_4, window_bounds = array<i64: 1, 1, 32>}, {transform_indices = @transform_5, window_bounds = array<i64: 1, 1, 32>}]} {
    %cst = arith.constant 0.000000e+00 : f32
    %0 = vector.broadcast %cst : f32 to vector<29x32xf32>
    %c0 = arith.constant 0 : index
    %c0_0 = arith.constant 0 : index
    %c0_1 = arith.constant 0 : index
    %c0_2 = arith.constant 0 : index
    %1 = vector.load %arg1[%c0, %c0_0, %c0_1, %c0_2] : memref<4x1x36x16xbf16, #tpu.memory_space<vmem>>, vector<1x1x29x16xbf16>
    %2 = vector.shape_cast %1 : vector<1x1x29x16xbf16> to vector<29x16xbf16>
    %c0_3 = arith.constant 0 : index
    %c0_4 = arith.constant 0 : index
    %c0_5 = arith.constant 0 : index
    %3 = vector.load %arg2[%c0_3, %c0_4, %c0_5] : memref<16x16x32xbf16, #tpu.memory_space<vmem>>, vector<1x16x32xbf16>
    %4 = vector.shape_cast %3 : vector<1x16x32xbf16> to vector<16x32xbf16>
    %cst_6 = arith.constant dense<0.000000e+00> : vector<29x32xf32>
    %5 = tpu.matmul %2, %4, %cst_6 {dimension_numbers = #tpu.dot_dimension_numbers<[1], [0], [0], [1], [0, 0, 1, 1], [], []>} : vector<29x16xbf16>, vector<16x32xbf16>, vector<29x32xf32> -> vector<29x32xf32>
    %6 = arith.addf %0, %5 : vector<29x32xf32>
    %c1 = arith.constant 1 : index
    %c0_7 = arith.constant 0 : index
    %c0_8 = arith.constant 0 : index
    %c0_9 = arith.constant 0 : index
    %7 = vector.load %arg1[%c1, %c0_7, %c0_8, %c0_9] : memref<4x1x36x16xbf16, #tpu.memory_space<vmem>>, vector<1x1x29x16xbf16>
    %8 = vector.shape_cast %7 : vector<1x1x29x16xbf16> to vector<29x16xbf16>
    %c1_10 = arith.constant 1 : index
    %c0_11 = arith.constant 0 : index
    %c0_12 = arith.constant 0 : index
    %9 = vector.load %arg2[%c1_10, %c0_11, %c0_12] : memref<16x16x32xbf16, #tpu.memory_space<vmem>>, vector<1x16x32xbf16>
    %10 = vector.shape_cast %9 : vector<1x16x32xbf16> to vector<16x32xbf16>
    %cst_13 = arith.constant dense<0.000000e+00> : vector<29x32xf32>
    %11 = tpu.matmul %8, %10, %cst_13 {dimension_numbers = #tpu.dot_dimension_numbers<[1], [0], [0], [1], [0, 0, 1, 1], [], []>} : vector<29x16xbf16>, vector<16x32xbf16>, vector<29x32xf32> -> vector<29x32xf32>
    %12 = arith.addf %6, %11 : vector<29x32xf32>
    %c0_14 = arith.constant 0 : index
    %c0_15 = arith.constant 0 : index
    %c1_16 = arith.constant 1 : index
    %c0_17 = arith.constant 0 : index
    %13 = vector.load %arg1[%c0_14, %c0_15, %c1_16, %c0_17] : memref<4x1x36x16xbf16, #tpu.memory_space<vmem>>, vector<1x1x29x16xbf16>
    %14 = vector.shape_cast %13 : vector<1x1x29x16xbf16> to vector<29x16xbf16>
    %c2 = arith.constant 2 : index
    %c0_18 = arith.constant 0 : index
    %c0_19 = arith.constant 0 : index
    %15 = vector.load %arg2[%c2, %c0_18, %c0_19] : memref<16x16x32xbf16, #tpu.memory_space<vmem>>, vector<1x16x32xbf16>
    %16 = vector.shape_cast %15 : vector<1x16x32xbf16> to vector<16x32xbf16>
    %cst_20 = arith.constant dense<0.000000e+00> : vector<29x32xf32>
    %17 = tpu.matmul %14, %16, %cst_20 {dimension_numbers = #tpu.dot_dimension_numbers<[1], [0], [0], [1], [0, 0, 1, 1], [], []>} : vector<29x16xbf16>, vector<16x32xbf16>, vector<29x32xf32> -> vector<29x32xf32>
    %18 = arith.addf %12, %17 : vector<29x32xf32>
    %c1_21 = arith.constant 1 : index
    %c0_22 = arith.constant 0 : index
    %c1_23 = arith.constant 1 : index
    %c0_24 = arith.constant 0 : index
    %19 = vector.load %arg1[%c1_21, %c0_22, %c1_23, %c0_24] : memref<4x1x36x16xbf16, #tpu.memory_space<vmem>>, vector<1x1x29x16xbf16>
    %20 = vector.shape_cast %19 : vector<1x1x29x16xbf16> to vector<29x16xbf16>
    %c3 = arith.constant 3 : index
    %c0_25 = arith.constant 0 : index
    %c0_26 = arith.constant 0 : index
    %21 = vector.load %arg2[%c3, %c0_25, %c0_26] : memref<16x16x32xbf16, #tpu.memory_space<vmem>>, vector<1x16x32xbf16>
    %22 = vector.shape_cast %21 : vector<1x16x32xbf16> to vector<16x32xbf16>
    %cst_27 = arith.constant dense<0.000000e+00> : vector<29x32xf32>
    %23 = tpu.matmul %20, %22, %cst_27 {dimension_numbers = #tpu.dot_dimension_numbers<[1], [0], [0], [1], [0, 0, 1, 1], [], []>} : vector<29x16xbf16>, vector<16x32xbf16>, vector<29x32xf32> -> vector<29x32xf32>
    %24 = arith.addf %18, %23 : vector<29x32xf32>
    %c2_28 = arith.constant 2 : index
    %c0_29 = arith.constant 0 : index
    %c0_30 = arith.constant 0 : index
    %c0_31 = arith.constant 0 : index
    %25 = vector.load %arg1[%c2_28, %c0_29, %c0_30, %c0_31] : memref<4x1x36x16xbf16, #tpu.memory_space<vmem>>, vector<1x1x29x16xbf16>
    %26 = vector.shape_cast %25 : vector<1x1x29x16xbf16> to vector<29x16xbf16>
    %c4 = arith.constant 4 : index
    %c0_32 = arith.constant 0 : index
    %c0_33 = arith.constant 0 : index
    %27 = vector.load %arg2[%c4, %c0_32, %c0_33] : memref<16x16x32xbf16, #tpu.memory_space<vmem>>, vector<1x16x32xbf16>
    %28 = vector.shape_cast %27 : vector<1x16x32xbf16> to vector<16x32xbf16>
    %cst_34 = arith.constant dense<0.000000e+00> : vector<29x32xf32>
    %29 = tpu.matmul %26, %28, %cst_34 {dimension_numbers = #tpu.dot_dimension_numbers<[1], [0], [0], [1], [0, 0, 1, 1], [], []>} : vector<29x16xbf16>, vector<16x32xbf16>, vector<29x32xf32> -> vector<29x32xf32>
    %30 = arith.addf %24, %29 : vector<29x32xf32>
    %c3_35 = arith.constant 3 : index
    %c0_36 = arith.constant 0 : index
    %c0_37 = arith.constant 0 : index
    %c0_38 = arith.constant 0 : index
    %31 = vector.load %arg1[%c3_35, %c0_36, %c0_37, %c0_38] : memref<4x1x36x16xbf16, #tpu.memory_space<vmem>>, vector<1x1x29x16xbf16>
    %32 = vector.shape_cast %31 : vector<1x1x29x16xbf16> to vector<29x16xbf16>
    %c5 = arith.constant 5 : index
    %c0_39 = arith.constant 0 : index
    %c0_40 = arith.constant 0 : index
    %33 = vector.load %arg2[%c5, %c0_39, %c0_40] : memref<16x16x32xbf16, #tpu.memory_space<vmem>>, vector<1x16x32xbf16>
    %34 = vector.shape_cast %33 : vector<1x16x32xbf16> to vector<16x32xbf16>
    %cst_41 = arith.constant dense<0.000000e+00> : vector<29x32xf32>
    %35 = tpu.matmul %32, %34, %cst_41 {dimension_numbers = #tpu.dot_dimension_numbers<[1], [0], [0], [1], [0, 0, 1, 1], [], []>} : vector<29x16xbf16>, vector<16x32xbf16>, vector<29x32xf32> -> vector<29x32xf32>
    %36 = arith.addf %30, %35 : vector<29x32xf32>
    %c2_42 = arith.constant 2 : index
    %c0_43 = arith.constant 0 : index
    %c1_44 = arith.constant 1 : index
    %c0_45 = arith.constant 0 : index
    %37 = vector.load %arg1[%c2_42, %c0_43, %c1_44, %c0_45] : memref<4x1x36x16xbf16, #tpu.memory_space<vmem>>, vector<1x1x29x16xbf16>
    %38 = vector.shape_cast %37 : vector<1x1x29x16xbf16> to vector<29x16xbf16>
    %c6 = arith.constant 6 : index
    %c0_46 = arith.constant 0 : index
    %c0_47 = arith.constant 0 : index
    %39 = vector.load %arg2[%c6, %c0_46, %c0_47] : memref<16x16x32xbf16, #tpu.memory_space<vmem>>, vector<1x16x32xbf16>
    %40 = vector.shape_cast %39 : vector<1x16x32xbf16> to vector<16x32xbf16>
    %cst_48 = arith.constant dense<0.000000e+00> : vector<29x32xf32>
    %41 = tpu.matmul %38, %40, %cst_48 {dimension_numbers = #tpu.dot_dimension_numbers<[1], [0], [0], [1], [0, 0, 1, 1], [], []>} : vector<29x16xbf16>, vector<16x32xbf16>, vector<29x32xf32> -> vector<29x32xf32>
    %42 = arith.addf %36, %41 : vector<29x32xf32>
    %c3_49 = arith.constant 3 : index
    %c0_50 = arith.constant 0 : index
    %c1_51 = arith.constant 1 : index
    %c0_52 = arith.constant 0 : index
    %43 = vector.load %arg1[%c3_49, %c0_50, %c1_51, %c0_52] : memref<4x1x36x16xbf16, #tpu.memory_space<vmem>>, vector<1x1x29x16xbf16>
    %44 = vector.shape_cast %43 : vector<1x1x29x16xbf16> to vector<29x16xbf16>
    %c7 = arith.constant 7 : index
    %c0_53 = arith.constant 0 : index
    %c0_54 = arith.constant 0 : index
    %45 = vector.load %arg2[%c7, %c0_53, %c0_54] : memref<16x16x32xbf16, #tpu.memory_space<vmem>>, vector<1x16x32xbf16>
    %46 = vector.shape_cast %45 : vector<1x16x32xbf16> to vector<16x32xbf16>
    %cst_55 = arith.constant dense<0.000000e+00> : vector<29x32xf32>
    %47 = tpu.matmul %44, %46, %cst_55 {dimension_numbers = #tpu.dot_dimension_numbers<[1], [0], [0], [1], [0, 0, 1, 1], [], []>} : vector<29x16xbf16>, vector<16x32xbf16>, vector<29x32xf32> -> vector<29x32xf32>
    %48 = arith.addf %42, %47 : vector<29x32xf32>
    %c0_56 = arith.constant 0 : index
    %c0_57 = arith.constant 0 : index
    %c6_58 = arith.constant 6 : index
    %c0_59 = arith.constant 0 : index
    %49 = vector.load %arg1[%c0_56, %c0_57, %c6_58, %c0_59] : memref<4x1x36x16xbf16, #tpu.memory_space<vmem>>, vector<1x1x29x16xbf16>
    %50 = vector.shape_cast %49 : vector<1x1x29x16xbf16> to vector<29x16xbf16>
    %c8 = arith.constant 8 : index
    %c0_60 = arith.constant 0 : index
    %c0_61 = arith.constant 0 : index
    %51 = vector.load %arg2[%c8, %c0_60, %c0_61] : memref<16x16x32xbf16, #tpu.memory_space<vmem>>, vector<1x16x32xbf16>
    %52 = vector.shape_cast %51 : vector<1x16x32xbf16> to vector<16x32xbf16>
    %cst_62 = arith.constant dense<0.000000e+00> : vector<29x32xf32>
    %53 = tpu.matmul %50, %52, %cst_62 {dimension_numbers = #tpu.dot_dimension_numbers<[1], [0], [0], [1], [0, 0, 1, 1], [], []>} : vector<29x16xbf16>, vector<16x32xbf16>, vector<29x32xf32> -> vector<29x32xf32>
    %54 = arith.addf %48, %53 : vector<29x32xf32>
    %c1_63 = arith.constant 1 : index
    %c0_64 = arith.constant 0 : index
    %c6_65 = arith.constant 6 : index
    %c0_66 = arith.constant 0 : index
    %55 = vector.load %arg1[%c1_63, %c0_64, %c6_65, %c0_66] : memref<4x1x36x16xbf16, #tpu.memory_space<vmem>>, vector<1x1x29x16xbf16>
    %56 = vector.shape_cast %55 : vector<1x1x29x16xbf16> to vector<29x16xbf16>
    %c9 = arith.constant 9 : index
    %c0_67 = arith.constant 0 : index
    %c0_68 = arith.constant 0 : index
    %57 = vector.load %arg2[%c9, %c0_67, %c0_68] : memref<16x16x32xbf16, #tpu.memory_space<vmem>>, vector<1x16x32xbf16>
    %58 = vector.shape_cast %57 : vector<1x16x32xbf16> to vector<16x32xbf16>
    %cst_69 = arith.constant dense<0.000000e+00> : vector<29x32xf32>
    %59 = tpu.matmul %56, %58, %cst_69 {dimension_numbers = #tpu.dot_dimension_numbers<[1], [0], [0], [1], [0, 0, 1, 1], [], []>} : vector<29x16xbf16>, vector<16x32xbf16>, vector<29x32xf32> -> vector<29x32xf32>
    %60 = arith.addf %54, %59 : vector<29x32xf32>
    %c0_70 = arith.constant 0 : index
    %c0_71 = arith.constant 0 : index
    %c7_72 = arith.constant 7 : index
    %c0_73 = arith.constant 0 : index
    %61 = vector.load %arg1[%c0_70, %c0_71, %c7_72, %c0_73] : memref<4x1x36x16xbf16, #tpu.memory_space<vmem>>, vector<1x1x29x16xbf16>
    %62 = vector.shape_cast %61 : vector<1x1x29x16xbf16> to vector<29x16xbf16>
    %c10 = arith.constant 10 : index
    %c0_74 = arith.constant 0 : index
    %c0_75 = arith.constant 0 : index
    %63 = vector.load %arg2[%c10, %c0_74, %c0_75] : memref<16x16x32xbf16, #tpu.memory_space<vmem>>, vector<1x16x32xbf16>
    %64 = vector.shape_cast %63 : vector<1x16x32xbf16> to vector<16x32xbf16>
    %cst_76 = arith.constant dense<0.000000e+00> : vector<29x32xf32>
    %65 = tpu.matmul %62, %64, %cst_76 {dimension_numbers = #tpu.dot_dimension_numbers<[1], [0], [0], [1], [0, 0, 1, 1], [], []>} : vector<29x16xbf16>, vector<16x32xbf16>, vector<29x32xf32> -> vector<29x32xf32>
    %66 = arith.addf %60, %65 : vector<29x32xf32>
    %c1_77 = arith.constant 1 : index
    %c0_78 = arith.constant 0 : index
    %c7_79 = arith.constant 7 : index
    %c0_80 = arith.constant 0 : index
    %67 = vector.load %arg1[%c1_77, %c0_78, %c7_79, %c0_80] : memref<4x1x36x16xbf16, #tpu.memory_space<vmem>>, vector<1x1x29x16xbf16>
    %68 = vector.shape_cast %67 : vector<1x1x29x16xbf16> to vector<29x16xbf16>
    %c11 = arith.constant 11 : index
    %c0_81 = arith.constant 0 : index
    %c0_82 = arith.constant 0 : index
    %69 = vector.load %arg2[%c11, %c0_81, %c0_82] : memref<16x16x32xbf16, #tpu.memory_space<vmem>>, vector<1x16x32xbf16>
    %70 = vector.shape_cast %69 : vector<1x16x32xbf16> to vector<16x32xbf16>
    %cst_83 = arith.constant dense<0.000000e+00> : vector<29x32xf32>
    %71 = tpu.matmul %68, %70, %cst_83 {dimension_numbers = #tpu.dot_dimension_numbers<[1], [0], [0], [1], [0, 0, 1, 1], [], []>} : vector<29x16xbf16>, vector<16x32xbf16>, vector<29x32xf32> -> vector<29x32xf32>
    %72 = arith.addf %66, %71 : vector<29x32xf32>
    %c2_84 = arith.constant 2 : index
    %c0_85 = arith.constant 0 : index
    %c6_86 = arith.constant 6 : index
    %c0_87 = arith.constant 0 : index
    %73 = vector.load %arg1[%c2_84, %c0_85, %c6_86, %c0_87] : memref<4x1x36x16xbf16, #tpu.memory_space<vmem>>, vector<1x1x29x16xbf16>
    %74 = vector.shape_cast %73 : vector<1x1x29x16xbf16> to vector<29x16xbf16>
    %c12 = arith.constant 12 : index
    %c0_88 = arith.constant 0 : index
    %c0_89 = arith.constant 0 : index
    %75 = vector.load %arg2[%c12, %c0_88, %c0_89] : memref<16x16x32xbf16, #tpu.memory_space<vmem>>, vector<1x16x32xbf16>
    %76 = vector.shape_cast %75 : vector<1x16x32xbf16> to vector<16x32xbf16>
    %cst_90 = arith.constant dense<0.000000e+00> : vector<29x32xf32>
    %77 = tpu.matmul %74, %76, %cst_90 {dimension_numbers = #tpu.dot_dimension_numbers<[1], [0], [0], [1], [0, 0, 1, 1], [], []>} : vector<29x16xbf16>, vector<16x32xbf16>, vector<29x32xf32> -> vector<29x32xf32>
    %78 = arith.addf %72, %77 : vector<29x32xf32>
    %c3_91 = arith.constant 3 : index
    %c0_92 = arith.constant 0 : index
    %c6_93 = arith.constant 6 : index
    %c0_94 = arith.constant 0 : index
    %79 = vector.load %arg1[%c3_91, %c0_92, %c6_93, %c0_94] : memref<4x1x36x16xbf16, #tpu.memory_space<vmem>>, vector<1x1x29x16xbf16>
    %80 = vector.shape_cast %79 : vector<1x1x29x16xbf16> to vector<29x16xbf16>
    %c13 = arith.constant 13 : index
    %c0_95 = arith.constant 0 : index
    %c0_96 = arith.constant 0 : index
    %81 = vector.load %arg2[%c13, %c0_95, %c0_96] : memref<16x16x32xbf16, #tpu.memory_space<vmem>>, vector<1x16x32xbf16>
    %82 = vector.shape_cast %81 : vector<1x16x32xbf16> to vector<16x32xbf16>
    %cst_97 = arith.constant dense<0.000000e+00> : vector<29x32xf32>
    %83 = tpu.matmul %80, %82, %cst_97 {dimension_numbers = #tpu.dot_dimension_numbers<[1], [0], [0], [1], [0, 0, 1, 1], [], []>} : vector<29x16xbf16>, vector<16x32xbf16>, vector<29x32xf32> -> vector<29x32xf32>
    %84 = arith.addf %78, %83 : vector<29x32xf32>
    %c2_98 = arith.constant 2 : index
    %c0_99 = arith.constant 0 : index
    %c7_100 = arith.constant 7 : index
    %c0_101 = arith.constant 0 : index
    %85 = vector.load %arg1[%c2_98, %c0_99, %c7_100, %c0_101] : memref<4x1x36x16xbf16, #tpu.memory_space<vmem>>, vector<1x1x29x16xbf16>
    %86 = vector.shape_cast %85 : vector<1x1x29x16xbf16> to vector<29x16xbf16>
    %c14 = arith.constant 14 : index
    %c0_102 = arith.constant 0 : index
    %c0_103 = arith.constant 0 : index
    %87 = vector.load %arg2[%c14, %c0_102, %c0_103] : memref<16x16x32xbf16, #tpu.memory_space<vmem>>, vector<1x16x32xbf16>
    %88 = vector.shape_cast %87 : vector<1x16x32xbf16> to vector<16x32xbf16>
    %cst_104 = arith.constant dense<0.000000e+00> : vector<29x32xf32>
    %89 = tpu.matmul %86, %88, %cst_104 {dimension_numbers = #tpu.dot_dimension_numbers<[1], [0], [0], [1], [0, 0, 1, 1], [], []>} : vector<29x16xbf16>, vector<16x32xbf16>, vector<29x32xf32> -> vector<29x32xf32>
    %90 = arith.addf %84, %89 : vector<29x32xf32>
    %c3_105 = arith.constant 3 : index
    %c0_106 = arith.constant 0 : index
    %c7_107 = arith.constant 7 : index
    %c0_108 = arith.constant 0 : index
    %91 = vector.load %arg1[%c3_105, %c0_106, %c7_107, %c0_108] : memref<4x1x36x16xbf16, #tpu.memory_space<vmem>>, vector<1x1x29x16xbf16>
    %92 = vector.shape_cast %91 : vector<1x1x29x16xbf16> to vector<29x16xbf16>
    %c15 = arith.constant 15 : index
    %c0_109 = arith.constant 0 : index
    %c0_110 = arith.constant 0 : index
    %93 = vector.load %arg2[%c15, %c0_109, %c0_110] : memref<16x16x32xbf16, #tpu.memory_space<vmem>>, vector<1x16x32xbf16>
    %94 = vector.shape_cast %93 : vector<1x16x32xbf16> to vector<16x32xbf16>
    %cst_111 = arith.constant dense<0.000000e+00> : vector<29x32xf32>
    %95 = tpu.matmul %92, %94, %cst_111 {dimension_numbers = #tpu.dot_dimension_numbers<[1], [0], [0], [1], [0, 0, 1, 1], [], []>} : vector<29x16xbf16>, vector<16x32xbf16>, vector<29x32xf32> -> vector<29x32xf32>
    %96 = arith.addf %90, %95 : vector<29x32xf32>
    %97 = arith.truncf %96 : vector<29x32xf32> to vector<29x32xbf16>
    %c0_112 = arith.constant 0 : index
    %c0_113 = arith.constant 0 : index
    %c0_114 = arith.constant 0 : index
    %98 = vector.load %arg4[%c0_112, %c0_113, %c0_114] : memref<1x29x32xbf16, #tpu.memory_space<vmem>>, vector<1x29x32xbf16>
    %99 = vector.shape_cast %98 : vector<1x29x32xbf16> to vector<29x32xbf16>
    %100 = vector.shape_cast %97 : vector<29x32xbf16> to vector<1x29x32xbf16>
    tpu.vector_store %arg4[%c0_112, %c0_113, %c0_114], %100 {strides = array<i32>} : memref<1x29x32xbf16, #tpu.memory_space<vmem>>, vector<1x29x32xbf16>,
    %c0_115 = arith.constant 0 : index
    %c0_116 = arith.constant 0 : index
    %101 = vector.load %arg3[%c0_115, %c0_116] : memref<29x1xf32, #tpu.memory_space<vmem>>, vector<29x1xf32>
    %102 = vector.broadcast %101 : vector<29x1xf32> to vector<29x32xf32>
    %103 = arith.mulf %96, %102 : vector<29x32xf32>
    %cst_117 = arith.constant dense<0.000000e+00> : vector<32xf32>
    %104 = vector.multi_reduction <add>, %103, %cst_117 [0] : vector<29x32xf32> to vector<32xf32>
    %105 = vector.shape_cast %104 : vector<32xf32> to vector<1x32xf32>
    %c0_118 = arith.constant 0 : index
    %c0_119 = arith.constant 0 : index
    %c0_120 = arith.constant 0 : index
    %106 = vector.load %arg5[%c0_118, %c0_119, %c0_120] : memref<1x1x32xf32, #tpu.memory_space<vmem>>, vector<1x1x32xf32>
    %107 = vector.shape_cast %106 : vector<1x1x32xf32> to vector<1x32xf32>
    %108 = vector.shape_cast %105 : vector<1x32xf32> to vector<1x1x32xf32>
    tpu.vector_store %arg5[%c0_118, %c0_119, %c0_120], %108 {strides = array<i32>} : memref<1x1x32xf32, #tpu.memory_space<vmem>>, vector<1x1x32xf32>,
    %109 = arith.mulf %103, %96 : vector<29x32xf32>
    %cst_121 = arith.constant dense<0.000000e+00> : vector<32xf32>
    %110 = vector.multi_reduction <add>, %109, %cst_121 [0] : vector<29x32xf32> to vector<32xf32>
    %111 = vector.shape_cast %110 : vector<32xf32> to vector<1x32xf32>
    %c0_122 = arith.constant 0 : index
    %c0_123 = arith.constant 0 : index
    %c0_124 = arith.constant 0 : index
    %112 = vector.load %arg6[%c0_122, %c0_123, %c0_124] : memref<1x1x32xf32, #tpu.memory_space<vmem>>, vector<1x1x32xf32>
    %113 = vector.shape_cast %112 : vector<1x1x32xf32> to vector<1x32xf32>
    %114 = vector.shape_cast %111 : vector<1x32xf32> to vector<1x1x32xf32>
    tpu.vector_store %arg6[%c0_122, %c0_123, %c0_124], %114 {strides = array<i32>} : memref<1x1x32xf32, #tpu.memory_space<vmem>>, vector<1x1x32xf32>,
    return
  }
  func.func @transform_0(%arg0: i32) -> (i32, i32, i32, i32) {
    %c0_i32 = arith.constant 0 : i32
    %c0_i32_0 = arith.constant 0 : i32
    %c0_i32_1 = arith.constant 0 : i32
    %c0_i32_2 = arith.constant 0 : i32
    return %c0_i32, %arg0, %c0_i32_0, %c0_i32_1 : i32, i32, i32, i32
  }
  func.func @transform_1(%arg0: i32) -> (i32, i32, i32) {
    %c0_i32 = arith.constant 0 : i32
    %c0_i32_0 = arith.constant 0 : i32
    %c0_i32_1 = arith.constant 0 : i32
    %c0_i32_2 = arith.constant 0 : i32
    return %c0_i32, %c0_i32_0, %c0_i32_1 : i32, i32, i32
  }
  func.func @transform_2(%arg0: i32) -> (i32, i32) {
    %c0_i32 = arith.constant 0 : i32
    %c0_i32_0 = arith.constant 0 : i32
    %c0_i32_1 = arith.constant 0 : i32
    return %c0_i32, %c0_i32_0 : i32, i32
  }
  func.func @transform_3(%arg0: i32) -> (i32, i32, i32) {
    %c0_i32 = arith.constant 0 : i32
    %c0_i32_0 = arith.constant 0 : i32
    %c0_i32_1 = arith.constant 0 : i32
    return %arg0, %c0_i32, %c0_i32_0 : i32, i32, i32
  }
  func.func @transform_4(%arg0: i32) -> (i32, i32, i32) {
    %c0_i32 = arith.constant 0 : i32
    %c0_i32_0 = arith.constant 0 : i32
    %c0_i32_1 = arith.constant 0 : i32
    return %arg0, %c0_i32, %c0_i32_0 : i32, i32, i32
  }
  func.func @transform_5(%arg0: i32) -> (i32, i32, i32) {
    %c0_i32 = arith.constant 0 : i32
    %c0_i32_0 = arith.constant 0 : i32
    %c0_i32_1 = arith.constant 0 : i32
    return %arg0, %c0_i32, %c0_i32_0 : i32, i32, i32
  }
}

module attributes {stable_mosaic.version = 11 : i64} {
  func.func @_conv_stats_kernel(%arg0: i32, %arg1: memref<4x1x16x32xbf16, #tpu.memory_space<vmem>>, %arg2: memref<16x32x64xbf16, #tpu.memory_space<vmem>>, %arg3: memref<11x1xf32, #tpu.memory_space<vmem>>, %arg4: memref<1x11x64xbf16, #tpu.memory_space<vmem>>, %arg5: memref<1x1x64xf32, #tpu.memory_space<vmem>>, %arg6: memref<1x1x64xf32, #tpu.memory_space<vmem>>) attributes {dimension_semantics = [#tpu.dimension_semantics<parallel>], iteration_bounds = array<i64: 2>, scalar_prefetch = 0 : i64, scratch_operands = 0 : i64, tpu.core_type = #tpu.core_type<tc>, window_params = [{transform_indices = @transform_0, window_bounds = array<i64: 4, 1, 16, 32>}, {pipeline_mode = #tpu.pipeline_mode<synchronous>, transform_indices = @transform_1, window_bounds = array<i64: 16, 32, 64>}, {pipeline_mode = #tpu.pipeline_mode<synchronous>, transform_indices = @transform_2, window_bounds = array<i64: 11, 1>}, {transform_indices = @transform_3, window_bounds = array<i64: 1, 11, 64>}, {transform_indices = @transform_4, window_bounds = array<i64: 1, 1, 64>}, {transform_indices = @transform_5, window_bounds = array<i64: 1, 1, 64>}]} {
    %cst = arith.constant 0.000000e+00 : f32
    %0 = vector.broadcast %cst : f32 to vector<11x64xf32>
    %c0 = arith.constant 0 : index
    %c0_0 = arith.constant 0 : index
    %c0_1 = arith.constant 0 : index
    %c0_2 = arith.constant 0 : index
    %1 = vector.load %arg1[%c0, %c0_0, %c0_1, %c0_2] : memref<4x1x16x32xbf16, #tpu.memory_space<vmem>>, vector<1x1x11x32xbf16>
    %2 = vector.shape_cast %1 : vector<1x1x11x32xbf16> to vector<11x32xbf16>
    %c0_3 = arith.constant 0 : index
    %c0_4 = arith.constant 0 : index
    %c0_5 = arith.constant 0 : index
    %3 = vector.load %arg2[%c0_3, %c0_4, %c0_5] : memref<16x32x64xbf16, #tpu.memory_space<vmem>>, vector<1x32x64xbf16>
    %4 = vector.shape_cast %3 : vector<1x32x64xbf16> to vector<32x64xbf16>
    %cst_6 = arith.constant dense<0.000000e+00> : vector<11x64xf32>
    %5 = tpu.matmul %2, %4, %cst_6 {dimension_numbers = #tpu.dot_dimension_numbers<[1], [0], [0], [1], [0, 0, 1, 1], [], []>} : vector<11x32xbf16>, vector<32x64xbf16>, vector<11x64xf32> -> vector<11x64xf32>
    %6 = arith.addf %0, %5 : vector<11x64xf32>
    %c1 = arith.constant 1 : index
    %c0_7 = arith.constant 0 : index
    %c0_8 = arith.constant 0 : index
    %c0_9 = arith.constant 0 : index
    %7 = vector.load %arg1[%c1, %c0_7, %c0_8, %c0_9] : memref<4x1x16x32xbf16, #tpu.memory_space<vmem>>, vector<1x1x11x32xbf16>
    %8 = vector.shape_cast %7 : vector<1x1x11x32xbf16> to vector<11x32xbf16>
    %c1_10 = arith.constant 1 : index
    %c0_11 = arith.constant 0 : index
    %c0_12 = arith.constant 0 : index
    %9 = vector.load %arg2[%c1_10, %c0_11, %c0_12] : memref<16x32x64xbf16, #tpu.memory_space<vmem>>, vector<1x32x64xbf16>
    %10 = vector.shape_cast %9 : vector<1x32x64xbf16> to vector<32x64xbf16>
    %cst_13 = arith.constant dense<0.000000e+00> : vector<11x64xf32>
    %11 = tpu.matmul %8, %10, %cst_13 {dimension_numbers = #tpu.dot_dimension_numbers<[1], [0], [0], [1], [0, 0, 1, 1], [], []>} : vector<11x32xbf16>, vector<32x64xbf16>, vector<11x64xf32> -> vector<11x64xf32>
    %12 = arith.addf %6, %11 : vector<11x64xf32>
    %c0_14 = arith.constant 0 : index
    %c0_15 = arith.constant 0 : index
    %c1_16 = arith.constant 1 : index
    %c0_17 = arith.constant 0 : index
    %13 = vector.load %arg1[%c0_14, %c0_15, %c1_16, %c0_17] : memref<4x1x16x32xbf16, #tpu.memory_space<vmem>>, vector<1x1x11x32xbf16>
    %14 = vector.shape_cast %13 : vector<1x1x11x32xbf16> to vector<11x32xbf16>
    %c2 = arith.constant 2 : index
    %c0_18 = arith.constant 0 : index
    %c0_19 = arith.constant 0 : index
    %15 = vector.load %arg2[%c2, %c0_18, %c0_19] : memref<16x32x64xbf16, #tpu.memory_space<vmem>>, vector<1x32x64xbf16>
    %16 = vector.shape_cast %15 : vector<1x32x64xbf16> to vector<32x64xbf16>
    %cst_20 = arith.constant dense<0.000000e+00> : vector<11x64xf32>
    %17 = tpu.matmul %14, %16, %cst_20 {dimension_numbers = #tpu.dot_dimension_numbers<[1], [0], [0], [1], [0, 0, 1, 1], [], []>} : vector<11x32xbf16>, vector<32x64xbf16>, vector<11x64xf32> -> vector<11x64xf32>
    %18 = arith.addf %12, %17 : vector<11x64xf32>
    %c1_21 = arith.constant 1 : index
    %c0_22 = arith.constant 0 : index
    %c1_23 = arith.constant 1 : index
    %c0_24 = arith.constant 0 : index
    %19 = vector.load %arg1[%c1_21, %c0_22, %c1_23, %c0_24] : memref<4x1x16x32xbf16, #tpu.memory_space<vmem>>, vector<1x1x11x32xbf16>
    %20 = vector.shape_cast %19 : vector<1x1x11x32xbf16> to vector<11x32xbf16>
    %c3 = arith.constant 3 : index
    %c0_25 = arith.constant 0 : index
    %c0_26 = arith.constant 0 : index
    %21 = vector.load %arg2[%c3, %c0_25, %c0_26] : memref<16x32x64xbf16, #tpu.memory_space<vmem>>, vector<1x32x64xbf16>
    %22 = vector.shape_cast %21 : vector<1x32x64xbf16> to vector<32x64xbf16>
    %cst_27 = arith.constant dense<0.000000e+00> : vector<11x64xf32>
    %23 = tpu.matmul %20, %22, %cst_27 {dimension_numbers = #tpu.dot_dimension_numbers<[1], [0], [0], [1], [0, 0, 1, 1], [], []>} : vector<11x32xbf16>, vector<32x64xbf16>, vector<11x64xf32> -> vector<11x64xf32>
    %24 = arith.addf %18, %23 : vector<11x64xf32>
    %c2_28 = arith.constant 2 : index
    %c0_29 = arith.constant 0 : index
    %c0_30 = arith.constant 0 : index
    %c0_31 = arith.constant 0 : index
    %25 = vector.load %arg1[%c2_28, %c0_29, %c0_30, %c0_31] : memref<4x1x16x32xbf16, #tpu.memory_space<vmem>>, vector<1x1x11x32xbf16>
    %26 = vector.shape_cast %25 : vector<1x1x11x32xbf16> to vector<11x32xbf16>
    %c4 = arith.constant 4 : index
    %c0_32 = arith.constant 0 : index
    %c0_33 = arith.constant 0 : index
    %27 = vector.load %arg2[%c4, %c0_32, %c0_33] : memref<16x32x64xbf16, #tpu.memory_space<vmem>>, vector<1x32x64xbf16>
    %28 = vector.shape_cast %27 : vector<1x32x64xbf16> to vector<32x64xbf16>
    %cst_34 = arith.constant dense<0.000000e+00> : vector<11x64xf32>
    %29 = tpu.matmul %26, %28, %cst_34 {dimension_numbers = #tpu.dot_dimension_numbers<[1], [0], [0], [1], [0, 0, 1, 1], [], []>} : vector<11x32xbf16>, vector<32x64xbf16>, vector<11x64xf32> -> vector<11x64xf32>
    %30 = arith.addf %24, %29 : vector<11x64xf32>
    %c3_35 = arith.constant 3 : index
    %c0_36 = arith.constant 0 : index
    %c0_37 = arith.constant 0 : index
    %c0_38 = arith.constant 0 : index
    %31 = vector.load %arg1[%c3_35, %c0_36, %c0_37, %c0_38] : memref<4x1x16x32xbf16, #tpu.memory_space<vmem>>, vector<1x1x11x32xbf16>
    %32 = vector.shape_cast %31 : vector<1x1x11x32xbf16> to vector<11x32xbf16>
    %c5 = arith.constant 5 : index
    %c0_39 = arith.constant 0 : index
    %c0_40 = arith.constant 0 : index
    %33 = vector.load %arg2[%c5, %c0_39, %c0_40] : memref<16x32x64xbf16, #tpu.memory_space<vmem>>, vector<1x32x64xbf16>
    %34 = vector.shape_cast %33 : vector<1x32x64xbf16> to vector<32x64xbf16>
    %cst_41 = arith.constant dense<0.000000e+00> : vector<11x64xf32>
    %35 = tpu.matmul %32, %34, %cst_41 {dimension_numbers = #tpu.dot_dimension_numbers<[1], [0], [0], [1], [0, 0, 1, 1], [], []>} : vector<11x32xbf16>, vector<32x64xbf16>, vector<11x64xf32> -> vector<11x64xf32>
    %36 = arith.addf %30, %35 : vector<11x64xf32>
    %c2_42 = arith.constant 2 : index
    %c0_43 = arith.constant 0 : index
    %c1_44 = arith.constant 1 : index
    %c0_45 = arith.constant 0 : index
    %37 = vector.load %arg1[%c2_42, %c0_43, %c1_44, %c0_45] : memref<4x1x16x32xbf16, #tpu.memory_space<vmem>>, vector<1x1x11x32xbf16>
    %38 = vector.shape_cast %37 : vector<1x1x11x32xbf16> to vector<11x32xbf16>
    %c6 = arith.constant 6 : index
    %c0_46 = arith.constant 0 : index
    %c0_47 = arith.constant 0 : index
    %39 = vector.load %arg2[%c6, %c0_46, %c0_47] : memref<16x32x64xbf16, #tpu.memory_space<vmem>>, vector<1x32x64xbf16>
    %40 = vector.shape_cast %39 : vector<1x32x64xbf16> to vector<32x64xbf16>
    %cst_48 = arith.constant dense<0.000000e+00> : vector<11x64xf32>
    %41 = tpu.matmul %38, %40, %cst_48 {dimension_numbers = #tpu.dot_dimension_numbers<[1], [0], [0], [1], [0, 0, 1, 1], [], []>} : vector<11x32xbf16>, vector<32x64xbf16>, vector<11x64xf32> -> vector<11x64xf32>
    %42 = arith.addf %36, %41 : vector<11x64xf32>
    %c3_49 = arith.constant 3 : index
    %c0_50 = arith.constant 0 : index
    %c1_51 = arith.constant 1 : index
    %c0_52 = arith.constant 0 : index
    %43 = vector.load %arg1[%c3_49, %c0_50, %c1_51, %c0_52] : memref<4x1x16x32xbf16, #tpu.memory_space<vmem>>, vector<1x1x11x32xbf16>
    %44 = vector.shape_cast %43 : vector<1x1x11x32xbf16> to vector<11x32xbf16>
    %c7 = arith.constant 7 : index
    %c0_53 = arith.constant 0 : index
    %c0_54 = arith.constant 0 : index
    %45 = vector.load %arg2[%c7, %c0_53, %c0_54] : memref<16x32x64xbf16, #tpu.memory_space<vmem>>, vector<1x32x64xbf16>
    %46 = vector.shape_cast %45 : vector<1x32x64xbf16> to vector<32x64xbf16>
    %cst_55 = arith.constant dense<0.000000e+00> : vector<11x64xf32>
    %47 = tpu.matmul %44, %46, %cst_55 {dimension_numbers = #tpu.dot_dimension_numbers<[1], [0], [0], [1], [0, 0, 1, 1], [], []>} : vector<11x32xbf16>, vector<32x64xbf16>, vector<11x64xf32> -> vector<11x64xf32>
    %48 = arith.addf %42, %47 : vector<11x64xf32>
    %c0_56 = arith.constant 0 : index
    %c0_57 = arith.constant 0 : index
    %c4_58 = arith.constant 4 : index
    %c0_59 = arith.constant 0 : index
    %49 = vector.load %arg1[%c0_56, %c0_57, %c4_58, %c0_59] : memref<4x1x16x32xbf16, #tpu.memory_space<vmem>>, vector<1x1x11x32xbf16>
    %50 = vector.shape_cast %49 : vector<1x1x11x32xbf16> to vector<11x32xbf16>
    %c8 = arith.constant 8 : index
    %c0_60 = arith.constant 0 : index
    %c0_61 = arith.constant 0 : index
    %51 = vector.load %arg2[%c8, %c0_60, %c0_61] : memref<16x32x64xbf16, #tpu.memory_space<vmem>>, vector<1x32x64xbf16>
    %52 = vector.shape_cast %51 : vector<1x32x64xbf16> to vector<32x64xbf16>
    %cst_62 = arith.constant dense<0.000000e+00> : vector<11x64xf32>
    %53 = tpu.matmul %50, %52, %cst_62 {dimension_numbers = #tpu.dot_dimension_numbers<[1], [0], [0], [1], [0, 0, 1, 1], [], []>} : vector<11x32xbf16>, vector<32x64xbf16>, vector<11x64xf32> -> vector<11x64xf32>
    %54 = arith.addf %48, %53 : vector<11x64xf32>
    %c1_63 = arith.constant 1 : index
    %c0_64 = arith.constant 0 : index
    %c4_65 = arith.constant 4 : index
    %c0_66 = arith.constant 0 : index
    %55 = vector.load %arg1[%c1_63, %c0_64, %c4_65, %c0_66] : memref<4x1x16x32xbf16, #tpu.memory_space<vmem>>, vector<1x1x11x32xbf16>
    %56 = vector.shape_cast %55 : vector<1x1x11x32xbf16> to vector<11x32xbf16>
    %c9 = arith.constant 9 : index
    %c0_67 = arith.constant 0 : index
    %c0_68 = arith.constant 0 : index
    %57 = vector.load %arg2[%c9, %c0_67, %c0_68] : memref<16x32x64xbf16, #tpu.memory_space<vmem>>, vector<1x32x64xbf16>
    %58 = vector.shape_cast %57 : vector<1x32x64xbf16> to vector<32x64xbf16>
    %cst_69 = arith.constant dense<0.000000e+00> : vector<11x64xf32>
    %59 = tpu.matmul %56, %58, %cst_69 {dimension_numbers = #tpu.dot_dimension_numbers<[1], [0], [0], [1], [0, 0, 1, 1], [], []>} : vector<11x32xbf16>, vector<32x64xbf16>, vector<11x64xf32> -> vector<11x64xf32>
    %60 = arith.addf %54, %59 : vector<11x64xf32>
    %c0_70 = arith.constant 0 : index
    %c0_71 = arith.constant 0 : index
    %c5_72 = arith.constant 5 : index
    %c0_73 = arith.constant 0 : index
    %61 = vector.load %arg1[%c0_70, %c0_71, %c5_72, %c0_73] : memref<4x1x16x32xbf16, #tpu.memory_space<vmem>>, vector<1x1x11x32xbf16>
    %62 = vector.shape_cast %61 : vector<1x1x11x32xbf16> to vector<11x32xbf16>
    %c10 = arith.constant 10 : index
    %c0_74 = arith.constant 0 : index
    %c0_75 = arith.constant 0 : index
    %63 = vector.load %arg2[%c10, %c0_74, %c0_75] : memref<16x32x64xbf16, #tpu.memory_space<vmem>>, vector<1x32x64xbf16>
    %64 = vector.shape_cast %63 : vector<1x32x64xbf16> to vector<32x64xbf16>
    %cst_76 = arith.constant dense<0.000000e+00> : vector<11x64xf32>
    %65 = tpu.matmul %62, %64, %cst_76 {dimension_numbers = #tpu.dot_dimension_numbers<[1], [0], [0], [1], [0, 0, 1, 1], [], []>} : vector<11x32xbf16>, vector<32x64xbf16>, vector<11x64xf32> -> vector<11x64xf32>
    %66 = arith.addf %60, %65 : vector<11x64xf32>
    %c1_77 = arith.constant 1 : index
    %c0_78 = arith.constant 0 : index
    %c5_79 = arith.constant 5 : index
    %c0_80 = arith.constant 0 : index
    %67 = vector.load %arg1[%c1_77, %c0_78, %c5_79, %c0_80] : memref<4x1x16x32xbf16, #tpu.memory_space<vmem>>, vector<1x1x11x32xbf16>
    %68 = vector.shape_cast %67 : vector<1x1x11x32xbf16> to vector<11x32xbf16>
    %c11 = arith.constant 11 : index
    %c0_81 = arith.constant 0 : index
    %c0_82 = arith.constant 0 : index
    %69 = vector.load %arg2[%c11, %c0_81, %c0_82] : memref<16x32x64xbf16, #tpu.memory_space<vmem>>, vector<1x32x64xbf16>
    %70 = vector.shape_cast %69 : vector<1x32x64xbf16> to vector<32x64xbf16>
    %cst_83 = arith.constant dense<0.000000e+00> : vector<11x64xf32>
    %71 = tpu.matmul %68, %70, %cst_83 {dimension_numbers = #tpu.dot_dimension_numbers<[1], [0], [0], [1], [0, 0, 1, 1], [], []>} : vector<11x32xbf16>, vector<32x64xbf16>, vector<11x64xf32> -> vector<11x64xf32>
    %72 = arith.addf %66, %71 : vector<11x64xf32>
    %c2_84 = arith.constant 2 : index
    %c0_85 = arith.constant 0 : index
    %c4_86 = arith.constant 4 : index
    %c0_87 = arith.constant 0 : index
    %73 = vector.load %arg1[%c2_84, %c0_85, %c4_86, %c0_87] : memref<4x1x16x32xbf16, #tpu.memory_space<vmem>>, vector<1x1x11x32xbf16>
    %74 = vector.shape_cast %73 : vector<1x1x11x32xbf16> to vector<11x32xbf16>
    %c12 = arith.constant 12 : index
    %c0_88 = arith.constant 0 : index
    %c0_89 = arith.constant 0 : index
    %75 = vector.load %arg2[%c12, %c0_88, %c0_89] : memref<16x32x64xbf16, #tpu.memory_space<vmem>>, vector<1x32x64xbf16>
    %76 = vector.shape_cast %75 : vector<1x32x64xbf16> to vector<32x64xbf16>
    %cst_90 = arith.constant dense<0.000000e+00> : vector<11x64xf32>
    %77 = tpu.matmul %74, %76, %cst_90 {dimension_numbers = #tpu.dot_dimension_numbers<[1], [0], [0], [1], [0, 0, 1, 1], [], []>} : vector<11x32xbf16>, vector<32x64xbf16>, vector<11x64xf32> -> vector<11x64xf32>
    %78 = arith.addf %72, %77 : vector<11x64xf32>
    %c3_91 = arith.constant 3 : index
    %c0_92 = arith.constant 0 : index
    %c4_93 = arith.constant 4 : index
    %c0_94 = arith.constant 0 : index
    %79 = vector.load %arg1[%c3_91, %c0_92, %c4_93, %c0_94] : memref<4x1x16x32xbf16, #tpu.memory_space<vmem>>, vector<1x1x11x32xbf16>
    %80 = vector.shape_cast %79 : vector<1x1x11x32xbf16> to vector<11x32xbf16>
    %c13 = arith.constant 13 : index
    %c0_95 = arith.constant 0 : index
    %c0_96 = arith.constant 0 : index
    %81 = vector.load %arg2[%c13, %c0_95, %c0_96] : memref<16x32x64xbf16, #tpu.memory_space<vmem>>, vector<1x32x64xbf16>
    %82 = vector.shape_cast %81 : vector<1x32x64xbf16> to vector<32x64xbf16>
    %cst_97 = arith.constant dense<0.000000e+00> : vector<11x64xf32>
    %83 = tpu.matmul %80, %82, %cst_97 {dimension_numbers = #tpu.dot_dimension_numbers<[1], [0], [0], [1], [0, 0, 1, 1], [], []>} : vector<11x32xbf16>, vector<32x64xbf16>, vector<11x64xf32> -> vector<11x64xf32>
    %84 = arith.addf %78, %83 : vector<11x64xf32>
    %c2_98 = arith.constant 2 : index
    %c0_99 = arith.constant 0 : index
    %c5_100 = arith.constant 5 : index
    %c0_101 = arith.constant 0 : index
    %85 = vector.load %arg1[%c2_98, %c0_99, %c5_100, %c0_101] : memref<4x1x16x32xbf16, #tpu.memory_space<vmem>>, vector<1x1x11x32xbf16>
    %86 = vector.shape_cast %85 : vector<1x1x11x32xbf16> to vector<11x32xbf16>
    %c14 = arith.constant 14 : index
    %c0_102 = arith.constant 0 : index
    %c0_103 = arith.constant 0 : index
    %87 = vector.load %arg2[%c14, %c0_102, %c0_103] : memref<16x32x64xbf16, #tpu.memory_space<vmem>>, vector<1x32x64xbf16>
    %88 = vector.shape_cast %87 : vector<1x32x64xbf16> to vector<32x64xbf16>
    %cst_104 = arith.constant dense<0.000000e+00> : vector<11x64xf32>
    %89 = tpu.matmul %86, %88, %cst_104 {dimension_numbers = #tpu.dot_dimension_numbers<[1], [0], [0], [1], [0, 0, 1, 1], [], []>} : vector<11x32xbf16>, vector<32x64xbf16>, vector<11x64xf32> -> vector<11x64xf32>
    %90 = arith.addf %84, %89 : vector<11x64xf32>
    %c3_105 = arith.constant 3 : index
    %c0_106 = arith.constant 0 : index
    %c5_107 = arith.constant 5 : index
    %c0_108 = arith.constant 0 : index
    %91 = vector.load %arg1[%c3_105, %c0_106, %c5_107, %c0_108] : memref<4x1x16x32xbf16, #tpu.memory_space<vmem>>, vector<1x1x11x32xbf16>
    %92 = vector.shape_cast %91 : vector<1x1x11x32xbf16> to vector<11x32xbf16>
    %c15 = arith.constant 15 : index
    %c0_109 = arith.constant 0 : index
    %c0_110 = arith.constant 0 : index
    %93 = vector.load %arg2[%c15, %c0_109, %c0_110] : memref<16x32x64xbf16, #tpu.memory_space<vmem>>, vector<1x32x64xbf16>
    %94 = vector.shape_cast %93 : vector<1x32x64xbf16> to vector<32x64xbf16>
    %cst_111 = arith.constant dense<0.000000e+00> : vector<11x64xf32>
    %95 = tpu.matmul %92, %94, %cst_111 {dimension_numbers = #tpu.dot_dimension_numbers<[1], [0], [0], [1], [0, 0, 1, 1], [], []>} : vector<11x32xbf16>, vector<32x64xbf16>, vector<11x64xf32> -> vector<11x64xf32>
    %96 = arith.addf %90, %95 : vector<11x64xf32>
    %97 = arith.truncf %96 : vector<11x64xf32> to vector<11x64xbf16>
    %c0_112 = arith.constant 0 : index
    %c0_113 = arith.constant 0 : index
    %c0_114 = arith.constant 0 : index
    %98 = vector.load %arg4[%c0_112, %c0_113, %c0_114] : memref<1x11x64xbf16, #tpu.memory_space<vmem>>, vector<1x11x64xbf16>
    %99 = vector.shape_cast %98 : vector<1x11x64xbf16> to vector<11x64xbf16>
    %100 = vector.shape_cast %97 : vector<11x64xbf16> to vector<1x11x64xbf16>
    tpu.vector_store %arg4[%c0_112, %c0_113, %c0_114], %100 {strides = array<i32>} : memref<1x11x64xbf16, #tpu.memory_space<vmem>>, vector<1x11x64xbf16>,
    %c0_115 = arith.constant 0 : index
    %c0_116 = arith.constant 0 : index
    %101 = vector.load %arg3[%c0_115, %c0_116] : memref<11x1xf32, #tpu.memory_space<vmem>>, vector<11x1xf32>
    %102 = vector.broadcast %101 : vector<11x1xf32> to vector<11x64xf32>
    %103 = arith.mulf %96, %102 : vector<11x64xf32>
    %cst_117 = arith.constant dense<0.000000e+00> : vector<64xf32>
    %104 = vector.multi_reduction <add>, %103, %cst_117 [0] : vector<11x64xf32> to vector<64xf32>
    %105 = vector.shape_cast %104 : vector<64xf32> to vector<1x64xf32>
    %c0_118 = arith.constant 0 : index
    %c0_119 = arith.constant 0 : index
    %c0_120 = arith.constant 0 : index
    %106 = vector.load %arg5[%c0_118, %c0_119, %c0_120] : memref<1x1x64xf32, #tpu.memory_space<vmem>>, vector<1x1x64xf32>
    %107 = vector.shape_cast %106 : vector<1x1x64xf32> to vector<1x64xf32>
    %108 = vector.shape_cast %105 : vector<1x64xf32> to vector<1x1x64xf32>
    tpu.vector_store %arg5[%c0_118, %c0_119, %c0_120], %108 {strides = array<i32>} : memref<1x1x64xf32, #tpu.memory_space<vmem>>, vector<1x1x64xf32>,
    %109 = arith.mulf %103, %96 : vector<11x64xf32>
    %cst_121 = arith.constant dense<0.000000e+00> : vector<64xf32>
    %110 = vector.multi_reduction <add>, %109, %cst_121 [0] : vector<11x64xf32> to vector<64xf32>
    %111 = vector.shape_cast %110 : vector<64xf32> to vector<1x64xf32>
    %c0_122 = arith.constant 0 : index
    %c0_123 = arith.constant 0 : index
    %c0_124 = arith.constant 0 : index
    %112 = vector.load %arg6[%c0_122, %c0_123, %c0_124] : memref<1x1x64xf32, #tpu.memory_space<vmem>>, vector<1x1x64xf32>
    %113 = vector.shape_cast %112 : vector<1x1x64xf32> to vector<1x64xf32>
    %114 = vector.shape_cast %111 : vector<1x64xf32> to vector<1x1x64xf32>
    tpu.vector_store %arg6[%c0_122, %c0_123, %c0_124], %114 {strides = array<i32>} : memref<1x1x64xf32, #tpu.memory_space<vmem>>, vector<1x1x64xf32>,
    return
  }
  func.func @transform_0(%arg0: i32) -> (i32, i32, i32, i32) {
    %c0_i32 = arith.constant 0 : i32
    %c0_i32_0 = arith.constant 0 : i32
    %c0_i32_1 = arith.constant 0 : i32
    %c0_i32_2 = arith.constant 0 : i32
    return %c0_i32, %arg0, %c0_i32_0, %c0_i32_1 : i32, i32, i32, i32
  }
  func.func @transform_1(%arg0: i32) -> (i32, i32, i32) {
    %c0_i32 = arith.constant 0 : i32
    %c0_i32_0 = arith.constant 0 : i32
    %c0_i32_1 = arith.constant 0 : i32
    %c0_i32_2 = arith.constant 0 : i32
    return %c0_i32, %c0_i32_0, %c0_i32_1 : i32, i32, i32
  }
  func.func @transform_2(%arg0: i32) -> (i32, i32) {
    %c0_i32 = arith.constant 0 : i32
    %c0_i32_0 = arith.constant 0 : i32
    %c0_i32_1 = arith.constant 0 : i32
    return %c0_i32, %c0_i32_0 : i32, i32
  }
  func.func @transform_3(%arg0: i32) -> (i32, i32, i32) {
    %c0_i32 = arith.constant 0 : i32
    %c0_i32_0 = arith.constant 0 : i32
    %c0_i32_1 = arith.constant 0 : i32
    return %arg0, %c0_i32, %c0_i32_0 : i32, i32, i32
  }
  func.func @transform_4(%arg0: i32) -> (i32, i32, i32) {
    %c0_i32 = arith.constant 0 : i32
    %c0_i32_0 = arith.constant 0 : i32
    %c0_i32_1 = arith.constant 0 : i32
    return %arg0, %c0_i32, %c0_i32_0 : i32, i32, i32
  }
  func.func @transform_5(%arg0: i32) -> (i32, i32, i32) {
    %c0_i32 = arith.constant 0 : i32
    %c0_i32_0 = arith.constant 0 : i32
    %c0_i32_1 = arith.constant 0 : i32
    return %arg0, %c0_i32, %c0_i32_0 : i32, i32, i32
  }
}

module attributes {stable_mosaic.version = 11 : i64} {
  func.func @_conv_stats_kernel(%arg0: i32, %arg1: memref<1x1x49x64xbf16, #tpu.memory_space<vmem>>, %arg2: memref<16x64x128xbf16, #tpu.memory_space<vmem>>, %arg3: memref<25x1xf32, #tpu.memory_space<vmem>>, %arg4: memref<1x25x128xbf16, #tpu.memory_space<vmem>>, %arg5: memref<1x1x128xf32, #tpu.memory_space<vmem>>, %arg6: memref<1x1x128xf32, #tpu.memory_space<vmem>>) attributes {dimension_semantics = [#tpu.dimension_semantics<parallel>], iteration_bounds = array<i64: 2>, scalar_prefetch = 0 : i64, scratch_operands = 0 : i64, tpu.core_type = #tpu.core_type<tc>, window_params = [{transform_indices = @transform_0, window_bounds = array<i64: 1, 1, 49, 64>}, {pipeline_mode = #tpu.pipeline_mode<synchronous>, transform_indices = @transform_1, window_bounds = array<i64: 16, 64, 128>}, {pipeline_mode = #tpu.pipeline_mode<synchronous>, transform_indices = @transform_2, window_bounds = array<i64: 25, 1>}, {transform_indices = @transform_3, window_bounds = array<i64: 1, 25, 128>}, {transform_indices = @transform_4, window_bounds = array<i64: 1, 1, 128>}, {transform_indices = @transform_5, window_bounds = array<i64: 1, 1, 128>}]} {
    %cst = arith.constant 0.000000e+00 : f32
    %0 = vector.broadcast %cst : f32 to vector<25x128xf32>
    %c0 = arith.constant 0 : index
    %c0_0 = arith.constant 0 : index
    %c0_1 = arith.constant 0 : index
    %c0_2 = arith.constant 0 : index
    %1 = vector.load %arg1[%c0, %c0_0, %c0_1, %c0_2] : memref<1x1x49x64xbf16, #tpu.memory_space<vmem>>, vector<1x1x25x64xbf16>
    %2 = vector.shape_cast %1 : vector<1x1x25x64xbf16> to vector<25x64xbf16>
    %c0_3 = arith.constant 0 : index
    %c0_4 = arith.constant 0 : index
    %c0_5 = arith.constant 0 : index
    %3 = vector.load %arg2[%c0_3, %c0_4, %c0_5] : memref<16x64x128xbf16, #tpu.memory_space<vmem>>, vector<1x64x128xbf16>
    %4 = vector.shape_cast %3 : vector<1x64x128xbf16> to vector<64x128xbf16>
    %cst_6 = arith.constant dense<0.000000e+00> : vector<25x128xf32>
    %5 = tpu.matmul %2, %4, %cst_6 {dimension_numbers = #tpu.dot_dimension_numbers<[1], [0], [0], [1], [0, 0, 1, 1], [], []>} : vector<25x64xbf16>, vector<64x128xbf16>, vector<25x128xf32> -> vector<25x128xf32>
    %6 = arith.addf %0, %5 : vector<25x128xf32>
    %c0_7 = arith.constant 0 : index
    %c0_8 = arith.constant 0 : index
    %c1 = arith.constant 1 : index
    %c0_9 = arith.constant 0 : index
    %7 = vector.load %arg1[%c0_7, %c0_8, %c1, %c0_9] : memref<1x1x49x64xbf16, #tpu.memory_space<vmem>>, vector<1x1x25x64xbf16>
    %8 = vector.shape_cast %7 : vector<1x1x25x64xbf16> to vector<25x64xbf16>
    %c1_10 = arith.constant 1 : index
    %c0_11 = arith.constant 0 : index
    %c0_12 = arith.constant 0 : index
    %9 = vector.load %arg2[%c1_10, %c0_11, %c0_12] : memref<16x64x128xbf16, #tpu.memory_space<vmem>>, vector<1x64x128xbf16>
    %10 = vector.shape_cast %9 : vector<1x64x128xbf16> to vector<64x128xbf16>
    %cst_13 = arith.constant dense<0.000000e+00> : vector<25x128xf32>
    %11 = tpu.matmul %8, %10, %cst_13 {dimension_numbers = #tpu.dot_dimension_numbers<[1], [0], [0], [1], [0, 0, 1, 1], [], []>} : vector<25x64xbf16>, vector<64x128xbf16>, vector<25x128xf32> -> vector<25x128xf32>
    %12 = arith.addf %6, %11 : vector<25x128xf32>
    %c0_14 = arith.constant 0 : index
    %c0_15 = arith.constant 0 : index
    %c2 = arith.constant 2 : index
    %c0_16 = arith.constant 0 : index
    %13 = vector.load %arg1[%c0_14, %c0_15, %c2, %c0_16] : memref<1x1x49x64xbf16, #tpu.memory_space<vmem>>, vector<1x1x25x64xbf16>
    %14 = vector.shape_cast %13 : vector<1x1x25x64xbf16> to vector<25x64xbf16>
    %c2_17 = arith.constant 2 : index
    %c0_18 = arith.constant 0 : index
    %c0_19 = arith.constant 0 : index
    %15 = vector.load %arg2[%c2_17, %c0_18, %c0_19] : memref<16x64x128xbf16, #tpu.memory_space<vmem>>, vector<1x64x128xbf16>
    %16 = vector.shape_cast %15 : vector<1x64x128xbf16> to vector<64x128xbf16>
    %cst_20 = arith.constant dense<0.000000e+00> : vector<25x128xf32>
    %17 = tpu.matmul %14, %16, %cst_20 {dimension_numbers = #tpu.dot_dimension_numbers<[1], [0], [0], [1], [0, 0, 1, 1], [], []>} : vector<25x64xbf16>, vector<64x128xbf16>, vector<25x128xf32> -> vector<25x128xf32>
    %18 = arith.addf %12, %17 : vector<25x128xf32>
    %c0_21 = arith.constant 0 : index
    %c0_22 = arith.constant 0 : index
    %c3 = arith.constant 3 : index
    %c0_23 = arith.constant 0 : index
    %19 = vector.load %arg1[%c0_21, %c0_22, %c3, %c0_23] : memref<1x1x49x64xbf16, #tpu.memory_space<vmem>>, vector<1x1x25x64xbf16>
    %20 = vector.shape_cast %19 : vector<1x1x25x64xbf16> to vector<25x64xbf16>
    %c3_24 = arith.constant 3 : index
    %c0_25 = arith.constant 0 : index
    %c0_26 = arith.constant 0 : index
    %21 = vector.load %arg2[%c3_24, %c0_25, %c0_26] : memref<16x64x128xbf16, #tpu.memory_space<vmem>>, vector<1x64x128xbf16>
    %22 = vector.shape_cast %21 : vector<1x64x128xbf16> to vector<64x128xbf16>
    %cst_27 = arith.constant dense<0.000000e+00> : vector<25x128xf32>
    %23 = tpu.matmul %20, %22, %cst_27 {dimension_numbers = #tpu.dot_dimension_numbers<[1], [0], [0], [1], [0, 0, 1, 1], [], []>} : vector<25x64xbf16>, vector<64x128xbf16>, vector<25x128xf32> -> vector<25x128xf32>
    %24 = arith.addf %18, %23 : vector<25x128xf32>
    %c0_28 = arith.constant 0 : index
    %c0_29 = arith.constant 0 : index
    %c7 = arith.constant 7 : index
    %c0_30 = arith.constant 0 : index
    %25 = vector.load %arg1[%c0_28, %c0_29, %c7, %c0_30] : memref<1x1x49x64xbf16, #tpu.memory_space<vmem>>, vector<1x1x25x64xbf16>
    %26 = vector.shape_cast %25 : vector<1x1x25x64xbf16> to vector<25x64xbf16>
    %c4 = arith.constant 4 : index
    %c0_31 = arith.constant 0 : index
    %c0_32 = arith.constant 0 : index
    %27 = vector.load %arg2[%c4, %c0_31, %c0_32] : memref<16x64x128xbf16, #tpu.memory_space<vmem>>, vector<1x64x128xbf16>
    %28 = vector.shape_cast %27 : vector<1x64x128xbf16> to vector<64x128xbf16>
    %cst_33 = arith.constant dense<0.000000e+00> : vector<25x128xf32>
    %29 = tpu.matmul %26, %28, %cst_33 {dimension_numbers = #tpu.dot_dimension_numbers<[1], [0], [0], [1], [0, 0, 1, 1], [], []>} : vector<25x64xbf16>, vector<64x128xbf16>, vector<25x128xf32> -> vector<25x128xf32>
    %30 = arith.addf %24, %29 : vector<25x128xf32>
    %c0_34 = arith.constant 0 : index
    %c0_35 = arith.constant 0 : index
    %c8 = arith.constant 8 : index
    %c0_36 = arith.constant 0 : index
    %31 = vector.load %arg1[%c0_34, %c0_35, %c8, %c0_36] : memref<1x1x49x64xbf16, #tpu.memory_space<vmem>>, vector<1x1x25x64xbf16>
    %32 = vector.shape_cast %31 : vector<1x1x25x64xbf16> to vector<25x64xbf16>
    %c5 = arith.constant 5 : index
    %c0_37 = arith.constant 0 : index
    %c0_38 = arith.constant 0 : index
    %33 = vector.load %arg2[%c5, %c0_37, %c0_38] : memref<16x64x128xbf16, #tpu.memory_space<vmem>>, vector<1x64x128xbf16>
    %34 = vector.shape_cast %33 : vector<1x64x128xbf16> to vector<64x128xbf16>
    %cst_39 = arith.constant dense<0.000000e+00> : vector<25x128xf32>
    %35 = tpu.matmul %32, %34, %cst_39 {dimension_numbers = #tpu.dot_dimension_numbers<[1], [0], [0], [1], [0, 0, 1, 1], [], []>} : vector<25x64xbf16>, vector<64x128xbf16>, vector<25x128xf32> -> vector<25x128xf32>
    %36 = arith.addf %30, %35 : vector<25x128xf32>
    %c0_40 = arith.constant 0 : index
    %c0_41 = arith.constant 0 : index
    %c9 = arith.constant 9 : index
    %c0_42 = arith.constant 0 : index
    %37 = vector.load %arg1[%c0_40, %c0_41, %c9, %c0_42] : memref<1x1x49x64xbf16, #tpu.memory_space<vmem>>, vector<1x1x25x64xbf16>
    %38 = vector.shape_cast %37 : vector<1x1x25x64xbf16> to vector<25x64xbf16>
    %c6 = arith.constant 6 : index
    %c0_43 = arith.constant 0 : index
    %c0_44 = arith.constant 0 : index
    %39 = vector.load %arg2[%c6, %c0_43, %c0_44] : memref<16x64x128xbf16, #tpu.memory_space<vmem>>, vector<1x64x128xbf16>
    %40 = vector.shape_cast %39 : vector<1x64x128xbf16> to vector<64x128xbf16>
    %cst_45 = arith.constant dense<0.000000e+00> : vector<25x128xf32>
    %41 = tpu.matmul %38, %40, %cst_45 {dimension_numbers = #tpu.dot_dimension_numbers<[1], [0], [0], [1], [0, 0, 1, 1], [], []>} : vector<25x64xbf16>, vector<64x128xbf16>, vector<25x128xf32> -> vector<25x128xf32>
    %42 = arith.addf %36, %41 : vector<25x128xf32>
    %c0_46 = arith.constant 0 : index
    %c0_47 = arith.constant 0 : index
    %c10 = arith.constant 10 : index
    %c0_48 = arith.constant 0 : index
    %43 = vector.load %arg1[%c0_46, %c0_47, %c10, %c0_48] : memref<1x1x49x64xbf16, #tpu.memory_space<vmem>>, vector<1x1x25x64xbf16>
    %44 = vector.shape_cast %43 : vector<1x1x25x64xbf16> to vector<25x64xbf16>
    %c7_49 = arith.constant 7 : index
    %c0_50 = arith.constant 0 : index
    %c0_51 = arith.constant 0 : index
    %45 = vector.load %arg2[%c7_49, %c0_50, %c0_51] : memref<16x64x128xbf16, #tpu.memory_space<vmem>>, vector<1x64x128xbf16>
    %46 = vector.shape_cast %45 : vector<1x64x128xbf16> to vector<64x128xbf16>
    %cst_52 = arith.constant dense<0.000000e+00> : vector<25x128xf32>
    %47 = tpu.matmul %44, %46, %cst_52 {dimension_numbers = #tpu.dot_dimension_numbers<[1], [0], [0], [1], [0, 0, 1, 1], [], []>} : vector<25x64xbf16>, vector<64x128xbf16>, vector<25x128xf32> -> vector<25x128xf32>
    %48 = arith.addf %42, %47 : vector<25x128xf32>
    %c0_53 = arith.constant 0 : index
    %c0_54 = arith.constant 0 : index
    %c14 = arith.constant 14 : index
    %c0_55 = arith.constant 0 : index
    %49 = vector.load %arg1[%c0_53, %c0_54, %c14, %c0_55] : memref<1x1x49x64xbf16, #tpu.memory_space<vmem>>, vector<1x1x25x64xbf16>
    %50 = vector.shape_cast %49 : vector<1x1x25x64xbf16> to vector<25x64xbf16>
    %c8_56 = arith.constant 8 : index
    %c0_57 = arith.constant 0 : index
    %c0_58 = arith.constant 0 : index
    %51 = vector.load %arg2[%c8_56, %c0_57, %c0_58] : memref<16x64x128xbf16, #tpu.memory_space<vmem>>, vector<1x64x128xbf16>
    %52 = vector.shape_cast %51 : vector<1x64x128xbf16> to vector<64x128xbf16>
    %cst_59 = arith.constant dense<0.000000e+00> : vector<25x128xf32>
    %53 = tpu.matmul %50, %52, %cst_59 {dimension_numbers = #tpu.dot_dimension_numbers<[1], [0], [0], [1], [0, 0, 1, 1], [], []>} : vector<25x64xbf16>, vector<64x128xbf16>, vector<25x128xf32> -> vector<25x128xf32>
    %54 = arith.addf %48, %53 : vector<25x128xf32>
    %c0_60 = arith.constant 0 : index
    %c0_61 = arith.constant 0 : index
    %c15 = arith.constant 15 : index
    %c0_62 = arith.constant 0 : index
    %55 = vector.load %arg1[%c0_60, %c0_61, %c15, %c0_62] : memref<1x1x49x64xbf16, #tpu.memory_space<vmem>>, vector<1x1x25x64xbf16>
    %56 = vector.shape_cast %55 : vector<1x1x25x64xbf16> to vector<25x64xbf16>
    %c9_63 = arith.constant 9 : index
    %c0_64 = arith.constant 0 : index
    %c0_65 = arith.constant 0 : index
    %57 = vector.load %arg2[%c9_63, %c0_64, %c0_65] : memref<16x64x128xbf16, #tpu.memory_space<vmem>>, vector<1x64x128xbf16>
    %58 = vector.shape_cast %57 : vector<1x64x128xbf16> to vector<64x128xbf16>
    %cst_66 = arith.constant dense<0.000000e+00> : vector<25x128xf32>
    %59 = tpu.matmul %56, %58, %cst_66 {dimension_numbers = #tpu.dot_dimension_numbers<[1], [0], [0], [1], [0, 0, 1, 1], [], []>} : vector<25x64xbf16>, vector<64x128xbf16>, vector<25x128xf32> -> vector<25x128xf32>
    %60 = arith.addf %54, %59 : vector<25x128xf32>
    %c0_67 = arith.constant 0 : index
    %c0_68 = arith.constant 0 : index
    %c16 = arith.constant 16 : index
    %c0_69 = arith.constant 0 : index
    %61 = vector.load %arg1[%c0_67, %c0_68, %c16, %c0_69] : memref<1x1x49x64xbf16, #tpu.memory_space<vmem>>, vector<1x1x25x64xbf16>
    %62 = vector.shape_cast %61 : vector<1x1x25x64xbf16> to vector<25x64xbf16>
    %c10_70 = arith.constant 10 : index
    %c0_71 = arith.constant 0 : index
    %c0_72 = arith.constant 0 : index
    %63 = vector.load %arg2[%c10_70, %c0_71, %c0_72] : memref<16x64x128xbf16, #tpu.memory_space<vmem>>, vector<1x64x128xbf16>
    %64 = vector.shape_cast %63 : vector<1x64x128xbf16> to vector<64x128xbf16>
    %cst_73 = arith.constant dense<0.000000e+00> : vector<25x128xf32>
    %65 = tpu.matmul %62, %64, %cst_73 {dimension_numbers = #tpu.dot_dimension_numbers<[1], [0], [0], [1], [0, 0, 1, 1], [], []>} : vector<25x64xbf16>, vector<64x128xbf16>, vector<25x128xf32> -> vector<25x128xf32>
    %66 = arith.addf %60, %65 : vector<25x128xf32>
    %c0_74 = arith.constant 0 : index
    %c0_75 = arith.constant 0 : index
    %c17 = arith.constant 17 : index
    %c0_76 = arith.constant 0 : index
    %67 = vector.load %arg1[%c0_74, %c0_75, %c17, %c0_76] : memref<1x1x49x64xbf16, #tpu.memory_space<vmem>>, vector<1x1x25x64xbf16>
    %68 = vector.shape_cast %67 : vector<1x1x25x64xbf16> to vector<25x64xbf16>
    %c11 = arith.constant 11 : index
    %c0_77 = arith.constant 0 : index
    %c0_78 = arith.constant 0 : index
    %69 = vector.load %arg2[%c11, %c0_77, %c0_78] : memref<16x64x128xbf16, #tpu.memory_space<vmem>>, vector<1x64x128xbf16>
    %70 = vector.shape_cast %69 : vector<1x64x128xbf16> to vector<64x128xbf16>
    %cst_79 = arith.constant dense<0.000000e+00> : vector<25x128xf32>
    %71 = tpu.matmul %68, %70, %cst_79 {dimension_numbers = #tpu.dot_dimension_numbers<[1], [0], [0], [1], [0, 0, 1, 1], [], []>} : vector<25x64xbf16>, vector<64x128xbf16>, vector<25x128xf32> -> vector<25x128xf32>
    %72 = arith.addf %66, %71 : vector<25x128xf32>
    %c0_80 = arith.constant 0 : index
    %c0_81 = arith.constant 0 : index
    %c21 = arith.constant 21 : index
    %c0_82 = arith.constant 0 : index
    %73 = vector.load %arg1[%c0_80, %c0_81, %c21, %c0_82] : memref<1x1x49x64xbf16, #tpu.memory_space<vmem>>, vector<1x1x25x64xbf16>
    %74 = vector.shape_cast %73 : vector<1x1x25x64xbf16> to vector<25x64xbf16>
    %c12 = arith.constant 12 : index
    %c0_83 = arith.constant 0 : index
    %c0_84 = arith.constant 0 : index
    %75 = vector.load %arg2[%c12, %c0_83, %c0_84] : memref<16x64x128xbf16, #tpu.memory_space<vmem>>, vector<1x64x128xbf16>
    %76 = vector.shape_cast %75 : vector<1x64x128xbf16> to vector<64x128xbf16>
    %cst_85 = arith.constant dense<0.000000e+00> : vector<25x128xf32>
    %77 = tpu.matmul %74, %76, %cst_85 {dimension_numbers = #tpu.dot_dimension_numbers<[1], [0], [0], [1], [0, 0, 1, 1], [], []>} : vector<25x64xbf16>, vector<64x128xbf16>, vector<25x128xf32> -> vector<25x128xf32>
    %78 = arith.addf %72, %77 : vector<25x128xf32>
    %c0_86 = arith.constant 0 : index
    %c0_87 = arith.constant 0 : index
    %c22 = arith.constant 22 : index
    %c0_88 = arith.constant 0 : index
    %79 = vector.load %arg1[%c0_86, %c0_87, %c22, %c0_88] : memref<1x1x49x64xbf16, #tpu.memory_space<vmem>>, vector<1x1x25x64xbf16>
    %80 = vector.shape_cast %79 : vector<1x1x25x64xbf16> to vector<25x64xbf16>
    %c13 = arith.constant 13 : index
    %c0_89 = arith.constant 0 : index
    %c0_90 = arith.constant 0 : index
    %81 = vector.load %arg2[%c13, %c0_89, %c0_90] : memref<16x64x128xbf16, #tpu.memory_space<vmem>>, vector<1x64x128xbf16>
    %82 = vector.shape_cast %81 : vector<1x64x128xbf16> to vector<64x128xbf16>
    %cst_91 = arith.constant dense<0.000000e+00> : vector<25x128xf32>
    %83 = tpu.matmul %80, %82, %cst_91 {dimension_numbers = #tpu.dot_dimension_numbers<[1], [0], [0], [1], [0, 0, 1, 1], [], []>} : vector<25x64xbf16>, vector<64x128xbf16>, vector<25x128xf32> -> vector<25x128xf32>
    %84 = arith.addf %78, %83 : vector<25x128xf32>
    %c0_92 = arith.constant 0 : index
    %c0_93 = arith.constant 0 : index
    %c23 = arith.constant 23 : index
    %c0_94 = arith.constant 0 : index
    %85 = vector.load %arg1[%c0_92, %c0_93, %c23, %c0_94] : memref<1x1x49x64xbf16, #tpu.memory_space<vmem>>, vector<1x1x25x64xbf16>
    %86 = vector.shape_cast %85 : vector<1x1x25x64xbf16> to vector<25x64xbf16>
    %c14_95 = arith.constant 14 : index
    %c0_96 = arith.constant 0 : index
    %c0_97 = arith.constant 0 : index
    %87 = vector.load %arg2[%c14_95, %c0_96, %c0_97] : memref<16x64x128xbf16, #tpu.memory_space<vmem>>, vector<1x64x128xbf16>
    %88 = vector.shape_cast %87 : vector<1x64x128xbf16> to vector<64x128xbf16>
    %cst_98 = arith.constant dense<0.000000e+00> : vector<25x128xf32>
    %89 = tpu.matmul %86, %88, %cst_98 {dimension_numbers = #tpu.dot_dimension_numbers<[1], [0], [0], [1], [0, 0, 1, 1], [], []>} : vector<25x64xbf16>, vector<64x128xbf16>, vector<25x128xf32> -> vector<25x128xf32>
    %90 = arith.addf %84, %89 : vector<25x128xf32>
    %c0_99 = arith.constant 0 : index
    %c0_100 = arith.constant 0 : index
    %c24 = arith.constant 24 : index
    %c0_101 = arith.constant 0 : index
    %91 = vector.load %arg1[%c0_99, %c0_100, %c24, %c0_101] : memref<1x1x49x64xbf16, #tpu.memory_space<vmem>>, vector<1x1x25x64xbf16>
    %92 = vector.shape_cast %91 : vector<1x1x25x64xbf16> to vector<25x64xbf16>
    %c15_102 = arith.constant 15 : index
    %c0_103 = arith.constant 0 : index
    %c0_104 = arith.constant 0 : index
    %93 = vector.load %arg2[%c15_102, %c0_103, %c0_104] : memref<16x64x128xbf16, #tpu.memory_space<vmem>>, vector<1x64x128xbf16>
    %94 = vector.shape_cast %93 : vector<1x64x128xbf16> to vector<64x128xbf16>
    %cst_105 = arith.constant dense<0.000000e+00> : vector<25x128xf32>
    %95 = tpu.matmul %92, %94, %cst_105 {dimension_numbers = #tpu.dot_dimension_numbers<[1], [0], [0], [1], [0, 0, 1, 1], [], []>} : vector<25x64xbf16>, vector<64x128xbf16>, vector<25x128xf32> -> vector<25x128xf32>
    %96 = arith.addf %90, %95 : vector<25x128xf32>
    %97 = arith.truncf %96 : vector<25x128xf32> to vector<25x128xbf16>
    %c0_106 = arith.constant 0 : index
    %c0_107 = arith.constant 0 : index
    %c0_108 = arith.constant 0 : index
    %98 = vector.load %arg4[%c0_106, %c0_107, %c0_108] : memref<1x25x128xbf16, #tpu.memory_space<vmem>>, vector<1x25x128xbf16>
    %99 = vector.shape_cast %98 : vector<1x25x128xbf16> to vector<25x128xbf16>
    %100 = vector.shape_cast %97 : vector<25x128xbf16> to vector<1x25x128xbf16>
    tpu.vector_store %arg4[%c0_106, %c0_107, %c0_108], %100 {strides = array<i32>} : memref<1x25x128xbf16, #tpu.memory_space<vmem>>, vector<1x25x128xbf16>,
    %c0_109 = arith.constant 0 : index
    %c0_110 = arith.constant 0 : index
    %101 = vector.load %arg3[%c0_109, %c0_110] : memref<25x1xf32, #tpu.memory_space<vmem>>, vector<25x1xf32>
    %102 = vector.broadcast %101 : vector<25x1xf32> to vector<25x128xf32>
    %103 = arith.mulf %96, %102 : vector<25x128xf32>
    %cst_111 = arith.constant dense<0.000000e+00> : vector<128xf32>
    %104 = vector.multi_reduction <add>, %103, %cst_111 [0] : vector<25x128xf32> to vector<128xf32>
    %105 = vector.shape_cast %104 : vector<128xf32> to vector<1x128xf32>
    %c0_112 = arith.constant 0 : index
    %c0_113 = arith.constant 0 : index
    %c0_114 = arith.constant 0 : index
    %106 = vector.load %arg5[%c0_112, %c0_113, %c0_114] : memref<1x1x128xf32, #tpu.memory_space<vmem>>, vector<1x1x128xf32>
    %107 = vector.shape_cast %106 : vector<1x1x128xf32> to vector<1x128xf32>
    %108 = vector.shape_cast %105 : vector<1x128xf32> to vector<1x1x128xf32>
    tpu.vector_store %arg5[%c0_112, %c0_113, %c0_114], %108 {strides = array<i32>} : memref<1x1x128xf32, #tpu.memory_space<vmem>>, vector<1x1x128xf32>,
    %109 = arith.mulf %103, %96 : vector<25x128xf32>
    %cst_115 = arith.constant dense<0.000000e+00> : vector<128xf32>
    %110 = vector.multi_reduction <add>, %109, %cst_115 [0] : vector<25x128xf32> to vector<128xf32>
    %111 = vector.shape_cast %110 : vector<128xf32> to vector<1x128xf32>
    %c0_116 = arith.constant 0 : index
    %c0_117 = arith.constant 0 : index
    %c0_118 = arith.constant 0 : index
    %112 = vector.load %arg6[%c0_116, %c0_117, %c0_118] : memref<1x1x128xf32, #tpu.memory_space<vmem>>, vector<1x1x128xf32>
    %113 = vector.shape_cast %112 : vector<1x1x128xf32> to vector<1x128xf32>
    %114 = vector.shape_cast %111 : vector<1x128xf32> to vector<1x1x128xf32>
    tpu.vector_store %arg6[%c0_116, %c0_117, %c0_118], %114 {strides = array<i32>} : memref<1x1x128xf32, #tpu.memory_space<vmem>>, vector<1x1x128xf32>,
    return
  }
  func.func @transform_0(%arg0: i32) -> (i32, i32, i32, i32) {
    %c0_i32 = arith.constant 0 : i32
    %c0_i32_0 = arith.constant 0 : i32
    %c0_i32_1 = arith.constant 0 : i32
    %c0_i32_2 = arith.constant 0 : i32
    return %c0_i32, %arg0, %c0_i32_0, %c0_i32_1 : i32, i32, i32, i32
  }
  func.func @transform_1(%arg0: i32) -> (i32, i32, i32) {
    %c0_i32 = arith.constant 0 : i32
    %c0_i32_0 = arith.constant 0 : i32
    %c0_i32_1 = arith.constant 0 : i32
    %c0_i32_2 = arith.constant 0 : i32
    return %c0_i32, %c0_i32_0, %c0_i32_1 : i32, i32, i32
  }
  func.func @transform_2(%arg0: i32) -> (i32, i32) {
    %c0_i32 = arith.constant 0 : i32
    %c0_i32_0 = arith.constant 0 : i32
    %c0_i32_1 = arith.constant 0 : i32
    return %c0_i32, %c0_i32_0 : i32, i32
  }
  func.func @transform_3(%arg0: i32) -> (i32, i32, i32) {
    %c0_i32 = arith.constant 0 : i32
    %c0_i32_0 = arith.constant 0 : i32
    %c0_i32_1 = arith.constant 0 : i32
    return %arg0, %c0_i32, %c0_i32_0 : i32, i32, i32
  }
  func.func @transform_4(%arg0: i32) -> (i32, i32, i32) {
    %c0_i32 = arith.constant 0 : i32
    %c0_i32_0 = arith.constant 0 : i32
    %c0_i32_1 = arith.constant 0 : i32
    return %arg0, %c0_i32, %c0_i32_0 : i32, i32, i32
  }
  func.func @transform_5(%arg0: i32) -> (i32, i32, i32) {
    %c0_i32 = arith.constant 0 : i32
    %c0_i32_0 = arith.constant 0 : i32
    %c0_i32_1 = arith.constant 0 : i32
    return %arg0, %c0_i32, %c0_i32_0 : i32, i32, i32
  }
}

module attributes {stable_mosaic.version = 11 : i64} {
  func.func @_conv_bias_kernel(%arg0: i32, %arg1: memref<1x1x64x128xbf16, #tpu.memory_space<vmem>>, %arg2: memref<16x128x128xbf16, #tpu.memory_space<vmem>>, %arg3: memref<1x128xf32, #tpu.memory_space<vmem>>, %arg4: memref<1x37x1xf32, #tpu.memory_space<vmem>>) attributes {dimension_semantics = [#tpu.dimension_semantics<parallel>], iteration_bounds = array<i64: 2>, scalar_prefetch = 0 : i64, scratch_operands = 0 : i64, tpu.core_type = #tpu.core_type<tc>, window_params = [{transform_indices = @transform_0, window_bounds = array<i64: 1, 1, 64, 128>}, {pipeline_mode = #tpu.pipeline_mode<synchronous>, transform_indices = @transform_1, window_bounds = array<i64: 16, 128, 128>}, {pipeline_mode = #tpu.pipeline_mode<synchronous>, transform_indices = @transform_2, window_bounds = array<i64: 1, 128>}, {transform_indices = @transform_3, window_bounds = array<i64: 1, 37, 1>}]} {
    %cst = arith.constant 0.000000e+00 : f32
    %0 = vector.broadcast %cst : f32 to vector<37x128xf32>
    %c0 = arith.constant 0 : index
    %c0_0 = arith.constant 0 : index
    %c0_1 = arith.constant 0 : index
    %c0_2 = arith.constant 0 : index
    %1 = vector.load %arg1[%c0, %c0_0, %c0_1, %c0_2] : memref<1x1x64x128xbf16, #tpu.memory_space<vmem>>, vector<1x1x37x128xbf16>
    %2 = vector.shape_cast %1 : vector<1x1x37x128xbf16> to vector<37x128xbf16>
    %c0_3 = arith.constant 0 : index
    %c0_4 = arith.constant 0 : index
    %c0_5 = arith.constant 0 : index
    %3 = vector.load %arg2[%c0_3, %c0_4, %c0_5] : memref<16x128x128xbf16, #tpu.memory_space<vmem>>, vector<1x128x128xbf16>
    %4 = vector.shape_cast %3 : vector<1x128x128xbf16> to vector<128x128xbf16>
    %cst_6 = arith.constant dense<0.000000e+00> : vector<37x128xf32>
    %5 = tpu.matmul %2, %4, %cst_6 {dimension_numbers = #tpu.dot_dimension_numbers<[1], [0], [0], [1], [0, 0, 1, 1], [], []>} : vector<37x128xbf16>, vector<128x128xbf16>, vector<37x128xf32> -> vector<37x128xf32>
    %6 = arith.addf %0, %5 : vector<37x128xf32>
    %c0_7 = arith.constant 0 : index
    %c0_8 = arith.constant 0 : index
    %c1 = arith.constant 1 : index
    %c0_9 = arith.constant 0 : index
    %7 = vector.load %arg1[%c0_7, %c0_8, %c1, %c0_9] : memref<1x1x64x128xbf16, #tpu.memory_space<vmem>>, vector<1x1x37x128xbf16>
    %8 = vector.shape_cast %7 : vector<1x1x37x128xbf16> to vector<37x128xbf16>
    %c1_10 = arith.constant 1 : index
    %c0_11 = arith.constant 0 : index
    %c0_12 = arith.constant 0 : index
    %9 = vector.load %arg2[%c1_10, %c0_11, %c0_12] : memref<16x128x128xbf16, #tpu.memory_space<vmem>>, vector<1x128x128xbf16>
    %10 = vector.shape_cast %9 : vector<1x128x128xbf16> to vector<128x128xbf16>
    %cst_13 = arith.constant dense<0.000000e+00> : vector<37x128xf32>
    %11 = tpu.matmul %8, %10, %cst_13 {dimension_numbers = #tpu.dot_dimension_numbers<[1], [0], [0], [1], [0, 0, 1, 1], [], []>} : vector<37x128xbf16>, vector<128x128xbf16>, vector<37x128xf32> -> vector<37x128xf32>
    %12 = arith.addf %6, %11 : vector<37x128xf32>
    %c0_14 = arith.constant 0 : index
    %c0_15 = arith.constant 0 : index
    %c2 = arith.constant 2 : index
    %c0_16 = arith.constant 0 : index
    %13 = vector.load %arg1[%c0_14, %c0_15, %c2, %c0_16] : memref<1x1x64x128xbf16, #tpu.memory_space<vmem>>, vector<1x1x37x128xbf16>
    %14 = vector.shape_cast %13 : vector<1x1x37x128xbf16> to vector<37x128xbf16>
    %c2_17 = arith.constant 2 : index
    %c0_18 = arith.constant 0 : index
    %c0_19 = arith.constant 0 : index
    %15 = vector.load %arg2[%c2_17, %c0_18, %c0_19] : memref<16x128x128xbf16, #tpu.memory_space<vmem>>, vector<1x128x128xbf16>
    %16 = vector.shape_cast %15 : vector<1x128x128xbf16> to vector<128x128xbf16>
    %cst_20 = arith.constant dense<0.000000e+00> : vector<37x128xf32>
    %17 = tpu.matmul %14, %16, %cst_20 {dimension_numbers = #tpu.dot_dimension_numbers<[1], [0], [0], [1], [0, 0, 1, 1], [], []>} : vector<37x128xbf16>, vector<128x128xbf16>, vector<37x128xf32> -> vector<37x128xf32>
    %18 = arith.addf %12, %17 : vector<37x128xf32>
    %c0_21 = arith.constant 0 : index
    %c0_22 = arith.constant 0 : index
    %c3 = arith.constant 3 : index
    %c0_23 = arith.constant 0 : index
    %19 = vector.load %arg1[%c0_21, %c0_22, %c3, %c0_23] : memref<1x1x64x128xbf16, #tpu.memory_space<vmem>>, vector<1x1x37x128xbf16>
    %20 = vector.shape_cast %19 : vector<1x1x37x128xbf16> to vector<37x128xbf16>
    %c3_24 = arith.constant 3 : index
    %c0_25 = arith.constant 0 : index
    %c0_26 = arith.constant 0 : index
    %21 = vector.load %arg2[%c3_24, %c0_25, %c0_26] : memref<16x128x128xbf16, #tpu.memory_space<vmem>>, vector<1x128x128xbf16>
    %22 = vector.shape_cast %21 : vector<1x128x128xbf16> to vector<128x128xbf16>
    %cst_27 = arith.constant dense<0.000000e+00> : vector<37x128xf32>
    %23 = tpu.matmul %20, %22, %cst_27 {dimension_numbers = #tpu.dot_dimension_numbers<[1], [0], [0], [1], [0, 0, 1, 1], [], []>} : vector<37x128xbf16>, vector<128x128xbf16>, vector<37x128xf32> -> vector<37x128xf32>
    %24 = arith.addf %18, %23 : vector<37x128xf32>
    %c0_28 = arith.constant 0 : index
    %c0_29 = arith.constant 0 : index
    %c8 = arith.constant 8 : index
    %c0_30 = arith.constant 0 : index
    %25 = vector.load %arg1[%c0_28, %c0_29, %c8, %c0_30] : memref<1x1x64x128xbf16, #tpu.memory_space<vmem>>, vector<1x1x37x128xbf16>
    %26 = vector.shape_cast %25 : vector<1x1x37x128xbf16> to vector<37x128xbf16>
    %c4 = arith.constant 4 : index
    %c0_31 = arith.constant 0 : index
    %c0_32 = arith.constant 0 : index
    %27 = vector.load %arg2[%c4, %c0_31, %c0_32] : memref<16x128x128xbf16, #tpu.memory_space<vmem>>, vector<1x128x128xbf16>
    %28 = vector.shape_cast %27 : vector<1x128x128xbf16> to vector<128x128xbf16>
    %cst_33 = arith.constant dense<0.000000e+00> : vector<37x128xf32>
    %29 = tpu.matmul %26, %28, %cst_33 {dimension_numbers = #tpu.dot_dimension_numbers<[1], [0], [0], [1], [0, 0, 1, 1], [], []>} : vector<37x128xbf16>, vector<128x128xbf16>, vector<37x128xf32> -> vector<37x128xf32>
    %30 = arith.addf %24, %29 : vector<37x128xf32>
    %c0_34 = arith.constant 0 : index
    %c0_35 = arith.constant 0 : index
    %c9 = arith.constant 9 : index
    %c0_36 = arith.constant 0 : index
    %31 = vector.load %arg1[%c0_34, %c0_35, %c9, %c0_36] : memref<1x1x64x128xbf16, #tpu.memory_space<vmem>>, vector<1x1x37x128xbf16>
    %32 = vector.shape_cast %31 : vector<1x1x37x128xbf16> to vector<37x128xbf16>
    %c5 = arith.constant 5 : index
    %c0_37 = arith.constant 0 : index
    %c0_38 = arith.constant 0 : index
    %33 = vector.load %arg2[%c5, %c0_37, %c0_38] : memref<16x128x128xbf16, #tpu.memory_space<vmem>>, vector<1x128x128xbf16>
    %34 = vector.shape_cast %33 : vector<1x128x128xbf16> to vector<128x128xbf16>
    %cst_39 = arith.constant dense<0.000000e+00> : vector<37x128xf32>
    %35 = tpu.matmul %32, %34, %cst_39 {dimension_numbers = #tpu.dot_dimension_numbers<[1], [0], [0], [1], [0, 0, 1, 1], [], []>} : vector<37x128xbf16>, vector<128x128xbf16>, vector<37x128xf32> -> vector<37x128xf32>
    %36 = arith.addf %30, %35 : vector<37x128xf32>
    %c0_40 = arith.constant 0 : index
    %c0_41 = arith.constant 0 : index
    %c10 = arith.constant 10 : index
    %c0_42 = arith.constant 0 : index
    %37 = vector.load %arg1[%c0_40, %c0_41, %c10, %c0_42] : memref<1x1x64x128xbf16, #tpu.memory_space<vmem>>, vector<1x1x37x128xbf16>
    %38 = vector.shape_cast %37 : vector<1x1x37x128xbf16> to vector<37x128xbf16>
    %c6 = arith.constant 6 : index
    %c0_43 = arith.constant 0 : index
    %c0_44 = arith.constant 0 : index
    %39 = vector.load %arg2[%c6, %c0_43, %c0_44] : memref<16x128x128xbf16, #tpu.memory_space<vmem>>, vector<1x128x128xbf16>
    %40 = vector.shape_cast %39 : vector<1x128x128xbf16> to vector<128x128xbf16>
    %cst_45 = arith.constant dense<0.000000e+00> : vector<37x128xf32>
    %41 = tpu.matmul %38, %40, %cst_45 {dimension_numbers = #tpu.dot_dimension_numbers<[1], [0], [0], [1], [0, 0, 1, 1], [], []>} : vector<37x128xbf16>, vector<128x128xbf16>, vector<37x128xf32> -> vector<37x128xf32>
    %42 = arith.addf %36, %41 : vector<37x128xf32>
    %c0_46 = arith.constant 0 : index
    %c0_47 = arith.constant 0 : index
    %c11 = arith.constant 11 : index
    %c0_48 = arith.constant 0 : index
    %43 = vector.load %arg1[%c0_46, %c0_47, %c11, %c0_48] : memref<1x1x64x128xbf16, #tpu.memory_space<vmem>>, vector<1x1x37x128xbf16>
    %44 = vector.shape_cast %43 : vector<1x1x37x128xbf16> to vector<37x128xbf16>
    %c7 = arith.constant 7 : index
    %c0_49 = arith.constant 0 : index
    %c0_50 = arith.constant 0 : index
    %45 = vector.load %arg2[%c7, %c0_49, %c0_50] : memref<16x128x128xbf16, #tpu.memory_space<vmem>>, vector<1x128x128xbf16>
    %46 = vector.shape_cast %45 : vector<1x128x128xbf16> to vector<128x128xbf16>
    %cst_51 = arith.constant dense<0.000000e+00> : vector<37x128xf32>
    %47 = tpu.matmul %44, %46, %cst_51 {dimension_numbers = #tpu.dot_dimension_numbers<[1], [0], [0], [1], [0, 0, 1, 1], [], []>} : vector<37x128xbf16>, vector<128x128xbf16>, vector<37x128xf32> -> vector<37x128xf32>
    %48 = arith.addf %42, %47 : vector<37x128xf32>
    %c0_52 = arith.constant 0 : index
    %c0_53 = arith.constant 0 : index
    %c16 = arith.constant 16 : index
    %c0_54 = arith.constant 0 : index
    %49 = vector.load %arg1[%c0_52, %c0_53, %c16, %c0_54] : memref<1x1x64x128xbf16, #tpu.memory_space<vmem>>, vector<1x1x37x128xbf16>
    %50 = vector.shape_cast %49 : vector<1x1x37x128xbf16> to vector<37x128xbf16>
    %c8_55 = arith.constant 8 : index
    %c0_56 = arith.constant 0 : index
    %c0_57 = arith.constant 0 : index
    %51 = vector.load %arg2[%c8_55, %c0_56, %c0_57] : memref<16x128x128xbf16, #tpu.memory_space<vmem>>, vector<1x128x128xbf16>
    %52 = vector.shape_cast %51 : vector<1x128x128xbf16> to vector<128x128xbf16>
    %cst_58 = arith.constant dense<0.000000e+00> : vector<37x128xf32>
    %53 = tpu.matmul %50, %52, %cst_58 {dimension_numbers = #tpu.dot_dimension_numbers<[1], [0], [0], [1], [0, 0, 1, 1], [], []>} : vector<37x128xbf16>, vector<128x128xbf16>, vector<37x128xf32> -> vector<37x128xf32>
    %54 = arith.addf %48, %53 : vector<37x128xf32>
    %c0_59 = arith.constant 0 : index
    %c0_60 = arith.constant 0 : index
    %c17 = arith.constant 17 : index
    %c0_61 = arith.constant 0 : index
    %55 = vector.load %arg1[%c0_59, %c0_60, %c17, %c0_61] : memref<1x1x64x128xbf16, #tpu.memory_space<vmem>>, vector<1x1x37x128xbf16>
    %56 = vector.shape_cast %55 : vector<1x1x37x128xbf16> to vector<37x128xbf16>
    %c9_62 = arith.constant 9 : index
    %c0_63 = arith.constant 0 : index
    %c0_64 = arith.constant 0 : index
    %57 = vector.load %arg2[%c9_62, %c0_63, %c0_64] : memref<16x128x128xbf16, #tpu.memory_space<vmem>>, vector<1x128x128xbf16>
    %58 = vector.shape_cast %57 : vector<1x128x128xbf16> to vector<128x128xbf16>
    %cst_65 = arith.constant dense<0.000000e+00> : vector<37x128xf32>
    %59 = tpu.matmul %56, %58, %cst_65 {dimension_numbers = #tpu.dot_dimension_numbers<[1], [0], [0], [1], [0, 0, 1, 1], [], []>} : vector<37x128xbf16>, vector<128x128xbf16>, vector<37x128xf32> -> vector<37x128xf32>
    %60 = arith.addf %54, %59 : vector<37x128xf32>
    %c0_66 = arith.constant 0 : index
    %c0_67 = arith.constant 0 : index
    %c18 = arith.constant 18 : index
    %c0_68 = arith.constant 0 : index
    %61 = vector.load %arg1[%c0_66, %c0_67, %c18, %c0_68] : memref<1x1x64x128xbf16, #tpu.memory_space<vmem>>, vector<1x1x37x128xbf16>
    %62 = vector.shape_cast %61 : vector<1x1x37x128xbf16> to vector<37x128xbf16>
    %c10_69 = arith.constant 10 : index
    %c0_70 = arith.constant 0 : index
    %c0_71 = arith.constant 0 : index
    %63 = vector.load %arg2[%c10_69, %c0_70, %c0_71] : memref<16x128x128xbf16, #tpu.memory_space<vmem>>, vector<1x128x128xbf16>
    %64 = vector.shape_cast %63 : vector<1x128x128xbf16> to vector<128x128xbf16>
    %cst_72 = arith.constant dense<0.000000e+00> : vector<37x128xf32>
    %65 = tpu.matmul %62, %64, %cst_72 {dimension_numbers = #tpu.dot_dimension_numbers<[1], [0], [0], [1], [0, 0, 1, 1], [], []>} : vector<37x128xbf16>, vector<128x128xbf16>, vector<37x128xf32> -> vector<37x128xf32>
    %66 = arith.addf %60, %65 : vector<37x128xf32>
    %c0_73 = arith.constant 0 : index
    %c0_74 = arith.constant 0 : index
    %c19 = arith.constant 19 : index
    %c0_75 = arith.constant 0 : index
    %67 = vector.load %arg1[%c0_73, %c0_74, %c19, %c0_75] : memref<1x1x64x128xbf16, #tpu.memory_space<vmem>>, vector<1x1x37x128xbf16>
    %68 = vector.shape_cast %67 : vector<1x1x37x128xbf16> to vector<37x128xbf16>
    %c11_76 = arith.constant 11 : index
    %c0_77 = arith.constant 0 : index
    %c0_78 = arith.constant 0 : index
    %69 = vector.load %arg2[%c11_76, %c0_77, %c0_78] : memref<16x128x128xbf16, #tpu.memory_space<vmem>>, vector<1x128x128xbf16>
    %70 = vector.shape_cast %69 : vector<1x128x128xbf16> to vector<128x128xbf16>
    %cst_79 = arith.constant dense<0.000000e+00> : vector<37x128xf32>
    %71 = tpu.matmul %68, %70, %cst_79 {dimension_numbers = #tpu.dot_dimension_numbers<[1], [0], [0], [1], [0, 0, 1, 1], [], []>} : vector<37x128xbf16>, vector<128x128xbf16>, vector<37x128xf32> -> vector<37x128xf32>
    %72 = arith.addf %66, %71 : vector<37x128xf32>
    %c0_80 = arith.constant 0 : index
    %c0_81 = arith.constant 0 : index
    %c24 = arith.constant 24 : index
    %c0_82 = arith.constant 0 : index
    %73 = vector.load %arg1[%c0_80, %c0_81, %c24, %c0_82] : memref<1x1x64x128xbf16, #tpu.memory_space<vmem>>, vector<1x1x37x128xbf16>
    %74 = vector.shape_cast %73 : vector<1x1x37x128xbf16> to vector<37x128xbf16>
    %c12 = arith.constant 12 : index
    %c0_83 = arith.constant 0 : index
    %c0_84 = arith.constant 0 : index
    %75 = vector.load %arg2[%c12, %c0_83, %c0_84] : memref<16x128x128xbf16, #tpu.memory_space<vmem>>, vector<1x128x128xbf16>
    %76 = vector.shape_cast %75 : vector<1x128x128xbf16> to vector<128x128xbf16>
    %cst_85 = arith.constant dense<0.000000e+00> : vector<37x128xf32>
    %77 = tpu.matmul %74, %76, %cst_85 {dimension_numbers = #tpu.dot_dimension_numbers<[1], [0], [0], [1], [0, 0, 1, 1], [], []>} : vector<37x128xbf16>, vector<128x128xbf16>, vector<37x128xf32> -> vector<37x128xf32>
    %78 = arith.addf %72, %77 : vector<37x128xf32>
    %c0_86 = arith.constant 0 : index
    %c0_87 = arith.constant 0 : index
    %c25 = arith.constant 25 : index
    %c0_88 = arith.constant 0 : index
    %79 = vector.load %arg1[%c0_86, %c0_87, %c25, %c0_88] : memref<1x1x64x128xbf16, #tpu.memory_space<vmem>>, vector<1x1x37x128xbf16>
    %80 = vector.shape_cast %79 : vector<1x1x37x128xbf16> to vector<37x128xbf16>
    %c13 = arith.constant 13 : index
    %c0_89 = arith.constant 0 : index
    %c0_90 = arith.constant 0 : index
    %81 = vector.load %arg2[%c13, %c0_89, %c0_90] : memref<16x128x128xbf16, #tpu.memory_space<vmem>>, vector<1x128x128xbf16>
    %82 = vector.shape_cast %81 : vector<1x128x128xbf16> to vector<128x128xbf16>
    %cst_91 = arith.constant dense<0.000000e+00> : vector<37x128xf32>
    %83 = tpu.matmul %80, %82, %cst_91 {dimension_numbers = #tpu.dot_dimension_numbers<[1], [0], [0], [1], [0, 0, 1, 1], [], []>} : vector<37x128xbf16>, vector<128x128xbf16>, vector<37x128xf32> -> vector<37x128xf32>
    %84 = arith.addf %78, %83 : vector<37x128xf32>
    %c0_92 = arith.constant 0 : index
    %c0_93 = arith.constant 0 : index
    %c26 = arith.constant 26 : index
    %c0_94 = arith.constant 0 : index
    %85 = vector.load %arg1[%c0_92, %c0_93, %c26, %c0_94] : memref<1x1x64x128xbf16, #tpu.memory_space<vmem>>, vector<1x1x37x128xbf16>
    %86 = vector.shape_cast %85 : vector<1x1x37x128xbf16> to vector<37x128xbf16>
    %c14 = arith.constant 14 : index
    %c0_95 = arith.constant 0 : index
    %c0_96 = arith.constant 0 : index
    %87 = vector.load %arg2[%c14, %c0_95, %c0_96] : memref<16x128x128xbf16, #tpu.memory_space<vmem>>, vector<1x128x128xbf16>
    %88 = vector.shape_cast %87 : vector<1x128x128xbf16> to vector<128x128xbf16>
    %cst_97 = arith.constant dense<0.000000e+00> : vector<37x128xf32>
    %89 = tpu.matmul %86, %88, %cst_97 {dimension_numbers = #tpu.dot_dimension_numbers<[1], [0], [0], [1], [0, 0, 1, 1], [], []>} : vector<37x128xbf16>, vector<128x128xbf16>, vector<37x128xf32> -> vector<37x128xf32>
    %90 = arith.addf %84, %89 : vector<37x128xf32>
    %c0_98 = arith.constant 0 : index
    %c0_99 = arith.constant 0 : index
    %c27 = arith.constant 27 : index
    %c0_100 = arith.constant 0 : index
    %91 = vector.load %arg1[%c0_98, %c0_99, %c27, %c0_100] : memref<1x1x64x128xbf16, #tpu.memory_space<vmem>>, vector<1x1x37x128xbf16>
    %92 = vector.shape_cast %91 : vector<1x1x37x128xbf16> to vector<37x128xbf16>
    %c15 = arith.constant 15 : index
    %c0_101 = arith.constant 0 : index
    %c0_102 = arith.constant 0 : index
    %93 = vector.load %arg2[%c15, %c0_101, %c0_102] : memref<16x128x128xbf16, #tpu.memory_space<vmem>>, vector<1x128x128xbf16>
    %94 = vector.shape_cast %93 : vector<1x128x128xbf16> to vector<128x128xbf16>
    %cst_103 = arith.constant dense<0.000000e+00> : vector<37x128xf32>
    %95 = tpu.matmul %92, %94, %cst_103 {dimension_numbers = #tpu.dot_dimension_numbers<[1], [0], [0], [1], [0, 0, 1, 1], [], []>} : vector<37x128xbf16>, vector<128x128xbf16>, vector<37x128xf32> -> vector<37x128xf32>
    %96 = arith.addf %90, %95 : vector<37x128xf32>
    %c0_104 = arith.constant 0 : index
    %c0_105 = arith.constant 0 : index
    %97 = vector.load %arg3[%c0_104, %c0_105] : memref<1x128xf32, #tpu.memory_space<vmem>>, vector<1x128xf32>
    %98 = vector.broadcast %97 : vector<1x128xf32> to vector<37x128xf32>
    %99 = arith.addf %96, %98 : vector<37x128xf32>
    %100 = vector.extract_strided_slice %99 {offsets = [0, 0], sizes = [37, 1], strides = [1, 1]} : vector<37x128xf32> to vector<37x1xf32>
    %c0_106 = arith.constant 0 : index
    %c0_107 = arith.constant 0 : index
    %c0_108 = arith.constant 0 : index
    %101 = vector.load %arg4[%c0_106, %c0_107, %c0_108] : memref<1x37x1xf32, #tpu.memory_space<vmem>>, vector<1x37x1xf32>
    %102 = vector.shape_cast %101 : vector<1x37x1xf32> to vector<37x1xf32>
    %103 = vector.shape_cast %100 : vector<37x1xf32> to vector<1x37x1xf32>
    tpu.vector_store %arg4[%c0_106, %c0_107, %c0_108], %103 {strides = array<i32>} : memref<1x37x1xf32, #tpu.memory_space<vmem>>, vector<1x37x1xf32>,
    return
  }
  func.func @transform_0(%arg0: i32) -> (i32, i32, i32, i32) {
    %c0_i32 = arith.constant 0 : i32
    %c0_i32_0 = arith.constant 0 : i32
    %c0_i32_1 = arith.constant 0 : i32
    %c0_i32_2 = arith.constant 0 : i32
    return %c0_i32, %arg0, %c0_i32_0, %c0_i32_1 : i32, i32, i32, i32
  }
  func.func @transform_1(%arg0: i32) -> (i32, i32, i32) {
    %c0_i32 = arith.constant 0 : i32
    %c0_i32_0 = arith.constant 0 : i32
    %c0_i32_1 = arith.constant 0 : i32
    %c0_i32_2 = arith.constant 0 : i32
    return %c0_i32, %c0_i32_0, %c0_i32_1 : i32, i32, i32
  }
  func.func @transform_2(%arg0: i32) -> (i32, i32) {
    %c0_i32 = arith.constant 0 : i32
    %c0_i32_0 = arith.constant 0 : i32
    %c0_i32_1 = arith.constant 0 : i32
    return %c0_i32, %c0_i32_0 : i32, i32
  }
  func.func @transform_3(%arg0: i32) -> (i32, i32, i32) {
    %c0_i32 = arith.constant 0 : i32
    %c0_i32_0 = arith.constant 0 : i32
    %c0_i32_1 = arith.constant 0 : i32
    return %arg0, %c0_i32, %c0_i32_0 : i32, i32, i32
  }
}

</mosaic_0001>

<bundles_post_ra>
// kernel: nlayer_discriminator_forward.6
= control target key start
LH: loop header
LB: loop body
LE: loop exit
PB: predicated region body
PF: predicated region fallthrough
CT: control target
= control target key end

     0   :  { %s1806_s18 = smov 0   ;;  %s1808_s19 = smov 0   ;;  %s2039_s0 = inlined_call_operand.vmem [shape: bf16[4,2,36,16], index: 0, kind: input, shape index: {}]   ;;  %s2040_s1 = inlined_call_operand.vmem [shape: bf16[16,16,32], index: 1, kind: input, shape index: {}]   ;;  %s2041_s2 = inlined_call_operand.vmem [shape: f32[29,1], index: 2, kind: input, shape index: {}]   ;;  %s2042_s3 = inlined_call_operand.vmem [shape: bf16[2,29,32], index: 3, kind: output, shape index: {0}]   ;;  %s2043_s4 = inlined_call_operand.vmem [shape: f32[2,1,32], index: 4, kind: output, shape index: {1}]   ;;  %s2044_s5 = inlined_call_operand.vmem [shape: f32[2,1,32], index: 5, kind: output, shape index: {2}]  }
   0x1   :  { %s1810_s20 = smov 0  }
   0x2 LB: > { %s1461_s21 = sadd.s32 4294967295, %s1773_s20   ;;  %s1823_s22 = sadd.s32 1, %s1773_s20   ;;  %s1773_s20 = sphi %s1810_s20, %s2047_s20   ;;  %s1769_s19 = sphi %s1808_s19, %s2046_s19   ;;  %s1765_s18 = sphi %s1806_s18, %s2045_s18  }
   0x3   : > { %s20_s23 = ssub.s32 %s1773_s20, %s1823_s22  ;;  %s23_s24 = sadd.s32 1, %s1769_s19 }
   0x4   : > { %p21_p0 = scmp.eq.s32.totalorder %s20_s23, 0  ;;  %p30_p1 = scmp.ne.s32.totalorder %s1769_s19, %s1765_s18 }
   0x5   : > { %p31_p2 = scmp.eq.s32.totalorder %s1773_s20, 0  ;;  %p1464_p4 = scmp.ge.s32.totalorder %s1773_s20, 2 }
   0x6   : > { %s1832_s25 = scalar_select %p21_p0, %s1769_s19, %s23_s24  }
   0x7   : > { %p32_p3 = por %p31_p2, %p30_p1  ;;  %182 = sbr.rel (%p1464_p4) target bundleno = 29 (0x1d), region = 24 }
   0xc   : > { %185 = sbr.rel (!%p32_p3) target bundleno = 29 (0x1d), region = 28  ;;  %s187_s26 = sand.u32 (%p32_p3), 1, %s1769_s19  }
   0xd   : > { %s1722_s27 = smul.u32 (%p32_p3), 20, %s1773_s20 }
   0xe   : > { %s1721_s28 = smul.u32 (%p32_p3), 80, %s187_s26 }
   0xf   : > { %s192_s6 = scalar_lea.vmem (%p32_p3), %s2039_s0, %s1722_s27 }
  0x10   : > { %v209_v0 = vld [vmem:[%s192_s6] sm:$0xff] (%p32_p3)   ;;  %v213_v1 = vld [vmem:[%s192_s6 + $0x8] sm:$0xff] (%p32_p3)   ;;  %v217_v2 = vld [vmem:[%s192_s6 + $0x10] sm:$0xf] (%p32_p3)  ;;  %s189_s7 = scalar_lea.vmem (%p32_p3), [#allocation2], %s1721_s28 }
  0x11   : > { %210 = vst [vmem:[%s189_s7] sm:$0xff] %v209_v0   ;;  %v219_v3 = vld [vmem:[%s192_s6 + $0x28] sm:$0xff]   ;;  %v223_v4 = vld [vmem:[%s192_s6 + $0x30] sm:$0xff]   ;;  %v227_v5 = vld [vmem:[%s192_s6 + $0x38] sm:$0xf] }
  0x12   : > { %214 = vst [vmem:[%s189_s7 + $0x8] sm:$0xff] %v213_v1   ;;  %v229_v6 = vld [vmem:[%s192_s6 + $0x50] sm:$0xff]   ;;  %v233_v7 = vld [vmem:[%s192_s6 + $0x58] sm:$0xff]   ;;  %v237_v8 = vld [vmem:[%s192_s6 + $0x60] sm:$0xf] }
  0x13   : > { %218 = vst [vmem:[%s189_s7 + $0x10] sm:$0xf] %v217_v2  ;;  %v239_v9 = vld [vmem:[%s192_s6 + $0x78] sm:$0xff]   ;;  %v243_v10 = vld [vmem:[%s192_s6 + $0x80] sm:$0xff]   ;;  %v247_v11 = vld [vmem:[%s192_s6 + $0x88] sm:$0xf] }
  0x14   : > { %220 = vst [vmem:[%s189_s7 + $0x14] sm:$0xff] %v219_v3  }
  0x15   : > { %224 = vst [vmem:[%s189_s7 + $0x1c] sm:$0xff] %v223_v4  }
  0x16   : > { %228 = vst [vmem:[%s189_s7 + $0x24] sm:$0xf] %v227_v5 }
  0x17   : > { %230 = vst [vmem:[%s189_s7 + $0x28] sm:$0xff] %v229_v6  }
  0x18   : > { %234 = vst [vmem:[%s189_s7 + $0x30] sm:$0xff] %v233_v7  }
  0x19   : > { %238 = vst [vmem:[%s189_s7 + $0x38] sm:$0xf] %v237_v8 }
  0x1a   : > { %240 = vst [vmem:[%s189_s7 + $0x3c] sm:$0xff] %v239_v9  }
  0x1b   : > { %244 = vst [vmem:[%s189_s7 + $0x44] sm:$0xff] %v243_v10  }
  0x1c   : > { %248 = vst [vmem:[%s189_s7 + $0x4c] sm:$0xf] %v247_v11 }
  0x1d PF: > { %p1466_p5 = scmp.ge.s32.totalorder %s1773_s20, 1  ;;  %p311_p6 = scmp.lt.s32.totalorder %s1773_s20, 3 }
  0x1f   : > { %p312_p7 = pnand %p1466_p5, %p311_p6 }
  0x20   : > { %s318_s12 = sand.u32 (!%p312_p7), 1, %s1765_s18   ;;  %p351_p8 = scmp.lt.s32.totalorder (!%p312_p7), %s1461_s21, 1 }
  0x21   : > { %315 = sbr.rel (%p312_p7) target bundleno = 325 (0x145), region = 69 }
  0x22   : > { %s1723_s15 = smul.u32 (!%p312_p7), 80, %s318_s12 }
  0x24   : > { %s1867_s6 = scalar_lea.vmem (!%p312_p7), [#allocation2], %s1723_s15 }
  0x26   : > { %v1694_v12 = vld [vmem:[%s2040_s1 + $0x8] sm:$0xff]  ;;  %v1691_v13 = vld [vmem:[%s2040_s1] sm:$0xff]  ;;  %v1695_v14 = vld [vmem:[%s2040_s1 + $0x10] sm:$0xff]  ;;  %vm393_vm0 = vcmask 130048   ;;  %vm463_vm1 = vsmask.f32 7424 }
  0x27   : > { %v1696_v15 = vld [vmem:[%s2040_s1 + $0x18] sm:$0xff]  ;;  %v1703_v16 = vld [vmem:[%s2040_s1 + $0x30] sm:$0xff]  ;;  %v1699_v17 = vld [vmem:[%s2040_s1 + $0x20] sm:$0xff]  ;;  %407 = vmatpush.bf16.msra.mxu0 %v1694_v12  ;;  %448 = vmatpush.bf16.msra.mxu1 %v1691_v13  ;;  %vm792_vm2 = vcmask 1044480   ;;  %vm897_vm3 = vsmask.f32 4352 }
  0x28   : > { %v1704_v18 = vld [vmem:[%s2040_s1 + $0x38] sm:$0xff]  ;;  %v1702_v19 = vld [vmem:[%s2040_s1 + $0x28] sm:$0xff]  ;;  %496 = vmatpush.bf16.msra.mxu2 %v1695_v14  ;;  %547 = vmatpush.bf16.msra.mxu3 %v1696_v15  ;;  %v1689_v21 = vld [vmem:[%s1867_s6] sm:$0xff]  ;;  %s2049_s21 = smov (!%p351_p8, %s1461_s21), 1  ;;  %vm1277_vm4 = vcmask 257024   ;;  %vm1315_vm5 = vcmask 261120  }
  0x29   : > { %v1692_v20 = vld [vmem:[%s1867_s6 + $0x14] sm:$0xff]  ;;  %v1495_v22 = vld [vmem:[%s1867_s6 + $0x8] sm:$0xf]  ;;  %v1690_v23 = vld [vmem:[%s1867_s6 + $0x8] sm:$0x70]  ;;  %v466_v27 = vshll.u32 %v1689_v21, 16  ;;  %s358_s16 = scalar_lea.vmem %s2043_s4, %s2049_s21  ;;  %s361_s24 = scalar_lea.vmem %s2044_s5, %s2049_s21 }
  0x2a   : > { %v1481_v24 = vld [vmem:[%s1867_s6 + $0x1c] sm:$0xf]  ;;  %v1693_v25 = vld [vmem:[%s1867_s6 + $0x1c] sm:$0x70]  ;;  %1487 = vmatmul.msk.bf16.vlgmr.msra.gmra.mxu0 %vm393_vm0, %v1692_v20  ;;  %v517_v26 = vshll.u32 %v1692_v20, 16  ;;  %1501 = vmatmul.msk.bf16.vlgmr.msra.gmra.mxu1 %vm393_vm0, %v1689_v21  ;;  %v1496_v28 = vor.u32 %v1690_v23, %v1495_v22  ;;  %v464_v29 = vshrl.u32 %v1689_v21, 16 }
  0x2b   : > { %600 = vmatpush.bf16.msrb.mxu0 %v1699_v17  ;;  %653 = vmatpush.bf16.msrb.mxu1 %v1702_v19  ;;  %v1482_v30 = vor.u32 %v1693_v25, %v1481_v24  ;;  %v515_v31 = vshrl.u32 %v1692_v20, 16  ;;  %v468_v32 = vrot.slane %v466_v27, 1  ;;  %v1711_v42 = vld [vmem:[%s2040_s1 + $0x50] sm:$0xff]  ;;  %v1707_v43 = vld [vmem:[%s2040_s1 + $0x40] sm:$0xff]  ;;  %v1712_v44 = vld [vmem:[%s2040_s1 + $0x58] sm:$0xff]  ;;  %s1688_s11 = sshll.u32 %s2049_s21, 4 }
  0x2c   : > { %704 = vmatpush.bf16.msrb.mxu2 %v1703_v16  ;;  %755 = vmatpush.bf16.msrb.mxu3 %v1704_v18  ;;  %v470_v33 = vshll.u32 %v1496_v28, 16  ;;  %v519_v34 = vrot.slane %v517_v26, 1  ;;  %v1710_v45 = vld [vmem:[%s2040_s1 + $0x48] sm:$0xff]  ;;  %v474_v46 = vshrl.u32 %v1496_v28, 16  ;;  %v1531_v52 = vld [vmem:[%s1867_s6 + $0x30] sm:$0xf]  ;;  %s2005_s20 = scalar_lea.vmem %s2042_s3, %s1688_s11 }
  0x2d   : > { %v521_v35 = vshll.u32 %v1482_v30, 16  ;;  %v469_v36 = vor.u32 %v468_v32, %v464_v29  ;;  %v525_v47 = vshrl.u32 %v1482_v30, 16  ;;  %v1697_v50 = vld [vmem:[%s1867_s6 + $0x28] sm:$0xff]  ;;  %v1700_v51 = vld [vmem:[%s1867_s6 + $0x3c] sm:$0xff]  ;;  %v1698_v53 = vld [vmem:[%s1867_s6 + $0x30] sm:$0x70] }
  0x2e   : > { %v472_v37 = vrot.slane %v470_v33, 1  ;;  %v520_v38 = vor.u32 %v519_v34, %v515_v31  ;;  %v1551_v54 = vld [vmem:[%s1867_s6 + $0x44] sm:$0xf]  ;;  %v1701_v55 = vld [vmem:[%s1867_s6 + $0x44] sm:$0x70]  ;;  %v1532_v56 = vor.u32 %v1698_v53, %v1531_v52  ;;  %v674_v57 = vshll.u32 %v1697_v50, 16 }
  0x2f   : > { %v523_v39 = vrot.slane %v521_v35, 1  ;;  %817 = vmatpush.bf16.msra.mxu0 %v1707_v43  ;;  %878 = vmatpush.bf16.msra.mxu1 %v1710_v45  ;;  %v1552_v58 = vor.u32 %v1701_v55, %v1551_v54  ;;  %v725_v59 = vshll.u32 %v1700_v51, 16  ;;  %v672_v60 = vshrl.u32 %v1697_v50, 16  ;;  %v1719_v8 = vld [vmem:[%s2040_s1 + $0x70] sm:$0xff]  ;;  %v1715_v9 = vld [vmem:[%s2040_s1 + $0x60] sm:$0xff]  ;;  %v1720_v10 = vld [vmem:[%s2040_s1 + $0x78] sm:$0xff] }
  0x30   : > { %v473_v40 = vsel %vm463_vm1, %v469_v36, %v472_v37  ;;  %v476_v48 = vor.u32 %v474_v46, %v472_v37  ;;  %v676_v61 = vrot.slane %v674_v57, 1  ;;  %v678_v62 = vshll.u32 %v1532_v56, 16  ;;  %v1718_v11 = vld [vmem:[%s2040_s1 + $0x68] sm:$0xff]  ;;  %v1579_v14 = vld [vmem:[%s1867_s6] sm:$0x8] }
  0x31   : > { %1509 = vmatmul.msk.bf16.vlgmr.msra.gmra.mxu2 %vm393_vm0, %v473_v40  ;;  %v524_v41 = vsel %vm463_vm1, %v520_v38, %v523_v39  ;;  %v527_v49 = vor.u32 %v525_v47, %v523_v39  ;;  %v723_v63 = vshrl.u32 %v1700_v51, 16  ;;  %v727_v0 = vrot.slane %v725_v59, 1  ;;  %v1705_v15 = vld [vmem:[%s1867_s6] sm:$0xf0]  ;;  %v1600_v16 = vld [vmem:[%s1867_s6 + $0x14] sm:$0x8] }
  0x32   : > { %1517 = vmatmul.msk.bf16.vlgmr.msra.gmra.mxu3 %vm393_vm0, %v524_v41  ;;  %943 = vmatpush.bf16.msra.mxu2 %v1711_v42  ;;  %v729_v1 = vshll.u32 %v1552_v58, 16  ;;  %v677_v2 = vor.u32 %v676_v61, %v672_v60  ;;  %v680_v3 = vrot.slane %v678_v62, 1  ;;  %v682_v12 = vshrl.u32 %v1532_v56, 16  ;;  %v1708_v17 = vld [vmem:[%s1867_s6 + $0x14] sm:$0xf0]  ;;  %v1706_v19 = vld [vmem:[%s1867_s6 + $0x8] sm:$0xff] }
  0x33   : > { %1007 = vmatpush.bf16.msra.mxu3 %v1712_v44  ;;  %v728_v4 = vor.u32 %v727_v0, %v723_v63  ;;  %v733_v13 = vshrl.u32 %v1552_v58, 16  ;;  %v1580_v20 = vor.u32 %v1705_v15, %v1579_v14  ;;  %v1709_v21 = vld [vmem:[%s1867_s6 + $0x1c] sm:$0xff]  ;;  %v1601_v22 = vor.u32 %v1708_v17, %v1600_v16  ;;  %v775_v46 = vld [vmem:[%s1867_s6 + $0x10] sm:$0x3]  ;;  %v1595_v47 = vld [vmem:[%s1867_s6 + $0x24] sm:$0x3] }
  0x34   : > { %v731_v5 = vrot.slane %v729_v1, 1  ;;  %v681_v6 = vsel %vm463_vm1, %v677_v2, %v680_v3  ;;  %v684_v18 = vor.u32 %v682_v12, %v680_v3  ;;  %v794_v25 = vrot.slane %v1706_v19, 3  ;;  %v1950_v12 = vld [vmem:[%s1867_s6 + $0x30] sm:$0xff]  ;;  %v1953_v14 = vld [vmem:[%s1867_s6 + $0x44] sm:$0xff] }
  0x35   : > { %v793_v24 = vrot.slane %v1580_v20, 3  ;;  %v854_v26 = vrot.slane %v1601_v22, 3  ;;  %v855_v27 = vrot.slane %v1709_v21, 3  ;;  %v902_v29 = vshll.u32 %v1580_v20, 16 }
  0x36   : > { %v732_v7 = vsel %vm463_vm1, %v728_v4, %v731_v5  ;;  %v735_v23 = vor.u32 %v733_v13, %v731_v5  ;;  %v910_v31 = vshll.u32 %v1706_v19, 16  ;;  %v963_v32 = vshrl.u32 %v1601_v22, 16 }
  0x37   : > { %v966_v33 = vshll.u32 %v1601_v22, 16  ;;  %v971_v34 = vshrl.u32 %v1709_v21, 16  ;;  %v974_v35 = vshll.u32 %v1709_v21, 16  ;;  %v795_v36 = vsel %vm792_vm2, %v793_v24, %v794_v25 }
  0x38   : > { %v856_v37 = vsel %vm792_vm2, %v854_v26, %v855_v27  ;;  %v904_v39 = vrot.slane %v902_v29, 4  ;;  %v912_v41 = vrot.slane %v910_v31, 4  ;;  %v965_v42 = vrot.slane %v963_v32, 3  ;;  %v1287_v26 = vld [vmem:[%s2041_s2] sm:$0xff] }
  0x39   : > { %v968_v43 = vrot.slane %v966_v33, 4  ;;  %v973_v44 = vrot.slane %v971_v34, 3  ;;  %v976_v45 = vrot.slane %v974_v35, 4  ;;  %v788_v52 = vunpack.c.l.b16 %v775_v46 }
  0x3a   : > { %1488 = vmatmul.msk.bf16.gmra.mxu0 %vm393_vm0, %v1482_v30  ;;  %1502 = vmatmul.msk.bf16.gmra.mxu1 %vm393_vm0, %v1496_v28  ;;  %v899_v28 = vshrl.u32 %v1580_v20, 16  ;;  %v907_v30 = vshrl.u32 %v1706_v19, 16  ;;  %v850_v53 = vunpack.c.l.b16 %v1595_v47  ;;  %v1106_v21 = vrot.slane %v1953_v14, 3 }
  0x3b   : > { %v1157_v24 = vshrl.u32 %v1950_v12, 16  ;;  %v1221_v29 = vshrl.u32 %v1953_v14, 16  ;;  %v1775_v31 = vmov 0   ;;  %vm1281_vm6 = vcmask 256000  }
  0x3c   : > { %v901_v38 = vrot.slane %v899_v28, 3  ;;  %v909_v40 = vrot.slane %v907_v30, 3  ;;  %v853_v57 = vpack.c.b16 %v850_v53, %v850_v53  ;;  %v1224_v30 = vshll.u32 %v1953_v14, 16  ;;  %1749 = vset.pattern.permute.xlu0 %v1775_v31  ;;  %1750 = vset.pattern.permute.xlu1 %v1775_v31 }
  0x3d   : > { %1293 = vperm.xlu0 %1749, %v1287_v26   ;;  %vm1282_vm7 = vsmask.f32 2304  ;;  %vm1321_vm9 = vcmask 258048   ;;  %vm1330_vm10 = vcmask 253952  }
  0x3e   : > { %v857_v61 = vrot.slane %v853_v57, 3  ;;  %v980_v62 = vshrl.u32 %v853_v57, 16  ;;  %v983_v63 = vshll.u32 %v853_v57, 16  ;;  %vm1283_vm8 = vmand %vm1281_vm6, %vm1282_vm7 }
  0x40   : > { %v858_v3 = vsel %vm792_vm2, %v855_v27, %v857_v61  ;;  %v982_v4 = vrot.slane %v980_v62, 3  ;;  %v985_v5 = vrot.slane %v983_v63, 4 }
  0x41   : > { %1510 = vmatmul.msk.bf16.gmra.mxu2 %vm393_vm0, %v476_v48  ;;  %v905_v48 = vor.u32 %v904_v39, %v901_v38 }
  0x42   : > { %1518 = vmatmul.msk.bf16.gmra.mxu3 %vm393_vm0, %v527_v49  ;;  %v913_v49 = vor.u32 %v912_v41, %v909_v40  ;;  %v1223_v40 = vrot.slane %v1221_v29, 3  ;;  %v1226_v41 = vrot.slane %v1224_v30, 4 }
  0x44   : > { %v914_v54 = vsel %vm897_vm3, %v905_v48, %v913_v49 }
  0x4a   : > { %1537 = vmatmul.msk.bf16.vlgmr.msrb.gmra.mxu0 %vm393_vm0, %v1697_v50  ;;  %1557 = vmatmul.msk.bf16.vlgmr.msrb.gmra.mxu1 %vm393_vm0, %v1700_v51  ;;  %v969_v50 = vor.u32 %v968_v43, %v965_v42  ;;  %v977_v51 = vor.u32 %v976_v45, %v973_v44  ;;  %v1632_v42 = vld [vmem:[%s1867_s6 + $0x38] sm:$0x3]  ;;  %v1653_v43 = vld [vmem:[%s1867_s6 + $0x4c] sm:$0x3]  ;;  %v1289_v44 = vld [vmem:[%s2041_s2 + $0x10] sm:$0xff] }
  0x4b   : > { %1068 = vmatpush.bf16.msrb.mxu0 %v1715_v9  ;;  %1129 = vmatpush.bf16.msrb.mxu1 %v1718_v11  ;;  %v1658_v9 = vld [vmem:[%s1867_s6 + $0x3c] sm:$0x8]  ;;  %v986_v11 = vor.u32 %v985_v5, %v982_v4 }
  0x4c   : > { %v978_v55 = vsel %vm897_vm3, %v969_v50, %v977_v51  ;;  %1303 = vperm.xlu1 %1750, %v1289_v44   ;;  %v1288_v45 = vld [vmem:[%s2041_s2 + $0x8] sm:$0xff]  ;;  %v1040_v50 = vunpack.c.l.b16 %v1632_v42 }
  0x4d   : > { %v987_v17 = vsel %vm897_vm3, %v977_v51, %v986_v11  ;;  %v1101_v51 = vunpack.c.l.b16 %v1653_v43  ;;  %1298 = vperm.xlu0 %1749, %v1288_v45  }
  0x51   : > { %1565 = vmatmul.msk.bf16.vlgmr.msrb.gmra.mxu2 %vm393_vm0, %v681_v6  ;;  %v1637_v6 = vld [vmem:[%s1867_s6 + $0x28] sm:$0x8] }
  0x52   : > { %1573 = vmatmul.msk.bf16.vlgmr.msrb.gmra.mxu3 %vm393_vm0, %v732_v7  ;;  %1193 = vmatpush.bf16.msrb.mxu2 %v1719_v8  ;;  %v1713_v8 = vld [vmem:[%s1867_s6 + $0x28] sm:$0xf0] }
  0x53   : > { %1257 = vmatpush.bf16.msrb.mxu3 %v1720_v10  ;;  %v1716_v10 = vld [vmem:[%s1867_s6 + $0x3c] sm:$0xf0]  ;;  %v1638_v13 = vor.u32 %v1713_v8, %v1637_v6 }
  0x54   : > { %v1659_v15 = vor.u32 %v1716_v10, %v1658_v9 }
  0x55   : > { %v1044_v19 = vrot.slane %v1638_v13, 3  ;;  %v1149_v22 = vshrl.u32 %v1638_v13, 16 }
  0x56   : > { %v1105_v20 = vrot.slane %v1659_v15, 3  ;;  %v1213_v27 = vshrl.u32 %v1659_v15, 16  ;;  %v1216_v28 = vshll.u32 %v1659_v15, 16 }
  0x57   : > { %v1151_v34 = vrot.slane %v1149_v22, 3 }
  0x58   : > { %v1107_v33 = vsel %vm792_vm2, %v1105_v20, %v1106_v21  ;;  %v1215_v38 = vrot.slane %v1213_v27, 3  ;;  %v1218_v39 = vrot.slane %v1216_v28, 4 }
  0x5a   : > { %1538 = vmatmul.msk.bf16.gmra.mxu0 %vm393_vm0, %v1532_v56  ;;  %1558 = vmatmul.msk.bf16.gmra.mxu1 %vm393_vm0, %v1552_v58  ;;  %v791_v56 = vpack.c.b16 %v788_v52, %v788_v52  ;;  %v1219_v48 = vor.u32 %v1218_v39, %v1215_v38 }
  0x5c   : > { %v916_v58 = vshrl.u32 %v791_v56, 16  ;;  %v919_v59 = vshll.u32 %v791_v56, 16  ;;  %v796_v60 = vrot.slane %v791_v56, 3 }
  0x5e   : > { %v918_v0 = vrot.slane %v916_v58, 3  ;;  %v921_v1 = vrot.slane %v919_v59, 4  ;;  %v797_v2 = vsel %vm792_vm2, %v794_v25, %v796_v60  ;;  %v1160_v25 = vshll.u32 %v1950_v12, 16 }
  0x60   : > { %v922_v7 = vor.u32 %v921_v1, %v918_v0  ;;  %v1290_v0 = vld [vmem:[%s2041_s2 + $0x18] sm:$0x1f] }
  0x61   : > { %1566 = vmatmul.msk.bf16.gmra.mxu2 %vm393_vm0, %v684_v18  ;;  %v1045_v18 = vrot.slane %v1950_v12, 3  ;;  %1308 = vperm.xlu1 %1750, %v1290_v0  }
  0x62   : > { %1574 = vmatmul.msk.bf16.gmra.mxu3 %vm393_vm0, %v735_v23  ;;  %v923_v16 = vsel %vm897_vm3, %v913_v49, %v922_v7  ;;  %v1152_v23 = vshll.u32 %v1638_v13, 16  ;;  %v1227_v49 = vor.u32 %v1226_v41, %v1223_v40 }
  0x63   : > { %v1046_v32 = vsel %vm792_vm2, %v1044_v19, %v1045_v18 }
  0x64   : > { %v1154_v35 = vrot.slane %v1152_v23, 4  ;;  %v1228_v53 = vsel %vm897_vm3, %v1219_v48, %v1227_v49 }
  0x66   : > { %v1155_v46 = vor.u32 %v1154_v35, %v1151_v34 }
  0x6a   : > { %1589 = vmatmul.msk.bf16.vlgmr.msra.gmra.mxu0 %vm393_vm0, %v795_v36  ;;  %1610 = vmatmul.msk.bf16.vlgmr.msra.gmra.mxu1 %vm393_vm0, %v856_v37  ;;  %v1159_v36 = vrot.slane %v1157_v24, 3  ;;  %v1162_v37 = vrot.slane %v1160_v25, 4 }
  0x6c   : > { %v1163_v47 = vor.u32 %v1162_v37, %v1159_v36 }
  0x6e   : > { %v1164_v52 = vsel %vm897_vm3, %v1155_v46, %v1163_v47 }
  0x71   : > { %1618 = vmatmul.msk.bf16.vlgmr.msra.gmra.mxu2 %vm393_vm0, %v914_v54  ;;  %v1043_v54 = vpack.c.b16 %v1040_v50, %v1040_v50 }
  0x72   : > { %1626 = vmatmul.msk.bf16.vlgmr.msra.gmra.mxu3 %vm393_vm0, %v978_v55  ;;  %v1104_v55 = vpack.c.b16 %v1101_v51, %v1101_v51 }
  0x73   : > { %v1166_v56 = vshrl.u32 %v1043_v54, 16  ;;  %v1169_v57 = vshll.u32 %v1043_v54, 16  ;;  %v1047_v58 = vrot.slane %v1043_v54, 3 }
  0x74   : > { %v1108_v59 = vrot.slane %v1104_v55, 3  ;;  %v1230_v60 = vshrl.u32 %v1104_v55, 16  ;;  %v1233_v61 = vshll.u32 %v1104_v55, 16 }
  0x75   : > { %v1168_v62 = vrot.slane %v1166_v56, 3  ;;  %v1171_v63 = vrot.slane %v1169_v57, 4  ;;  %v1048_v1 = vsel %vm792_vm2, %v1045_v18, %v1047_v58 }
  0x76   : > { %v1235_v4 = vrot.slane %v1233_v61, 4 }
  0x77   : > { %v1172_v5 = vor.u32 %v1171_v63, %v1168_v62 }
  0x79   : > { %v1173_v7 = vsel %vm897_vm3, %v1163_v47, %v1172_v5 }
  0x7a   : > { %1590 = vmatmul.msk.bf16.gmra.mxu0 %vm393_vm0, %v797_v2  ;;  %1611 = vmatmul.msk.bf16.gmra.mxu1 %vm393_vm0, %v858_v3  ;;  %v1109_v2 = vsel %vm792_vm2, %v1106_v21, %v1108_v59  ;;  %v1232_v3 = vrot.slane %v1230_v60, 3 }
  0x7c   : > { %v1236_v6 = vor.u32 %v1235_v4, %v1232_v3 }
  0x7e   : > { %v1237_v8 = vsel %vm897_vm3, %v1227_v49, %v1236_v6 }
  0x81   : > { %1619 = vmatmul.msk.bf16.gmra.mxu2 %vm393_vm0, %v923_v16 }
  0x82   : > { %1627 = vmatmul.msk.bf16.gmra.mxu3 %vm393_vm0, %v987_v17 }
  0x8a   : > { %1647 = vmatmul.msk.bf16.vlgmr.msrb.gmra.mxu0 %vm393_vm0, %v1046_v32  ;;  %1668 = vmatmul.msk.bf16.vlgmr.msrb.gmra.mxu1 %vm393_vm0, %v1107_v33 }
  0x91   : > { %1676 = vmatmul.msk.bf16.vlgmr.msrb.gmra.mxu2 %vm393_vm0, %v1164_v52 }
  0x92   : > { %1684 = vmatmul.msk.bf16.vlgmr.msrb.gmra.mxu3 %vm393_vm0, %v1228_v53 }
  0x9a   : > { %1648 = vmatmul.msk.bf16.gmra.mxu0 %vm393_vm0, %v1048_v1  ;;  %1669 = vmatmul.msk.bf16.gmra.mxu1 %vm393_vm0, %v1109_v2 }
  0xa1   : > { %1677 = vmatmul.msk.bf16.gmra.mxu2 %vm393_vm0, %v1173_v7 }
  0xa2   : > { %1685 = vmatmul.msk.bf16.gmra.mxu3 %vm393_vm0, %v1237_v8 }
  0xa7   : > { %v409_v9 = vpop.f32.mrf.mxu0  ;;  %v450_v10 = vpop.f32.mrf.mxu1 }
  0xa8   : > { %v451_v11 = vadd.f32 %v450_v10, %v409_v9 }
  0xaf   : > { %v411_v12 = vpop.f32.mrf.mxu0  ;;  %v452_v13 = vpop.f32.mrf.mxu1 }
  0xb0   : > { %v453_v14 = vadd.f32 %v452_v13, %v411_v12 }
  0xb4   : > { %v498_v15 = vpop.f32.mrf.mxu2 }
  0xb5   : > { %v508_v16 = vadd.f32 %v498_v15, %v451_v11  ;;  %v549_v17 = vpop.f32.mrf.mxu3 }
  0xb7   : > { %v559_v18 = vadd.f32 %v549_v17, %v508_v16  ;;  %v414_v19 = vpop.f32.mrf.mxu0  ;;  %v455_v20 = vpop.f32.mrf.mxu1 }
  0xb8   : > { %v456_v21 = vadd.f32 %v455_v20, %v414_v19 }
  0xbc   : > { %v500_v22 = vpop.f32.mrf.mxu2 }
  0xbd   : > { %v509_v23 = vadd.f32 %v500_v22, %v453_v14  ;;  %v551_v24 = vpop.f32.mrf.mxu3 }
  0xbf   : > { %v560_v25 = vadd.f32 %v551_v24, %v509_v23  ;;  %v416_v26 = vpop.f32.mrf.mxu0  ;;  %v457_v27 = vpop.f32.mrf.mxu1 }
  0xc0   : > { %v458_v28 = vadd.f32 %v457_v27, %v416_v26 }
  0xc4   : > { %v503_v29 = vpop.f32.mrf.mxu2 }
  0xc5   : > { %v510_v30 = vadd.f32 %v503_v29, %v456_v21  ;;  %v554_v31 = vpop.f32.mrf.mxu3 }
  0xc7   : > { %v561_v32 = vadd.f32 %v554_v31, %v510_v30  ;;  %v602_v33 = vpop.f32.mrf.mxu0  ;;  %v655_v34 = vpop.f32.mrf.mxu1 }
  0xc8   : > { %v612_v59 = vadd.f32 %v602_v33, %v559_v18 }
  0xca   : > { %v665_v62 = vadd.f32 %v655_v34, %v612_v59 }
  0xcc   : > { %v505_v35 = vpop.f32.mrf.mxu2 }
  0xcd   : > { %v511_v36 = vadd.f32 %v505_v35, %v458_v28  ;;  %v556_v37 = vpop.f32.mrf.mxu3 }
  0xcf   : > { %v562_v38 = vadd.f32 %v556_v37, %v511_v36  ;;  %v604_v39 = vpop.f32.mrf.mxu0  ;;  %v657_v40 = vpop.f32.mrf.mxu1 }
  0xd0   : > { %v613_v2 = vadd.f32 %v604_v39, %v560_v25 }
  0xd2   : > { %v666_v6 = vadd.f32 %v657_v40, %v613_v2 }
  0xd4   : > { %v706_v41 = vpop.f32.mrf.mxu2 }
  0xd5   : > { %v757_v42 = vpop.f32.mrf.mxu3  ;;  %v716_v0 = vadd.f32 %v706_v41, %v665_v62 }
  0xd7   : > { %v607_v43 = vpop.f32.mrf.mxu0  ;;  %v660_v44 = vpop.f32.mrf.mxu1  ;;  %v767_v5 = vadd.f32 %v757_v42, %v716_v0 }
  0xd8   : > { %v614_v11 = vadd.f32 %v607_v43, %v561_v32  ;;  %v1294_v32 = vpop.permute.xlu0 %1293 }
  0xda   : > { %v667_v17 = vadd.f32 %v660_v44, %v614_v11 }
  0xdc   : > { %v708_v45 = vpop.f32.mrf.mxu2 }
  0xdd   : > { %v759_v46 = vpop.f32.mrf.mxu3  ;;  %v717_v9 = vadd.f32 %v708_v45, %v666_v6 }
  0xdf   : > { %v609_v47 = vpop.f32.mrf.mxu0  ;;  %v662_v48 = vpop.f32.mrf.mxu1  ;;  %v768_v14 = vadd.f32 %v759_v46, %v717_v9 }
  0xe0   : > { %v615_v23 = vadd.f32 %v609_v47, %v562_v38 }
  0xe2   : > { %v668_v29 = vadd.f32 %v662_v48, %v615_v23 }
  0xe4   : > { %v711_v49 = vpop.f32.mrf.mxu2 }
  0xe5   : > { %v762_v50 = vpop.f32.mrf.mxu3  ;;  %v718_v20 = vadd.f32 %v711_v49, %v667_v17 }
  0xe7   : > { %v819_v51 = vpop.f32.mrf.mxu0  ;;  %v880_v52 = vpop.f32.mrf.mxu1  ;;  %v769_v27 = vadd.f32 %v762_v50, %v718_v20 }
  0xe8   : > { %v829_v7 = vadd.f32 %v819_v51, %v767_v5 }
  0xea   : > { %v890_v12 = vadd.f32 %v880_v52, %v829_v7 }
  0xec   : > { %v713_v53 = vpop.f32.mrf.mxu2 }
  0xed   : > { %v764_v54 = vpop.f32.mrf.mxu3  ;;  %v719_v35 = vadd.f32 %v713_v53, %v668_v29 }
  0xef   : > { %v821_v55 = vpop.f32.mrf.mxu0  ;;  %v882_v56 = vpop.f32.mrf.mxu1  ;;  %v770_v42 = vadd.f32 %v764_v54, %v719_v35 }
  0xf0   : > { %v830_v18 = vadd.f32 %v821_v55, %v768_v14  ;;  %v1299_v55 = vpop.permute.xlu0 %1298 }
  0xf2   : > { %v891_v24 = vadd.f32 %v882_v56, %v830_v18 }
  0xf4   : > { %v945_v57 = vpop.f32.mrf.mxu2 }
  0xf5   : > { %v1009_v58 = vpop.f32.mrf.mxu3  ;;  %v955_v15 = vadd.f32 %v945_v57, %v890_v12 }
  0xf7   : > { %v824_v60 = vpop.f32.mrf.mxu0  ;;  %v885_v61 = vpop.f32.mrf.mxu1  ;;  %v1019_v21 = vadd.f32 %v1009_v58, %v955_v15 }
  0xf8   : > { %v831_v30 = vadd.f32 %v824_v60, %v769_v27 }
  0xfa   : > { %v892_v39 = vadd.f32 %v885_v61, %v831_v30 }
  0xfc   : > { %v947_v63 = vpop.f32.mrf.mxu2 }
  0xfd   : > { %v1011_v1 = vpop.f32.mrf.mxu3  ;;  %v956_v28 = vadd.f32 %v947_v63, %v891_v24 }
  0xff   : > { %v826_v3 = vpop.f32.mrf.mxu0  ;;  %v887_v4 = vpop.f32.mrf.mxu1  ;;  %v1020_v36 = vadd.f32 %v1011_v1, %v956_v28  ;;  %v1284_v28 = vld [vmem:[%s2005_s20 + $0xc] sm:$0x7] }
 0x100   : > { %v832_v46 = vadd.f32 %v826_v3, %v770_v42 }
 0x102   : > { %v893_v56 = vadd.f32 %v887_v4, %v832_v46 }
 0x104   : > { %v950_v8 = vpop.f32.mrf.mxu2 }
 0x105   : > { %v1014_v10 = vpop.f32.mrf.mxu3  ;;  %v957_v43 = vadd.f32 %v950_v8, %v892_v39 }
 0x107   : > { %v1070_v13 = vpop.f32.mrf.mxu0  ;;  %v1131_v16 = vpop.f32.mrf.mxu1  ;;  %v1021_v49 = vadd.f32 %v1014_v10, %v957_v43 }
 0x108   : > { %v1080_v25 = vadd.f32 %v1070_v13, %v1019_v21  ;;  %v1304_v10 = vpop.permute.xlu1 %1303 }
 0x10a   : > { %v1141_v31 = vadd.f32 %v1131_v16, %v1080_v25 }
 0x10c   : > { %v952_v19 = vpop.f32.mrf.mxu2 }
 0x10d   : > { %v1016_v22 = vpop.f32.mrf.mxu3  ;;  %v958_v54 = vadd.f32 %v952_v19, %v893_v56 }
 0x10f   : > { %v1072_v26 = vpop.f32.mrf.mxu0  ;;  %v1133_v33 = vpop.f32.mrf.mxu1  ;;  %v1022_v4 = vadd.f32 %v1016_v22, %v958_v54 }
 0x110   : > { %v1081_v40 = vadd.f32 %v1072_v26, %v1020_v36  ;;  %v1309_v27 = vpop.permute.xlu1 %1308 }
 0x112   : > { %v1142_v47 = vadd.f32 %v1133_v33, %v1081_v40 }
 0x114   : > { %v1195_v34 = vpop.f32.mrf.mxu2 }
 0x115   : > { %v1205_v37 = vadd.f32 %v1195_v34, %v1141_v31  ;;  %v1259_v38 = vpop.f32.mrf.mxu3 }
 0x117   : > { %v1269_v41 = vadd.f32 %v1259_v38, %v1205_v37  ;;  %v1075_v45 = vpop.f32.mrf.mxu0  ;;  %v1136_v53 = vpop.f32.mrf.mxu1 }
 0x118   : > { %v1082_v57 = vadd.f32 %v1075_v45, %v1021_v49 }
 0x119   : > { %v1273_v44 = vpack.c.bf16 %v1269_v41, %v1269_v41  ;;  %v1311_v50 = vmul.f32 %v1294_v32, %v1269_v41 }
 0x11a   : > { %v1143_v63 = vadd.f32 %v1136_v53, %v1082_v57 }
 0x11b   : > { %1278 = vst.msk [vmem:[%s2005_s20] sm:$0xf] %vm1277_vm4, %v1273_v44  ;;  %v1332_v59 = vmul.f32 %v1311_v50, %v1269_v41  ;;  %v1316_v62 = vsel %vm1315_vm5, %v1311_v50, 0.0 }
 0x11c   : > { %v1197_v48 = vpop.f32.mrf.mxu2 }
 0x11d   : > { %v1206_v51 = vadd.f32 %v1197_v48, %v1142_v47  ;;  %v1261_v52 = vpop.f32.mrf.mxu3  ;;  %v1336_v6 = vsel %vm1315_vm5, %v1332_v59, 0.0 }
 0x11f   : > { %v1270_v58 = vadd.f32 %v1261_v52, %v1206_v51  ;;  %v1077_v2 = vpop.f32.mrf.mxu0  ;;  %v1138_v14 = vpop.f32.mrf.mxu1 }
 0x120   : > { %v1083_v12 = vadd.f32 %v1077_v2, %v1022_v4 }
 0x121   : > { %v1274_v60 = vpack.c.bf16 %v1270_v58, %v1270_v58  ;;  %v1312_v61 = vmul.f32 %v1299_v55, %v1270_v58 }
 0x122   : > { %v1144_v17 = vadd.f32 %v1138_v14, %v1083_v12 }
 0x123   : > { %1279 = vst.msk [vmem:[%s2005_s20 + $0x4] sm:$0xf] %vm1277_vm4, %v1274_v60  ;;  %v1317_v0 = vsel %vm1315_vm5, %v1312_v61, 0.0  ;;  %v1333_v1 = vmul.f32 %v1312_v61, %v1270_v58 }
 0x124   : > { %v1318_v3 = vadd.f32 %v1317_v0, %v1316_v62  ;;  %v1200_v5 = vpop.f32.mrf.mxu2 }
 0x125   : > { %v1337_v7 = vsel %vm1315_vm5, %v1333_v1, 0.0  ;;  %v1207_v8 = vadd.f32 %v1200_v5, %v1143_v63  ;;  %v1264_v9 = vpop.f32.mrf.mxu3 }
 0x126   : > { %v1338_v11 = vadd.f32 %v1337_v7, %v1336_v6 }
 0x127   : > { %v1271_v13 = vadd.f32 %v1264_v9, %v1207_v8 }
 0x129   : > { %v1275_v15 = vpack.c.bf16 %v1271_v13, %v1271_v13  ;;  %v1313_v16 = vmul.f32 %v1304_v10, %v1271_v13 }
 0x12b   : > { %1280 = vst.msk [vmem:[%s2005_s20 + $0x8] sm:$0xf] %vm1277_vm4, %v1275_v15  ;;  %v1319_v18 = vsel %vm1315_vm5, %v1313_v16, 0.0  ;;  %v1334_v19 = vmul.f32 %v1313_v16, %v1271_v13 }
 0x12c   : > { %v1320_v20 = vadd.f32 %v1319_v18, %v1318_v3  ;;  %v1202_v21 = vpop.f32.mrf.mxu2 }
 0x12d   : > { %v1339_v22 = vsel %vm1315_vm5, %v1334_v19, 0.0  ;;  %v1208_v23 = vadd.f32 %v1202_v21, %v1144_v17  ;;  %v1266_v25 = vpop.f32.mrf.mxu3 }
 0x12e   : > { %v1340_v24 = vadd.f32 %v1339_v22, %v1338_v11 }
 0x12f   : > { %v1272_v26 = vadd.f32 %v1266_v25, %v1208_v23 }
 0x131   : > { %v1276_v29 = vpack.c.bf16 %v1272_v26, %v1272_v26  ;;  %v1314_v30 = vmul.f32 %v1309_v27, %v1272_v26 }
 0x133   : > { %v1285_v31 = vsel %vm1283_vm8, %v1276_v29, %v1284_v28  ;;  %v1322_v32 = vsel %vm1321_vm9, %v1314_v30, 0.0  ;;  %v1335_v33 = vmul.f32 %v1314_v30, %v1272_v26 }
 0x134   : > { %1286 = vst [vmem:[%s2005_s20 + $0xc] sm:$0x7] %v1285_v31  ;;  %v1323_v34 = vadd.f32 %v1322_v32, %v1320_v20 }
 0x135   : > { %v1341_v35 = vsel %vm1321_vm9, %v1335_v33, 0.0 }
 0x136   : > { %v1324_v36 = vrot.slane %v1323_v34, 4  ;;  %v1342_v37 = vadd.f32 %v1341_v35, %v1340_v24 }
 0x138   : > { %v1325_v38 = vadd.f32 %v1324_v36, %v1323_v34  ;;  %v1343_v39 = vrot.slane %v1342_v37, 4 }
 0x13a   : > { %v1326_v40 = vrot.slane %v1325_v38, 2  ;;  %v1344_v41 = vadd.f32 %v1343_v39, %v1342_v37 }
 0x13c   : > { %v1327_v42 = vadd.f32 %v1326_v40, %v1325_v38  ;;  %v1345_v43 = vrot.slane %v1344_v41, 2 }
 0x13e   : > { %v1328_v44 = vrot.slane %v1327_v42, 1  ;;  %v1346_v45 = vadd.f32 %v1345_v43, %v1344_v41 }
 0x140   : > { %v1329_v46 = vadd.f32 %v1328_v44, %v1327_v42  ;;  %v1347_v47 = vrot.slane %v1346_v45, 1 }
 0x142   : > { %1331 = vst.msk [vmem:[%s358_s16] sm:$0x1] %vm1330_vm10, %v1329_v46  ;;  %v1348_v48 = vadd.f32 %v1347_v47, %v1346_v45 }
 0x144   : > { %1349 = vst.msk [vmem:[%s361_s24] sm:$0x1] %vm1330_vm10, %v1348_v48 }
 0x145 PF: > { %p13_p9 = scmp.ge.s32.totalorder %s1823_s22, 4   ;;  %s2045_s18 = smov %s1769_s19 }
 0x146   : > { %s2046_s19 = smov %s1832_s25  ;;  %s2047_s20 = smov %s1823_s22 }
 0x147   :  { %15 = sbr.rel (!%p13_p9) target bundleno = 2 (0x2), region = 150 }

// kernel: nlayer_discriminator_forward.5
= control target key start
LH: loop header
LB: loop body
LE: loop exit
PB: predicated region body
PF: predicated region fallthrough
CT: control target
= control target key end

     0   :  { %s2991_s12 = smov 0   ;;  %s2993_s13 = smov 0   ;;  %s3598_s0 = inlined_call_operand.vmem [shape: bf16[4,2,100,4], index: 0, kind: input, shape index: {}]   ;;  %s3599_s1 = inlined_call_operand.vmem [shape: bf16[16,4,16], index: 1, kind: input, shape index: {}]   ;;  %s3600_s2 = inlined_call_operand.vmem [shape: f32[1,16], index: 2, kind: input, shape index: {}]   ;;  %s3601_s3 = inlined_call_operand.vmem [shape: bf16[2,89,16], index: 3, kind: output, shape index: {}]  }
   0x1   :  { %s2995_s14 = smov 0  }
   0x2 LB: > { %s2486_s15 = sadd.s32 4294967295, %s2969_s14   ;;  %s3008_s16 = sadd.s32 1, %s2969_s14   ;;  %s2969_s14 = sphi %s2995_s14, %s3604_s14   ;;  %s2965_s13 = sphi %s2993_s13, %s3603_s13   ;;  %s2961_s12 = sphi %s2991_s12, %s3602_s12  }
   0x3   : > { %s17_s17 = ssub.s32 %s2969_s14, %s3008_s16  ;;  %s20_s18 = sadd.s32 1, %s2965_s13 }
   0x4   : > { %p18_p0 = scmp.eq.s32.totalorder %s17_s17, 0  ;;  %p27_p1 = scmp.ne.s32.totalorder %s2965_s13, %s2961_s12 }
   0x5   : > { %p28_p2 = scmp.eq.s32.totalorder %s2969_s14, 0  ;;  %p2489_p4 = scmp.ge.s32.totalorder %s2969_s14, 2 }
   0x6   : > { %s3017_s19 = scalar_select %p18_p0, %s2965_s13, %s20_s18  }
   0x7   : > { %p29_p3 = por %p28_p2, %p27_p1  ;;  %127 = sbr.rel (%p2489_p4) target bundleno = 45 (0x2d), region = 24 }
   0xc   : > { %130 = sbr.rel (!%p29_p3) target bundleno = 45 (0x2d), region = 28  ;;  %s132_s20 = sand.u32 (%p29_p3), 1, %s2965_s13  }
   0xd   : > { %s2919_s21 = smul.u32 (%p29_p3), 52, %s2969_s14 }
   0xe   : > { %s2918_s22 = smul.u32 (%p29_p3), 208, %s132_s20 }
   0xf   : > { %s3025_s25 = scalar_lea.vmem (%p29_p3), %s3598_s0, %s2919_s21 }
  0x10   : > { %v154_v0 = vld [vmem:[%s3025_s25] sm:$0xff] (%p29_p3)   ;;  %v158_v1 = vld [vmem:[%s3025_s25 + $0x8] sm:$0xff] (%p29_p3)   ;;  %v162_v2 = vld [vmem:[%s3025_s25 + $0x10] sm:$0xff] (%p29_p3)   ;;  %s3030_s26 = scalar_lea.vmem (%p29_p3), [#allocation2], %s2918_s22 }
  0x11   : > { %155 = vst [vmem:[%s3030_s26] sm:$0xff] %v154_v0   ;;  %v166_v3 = vld [vmem:[%s3025_s25 + $0x18] sm:$0xff]   ;;  %v170_v4 = vld [vmem:[%s3025_s25 + $0x20] sm:$0xff]   ;;  %v174_v5 = vld [vmem:[%s3025_s25 + $0x28] sm:$0xff]  }
  0x12   : > { %159 = vst [vmem:[%s3030_s26 + $0x8] sm:$0xff] %v158_v1   ;;  %v178_v6 = vld [vmem:[%s3025_s25 + $0x30] sm:$0xf]  ;;  %v180_v7 = vld [vmem:[%s3025_s25 + $0x68] sm:$0xff]   ;;  %v188_v9 = vld [vmem:[%s3025_s25 + $0x78] sm:$0xff]  }
  0x13   : > { %163 = vst [vmem:[%s3030_s26 + $0x10] sm:$0xff] %v162_v2   ;;  %v184_v8 = vld [vmem:[%s3025_s25 + $0x70] sm:$0xff]   ;;  %v192_v10 = vld [vmem:[%s3025_s25 + $0x80] sm:$0xff]   ;;  %v196_v11 = vld [vmem:[%s3025_s25 + $0x88] sm:$0xff]  }
  0x14   : > { %167 = vst [vmem:[%s3030_s26 + $0x18] sm:$0xff] %v166_v3   ;;  %v200_v12 = vld [vmem:[%s3025_s25 + $0x90] sm:$0xff]   ;;  %v204_v13 = vld [vmem:[%s3025_s25 + $0x98] sm:$0xf]  ;;  %v214_v16 = vld [vmem:[%s3025_s25 + $0xe0] sm:$0xff]  }
  0x15   : > { %171 = vst [vmem:[%s3030_s26 + $0x20] sm:$0xff] %v170_v4   ;;  %v206_v14 = vld [vmem:[%s3025_s25 + $0xd0] sm:$0xff]   ;;  %v210_v15 = vld [vmem:[%s3025_s25 + $0xd8] sm:$0xff]   ;;  %v218_v17 = vld [vmem:[%s3025_s25 + $0xe8] sm:$0xff]  }
  0x16   : > { %175 = vst [vmem:[%s3030_s26 + $0x28] sm:$0xff] %v174_v5   ;;  %v222_v18 = vld [vmem:[%s3025_s25 + $0xf0] sm:$0xff]   ;;  %v226_v19 = vld [vmem:[%s3025_s25 + $0xf8] sm:$0xff]   ;;  %v230_v20 = vld [vmem:[%s3025_s25 + $0x100] sm:$0xf] }
  0x17   : > { %179 = vst [vmem:[%s3030_s26 + $0x30] sm:$0xf] %v178_v6  ;;  %v232_v21 = vld [vmem:[%s3025_s25 + $0x138] sm:$0xff]   ;;  %v236_v22 = vld [vmem:[%s3025_s25 + $0x140] sm:$0xff]   ;;  %v240_v23 = vld [vmem:[%s3025_s25 + $0x148] sm:$0xff]  }
  0x18   : > { %181 = vst [vmem:[%s3030_s26 + $0x34] sm:$0xff] %v180_v7   ;;  %v244_v24 = vld [vmem:[%s3025_s25 + $0x150] sm:$0xff]   ;;  %v248_v25 = vld [vmem:[%s3025_s25 + $0x158] sm:$0xff]   ;;  %v252_v26 = vld [vmem:[%s3025_s25 + $0x160] sm:$0xff]  }
  0x19   : > { %185 = vst [vmem:[%s3030_s26 + $0x3c] sm:$0xff] %v184_v8   ;;  %v256_v27 = vld [vmem:[%s3025_s25 + $0x168] sm:$0xf] }
  0x1a   : > { %189 = vst [vmem:[%s3030_s26 + $0x44] sm:$0xff] %v188_v9  }
  0x1b   : > { %193 = vst [vmem:[%s3030_s26 + $0x4c] sm:$0xff] %v192_v10  }
  0x1c   : > { %197 = vst [vmem:[%s3030_s26 + $0x54] sm:$0xff] %v196_v11  }
  0x1d   : > { %201 = vst [vmem:[%s3030_s26 + $0x5c] sm:$0xff] %v200_v12  }
  0x1e   : > { %205 = vst [vmem:[%s3030_s26 + $0x64] sm:$0xf] %v204_v13 }
  0x1f   : > { %207 = vst [vmem:[%s3030_s26 + $0x68] sm:$0xff] %v206_v14  }
  0x20   : > { %211 = vst [vmem:[%s3030_s26 + $0x70] sm:$0xff] %v210_v15  }
  0x21   : > { %215 = vst [vmem:[%s3030_s26 + $0x78] sm:$0xff] %v214_v16  }
  0x22   : > { %219 = vst [vmem:[%s3030_s26 + $0x80] sm:$0xff] %v218_v17  }
  0x23   : > { %223 = vst [vmem:[%s3030_s26 + $0x88] sm:$0xff] %v222_v18  }
  0x24   : > { %227 = vst [vmem:[%s3030_s26 + $0x90] sm:$0xff] %v226_v19  }
  0x25   : > { %231 = vst [vmem:[%s3030_s26 + $0x98] sm:$0xf] %v230_v20 }
  0x26   : > { %233 = vst [vmem:[%s3030_s26 + $0x9c] sm:$0xff] %v232_v21  }
  0x27   : > { %237 = vst [vmem:[%s3030_s26 + $0xa4] sm:$0xff] %v236_v22  }
  0x28   : > { %241 = vst [vmem:[%s3030_s26 + $0xac] sm:$0xff] %v240_v23  }
  0x29   : > { %245 = vst [vmem:[%s3030_s26 + $0xb4] sm:$0xff] %v244_v24  }
  0x2a   : > { %249 = vst [vmem:[%s3030_s26 + $0xbc] sm:$0xff] %v248_v25  }
  0x2b   : > { %253 = vst [vmem:[%s3030_s26 + $0xc4] sm:$0xff] %v252_v26  }
  0x2c   : > { %257 = vst [vmem:[%s3030_s26 + $0xcc] sm:$0xf] %v256_v27 }
  0x2d PF: > { %p2491_p5 = scmp.ge.s32.totalorder %s2969_s14, 1  ;;  %p384_p6 = scmp.lt.s32.totalorder %s2969_s14, 3 }
  0x2f   : > { %p385_p7 = pnand %p2491_p5, %p384_p6 }
  0x30   : > { %s391_s4 = sand.u32 (!%p385_p7), 1, %s2961_s12   ;;  %p414_p8 = scmp.lt.s32.totalorder (!%p385_p7), %s2486_s15, 1 }
  0x31   : > { %388 = sbr.rel (%p385_p7) target bundleno = 586 (0x24a), region = 69 }
  0x32   : > { %s2920_s5 = smul.u32 (!%p385_p7), 208, %s391_s4 }
  0x34   : > { %s3110_s18 = scalar_lea.vmem (!%p385_p7), [#allocation2], %s2920_s5 }
  0x36   : > { %v2505_v28 = vld [vmem:[%s3599_s1 + $0x2] sm:$0x3]  ;;  %vm497_vm0 = vcmask 1041408   ;;  %v432_v29 = vld [vmem:[%s3599_s1] sm:$0x3]  ;;  %vm478_vm1 = vcmask 31744  }
  0x37   : > { %v499_v30 = vsel %vm497_vm0, %v2505_v28, 0  ;;  %v589_v31 = vsel %vm497_vm0, %v432_v29, 0  ;;  %v2566_v32 = vld [vmem:[%s3599_s1 + $0x4] sm:$0x3]  ;;  %v2573_v34 = vld [vmem:[%s3599_s1 + $0x6] sm:$0x3] }
  0x38   : > { %508 = vmatpush.bf16.msra.mxu0 %v499_v30  ;;  %598 = vmatpush.bf16.msra.mxu1 %v589_v31  ;;  %v693_v33 = vsel %vm497_vm0, %v2566_v32, 0  ;;  %v808_v35 = vsel %vm497_vm0, %v2573_v34, 0  ;;  %v2666_v36 = vld [vmem:[%s3599_s1 + $0xc] sm:$0x3]  ;;  %v2592_v37 = vld [vmem:[%s3599_s1 + $0x8] sm:$0x3] }
  0x39   : > { %702 = vmatpush.bf16.msra.mxu2 %v693_v33  ;;  %v2876_v38 = vld [vmem:[%s3110_s18 + $0x34] sm:$0xff]  ;;  %v2870_v39 = vld [vmem:[%s3110_s18] sm:$0xff]  ;;  %817 = vmatpush.bf16.msra.mxu3 %v808_v35  ;;  %v2871_v40 = vld [vmem:[%s3110_s18 + $0x8] sm:$0xff]  ;;  %v1157_v41 = vsel %vm497_vm0, %v2666_v36, 0  ;;  %v925_v42 = vsel %vm497_vm0, %v2592_v37, 0  ;;  %vm1369_vm3 = vcmask 1046528  }
  0x3a   : > { %v2877_v43 = vld [vmem:[%s3110_s18 + $0x3c] sm:$0xff]  ;;  %v2635_v45 = vld [vmem:[%s3599_s1 + $0xa] sm:$0x3]  ;;  %v750_v46 = vshll.u32 %v2876_v38, 16  ;;  %v635_v47 = vshll.u32 %v2870_v39, 16  ;;  %v633_v48 = vshrl.u32 %v2870_v39, 16 }
  0x3b   : > { %v2673_v44 = vld [vmem:[%s3599_s1 + $0xe] sm:$0x3]  ;;  %2530 = vmatmul.msk.bf16.vlgmr.msra.gmra.mxu0 %vm478_vm1, %v2876_v38  ;;  %2560 = vmatmul.msk.bf16.vlgmr.msra.gmra.mxu1 %vm478_vm1, %v2870_v39  ;;  %v639_v49 = vshll.u32 %v2871_v40, 16  ;;  %v748_v50 = vshrl.u32 %v2876_v38, 16  ;;  %v754_v51 = vshll.u32 %v2877_v43, 16  ;;  %v1042_v53 = vsel %vm497_vm0, %v2635_v45, 0 }
  0x3c   : > { %934 = vmatpush.bf16.msrb.mxu0 %v925_v42  ;;  %v1272_v52 = vsel %vm497_vm0, %v2673_v44, 0  ;;  %v637_v54 = vrot.slane %v635_v47, 1  ;;  %v752_v56 = vrot.slane %v750_v46, 1  ;;  %1051 = vmatpush.bf16.msrb.mxu1 %v1042_v53  ;;  %vm632_vm2 = vsmask.f32 7424  ;;  %v2872_v62 = vld [vmem:[%s3110_s18 + $0x10] sm:$0xff] }
  0x3d   : > { %1166 = vmatpush.bf16.msrb.mxu2 %v1157_v41  ;;  %v641_v55 = vrot.slane %v639_v49, 1  ;;  %1281 = vmatpush.bf16.msrb.mxu3 %v1272_v52  ;;  %v756_v57 = vrot.slane %v754_v51, 1  ;;  %v2878_v63 = vld [vmem:[%s3110_s18 + $0x44] sm:$0xff]  ;;  %v643_v0 = vshrl.u32 %v2871_v40, 16  ;;  %v646_v1 = vshll.u32 %v2872_v62, 16  ;;  %v2873_v10 = vld [vmem:[%s3110_s18 + $0x18] sm:$0xff] }
  0x3e   : > { %v638_v58 = vor.u32 %v637_v54, %v633_v48  ;;  %v753_v59 = vor.u32 %v752_v56, %v748_v50  ;;  %v758_v2 = vshrl.u32 %v2877_v43, 16  ;;  %v761_v3 = vshll.u32 %v2878_v63, 16  ;;  %v2879_v11 = vld [vmem:[%s3110_s18 + $0x4c] sm:$0xff]  ;;  %v2874_v22 = vld [vmem:[%s3110_s18 + $0x20] sm:$0xff]  ;;  %v2880_v23 = vld [vmem:[%s3110_s18 + $0x54] sm:$0xff]  ;;  %s3606_s15 = smov (!%p414_p8, %s2486_s15), 1 }
  0x3f   : > { %v645_v4 = vor.u32 %v643_v0, %v641_v55  ;;  %v648_v5 = vrot.slane %v646_v1, 1  ;;  %v650_v12 = vshrl.u32 %v2872_v62, 16  ;;  %v653_v13 = vshll.u32 %v2873_v10, 16  ;;  %v2558_v34 = vld [vmem:[%s3110_s18 + $0x28] sm:$0xf]  ;;  %v2883_v1 = vld [vmem:[%s3110_s18 + $0x70] sm:$0xff] }
  0x40   : > { %v642_v60 = vsel %vm632_vm2, %v638_v58, %v641_v55  ;;  %v757_v61 = vsel %vm632_vm2, %v753_v59, %v756_v57  ;;  %v760_v6 = vor.u32 %v758_v2, %v756_v57  ;;  %v763_v7 = vrot.slane %v761_v3, 1  ;;  %v2875_v35 = vld [vmem:[%s3110_s18 + $0x28] sm:$0x10]  ;;  %v2528_v36 = vld [vmem:[%s3110_s18 + $0x5c] sm:$0xf]  ;;  %v2889_v2 = vld [vmem:[%s3110_s18 + $0xa4] sm:$0xff] }
  0x41   : > { %2567 = vmatmul.msk.bf16.vlgmr.msra.gmra.mxu2 %vm478_vm1, %v642_v60  ;;  %2574 = vmatmul.msk.bf16.vlgmr.msra.gmra.mxu3 %vm478_vm1, %v757_v61  ;;  %v649_v8 = vsel %vm632_vm2, %v645_v4, %v648_v5  ;;  %v765_v14 = vshrl.u32 %v2878_v63, 16  ;;  %v768_v15 = vshll.u32 %v2879_v11, 16  ;;  %v652_v16 = vor.u32 %v650_v12, %v648_v5  ;;  %v2881_v37 = vld [vmem:[%s3110_s18 + $0x5c] sm:$0x10]  ;;  %v2754_v50 = vld [vmem:[%s3599_s1 + $0x14] sm:$0x3] }
  0x42   : > { %v764_v9 = vsel %vm632_vm2, %v760_v6, %v763_v7  ;;  %v655_v17 = vrot.slane %v653_v13, 1  ;;  %v657_v24 = vshrl.u32 %v2873_v10, 16  ;;  %v660_v25 = vshll.u32 %v2874_v22, 16  ;;  %v2680_v51 = vld [vmem:[%s3599_s1 + $0x10] sm:$0x3]  ;;  %s2921_s20 = smul.u32 48, %s3606_s15 }
  0x43   : > { %v767_v18 = vor.u32 %v765_v14, %v763_v7  ;;  %v770_v19 = vrot.slane %v768_v15, 1  ;;  %v772_v26 = vshrl.u32 %v2879_v11, 16  ;;  %v775_v27 = vshll.u32 %v2880_v23, 16  ;;  %v2761_v52 = vld [vmem:[%s3599_s1 + $0x16] sm:$0x3] }
  0x44   : > { %v656_v20 = vsel %vm632_vm2, %v652_v16, %v655_v17  ;;  %v659_v28 = vor.u32 %v657_v24, %v655_v17  ;;  %v662_v29 = vrot.slane %v660_v25, 1  ;;  %v2559_v38 = vor.u32 %v2875_v35, %v2558_v34  ;;  %v2723_v56 = vld [vmem:[%s3599_s1 + $0x12] sm:$0x3]  ;;  %v2884_v16 = vld [vmem:[%s3110_s18 + $0x78] sm:$0xff]  ;;  %s3541_s22 = scalar_lea.vmem %s3601_s3, %s2921_s20 }
  0x45   : > { %v771_v21 = vsel %vm632_vm2, %v767_v18, %v770_v19  ;;  %v774_v30 = vor.u32 %v772_v26, %v770_v19  ;;  %v777_v31 = vrot.slane %v775_v27, 1  ;;  %v2529_v39 = vor.u32 %v2881_v37, %v2528_v36  ;;  %v2890_v17 = vld [vmem:[%s3110_s18 + $0xac] sm:$0xff] }
  0x46   : > { %v663_v32 = vsel %vm632_vm2, %v659_v28, %v662_v29  ;;  %v667_v41 = vshll.u32 %v2559_v38, 16  ;;  %v779_v42 = vshrl.u32 %v2880_v23, 16  ;;  %v1655_v53 = vsel %vm497_vm0, %v2754_v50, 0  ;;  %v2885_v28 = vld [vmem:[%s3110_s18 + $0x80] sm:$0xff] }
  0x47   : > { %v778_v33 = vsel %vm632_vm2, %v774_v30, %v777_v31  ;;  %v1400_v54 = vsel %vm497_vm0, %v2680_v51, 0  ;;  %v1782_v55 = vsel %vm497_vm0, %v2761_v52, 0  ;;  %1664 = vmatpush.bf16.msra.mxu2 %v1655_v53  ;;  %v1527_v57 = vsel %vm497_vm0, %v2723_v56, 0 }
  0x48   : > { %v669_v45 = vrot.slane %v667_v41, 1  ;;  %v781_v46 = vor.u32 %v779_v42, %v777_v31  ;;  %1409 = vmatpush.bf16.msra.mxu0 %v1400_v54  ;;  %1791 = vmatpush.bf16.msra.mxu3 %v1782_v55  ;;  %v671_v58 = vshrl.u32 %v2559_v38, 16  ;;  %v786_v59 = vshrl.u32 %v2529_v39, 16 }
  0x49   : > { %1536 = vmatpush.bf16.msra.mxu1 %v1527_v57  ;;  %v1103_v6 = vshll.u32 %v2883_v1, 16  ;;  %v1107_v18 = vshrl.u32 %v2883_v1, 16  ;;  %v1110_v19 = vshll.u32 %v2884_v16, 16  ;;  %v1114_v30 = vshrl.u32 %v2884_v16, 16 }
  0x4a   : > { %v673_v60 = vor.u32 %v671_v58, %v669_v45  ;;  %v1117_v31 = vshll.u32 %v2885_v28, 16  ;;  %v1121_v51 = vshrl.u32 %v2885_v28, 16  ;;  %vm1582_vm4 = vsmask.f32 6400 }
  0x4b   : > { %2531 = vmatmul.msk.bf16.gmra.mxu0 %vm478_vm1, %v2877_v43  ;;  %2561 = vmatmul.msk.bf16.gmra.mxu1 %vm478_vm1, %v2871_v40  ;;  %v664_v40 = vshrl.u32 %v2874_v22, 16  ;;  %v782_v43 = vshll.u32 %v2529_v39, 16  ;;  %vm2407_vm6 = vcmask 125952  }
  0x4d   : > { %v666_v44 = vor.u32 %v664_v40, %v662_v29  ;;  %v784_v47 = vrot.slane %v782_v43, 1  ;;  %v2891_v29 = vld [vmem:[%s3110_s18 + $0xb4] sm:$0xff] }
  0x4e   : > { %v1236_v53 = vshrl.u32 %v2891_v29, 16 }
  0x4f   : > { %v670_v48 = vsel %vm632_vm2, %v666_v44, %v669_v45  ;;  %v785_v49 = vsel %vm632_vm2, %v781_v46, %v784_v47  ;;  %v788_v61 = vor.u32 %v786_v59, %v784_v47  ;;  %v2886_v46 = vld [vmem:[%s3110_s18 + $0x88] sm:$0xff]  ;;  %v2892_v47 = vld [vmem:[%s3110_s18 + $0xbc] sm:$0xff] }
  0x50   : > { %v1124_v52 = vshll.u32 %v2886_v46, 16  ;;  %v1239_v54 = vshll.u32 %v2892_v47, 16 }
  0x51   : > { %2568 = vmatmul.msk.bf16.gmra.mxu2 %vm478_vm1, %v649_v8  ;;  %2575 = vmatmul.msk.bf16.gmra.mxu3 %vm478_vm1, %v764_v9  ;;  %v1218_v9 = vshll.u32 %v2889_v2, 16 }
  0x53   : > { %v1220_v13 = vrot.slane %v1218_v9, 1  ;;  %v2658_v9 = vld [vmem:[%s3110_s18 + $0xc4] sm:$0xf] }
  0x5b   : > { %2532 = vmatmul.msk.bf16.gmra.mxu0 %vm478_vm1, %v2878_v63  ;;  %2562 = vmatmul.msk.bf16.gmra.mxu1 %vm478_vm1, %v2872_v62  ;;  %v2882_v62 = vld [vmem:[%s3110_s18 + $0x68] sm:$0xff]  ;;  %v2888_v63 = vld [vmem:[%s3110_s18 + $0x9c] sm:$0xff] }
  0x5c   : > { %v1099_v0 = vshll.u32 %v2882_v62, 16  ;;  %v1214_v3 = vshll.u32 %v2888_v63, 16  ;;  %v1097_v4 = vshrl.u32 %v2882_v62, 16  ;;  %v1212_v7 = vshrl.u32 %v2888_v63, 16 }
  0x5e   : > { %v1101_v5 = vrot.slane %v1099_v0, 1  ;;  %v1216_v8 = vrot.slane %v1214_v3, 1 }
  0x60   : > { %v1217_v12 = vor.u32 %v1216_v8, %v1212_v7  ;;  %v2887_v8 = vld [vmem:[%s3110_s18 + $0x90] sm:$0x10] }
  0x61   : > { %2569 = vmatmul.msk.bf16.gmra.mxu2 %vm478_vm1, %v656_v20  ;;  %2576 = vmatmul.msk.bf16.gmra.mxu3 %vm478_vm1, %v771_v21  ;;  %v1222_v20 = vshrl.u32 %v2889_v2, 16  ;;  %v1225_v21 = vshll.u32 %v2890_v17, 16 }
  0x62   : > { %v1221_v15 = vsel %vm632_vm2, %v1217_v12, %v1220_v13 }
  0x63   : > { %v1224_v24 = vor.u32 %v1222_v20, %v1220_v13  ;;  %v1227_v25 = vrot.slane %v1225_v21, 1 }
  0x65   : > { %v1228_v27 = vsel %vm632_vm2, %v1224_v24, %v1227_v25 }
  0x6b   : > { %2533 = vmatmul.msk.bf16.gmra.mxu0 %vm478_vm1, %v2879_v11  ;;  %2563 = vmatmul.msk.bf16.gmra.mxu1 %vm478_vm1, %v2873_v10  ;;  %v1102_v10 = vor.u32 %v1101_v5, %v1097_v4  ;;  %v1105_v11 = vrot.slane %v1103_v6, 1  ;;  %v2615_v4 = vld [vmem:[%s3110_s18 + $0x90] sm:$0xf] }
  0x6c   : > { %v2616_v12 = vor.u32 %v2887_v8, %v2615_v4  ;;  %v3268_v8 = vld [vmem:[%s3110_s18 + $0xc] sm:$0xff] }
  0x6d   : > { %v1106_v14 = vsel %vm632_vm2, %v1102_v10, %v1105_v11  ;;  %v2893_v10 = vld [vmem:[%s3110_s18 + $0xc4] sm:$0x10] }
  0x6e   : > { %v2659_v13 = vor.u32 %v2893_v10, %v2658_v9 }
  0x70   : > { %v1246_v20 = vshll.u32 %v2659_v13, 16 }
  0x71   : > { %2570 = vmatmul.msk.bf16.gmra.mxu2 %vm478_vm1, %v663_v32  ;;  %2577 = vmatmul.msk.bf16.gmra.mxu3 %vm478_vm1, %v778_v33  ;;  %v1229_v32 = vshrl.u32 %v2890_v17, 16  ;;  %v1232_v33 = vshll.u32 %v2891_v29, 16 }
  0x73   : > { %v1234_v40 = vrot.slane %v1232_v33, 1 }
  0x7b   : > { %2534 = vmatmul.msk.bf16.gmra.mxu0 %vm478_vm1, %v2880_v23  ;;  %2564 = vmatmul.msk.bf16.gmra.mxu1 %vm478_vm1, %v2874_v22  ;;  %v1109_v22 = vor.u32 %v1107_v18, %v1105_v11  ;;  %v1112_v23 = vrot.slane %v1110_v19, 1  ;;  %v1131_v18 = vshll.u32 %v2616_v12, 16  ;;  %v1243_v19 = vshrl.u32 %v2892_v47, 16 }
  0x7d   : > { %v1113_v26 = vsel %vm632_vm2, %v1109_v22, %v1112_v23  ;;  %v1116_v37 = vor.u32 %v1114_v30, %v1112_v23 }
  0x81   : > { %2571 = vmatmul.msk.bf16.gmra.mxu2 %vm478_vm1, %v670_v48  ;;  %2578 = vmatmul.msk.bf16.gmra.mxu3 %vm478_vm1, %v785_v49 }
  0x8b   : > { %2535 = vmatmul.msk.bf16.gmra.mxu0 %vm478_vm1, %v2529_v39  ;;  %2565 = vmatmul.msk.bf16.gmra.mxu1 %vm478_vm1, %v2559_v38  ;;  %v1119_v38 = vrot.slane %v1117_v31, 1  ;;  %v1231_v39 = vor.u32 %v1229_v32, %v1227_v25 }
  0x8d   : > { %v1120_v41 = vsel %vm632_vm2, %v1116_v37, %v1119_v38  ;;  %v1235_v42 = vsel %vm632_vm2, %v1231_v39, %v1234_v40  ;;  %v1123_v59 = vor.u32 %v1121_v51, %v1119_v38  ;;  %v2854_v38 = vld [vmem:[%s3599_s1 + $0x1c] sm:$0x3]  ;;  %v2780_v39 = vld [vmem:[%s3599_s1 + $0x18] sm:$0x3] }
  0x91   : > { %2572 = vmatmul.msk.bf16.gmra.mxu2 %vm478_vm1, %v673_v60  ;;  %2579 = vmatmul.msk.bf16.gmra.mxu3 %vm478_vm1, %v788_v61  ;;  %v1126_v60 = vrot.slane %v1124_v52, 1  ;;  %v1238_v61 = vor.u32 %v1236_v53, %v1234_v40  ;;  %v2861_v40 = vld [vmem:[%s3599_s1 + $0x1e] sm:$0x3]  ;;  %v1135_v53 = vshrl.u32 %v2616_v12, 16 }
  0x9b   : > { %2617 = vmatmul.msk.bf16.vlgmr.msrb.gmra.mxu0 %vm478_vm1, %v2882_v62  ;;  %2660 = vmatmul.msk.bf16.vlgmr.msrb.gmra.mxu1 %vm478_vm1, %v2888_v63  ;;  %v1241_v62 = vrot.slane %v1239_v54, 1  ;;  %v1250_v54 = vshrl.u32 %v2659_v13, 16 }
  0x9d   : > { %v1242_v3 = vsel %vm632_vm2, %v1238_v61, %v1241_v62 }
  0xa1   : > { %2667 = vmatmul.msk.bf16.vlgmr.msrb.gmra.mxu2 %vm478_vm1, %v1106_v14  ;;  %2674 = vmatmul.msk.bf16.vlgmr.msrb.gmra.mxu3 %vm478_vm1, %v1221_v15 }
  0xab   : > { %2618 = vmatmul.msk.bf16.gmra.mxu0 %vm478_vm1, %v2883_v1  ;;  %2661 = vmatmul.msk.bf16.gmra.mxu1 %vm478_vm1, %v2889_v2  ;;  %v1127_v2 = vsel %vm632_vm2, %v1123_v59, %v1126_v60  ;;  %v2900_v59 = vld [vmem:[%s3110_s18 + $0x38] sm:$0xf0] }
  0xb1   : > { %2668 = vmatmul.msk.bf16.gmra.mxu2 %vm478_vm1, %v1113_v26  ;;  %2675 = vmatmul.msk.bf16.gmra.mxu3 %vm478_vm1, %v1228_v27  ;;  %v1133_v26 = vrot.slane %v1131_v18, 1  ;;  %v1245_v27 = vor.u32 %v1243_v19, %v1241_v62  ;;  %v1371_v19 = vrot.slane %v3268_v8, 1 }
  0xb8   : > { %v510_v34 = vpop.f32.mrf.mxu0  ;;  %v600_v35 = vpop.f32.mrf.mxu1 }
  0xb9   : > { %v601_v36 = vadd.f32 %v600_v35, %v510_v34 }
  0xbb   : > { %2619 = vmatmul.msk.bf16.gmra.mxu0 %vm478_vm1, %v2884_v16  ;;  %2662 = vmatmul.msk.bf16.gmra.mxu1 %vm478_vm1, %v2890_v17  ;;  %v1128_v17 = vshrl.u32 %v2886_v46, 16 }
  0xbd   : > { %v1130_v25 = vor.u32 %v1128_v17, %v1126_v60 }
  0xbf   : > { %v1134_v32 = vsel %vm632_vm2, %v1130_v25, %v1133_v26 }
  0xc0   : > { %v512_v43 = vpop.f32.mrf.mxu0  ;;  %v602_v44 = vpop.f32.mrf.mxu1 }
  0xc1   : > { %v603_v45 = vadd.f32 %v602_v44, %v512_v43  ;;  %2669 = vmatmul.msk.bf16.gmra.mxu2 %vm478_vm1, %v1120_v41  ;;  %2676 = vmatmul.msk.bf16.gmra.mxu3 %vm478_vm1, %v1235_v42  ;;  %v2163_v41 = vsel %vm497_vm0, %v2854_v38, 0  ;;  %v1909_v42 = vsel %vm497_vm0, %v2780_v39, 0  ;;  %v2290_v43 = vsel %vm497_vm0, %v2861_v40, 0 }
  0xc2   : > { %2172 = vmatpush.bf16.msrb.mxu2 %v2163_v41  ;;  %1918 = vmatpush.bf16.msrb.mxu0 %v1909_v42 }
  0xc3   : > { %2299 = vmatpush.bf16.msrb.mxu3 %v2290_v43 }
  0xc4   : > { %v704_v48 = vpop.f32.mrf.mxu2  ;;  %v819_v49 = vpop.f32.mrf.mxu3 }
  0xc5   : > { %v734_v50 = vadd.f32 %v704_v48, %v601_v36 }
  0xc7   : > { %v3214_v55 = vadd.f32 %v819_v49, %v734_v50  ;;  %v2823_v50 = vld [vmem:[%s3599_s1 + $0x1a] sm:$0x3] }
  0xc8   : > { %v515_v56 = vpop.f32.mrf.mxu0  ;;  %v605_v57 = vpop.f32.mrf.mxu1  ;;  %v2036_v52 = vsel %vm497_vm0, %v2823_v50, 0 }
  0xc9   : > { %v606_v58 = vadd.f32 %v605_v57, %v515_v56  ;;  %2045 = vmatpush.bf16.msrb.mxu1 %v2036_v52  ;;  %v2683_v56 = vld [vmem:[%s3110_s18 + $0x4] sm:$0xe]  ;;  %v2894_v57 = vld [vmem:[%s3110_s18 + $0x4] sm:$0xf0] }
  0xcb   : > { %2620 = vmatmul.msk.bf16.gmra.mxu0 %vm478_vm1, %v2885_v28  ;;  %2663 = vmatmul.msk.bf16.gmra.mxu1 %vm478_vm1, %v2891_v29  ;;  %v1248_v28 = vrot.slane %v1246_v20, 1 }
  0xcc   : > { %v706_v63 = vpop.f32.mrf.mxu2  ;;  %v821_v0 = vpop.f32.mrf.mxu3 }
  0xcd   : > { %v735_v1 = vadd.f32 %v706_v63, %v603_v45  ;;  %v1249_v33 = vsel %vm632_vm2, %v1245_v27, %v1248_v28  ;;  %v1137_v63 = vor.u32 %v1135_v53, %v1133_v26  ;;  %vm2420_vm2 = vsmask.f32 256 }
  0xcf   : > { %v3221_v5 = vadd.f32 %v821_v0, %v735_v1  ;;  %v1252_v0 = vor.u32 %v1250_v54, %v1248_v28  ;;  %v2684_v1 = vor.u32 %v2894_v57, %v2683_v56  ;;  %v2896_v56 = vld [vmem:[%s3110_s18 + $0x14] sm:$0xff] }
  0xd0   : > { %v517_v6 = vpop.f32.mrf.mxu0  ;;  %v607_v7 = vpop.f32.mrf.mxu1 }
  0xd1   : > { %v608_v11 = vadd.f32 %v607_v7, %v517_v6  ;;  %2670 = vmatmul.msk.bf16.gmra.mxu2 %vm478_vm1, %v1127_v2  ;;  %2677 = vmatmul.msk.bf16.gmra.mxu3 %vm478_vm1, %v1242_v3  ;;  %v3263_v2 = vld [vmem:[%s3110_s18 + $0x40] sm:$0xff]  ;;  %v1584_v10 = vshrl.u32 %v2684_v1, 16  ;;  %v1370_v18 = vrot.slane %v2684_v1, 1 }
  0xd2   : > { %v1722_v17 = vshll.u32 %v3263_v2, 16 }
  0xd3   : > { %v1586_v25 = vrot.slane %v1584_v10, 1  ;;  %v1372_v38 = vsel %vm1369_vm3, %v1370_v18, %v1371_v19 }
  0xd4   : > { %v709_v14 = vpop.f32.mrf.mxu2  ;;  %v824_v15 = vpop.f32.mrf.mxu3 }
  0xd5   : > { %v736_v16 = vadd.f32 %v709_v14, %v606_v58  ;;  %v2726_v58 = vld [vmem:[%s3110_s18 + $0x38] sm:$0xe] }
  0xd6   : > { %v2727_v3 = vor.u32 %v2900_v59, %v2726_v58  ;;  %v1601_v58 = vshrl.u32 %v2896_v56, 16  ;;  %v1604_v59 = vshll.u32 %v2896_v56, 16 }
  0xd7   : > { %v3228_v21 = vadd.f32 %v824_v15, %v736_v16  ;;  %v1719_v16 = vshrl.u32 %v3263_v2, 16 }
  0xd8   : > { %v520_v22 = vpop.f32.mrf.mxu0  ;;  %v610_v23 = vpop.f32.mrf.mxu1  ;;  %v1711_v14 = vshrl.u32 %v2727_v3, 16  ;;  %v1714_v15 = vshll.u32 %v2727_v3, 16  ;;  %v1497_v20 = vrot.slane %v2727_v3, 1  ;;  %v1603_v3 = vrot.slane %v1601_v58, 1 }
  0xd9   : > { %v611_v24 = vadd.f32 %v610_v23, %v520_v22  ;;  %v1498_v22 = vrot.slane %v3263_v2, 1 }
  0xdb   : > { %2621 = vmatmul.msk.bf16.gmra.mxu0 %vm478_vm1, %v2886_v46  ;;  %2664 = vmatmul.msk.bf16.gmra.mxu1 %vm478_vm1, %v2892_v47  ;;  %v1499_v39 = vsel %vm1369_vm3, %v1497_v20, %v1498_v22 }
  0xdc   : > { %v711_v29 = vpop.f32.mrf.mxu2  ;;  %v826_v30 = vpop.f32.mrf.mxu3 }
  0xdd   : > { %v737_v31 = vadd.f32 %v711_v29, %v608_v11  ;;  %v1587_v11 = vshll.u32 %v2684_v1, 16 }
  0xdf   : > { %v3234_v34 = vadd.f32 %v826_v30, %v737_v31  ;;  %v1589_v27 = vrot.slane %v1587_v11, 2  ;;  %v1713_v30 = vrot.slane %v1711_v14, 1  ;;  %v1716_v31 = vrot.slane %v1714_v15, 2 }
  0xe0   : > { %v522_v35 = vpop.f32.mrf.mxu0  ;;  %v612_v36 = vpop.f32.mrf.mxu1 }
  0xe1   : > { %v613_v37 = vadd.f32 %v612_v36, %v522_v35  ;;  %2671 = vmatmul.msk.bf16.gmra.mxu2 %vm478_vm1, %v1134_v32  ;;  %2678 = vmatmul.msk.bf16.gmra.mxu3 %vm478_vm1, %v1249_v33  ;;  %v1721_v32 = vrot.slane %v1719_v16, 1  ;;  %v1724_v33 = vrot.slane %v1722_v17, 2  ;;  %v1590_v41 = vor.u32 %v1589_v27, %v1586_v25  ;;  %v3306_v25 = vld [vmem:[%s3110_s18 + $0x50] sm:$0xff]  ;;  %v2897_v27 = vld [vmem:[%s3110_s18 + $0x1c] sm:$0xff] }
  0xe2   : > { %v1717_v43 = vor.u32 %v1716_v31, %v1713_v30  ;;  %v1613_v30 = vshll.u32 %v2897_v27, 16  ;;  %v1737_v31 = vshrl.u32 %v3306_v25, 16 }
  0xe4   : > { %v714_v44 = vpop.f32.mrf.mxu2  ;;  %v829_v45 = vpop.f32.mrf.mxu3 }
  0xe5   : > { %v738_v46 = vadd.f32 %v714_v44, %v611_v24  ;;  %v1725_v44 = vor.u32 %v1724_v33, %v1721_v32  ;;  %v1740_v32 = vshll.u32 %v3306_v25, 16  ;;  %v1375_v33 = vrot.slane %v2897_v27, 1 }
  0xe7   : > { %v3250_v47 = vadd.f32 %v829_v45, %v738_v46  ;;  %v1726_v50 = vsel %vm1582_vm4, %v1717_v43, %v1725_v44  ;;  %v1742_v43 = vrot.slane %v1740_v32, 2 }
  0xe8   : > { %v525_v48 = vpop.f32.mrf.mxu0  ;;  %v615_v49 = vpop.f32.mrf.mxu1 }
  0xe9   : > { %v616_v51 = vadd.f32 %v615_v49, %v525_v48 }
  0xeb   : > { %2622 = vmatmul.msk.bf16.gmra.mxu0 %vm478_vm1, %v2616_v12  ;;  %2665 = vmatmul.msk.bf16.gmra.mxu1 %vm478_vm1, %v2659_v13  ;;  %v1592_v12 = vshrl.u32 %v3268_v8, 16  ;;  %v1595_v13 = vshll.u32 %v3268_v8, 16 }
  0xec   : > { %v716_v60 = vpop.f32.mrf.mxu2  ;;  %v831_v61 = vpop.f32.mrf.mxu3 }
  0xed   : > { %v739_v62 = vadd.f32 %v716_v60, %v613_v37  ;;  %v1594_v28 = vrot.slane %v1592_v12, 1  ;;  %v1597_v29 = vrot.slane %v1595_v13, 2 }
  0xef   : > { %v3265_v4 = vadd.f32 %v831_v61, %v739_v62  ;;  %v1598_v42 = vor.u32 %v1597_v29, %v1594_v28  ;;  %v1373_v62 = vrot.slane %v2896_v56, 1  ;;  %v1610_v29 = vshrl.u32 %v2897_v27, 16 }
  0xf0   : > { %v527_v6 = vpop.f32.mrf.mxu0  ;;  %v617_v7 = vpop.f32.mrf.mxu1 }
  0xf1   : > { %v618_v9 = vadd.f32 %v617_v7, %v527_v6  ;;  %2672 = vmatmul.msk.bf16.gmra.mxu2 %vm478_vm1, %v1137_v63  ;;  %2679 = vmatmul.msk.bf16.gmra.mxu3 %vm478_vm1, %v1252_v0  ;;  %v1599_v49 = vsel %vm1582_vm4, %v1590_v41, %v1598_v42  ;;  %v1606_v6 = vrot.slane %v1604_v59, 2  ;;  %v1374_v12 = vsel %vm1369_vm3, %v1371_v19, %v1373_v62 }
  0xf2   : > { %v1615_v41 = vrot.slane %v1613_v30, 2  ;;  %v2905_v30 = vld [vmem:[%s3110_s18 + $0x60] sm:$0x30] }
  0xf3   : > { %v1607_v15 = vor.u32 %v1606_v6, %v1603_v3 }
  0xf4   : > { %v719_v23 = vpop.f32.mrf.mxu2  ;;  %v834_v24 = vpop.f32.mrf.mxu3 }
  0xf5   : > { %v740_v26 = vadd.f32 %v719_v23, %v616_v51  ;;  %v3287_v51 = vld [vmem:[%s3110_s18 + $0x48] sm:$0xff]  ;;  %v1608_v23 = vsel %vm1582_vm4, %v1598_v42, %v1607_v15  ;;  %v1739_v42 = vrot.slane %v1737_v31, 1 }
  0xf6   : > { %v1728_v60 = vshrl.u32 %v3287_v51, 16  ;;  %v1731_v61 = vshll.u32 %v3287_v51, 16  ;;  %v1500_v63 = vrot.slane %v3287_v51, 1 }
  0xf7   : > { %v3278_v35 = vadd.f32 %v834_v24, %v740_v26 }
  0xf8   : > { %v530_v36 = vpop.f32.mrf.mxu0  ;;  %v620_v37 = vpop.f32.mrf.mxu1  ;;  %v1730_v7 = vrot.slane %v1728_v60, 1  ;;  %v1733_v8 = vrot.slane %v1731_v61, 2  ;;  %v1501_v13 = vsel %vm1369_vm3, %v1498_v22, %v1500_v63  ;;  %v3326_v61 = vld [vmem:[%s3110_s18 + $0x58] sm:$0xff] }
  0xf9   : > { %v621_v40 = vadd.f32 %v620_v37, %v530_v36  ;;  %v1502_v36 = vrot.slane %v3306_v25, 1 }
  0xfa   : > { %v1734_v16 = vor.u32 %v1733_v8, %v1730_v7  ;;  %v1746_v7 = vshrl.u32 %v3326_v61, 16  ;;  %v1749_v8 = vshll.u32 %v3326_v61, 16 }
  0xfb   : > { %2705 = vmatmul.msk.bf16.vlgmr.msra.gmra.mxu0 %vm478_vm1, %v1372_v38  ;;  %2748 = vmatmul.msk.bf16.vlgmr.msra.gmra.mxu1 %vm478_vm1, %v1499_v39 }
  0xfc   : > { %v721_v45 = vpop.f32.mrf.mxu2  ;;  %v836_v46 = vpop.f32.mrf.mxu3  ;;  %v1735_v24 = vsel %vm1582_vm4, %v1725_v44, %v1734_v16 }
  0xfd   : > { %v741_v48 = vadd.f32 %v721_v45, %v618_v9 }
  0xff   : > { %v3289_v52 = vadd.f32 %v836_v46, %v741_v48  ;;  %v1376_v48 = vsel %vm1369_vm3, %v1373_v62, %v1375_v33 }
 0x100   : > { %v532_v53 = vpop.f32.mrf.mxu0  ;;  %v622_v54 = vpop.f32.mrf.mxu1 }
 0x101   : > { %v623_v57 = vadd.f32 %v622_v54, %v532_v53  ;;  %2755 = vmatmul.msk.bf16.vlgmr.msra.gmra.mxu2 %vm478_vm1, %v1599_v49  ;;  %2762 = vmatmul.msk.bf16.vlgmr.msra.gmra.mxu3 %vm478_vm1, %v1726_v50  ;;  %v1503_v49 = vsel %vm1369_vm3, %v1500_v63, %v1502_v36  ;;  %v1743_v54 = vor.u32 %v1742_v43, %v1739_v42 }
 0x103   : > { %v1744_v60 = vsel %vm1582_vm4, %v1734_v16, %v1743_v54  ;;  %v1748_v16 = vrot.slane %v1746_v7, 1 }
 0x104   : > { %v724_v0 = vpop.f32.mrf.mxu2  ;;  %v839_v1 = vpop.f32.mrf.mxu3 }
 0x105   : > { %v742_v2 = vadd.f32 %v724_v0, %v621_v40  ;;  %v1612_v40 = vrot.slane %v1610_v29, 1  ;;  %v3331_v0 = vld [vmem:[%s3110_s18 + $0x24] sm:$0xff]  ;;  %v2746_v29 = vld [vmem:[%s3110_s18 + $0x60] sm:$0xf] }
 0x106   : > { %v1622_v6 = vshll.u32 %v3331_v0, 16 }
 0x107   : > { %v3297_v9 = vadd.f32 %v839_v1, %v742_v2  ;;  %v1616_v53 = vor.u32 %v1615_v41, %v1612_v40  ;;  %v1619_v2 = vshrl.u32 %v3331_v0, 16  ;;  %v2747_v40 = vor.u32 %v2905_v30, %v2746_v29  ;;  %v2912_v29 = vld [vmem:[%s3110_s18 + $0xa0] sm:$0xf0]  ;;  %v2783_v30 = vld [vmem:[%s3110_s18 + $0x6c] sm:$0xe] }
 0x108   : > { %v535_v10 = vpop.f32.mrf.mxu0  ;;  %v625_v11 = vpop.f32.mrf.mxu1 }
 0x109   : > { %v626_v14 = vadd.f32 %v625_v11, %v535_v10  ;;  %v1617_v59 = vsel %vm1582_vm4, %v1607_v15, %v1616_v53  ;;  %v1377_v10 = vrot.slane %v3331_v0, 1  ;;  %v1504_v11 = vrot.slane %v3326_v61, 1 }
 0x10a   : > { %v1624_v15 = vrot.slane %v1622_v6, 2 }
 0x10b   : > { %2706 = vmatmul.msk.bf16.gmra.mxu0 %vm478_vm1, %v1374_v12  ;;  %2749 = vmatmul.msk.bf16.gmra.mxu1 %vm478_vm1, %v1501_v13  ;;  %v1505_v25 = vsel %vm1369_vm3, %v1502_v36, %v1504_v11 }
 0x10c   : > { %v726_v17 = vpop.f32.mrf.mxu2  ;;  %v841_v18 = vpop.f32.mrf.mxu3 }
 0x10d   : > { %v743_v20 = vadd.f32 %v726_v17, %v623_v57  ;;  %v1751_v17 = vrot.slane %v1749_v8, 2 }
 0x10f   : > { %v3308_v19 = vadd.f32 %v841_v18, %v743_v20 }
 0x110   : > { %v537_v26 = vpop.f32.mrf.mxu0  ;;  %v627_v22 = vpop.f32.mrf.mxu1 }
 0x111   : > { %v628_v28 = vadd.f32 %v627_v22, %v537_v26  ;;  %2756 = vmatmul.msk.bf16.gmra.mxu2 %vm478_vm1, %v1608_v23  ;;  %2763 = vmatmul.msk.bf16.gmra.mxu3 %vm478_vm1, %v1735_v24  ;;  %v1378_v24 = vsel %vm1369_vm3, %v1375_v33, %v1377_v10 }
 0x114   : > { %v729_v37 = vpop.f32.mrf.mxu2  ;;  %v844_v38 = vpop.f32.mrf.mxu3 }
 0x115   : > { %v744_v39 = vadd.f32 %v729_v37, %v626_v14  ;;  %v1621_v14 = vrot.slane %v1619_v2, 1  ;;  %v2703_v37 = vld [vmem:[%s3110_s18 + $0x2c] sm:$0xf] }
 0x117   : > { %v3316_v44 = vadd.f32 %v844_v38, %v744_v39  ;;  %v1625_v27 = vor.u32 %v1624_v15, %v1621_v14  ;;  %v2899_v38 = vld [vmem:[%s3110_s18 + $0x2c] sm:$0x30] }
 0x118   : > { %v936_v45 = vpop.f32.mrf.mxu0  ;;  %v1053_v46 = vpop.f32.mrf.mxu1  ;;  %v2704_v43 = vor.u32 %v2899_v38, %v2703_v37 }
 0x119   : > { %v966_v50 = vadd.f32 %v936_v45, %v3214_v55  ;;  %v1626_v33 = vsel %vm1582_vm4, %v1616_v53, %v1625_v27 }
 0x11a   : > { %v1379_v53 = vrot.slane %v2704_v43, 1 }
 0x11b   : > { %v1083_v51 = vadd.f32 %v1053_v46, %v966_v50  ;;  %2707 = vmatmul.msk.bf16.gmra.mxu0 %vm478_vm1, %v1376_v48  ;;  %2750 = vmatmul.msk.bf16.gmra.mxu1 %vm478_vm1, %v1503_v49  ;;  %v1628_v46 = vshrl.u32 %v2704_v43, 16  ;;  %v1631_v49 = vshll.u32 %v2704_v43, 16  ;;  %v1755_v50 = vshrl.u32 %v2747_v40, 16 }
 0x11c   : > { %v731_v56 = vpop.f32.mrf.mxu2  ;;  %v846_v57 = vpop.f32.mrf.mxu3 }
 0x11d   : > { %v745_v58 = vadd.f32 %v731_v56, %v628_v28  ;;  %v1752_v28 = vor.u32 %v1751_v17, %v1748_v16  ;;  %v1506_v56 = vrot.slane %v2747_v40, 1  ;;  %v1757_v61 = vrot.slane %v1755_v50, 1 }
 0x11f   : > { %v3328_v62 = vadd.f32 %v846_v57, %v745_v58  ;;  %v1753_v36 = vsel %vm1582_vm4, %v1743_v54, %v1752_v28  ;;  %v1507_v2 = vsel %vm1369_vm3, %v1504_v11, %v1506_v56 }
 0x120   : > { %v938_v63 = vpop.f32.mrf.mxu0  ;;  %v1055_v55 = vpop.f32.mrf.mxu1 }
 0x121   : > { %v967_v1 = vadd.f32 %v938_v63, %v3221_v5  ;;  %2757 = vmatmul.msk.bf16.gmra.mxu2 %vm478_vm1, %v1617_v59  ;;  %2764 = vmatmul.msk.bf16.gmra.mxu3 %vm478_vm1, %v1744_v60  ;;  %v1630_v59 = vrot.slane %v1628_v46, 1  ;;  %v1633_v60 = vrot.slane %v1631_v49, 2 }
 0x123   : > { %v1084_v3 = vadd.f32 %v1055_v55, %v967_v1  ;;  %v1380_v1 = vsel %vm1369_vm3, %v1377_v10, %v1379_v53  ;;  %v1634_v7 = vor.u32 %v1633_v60, %v1630_v59 }
 0x124   : > { %v1168_v12 = vpop.f32.mrf.mxu2  ;;  %v1283_v13 = vpop.f32.mrf.mxu3 }
 0x125   : > { %v1198_v5 = vadd.f32 %v1168_v12, %v1083_v51  ;;  %v1758_v51 = vshll.u32 %v2747_v40, 16  ;;  %v1635_v14 = vsel %vm1582_vm4, %v1625_v27, %v1634_v7 }
 0x127   : > { %v3342_v18 = vadd.f32 %v1283_v13, %v1198_v5  ;;  %v1760_v63 = vrot.slane %v1758_v51, 2 }
 0x128   : > { %v941_v20 = vpop.f32.mrf.mxu0  ;;  %v1058_v23 = vpop.f32.mrf.mxu1 }
 0x129   : > { %v968_v26 = vadd.f32 %v941_v20, %v3228_v21  ;;  %v1761_v8 = vor.u32 %v1760_v63, %v1757_v61 }
 0x12b   : > { %v1085_v22 = vadd.f32 %v1058_v23, %v968_v26  ;;  %2708 = vmatmul.msk.bf16.gmra.mxu0 %vm478_vm1, %v1378_v24  ;;  %2751 = vmatmul.msk.bf16.gmra.mxu1 %vm478_vm1, %v1505_v25  ;;  %v1762_v15 = vsel %vm1582_vm4, %v1752_v28, %v1761_v8 }
 0x12c   : > { %v1170_v31 = vpop.f32.mrf.mxu2  ;;  %v1285_v32 = vpop.f32.mrf.mxu3 }
 0x12d   : > { %v1199_v39 = vadd.f32 %v1170_v31, %v1084_v3  ;;  %v2906_v31 = vld [vmem:[%s3110_s18 + $0x6c] sm:$0xf0] }
 0x12f   : > { %v3355_v21 = vadd.f32 %v1285_v32, %v1199_v39 }
 0x130   : > { %v943_v41 = vpop.f32.mrf.mxu0  ;;  %v1060_v42 = vpop.f32.mrf.mxu1 }
 0x131   : > { %v969_v45 = vadd.f32 %v943_v41, %v3234_v34  ;;  %2758 = vmatmul.msk.bf16.gmra.mxu2 %vm478_vm1, %v1626_v33  ;;  %2765 = vmatmul.msk.bf16.gmra.mxu3 %vm478_vm1, %v1753_v36  ;;  %v2784_v33 = vor.u32 %v2906_v31, %v2783_v30  ;;  %v3384_v36 = vld [vmem:[%s3110_s18 + $0xa8] sm:$0xff]  ;;  %v2908_v31 = vld [vmem:[%s3110_s18 + $0x7c] sm:$0xff] }
 0x132   : > { %v2007_v59 = vrot.slane %v3384_v36, 1 }
 0x133   : > { %v1086_v48 = vadd.f32 %v1060_v42, %v969_v45  ;;  %v3389_v42 = vld [vmem:[%s3110_s18 + $0x74] sm:$0xff]  ;;  %v2092_v45 = vshrl.u32 %v2784_v33, 16  ;;  %v2095_v46 = vshll.u32 %v2784_v33, 16 }
 0x134   : > { %v1173_v54 = vpop.f32.mrf.mxu2  ;;  %v1288_v57 = vpop.f32.mrf.mxu3  ;;  %v2103_v49 = vshll.u32 %v3389_v42, 16 }
 0x135   : > { %v1200_v58 = vadd.f32 %v1173_v54, %v1085_v22  ;;  %v2230_v54 = vshll.u32 %v3384_v36, 16  ;;  %v2094_v63 = vrot.slane %v2092_v45, 1 }
 0x137   : > { %v3360_v55 = vadd.f32 %v1288_v57, %v1200_v58  ;;  %v1879_v57 = vrot.slane %v2784_v33, 1 }
 0x138   : > { %v946_v34 = vpop.f32.mrf.mxu0  ;;  %v1063_v0 = vpop.f32.mrf.mxu1 }
 0x139   : > { %v970_v3 = vadd.f32 %v946_v34, %v3250_v47 }
 0x13b   : > { %v1087_v6 = vadd.f32 %v1063_v0, %v970_v3  ;;  %2709 = vmatmul.msk.bf16.gmra.mxu0 %vm478_vm1, %v1380_v1  ;;  %2752 = vmatmul.msk.bf16.gmra.mxu1 %vm478_vm1, %v1507_v2  ;;  %v2097_v0 = vrot.slane %v2095_v46, 2  ;;  %v2105_v2 = vrot.slane %v2103_v49, 2 }
 0x13c   : > { %v1175_v12 = vpop.f32.mrf.mxu2  ;;  %v1290_v13 = vpop.f32.mrf.mxu3 }
 0x13d   : > { %v1201_v5 = vadd.f32 %v1175_v12, %v1086_v48  ;;  %v2100_v48 = vshrl.u32 %v3389_v42, 16 }
 0x13f   : > { %v3369_v16 = vadd.f32 %v1290_v13, %v1201_v5  ;;  %v2102_v1 = vrot.slane %v2100_v48, 1 }
 0x140   : > { %v948_v10 = vpop.f32.mrf.mxu0  ;;  %v1065_v11 = vpop.f32.mrf.mxu1 }
 0x141   : > { %v971_v47 = vadd.f32 %v948_v10, %v3265_v4  ;;  %2759 = vmatmul.msk.bf16.gmra.mxu2 %vm478_vm1, %v1635_v14  ;;  %2766 = vmatmul.msk.bf16.gmra.mxu3 %vm478_vm1, %v1762_v15  ;;  %v2826_v4 = vld [vmem:[%s3110_s18 + $0xa0] sm:$0xe] }
 0x142   : > { %v2827_v39 = vor.u32 %v2912_v29, %v2826_v4  ;;  %v3410_v4 = vld [vmem:[%s3110_s18 + $0xb0] sm:$0xff] }
 0x143   : > { %v1088_v17 = vadd.f32 %v1065_v11, %v971_v47  ;;  %v2098_v11 = vor.u32 %v2097_v0, %v2094_v63  ;;  %v2106_v47 = vor.u32 %v2105_v2, %v2102_v1  ;;  %v2236_v33 = vshrl.u32 %v3410_v4, 16 }
 0x144   : > { %v1178_v20 = vpop.f32.mrf.mxu2  ;;  %v1293_v23 = vpop.f32.mrf.mxu3  ;;  %v2219_v50 = vshrl.u32 %v2827_v39, 16  ;;  %v2006_v58 = vrot.slane %v2827_v39, 1 }
 0x145   : > { %v1202_v24 = vadd.f32 %v1178_v20, %v1087_v6 }
 0x146   : > { %v2221_v3 = vrot.slane %v2219_v50, 1  ;;  %v2008_v15 = vsel %vm1369_vm3, %v2006_v58, %v2007_v59 }
 0x147   : > { %v3374_v25 = vadd.f32 %v1293_v23, %v1202_v24 }
 0x148   : > { %v951_v26 = vpop.f32.mrf.mxu0  ;;  %v1068_v22 = vpop.f32.mrf.mxu1 }
 0x149   : > { %v972_v27 = vadd.f32 %v951_v26, %v3278_v35 }
 0x14b   : > { %v1089_v28 = vadd.f32 %v1068_v22, %v972_v27  ;;  %2710 = vmatmul.msk.bf16.gmra.mxu0 %vm478_vm1, %v1379_v53  ;;  %2753 = vmatmul.msk.bf16.gmra.mxu1 %vm478_vm1, %v1506_v56  ;;  %v2222_v53 = vshll.u32 %v2827_v39, 16  ;;  %v2227_v56 = vshrl.u32 %v3384_v36, 16  ;;  %v2107_v27 = vsel %vm1582_vm4, %v2098_v11, %v2106_v47 }
 0x14c   : > { %v1180_v32 = vpop.f32.mrf.mxu2  ;;  %v1295_v37 = vpop.f32.mrf.mxu3  ;;  %v2112_v39 = vshll.u32 %v2908_v31, 16  ;;  %v2239_v36 = vshll.u32 %v3410_v4, 16 }
 0x14d   : > { %v1203_v38 = vadd.f32 %v1180_v32, %v1088_v17  ;;  %v2224_v6 = vrot.slane %v2222_v53, 2 }
 0x14e   : > { %v2114_v48 = vrot.slane %v2112_v39, 2  ;;  %v2241_v49 = vrot.slane %v2239_v36, 2 }
 0x14f   : > { %v3386_v40 = vadd.f32 %v1295_v37, %v1203_v38  ;;  %v2225_v20 = vor.u32 %v2224_v6, %v2221_v3  ;;  %v2109_v37 = vshrl.u32 %v2908_v31, 16  ;;  %v2909_v6 = vld [vmem:[%s3110_s18 + $0x84] sm:$0xff] }
 0x150   : > { %v953_v35 = vpop.f32.mrf.mxu0  ;;  %v1070_v41 = vpop.f32.mrf.mxu1 }
 0x151   : > { %v973_v43 = vadd.f32 %v953_v35, %v3289_v52  ;;  %2760 = vmatmul.msk.bf16.gmra.mxu2 %vm478_vm1, %v1634_v7  ;;  %2767 = vmatmul.msk.bf16.gmra.mxu3 %vm478_vm1, %v1761_v8  ;;  %v1880_v52 = vrot.slane %v3389_v42, 1  ;;  %v2229_v7 = vrot.slane %v2227_v56, 1  ;;  %v2232_v8 = vrot.slane %v2230_v54, 2 }
 0x152   : > { %v1882_v35 = vrot.slane %v2908_v31, 1  ;;  %v2111_v46 = vrot.slane %v2109_v37, 1 }
 0x153   : > { %v1090_v51 = vadd.f32 %v1070_v41, %v973_v43  ;;  %v1881_v14 = vsel %vm1369_vm3, %v1879_v57, %v1880_v52  ;;  %v2233_v23 = vor.u32 %v2232_v8, %v2229_v7  ;;  %v2009_v41 = vrot.slane %v3410_v4, 1 }
 0x154   : > { %v1183_v60 = vpop.f32.mrf.mxu2  ;;  %v1298_v61 = vpop.f32.mrf.mxu3  ;;  %v1883_v56 = vsel %vm1369_vm3, %v1880_v52, %v1882_v35  ;;  %v3431_v52 = vld [vmem:[%s3110_s18 + $0xb8] sm:$0xff]  ;;  %v2118_v8 = vshrl.u32 %v2909_v6, 16 }
 0x155   : > { %v1204_v34 = vadd.f32 %v1183_v60, %v1089_v28  ;;  %v2234_v28 = vsel %vm1582_vm4, %v2225_v20, %v2233_v23  ;;  %v2010_v54 = vsel %vm1369_vm3, %v2007_v59, %v2009_v41  ;;  %v2115_v60 = vor.u32 %v2114_v48, %v2111_v46 }
 0x156   : > { %v2011_v11 = vrot.slane %v3431_v52, 1 }
 0x157   : > { %v3400_v12 = vadd.f32 %v1298_v61, %v1204_v34  ;;  %v2116_v1 = vsel %vm1582_vm4, %v2106_v47, %v2115_v60 }
 0x158   : > { %v956_v13 = vpop.f32.mrf.mxu0  ;;  %v1073_v5 = vpop.f32.mrf.mxu1 }
 0x159   : > { %v974_v10 = vadd.f32 %v956_v13, %v3297_v9 }
 0x15b   : > { %v1091_v17 = vadd.f32 %v1073_v5, %v974_v10  ;;  %2805 = vmatmul.msk.bf16.vlgmr.msrb.gmra.mxu0 %vm478_vm1, %v1881_v14  ;;  %2848 = vmatmul.msk.bf16.vlgmr.msrb.gmra.mxu1 %vm478_vm1, %v2008_v15  ;;  %v2121_v5 = vshll.u32 %v2909_v6, 16  ;;  %v2245_v14 = vshrl.u32 %v3431_v52, 16  ;;  %v2248_v15 = vshll.u32 %v3431_v52, 16 }
 0x15c   : > { %v1185_v24 = vpop.f32.mrf.mxu2  ;;  %v1300_v26 = vpop.f32.mrf.mxu3  ;;  %v1884_v10 = vrot.slane %v2909_v6, 1 }
 0x15d   : > { %v1205_v22 = vadd.f32 %v1185_v24, %v1090_v51  ;;  %v2123_v24 = vrot.slane %v2121_v5, 2  ;;  %v2917_v5 = vld [vmem:[%s3110_s18 + $0xc8] sm:$0x30] }
 0x15e   : > { %v1885_v4 = vsel %vm1369_vm3, %v1882_v35, %v1884_v10  ;;  %v3452_v35 = vld [vmem:[%s3110_s18 + $0xc0] sm:$0xff] }
 0x15f   : > { %v3412_v9 = vadd.f32 %v1300_v26, %v1205_v22  ;;  %v2250_v26 = vrot.slane %v2248_v15, 2 }
 0x160   : > { %v958_v29 = vpop.f32.mrf.mxu0  ;;  %v1075_v30 = vpop.f32.mrf.mxu1 }
 0x161   : > { %v975_v32 = vadd.f32 %v958_v29, %v3308_v19  ;;  %2855 = vmatmul.msk.bf16.vlgmr.msrb.gmra.mxu2 %vm478_vm1, %v2107_v27  ;;  %2862 = vmatmul.msk.bf16.vlgmr.msrb.gmra.mxu3 %vm478_vm1, %v2234_v28  ;;  %v2238_v19 = vrot.slane %v2236_v33, 1  ;;  %v2012_v29 = vsel %vm1369_vm3, %v2009_v41, %v2011_v11 }
 0x163   : > { %v1092_v38 = vadd.f32 %v1075_v30, %v975_v32  ;;  %v2242_v61 = vor.u32 %v2241_v49, %v2238_v19 }
 0x164   : > { %v1188_v42 = vpop.f32.mrf.mxu2  ;;  %v1303_v43 = vpop.f32.mrf.mxu3 }
 0x165   : > { %v1206_v45 = vadd.f32 %v1188_v42, %v1091_v17  ;;  %v2243_v2 = vsel %vm1582_vm4, %v2233_v23, %v2242_v61  ;;  %v2120_v23 = vrot.slane %v2118_v8, 1 }
 0x167   : > { %v3421_v50 = vadd.f32 %v1303_v43, %v1206_v45  ;;  %v2124_v32 = vor.u32 %v2123_v24, %v2120_v23  ;;  %v3457_v45 = vld [vmem:[%s3110_s18 + $0x8c] sm:$0xff] }
 0x168   : > { %v961_v51 = vpop.f32.mrf.mxu0  ;;  %v1078_v53 = vpop.f32.mrf.mxu1  ;;  %v2127_v48 = vshrl.u32 %v3457_v45, 16  ;;  %v2130_v49 = vshll.u32 %v3457_v45, 16 }
 0x169   : > { %v976_v57 = vadd.f32 %v961_v51, %v3316_v44  ;;  %v2125_v36 = vsel %vm1582_vm4, %v2115_v60, %v2124_v32  ;;  %v2254_v51 = vshrl.u32 %v3452_v35, 16 }
 0x16a   : > { %v2129_v60 = vrot.slane %v2127_v48, 1 }
 0x16b   : > { %v1093_v58 = vadd.f32 %v1078_v53, %v976_v57  ;;  %2806 = vmatmul.msk.bf16.gmra.mxu0 %vm478_vm1, %v1883_v56  ;;  %2849 = vmatmul.msk.bf16.gmra.mxu1 %vm478_vm1, %v2010_v54  ;;  %v2257_v53 = vshll.u32 %v3452_v35, 16  ;;  %v1886_v56 = vrot.slane %v3457_v45, 1  ;;  %v2013_v54 = vrot.slane %v3452_v35, 1 }
 0x16c   : > { %v1190_v63 = vpop.f32.mrf.mxu2  ;;  %v1305_v34 = vpop.f32.mrf.mxu3 }
 0x16d   : > { %v1207_v0 = vadd.f32 %v1190_v63, %v1092_v38  ;;  %v2256_v63 = vrot.slane %v2254_v51, 1  ;;  %v1887_v52 = vsel %vm1369_vm3, %v1884_v10, %v1886_v56 }
 0x16f   : > { %v3433_v59 = vadd.f32 %v1305_v34, %v1207_v0  ;;  %v2259_v34 = vrot.slane %v2257_v53, 2 }
 0x170   : > { %v963_v3 = vpop.f32.mrf.mxu0  ;;  %v1080_v44 = vpop.f32.mrf.mxu1 }
 0x171   : > { %v977_v7 = vadd.f32 %v963_v3, %v3328_v62  ;;  %2856 = vmatmul.msk.bf16.gmra.mxu2 %vm478_vm1, %v2116_v1  ;;  %2863 = vmatmul.msk.bf16.gmra.mxu3 %vm478_vm1, %v2243_v2  ;;  %v2247_v62 = vrot.slane %v2245_v14, 1  ;;  %v2014_v3 = vsel %vm1369_vm3, %v2011_v11, %v2013_v54  ;;  %v2260_v8 = vor.u32 %v2259_v34, %v2256_v63 }
 0x173   : > { %v1094_v13 = vadd.f32 %v1080_v44, %v977_v7  ;;  %v2251_v37 = vor.u32 %v2250_v26, %v2247_v62 }
 0x174   : > { %v1193_v47 = vpop.f32.mrf.mxu2  ;;  %v1308_v17 = vpop.f32.mrf.mxu3 }
 0x175   : > { %v1208_v20 = vadd.f32 %v1193_v47, %v1093_v58  ;;  %v2252_v42 = vsel %vm1582_vm4, %v2242_v61, %v2251_v37  ;;  %v2132_v61 = vrot.slane %v2130_v49, 2  ;;  %v2803_v47 = vld [vmem:[%s3110_s18 + $0x94] sm:$0xf]  ;;  %v2261_v11 = vsel %vm1582_vm4, %v2251_v37, %v2260_v8 }
 0x177   : > { %v3442_v22 = vadd.f32 %v1308_v17, %v1208_v20  ;;  %v2133_v7 = vor.u32 %v2132_v61, %v2129_v60  ;;  %v2911_v17 = vld [vmem:[%s3110_s18 + $0x94] sm:$0x30] }
 0x178   : > { %v1411_v27 = vpop.f32.mrf.mxu0  ;;  %v1538_v28 = vpop.f32.mrf.mxu1  ;;  %v2804_v26 = vor.u32 %v2911_v17, %v2803_v47 }
 0x179   : > { %v1441_v30 = vadd.f32 %v1411_v27, %v3342_v18  ;;  %v2134_v10 = vsel %vm1582_vm4, %v2124_v32, %v2133_v7 }
 0x17a   : > { %v1888_v32 = vrot.slane %v2804_v26, 1 }
 0x17b   : > { %v1568_v31 = vadd.f32 %v1538_v28, %v1441_v30  ;;  %2807 = vmatmul.msk.bf16.gmra.mxu0 %vm478_vm1, %v1885_v4  ;;  %2850 = vmatmul.msk.bf16.gmra.mxu1 %vm478_vm1, %v2012_v29  ;;  %v2136_v28 = vshrl.u32 %v2804_v26, 16  ;;  %v2139_v29 = vshll.u32 %v2804_v26, 16 }
 0x17c   : > { %v1195_v38 = vpop.f32.mrf.mxu2  ;;  %v1310_v39 = vpop.f32.mrf.mxu3 }
 0x17d   : > { %v1209_v33 = vadd.f32 %v1195_v38, %v1094_v13  ;;  %v2846_v13 = vld [vmem:[%s3110_s18 + $0xc8] sm:$0xf] }
 0x17e   : > { %v2847_v23 = vor.u32 %v2917_v5, %v2846_v13 }
 0x17f   : > { %v3454_v41 = vadd.f32 %v1310_v39, %v1209_v33 }
 0x180   : > { %v1413_v43 = vpop.f32.mrf.mxu0  ;;  %v1540_v18 = vpop.f32.mrf.mxu1  ;;  %v2263_v30 = vshrl.u32 %v2847_v23, 16  ;;  %v2015_v38 = vrot.slane %v2847_v23, 1 }
 0x181   : > { %v1442_v46 = vadd.f32 %v1413_v43, %v3355_v21  ;;  %2857 = vmatmul.msk.bf16.gmra.mxu2 %vm478_vm1, %v2125_v36  ;;  %2864 = vmatmul.msk.bf16.gmra.mxu3 %vm478_vm1, %v2252_v42  ;;  %v2138_v36 = vrot.slane %v2136_v28, 1  ;;  %v2141_v42 = vrot.slane %v2139_v29, 2 }
 0x182   : > { %v2265_v35 = vrot.slane %v2263_v30, 1  ;;  %v2016_v48 = vsel %vm1369_vm3, %v2013_v54, %v2015_v38 }
 0x183   : > { %v1569_v19 = vadd.f32 %v1540_v18, %v1442_v46  ;;  %v1889_v46 = vsel %vm1369_vm3, %v1886_v56, %v1888_v32  ;;  %v2142_v51 = vor.u32 %v2141_v42, %v2138_v36 }
 0x184   : > { %v1666_v57 = vpop.f32.mrf.mxu2  ;;  %v1793_v58 = vpop.f32.mrf.mxu3 }
 0x185   : > { %v1696_v21 = vadd.f32 %v1666_v57, %v1568_v31  ;;  %v2266_v31 = vshll.u32 %v2847_v23, 16  ;;  %v2143_v60 = vsel %vm1582_vm4, %v2133_v7, %v2142_v51 }
 0x187   : > { %v3468_v0 = vadd.f32 %v1793_v58, %v1696_v21  ;;  %v2268_v43 = vrot.slane %v2266_v31, 2 }
 0x188   : > { %v1416_v1 = vpop.f32.mrf.mxu0  ;;  %v1543_v2 = vpop.f32.mrf.mxu1 }
 0x189   : > { %v1443_v44 = vadd.f32 %v1416_v1, %v3360_v55  ;;  %v2269_v53 = vor.u32 %v2268_v43, %v2265_v35 }
 0x18b   : > { %v1570_v6 = vadd.f32 %v1543_v2, %v1443_v44  ;;  %2808 = vmatmul.msk.bf16.gmra.mxu0 %vm478_vm1, %v1887_v52  ;;  %2851 = vmatmul.msk.bf16.gmra.mxu1 %vm478_vm1, %v2014_v3  ;;  %v2270_v61 = vsel %vm1582_vm4, %v2260_v8, %v2269_v53 }
 0x18c   : > { %v1668_v14 = vpop.f32.mrf.mxu2  ;;  %v1795_v15 = vpop.f32.mrf.mxu3 }
 0x18d   : > { %v1697_v20 = vadd.f32 %v1668_v14, %v1569_v19 }
 0x18f   : > { %v3481_v55 = vadd.f32 %v1795_v15, %v1697_v20 }
 0x190   : > { %v1418_v24 = vpop.f32.mrf.mxu0  ;;  %v1545_v62 = vpop.f32.mrf.mxu1 }
 0x191   : > { %v1444_v27 = vadd.f32 %v1418_v24, %v3369_v16  ;;  %2858 = vmatmul.msk.bf16.gmra.mxu2 %vm478_vm1, %v2134_v10  ;;  %2865 = vmatmul.msk.bf16.gmra.mxu3 %vm478_vm1, %v2261_v11 }
 0x193   : > { %v1571_v4 = vadd.f32 %v1545_v62, %v1444_v27 }
 0x194   : > { %v1671_v37 = vpop.f32.mrf.mxu2  ;;  %v1798_v39 = vpop.f32.mrf.mxu3 }
 0x195   : > { %v1698_v33 = vadd.f32 %v1671_v37, %v1570_v6 }
 0x197   : > { %v3486_v18 = vadd.f32 %v1798_v39, %v1698_v33 }
 0x198   : > { %v1421_v16 = vpop.f32.mrf.mxu0  ;;  %v1548_v45 = vpop.f32.mrf.mxu1 }
 0x199   : > { %v1445_v19 = vadd.f32 %v1421_v16, %v3374_v25 }
 0x19b   : > { %v1572_v49 = vadd.f32 %v1548_v45, %v1445_v19  ;;  %2809 = vmatmul.msk.bf16.gmra.mxu0 %vm478_vm1, %v1889_v46  ;;  %2852 = vmatmul.msk.bf16.gmra.mxu1 %vm478_vm1, %v2016_v48 }
 0x19c   : > { %v1673_v57 = vpop.f32.mrf.mxu2  ;;  %v1800_v58 = vpop.f32.mrf.mxu3 }
 0x19d   : > { %v1699_v21 = vadd.f32 %v1673_v57, %v1571_v4 }
 0x19f   : > { %v3495_v63 = vadd.f32 %v1800_v58, %v1699_v21 }
 0x1a0   : > { %v1423_v56 = vpop.f32.mrf.mxu0  ;;  %v1550_v54 = vpop.f32.mrf.mxu1 }
 0x1a1   : > { %v1446_v25 = vadd.f32 %v1423_v56, %v3386_v40  ;;  %2859 = vmatmul.msk.bf16.gmra.mxu2 %vm478_vm1, %v2143_v60  ;;  %2866 = vmatmul.msk.bf16.gmra.mxu3 %vm478_vm1, %v2270_v61 }
 0x1a3   : > { %v1573_v34 = vadd.f32 %v1550_v54, %v1446_v25 }
 0x1a4   : > { %v1676_v1 = vpop.f32.mrf.mxu2  ;;  %v1803_v2 = vpop.f32.mrf.mxu3 }
 0x1a5   : > { %v1700_v52 = vadd.f32 %v1676_v1, %v1572_v49 }
 0x1a7   : > { %v3500_v3 = vadd.f32 %v1803_v2, %v1700_v52 }
 0x1a8   : > { %v1426_v44 = vpop.f32.mrf.mxu0  ;;  %v1553_v6 = vpop.f32.mrf.mxu1 }
 0x1a9   : > { %v1447_v7 = vadd.f32 %v1426_v44, %v3400_v12 }
 0x1ab   : > { %v1574_v8 = vadd.f32 %v1553_v6, %v1447_v7  ;;  %2810 = vmatmul.msk.bf16.gmra.mxu0 %vm478_vm1, %v1888_v32  ;;  %2853 = vmatmul.msk.bf16.gmra.mxu1 %vm478_vm1, %v2015_v38  ;;  %v3534_v7 = vld [vmem:[%s3600_s2] ss:$0 sm:$0xff] }
 0x1ac   : > { %v1678_v40 = vpop.f32.mrf.mxu2  ;;  %v1805_v13 = vpop.f32.mrf.mxu3 }
 0x1ad   : > { %v1701_v5 = vadd.f32 %v1678_v40, %v1573_v34 }
 0x1af   : > { %v3505_v14 = vadd.f32 %v1805_v13, %v1701_v5 }
 0x1b0   : > { %v1428_v15 = vpop.f32.mrf.mxu0  ;;  %v1555_v47 = vpop.f32.mrf.mxu1 }
 0x1b1   : > { %v1448_v17 = vadd.f32 %v1428_v15, %v3412_v9  ;;  %2860 = vmatmul.msk.bf16.gmra.mxu2 %vm478_vm1, %v2142_v51  ;;  %2867 = vmatmul.msk.bf16.gmra.mxu3 %vm478_vm1, %v2269_v53  ;;  %vm2419_vm1 = vcmask 122880  }
 0x1b2   : > { %vm2421_vm4 = vmand %vm2419_vm1, %vm2420_vm2 }
 0x1b3   : > { %v1575_v20 = vadd.f32 %v1555_v47, %v1448_v17 }
 0x1b4   : > { %v1681_v12 = vpop.f32.mrf.mxu2  ;;  %v1808_v10 = vpop.f32.mrf.mxu3 }
 0x1b5   : > { %v1702_v11 = vadd.f32 %v1681_v12, %v1574_v8 }
 0x1b7   : > { %v3510_v23 = vadd.f32 %v1808_v10, %v1702_v11 }
 0x1b8   : > { %v1431_v24 = vpop.f32.mrf.mxu0  ;;  %v1558_v62 = vpop.f32.mrf.mxu1 }
 0x1b9   : > { %v1449_v26 = vadd.f32 %v1431_v24, %v3421_v50 }
 0x1bb   : > { %v1576_v27 = vadd.f32 %v1558_v62, %v1449_v26 }
 0x1bc   : > { %v1683_v28 = vpop.f32.mrf.mxu2  ;;  %v1810_v4 = vpop.f32.mrf.mxu3 }
 0x1bd   : > { %v1703_v29 = vadd.f32 %v1683_v28, %v1575_v20 }
 0x1bf   : > { %v3513_v30 = vadd.f32 %v1810_v4, %v1703_v29 }
 0x1c0   : > { %v1433_v9 = vpop.f32.mrf.mxu0  ;;  %v1560_v31 = vpop.f32.mrf.mxu1 }
 0x1c1   : > { %v1450_v32 = vadd.f32 %v1433_v9, %v3433_v59 }
 0x1c3   : > { %v1577_v38 = vadd.f32 %v1560_v31, %v1450_v32 }
 0x1c4   : > { %v1686_v37 = vpop.f32.mrf.mxu2  ;;  %v1813_v39 = vpop.f32.mrf.mxu3 }
 0x1c5   : > { %v1704_v33 = vadd.f32 %v1686_v37, %v1576_v27 }
 0x1c7   : > { %v3516_v36 = vadd.f32 %v1813_v39, %v1704_v33 }
 0x1c8   : > { %v1436_v42 = vpop.f32.mrf.mxu0  ;;  %v1563_v35 = vpop.f32.mrf.mxu1 }
 0x1c9   : > { %v1451_v50 = vadd.f32 %v1436_v42, %v3442_v22 }
 0x1cb   : > { %v1578_v43 = vadd.f32 %v1563_v35, %v1451_v50 }
 0x1cc   : > { %v1688_v16 = vpop.f32.mrf.mxu2  ;;  %v1815_v45 = vpop.f32.mrf.mxu3 }
 0x1cd   : > { %v1705_v46 = vadd.f32 %v1688_v16, %v1577_v38 }
 0x1cf   : > { %v3519_v48 = vadd.f32 %v1815_v45, %v1705_v46 }
 0x1d0   : > { %v1438_v19 = vpop.f32.mrf.mxu0  ;;  %v1565_v49 = vpop.f32.mrf.mxu1 }
 0x1d1   : > { %v1452_v59 = vadd.f32 %v1438_v19, %v3454_v41 }
 0x1d3   : > { %v1579_v51 = vadd.f32 %v1565_v49, %v1452_v59 }
 0x1d4   : > { %v1691_v53 = vpop.f32.mrf.mxu2  ;;  %v1818_v57 = vpop.f32.mrf.mxu3 }
 0x1d5   : > { %v1706_v58 = vadd.f32 %v1691_v53, %v1578_v43 }
 0x1d7   : > { %v3522_v21 = vadd.f32 %v1818_v57, %v1706_v58 }
 0x1d8   : > { %v1920_v60 = vpop.f32.mrf.mxu0  ;;  %v2047_v22 = vpop.f32.mrf.mxu1 }
 0x1d9   : > { %v1950_v25 = vadd.f32 %v1920_v60, %v3468_v0 }
 0x1db   : > { %v2077_v41 = vadd.f32 %v2047_v22, %v1950_v25 }
 0x1dc   : > { %v1693_v61 = vpop.f32.mrf.mxu2  ;;  %v1820_v56 = vpop.f32.mrf.mxu3 }
 0x1dd   : > { %v1707_v54 = vadd.f32 %v1693_v61, %v1579_v51 }
 0x1df   : > { %v3525_v34 = vadd.f32 %v1820_v56, %v1707_v54 }
 0x1e0   : > { %v1922_v1 = vpop.f32.mrf.mxu0  ;;  %v2049_v2 = vpop.f32.mrf.mxu1 }
 0x1e1   : > { %v1951_v8 = vadd.f32 %v1922_v1, %v3481_v55 }
 0x1e3   : > { %v2078_v15 = vadd.f32 %v2049_v2, %v1951_v8 }
 0x1e4   : > { %v2174_v52 = vpop.f32.mrf.mxu2  ;;  %v2301_v44 = vpop.f32.mrf.mxu3 }
 0x1e5   : > { %v2204_v6 = vadd.f32 %v2174_v52, %v2077_v41 }
 0x1e7   : > { %v2331_v0 = vadd.f32 %v2301_v44, %v2204_v6 }
 0x1e8   : > { %v1925_v40 = vpop.f32.mrf.mxu0  ;;  %v2052_v13 = vpop.f32.mrf.mxu1 }
 0x1e9   : > { %v2347_v5 = vadd.f32 %v3534_v7, %v2331_v0  ;;  %v1952_v11 = vadd.f32 %v1925_v40, %v3486_v18 }
 0x1eb   : > { %vm2359_vm5 = vcmp.ge.f32.partialorder %v2347_v5, 0.0  ;;  %v2371_v47 = vmul.f32 0.2, %v2347_v5  ;;  %v2079_v28 = vadd.f32 %v2052_v13, %v1952_v11 }
 0x1ec   : > { %v2176_v17 = vpop.f32.mrf.mxu2  ;;  %v2303_v20 = vpop.f32.mrf.mxu3 }
 0x1ed   : > { %v2383_v12 = vsel %vm2359_vm5, %v2347_v5, %v2371_v47  ;;  %v2205_v55 = vadd.f32 %v2176_v17, %v2078_v15 }
 0x1ee   : > { %v2395_v10 = vpack.c.bf16 %v2383_v12, %v2383_v12 }
 0x1ef   : > { %v2332_v24 = vadd.f32 %v2303_v20, %v2205_v55 }
 0x1f0   : > { %v1927_v62 = vpop.f32.mrf.mxu0  ;;  %v2054_v26 = vpop.f32.mrf.mxu1  ;;  %2408 = vst.msk [vmem:[%s3541_s22] sm:$0xf] %vm2407_vm6, %v2395_v10 }
 0x1f1   : > { %v2348_v27 = vadd.f32 %v3534_v7, %v2332_v24  ;;  %v1953_v37 = vadd.f32 %v1927_v62, %v3495_v63 }
 0x1f3   : > { %vm2360_vm7 = vcmp.ge.f32.partialorder %v2348_v27, 0.0  ;;  %v2372_v4 = vmul.f32 0.2, %v2348_v27  ;;  %v2080_v35 = vadd.f32 %v2054_v26, %v1953_v37 }
 0x1f4   : > { %v2179_v29 = vpop.f32.mrf.mxu2  ;;  %v2306_v9 = vpop.f32.mrf.mxu3 }
 0x1f5   : > { %v2384_v31 = vsel %vm2360_vm7, %v2348_v27, %v2372_v4  ;;  %v2206_v32 = vadd.f32 %v2179_v29, %v2079_v28 }
 0x1f6   : > { %v2396_v38 = vpack.c.bf16 %v2384_v31, %v2384_v31 }
 0x1f7   : > { %v2333_v39 = vadd.f32 %v2306_v9, %v2206_v32 }
 0x1f8   : > { %v1930_v18 = vpop.f32.mrf.mxu0  ;;  %v2057_v33 = vpop.f32.mrf.mxu1  ;;  %2409 = vst.msk [vmem:[%s3541_s22 + $0x4] sm:$0xf] %vm2407_vm6, %v2396_v38 }
 0x1f9   : > { %v2349_v42 = vadd.f32 %v3534_v7, %v2333_v39  ;;  %v1954_v49 = vadd.f32 %v1930_v18, %v3500_v3 }
 0x1fb   : > { %vm2361_vm8 = vcmp.ge.f32.partialorder %v2349_v42, 0.0  ;;  %v2373_v50 = vmul.f32 0.2, %v2349_v42  ;;  %v2081_v57 = vadd.f32 %v2057_v33, %v1954_v49 }
 0x1fc   : > { %v2181_v43 = vpop.f32.mrf.mxu2  ;;  %v2308_v16 = vpop.f32.mrf.mxu3 }
 0x1fd   : > { %v2385_v45 = vsel %vm2361_vm8, %v2349_v42, %v2373_v50  ;;  %v2207_v46 = vadd.f32 %v2181_v43, %v2080_v35 }
 0x1fe   : > { %v2397_v19 = vpack.c.bf16 %v2385_v45, %v2385_v45 }
 0x1ff   : > { %v2334_v59 = vadd.f32 %v2308_v16, %v2207_v46 }
 0x200   : > { %v1932_v63 = vpop.f32.mrf.mxu0  ;;  %v2059_v51 = vpop.f32.mrf.mxu1  ;;  %2410 = vst.msk [vmem:[%s3541_s22 + $0x8] sm:$0xf] %vm2407_vm6, %v2397_v19 }
 0x201   : > { %v2350_v53 = vadd.f32 %v3534_v7, %v2334_v59  ;;  %v1955_v25 = vadd.f32 %v1932_v63, %v3505_v14 }
 0x203   : > { %vm2362_vm9 = vcmp.ge.f32.partialorder %v2350_v53, 0.0  ;;  %v2374_v58 = vmul.f32 0.2, %v2350_v53  ;;  %v2082_v52 = vadd.f32 %v2059_v51, %v1955_v25 }
 0x204   : > { %v2184_v60 = vpop.f32.mrf.mxu2  ;;  %v2311_v22 = vpop.f32.mrf.mxu3 }
 0x205   : > { %v2386_v61 = vsel %vm2362_vm9, %v2350_v53, %v2374_v58  ;;  %v2208_v56 = vadd.f32 %v2184_v60, %v2081_v57 }
 0x206   : > { %v2398_v54 = vpack.c.bf16 %v2386_v61, %v2386_v61 }
 0x207   : > { %v2335_v1 = vadd.f32 %v2311_v22, %v2208_v56 }
 0x208   : > { %v1935_v3 = vpop.f32.mrf.mxu0  ;;  %v2062_v2 = vpop.f32.mrf.mxu1  ;;  %2411 = vst.msk [vmem:[%s3541_s22 + $0xc] sm:$0xf] %vm2407_vm6, %v2398_v54 }
 0x209   : > { %v2351_v41 = vadd.f32 %v3534_v7, %v2335_v1  ;;  %v1956_v5 = vadd.f32 %v1935_v3, %v3510_v23 }
 0x20b   : > { %vm2363_vm10 = vcmp.ge.f32.partialorder %v2351_v41, 0.0  ;;  %v2375_v44 = vmul.f32 0.2, %v2351_v41  ;;  %v2083_v20 = vadd.f32 %v2062_v2, %v1956_v5 }
 0x20c   : > { %v2186_v6 = vpop.f32.mrf.mxu2  ;;  %v2313_v8 = vpop.f32.mrf.mxu3 }
 0x20d   : > { %v2387_v0 = vsel %vm2363_vm10, %v2351_v41, %v2375_v44  ;;  %v2209_v40 = vadd.f32 %v2186_v6, %v2082_v52 }
 0x20e   : > { %v2399_v13 = vpack.c.bf16 %v2387_v0, %v2387_v0 }
 0x20f   : > { %v2336_v15 = vadd.f32 %v2313_v8, %v2209_v40 }
 0x210   : > { %v1937_v14 = vpop.f32.mrf.mxu0  ;;  %v2064_v47 = vpop.f32.mrf.mxu1  ;;  %2412 = vst.msk [vmem:[%s3541_s22 + $0x10] sm:$0xf] %vm2407_vm6, %v2399_v13 }
 0x211   : > { %v2352_v17 = vadd.f32 %v3534_v7, %v2336_v15  ;;  %v1957_v26 = vadd.f32 %v1937_v14, %v3513_v30 }
 0x213   : > { %vm2364_vm11 = vcmp.ge.f32.partialorder %v2352_v17, 0.0  ;;  %v2376_v12 = vmul.f32 0.2, %v2352_v17  ;;  %v2084_v29 = vadd.f32 %v2064_v47, %v1957_v26 }
 0x214   : > { %v2189_v55 = vpop.f32.mrf.mxu2  ;;  %v2316_v10 = vpop.f32.mrf.mxu3 }
 0x215   : > { %v2388_v11 = vsel %vm2364_vm11, %v2352_v17, %v2376_v12  ;;  %v2210_v24 = vadd.f32 %v2189_v55, %v2083_v20 }
 0x216   : > { %v2400_v62 = vpack.c.bf16 %v2388_v11, %v2388_v11 }
 0x217   : > { %v2337_v27 = vadd.f32 %v2316_v10, %v2210_v24 }
 0x218   : > { %v1940_v23 = vpop.f32.mrf.mxu0  ;;  %2413 = vst.msk [vmem:[%s3541_s22 + $0x14] sm:$0xf] %vm2407_vm6, %v2400_v62  ;;  %v2067_v4 = vpop.f32.mrf.mxu1  ;;  %v2422_v62 = vld [vmem:[%s3541_s22 + $0x2c] sm:$0x1] }
 0x219   : > { %v2353_v28 = vadd.f32 %v3534_v7, %v2337_v27  ;;  %v1958_v18 = vadd.f32 %v1940_v23, %v3516_v36 }
 0x21b   : > { %vm2365_vm12 = vcmp.ge.f32.partialorder %v2353_v28, 0.0  ;;  %v2377_v9 = vmul.f32 0.2, %v2353_v28  ;;  %v2085_v35 = vadd.f32 %v2067_v4, %v1958_v18 }
 0x21c   : > { %v2191_v31 = vpop.f32.mrf.mxu2  ;;  %v2318_v32 = vpop.f32.mrf.mxu3 }
 0x21d   : > { %v2389_v38 = vsel %vm2365_vm12, %v2353_v28, %v2377_v9  ;;  %v2211_v37 = vadd.f32 %v2191_v31, %v2084_v29 }
 0x21e   : > { %v2401_v39 = vpack.c.bf16 %v2389_v38, %v2389_v38 }
 0x21f   : > { %v2338_v30 = vadd.f32 %v2318_v32, %v2211_v37 }
 0x220   : > { %v1942_v33 = vpop.f32.mrf.mxu0  ;;  %2414 = vst.msk [vmem:[%s3541_s22 + $0x18] sm:$0xf] %vm2407_vm6, %v2401_v39  ;;  %v2069_v43 = vpop.f32.mrf.mxu1 }
 0x221   : > { %v2354_v42 = vadd.f32 %v3534_v7, %v2338_v30  ;;  %v1959_v59 = vadd.f32 %v1942_v33, %v3519_v48 }
 0x223   : > { %vm2366_vm13 = vcmp.ge.f32.partialorder %v2354_v42, 0.0  ;;  %v2378_v50 = vmul.f32 0.2, %v2354_v42  ;;  %v2086_v53 = vadd.f32 %v2069_v43, %v1959_v59 }
 0x224   : > { %v2194_v16 = vpop.f32.mrf.mxu2  ;;  %v2321_v45 = vpop.f32.mrf.mxu3 }
 0x225   : > { %v2390_v46 = vsel %vm2366_vm13, %v2354_v42, %v2378_v50  ;;  %v2212_v19 = vadd.f32 %v2194_v16, %v2085_v35 }
 0x226   : > { %v2402_v49 = vpack.c.bf16 %v2390_v46, %v2390_v46 }
 0x227   : > { %v2339_v36 = vadd.f32 %v2321_v45, %v2212_v19 }
 0x228   : > { %2415 = vst.msk [vmem:[%s3541_s22 + $0x1c] sm:$0xf] %vm2407_vm6, %v2402_v49  ;;  %v1945_v51 = vpop.f32.mrf.mxu0  ;;  %v2072_v54 = vpop.f32.mrf.mxu1 }
 0x229   : > { %v2355_v63 = vadd.f32 %v3534_v7, %v2339_v36  ;;  %v1960_v25 = vadd.f32 %v1945_v51, %v3522_v21 }
 0x22b   : > { %vm2367_vm14 = vcmp.ge.f32.partialorder %v2355_v63, 0.0  ;;  %v2379_v57 = vmul.f32 0.2, %v2355_v63  ;;  %v2087_v3 = vadd.f32 %v2072_v54, %v1960_v25 }
 0x22c   : > { %v2196_v58 = vpop.f32.mrf.mxu2  ;;  %v2323_v60 = vpop.f32.mrf.mxu3 }
 0x22d   : > { %v2391_v22 = vsel %vm2367_vm14, %v2355_v63, %v2379_v57  ;;  %v2213_v61 = vadd.f32 %v2196_v58, %v2086_v53 }
 0x22e   : > { %v2403_v56 = vpack.c.bf16 %v2391_v22, %v2391_v22 }
 0x22f   : > { %v2340_v48 = vadd.f32 %v2323_v60, %v2213_v61 }
 0x230   : > { %2416 = vst.msk [vmem:[%s3541_s22 + $0x20] sm:$0xf] %vm2407_vm6, %v2403_v56  ;;  %v1947_v41 = vpop.f32.mrf.mxu0  ;;  %v2074_v21 = vpop.f32.mrf.mxu1 }
 0x231   : > { %v2356_v1 = vadd.f32 %v3534_v7, %v2340_v48  ;;  %v1961_v40 = vadd.f32 %v1947_v41, %v3525_v34 }
 0x233   : > { %vm2368_vm15 = vcmp.ge.f32.partialorder %v2356_v1, 0.0  ;;  %v2380_v2 = vmul.f32 0.2, %v2356_v1  ;;  %v2088_v15 = vadd.f32 %v2074_v21, %v1961_v40 }
 0x234   : > { %v2199_v52 = vpop.f32.mrf.mxu2  ;;  %v2326_v44 = vpop.f32.mrf.mxu3 }
 0x235   : > { %v2392_v6 = vsel %vm2368_vm15, %v2356_v1, %v2380_v2  ;;  %v2214_v8 = vadd.f32 %v2199_v52, %v2087_v3 }
 0x236   : > { %v2404_v0 = vpack.c.bf16 %v2392_v6, %v2392_v6 }
 0x237   : > { %v2341_v13 = vadd.f32 %v2326_v44, %v2214_v8 }
 0x238   : > { %2417 = vst.msk [vmem:[%s3541_s22 + $0x24] sm:$0xf] %vm2407_vm6, %v2404_v0 }
 0x239   : > { %v2357_v5 = vadd.f32 %v3534_v7, %v2341_v13 }
 0x23b   : > { %vm2369_vm0 = vcmp.ge.f32.partialorder %v2357_v5, 0.0  ;;  %v2381_v14 = vmul.f32 0.2, %v2357_v5 }
 0x23c   : > { %v2201_v47 = vpop.f32.mrf.mxu2  ;;  %v2328_v55 = vpop.f32.mrf.mxu3 }
 0x23d   : > { %v2393_v17 = vsel %vm2369_vm0, %v2357_v5, %v2381_v14  ;;  %v2215_v20 = vadd.f32 %v2201_v47, %v2088_v15 }
 0x23e   : > { %v2405_v12 = vpack.c.bf16 %v2393_v17, %v2393_v17 }
 0x23f   : > { %v2342_v10 = vadd.f32 %v2328_v55, %v2215_v20 }
 0x240   : > { %2418 = vst.msk [vmem:[%s3541_s22 + $0x28] sm:$0xf] %vm2407_vm6, %v2405_v12 }
 0x241   : > { %v2358_v34 = vadd.f32 %v3534_v7, %v2342_v10 }
 0x243   : > { %vm2370_vm3 = vcmp.ge.f32.partialorder %v2358_v34, 0.0  ;;  %v2382_v11 = vmul.f32 0.2, %v2358_v34 }
 0x245   : > { %v2394_v24 = vsel %vm2370_vm3, %v2358_v34, %v2382_v11 }
 0x246   : > { %v2406_v26 = vpack.c.bf16 %v2394_v24, %v2394_v24 }
 0x248   : > { %v2423_v27 = vsel %vm2421_vm4, %v2406_v26, %v2422_v62 }
 0x249   : > { %2424 = vst [vmem:[%s3541_s22 + $0x2c] sm:$0x1] %v2423_v27 }
 0x24a PF: > { %p10_p9 = scmp.ge.s32.totalorder %s3008_s16, 4   ;;  %s3602_s12 = smov %s2965_s13 }
 0x24b   : > { %s3603_s13 = smov %s3017_s19  ;;  %s3604_s14 = smov %s3008_s16 }
 0x24c   :  { %12 = sbr.rel (!%p10_p9) target bundleno = 2 (0x2), region = 126 }

// kernel: nlayer_discriminator_forward.7
= control target key start
LH: loop header
LB: loop body
LE: loop exit
PB: predicated region body
PF: predicated region fallthrough
CT: control target
= control target key end

     0   :  { %s1550_s18 = smov 0   ;;  %s1552_s19 = smov 0   ;;  %s1751_s0 = inlined_call_operand.vmem [shape: bf16[4,2,16,32], index: 0, kind: input, shape index: {}]   ;;  %s1752_s1 = inlined_call_operand.vmem [shape: bf16[16,32,64], index: 1, kind: input, shape index: {}]   ;;  %s1753_s2 = inlined_call_operand.vmem [shape: f32[11,1], index: 2, kind: input, shape index: {}]   ;;  %s1754_s3 = inlined_call_operand.vmem [shape: bf16[2,11,64], index: 3, kind: output, shape index: {0}]   ;;  %s1755_s4 = inlined_call_operand.vmem [shape: f32[2,1,64], index: 4, kind: output, shape index: {1}]   ;;  %s1756_s5 = inlined_call_operand.vmem [shape: f32[2,1,64], index: 5, kind: output, shape index: {2}]  }
   0x1   :  { %s1554_s20 = smov 0  }
   0x2 LB: > { %s1166_s21 = sadd.s32 4294967295, %s1517_s20   ;;  %s1567_s22 = sadd.s32 1, %s1517_s20   ;;  %s1517_s20 = sphi %s1554_s20, %s1759_s20   ;;  %s1513_s19 = sphi %s1552_s19, %s1758_s19   ;;  %s1509_s18 = sphi %s1550_s18, %s1757_s18  }
   0x3   : > { %s20_s23 = ssub.s32 %s1517_s20, %s1567_s22  ;;  %s23_s24 = sadd.s32 1, %s1513_s19 }
   0x4   : > { %p21_p0 = scmp.eq.s32.totalorder %s20_s23, 0  ;;  %p30_p1 = scmp.ne.s32.totalorder %s1513_s19, %s1509_s18 }
   0x5   : > { %p31_p2 = scmp.eq.s32.totalorder %s1517_s20, 0  ;;  %p1169_p4 = scmp.ge.s32.totalorder %s1517_s20, 2 }
   0x6   : > { %s1576_s25 = scalar_select %p21_p0, %s1513_s19, %s23_s24  }
   0x7   : > { %p32_p3 = por %p31_p2, %p30_p1  ;;  %182 = sbr.rel (%p1169_p4) target bundleno = 20 (0x14), region = 24 }
   0xc   : > { %185 = sbr.rel (!%p32_p3) target bundleno = 20 (0x14), region = 28  ;;  %s187_s26 = sand.u32 (%p32_p3), 1, %s1513_s19  }
   0xd   : > { %s1427_s27 = sshll.u32 (%p32_p3), %s1517_s20, 3  ;;  %s1170_s28 = sshll.u32 (%p32_p3), %s187_s26, 5 }
   0xe   : > { %s192_s6 = scalar_lea.vmem (%p32_p3), %s1751_s0, %s1427_s27  ;;  %s189_s7 = scalar_lea.vmem (%p32_p3), [#allocation2], %s1170_s28 }
   0xf   : > { %v209_v0 = vld [vmem:[%s192_s6] sm:$0xff] (%p32_p3)   ;;  %v213_v1 = vld [vmem:[%s192_s6 + $0x10] sm:$0xff] (%p32_p3)  }
  0x10   : > { %v217_v2 = vld [vmem:[%s192_s6 + $0x20] sm:$0xff] (%p32_p3)   ;;  %210 = vst [vmem:[%s189_s7] sm:$0xff] (%p32_p3), %v209_v0   ;;  %v221_v3 = vld [vmem:[%s192_s6 + $0x30] sm:$0xff] (%p32_p3)  }
  0x11   : > { %214 = vst [vmem:[%s189_s7 + $0x8] sm:$0xff] %v213_v1  }
  0x12   : > { %218 = vst [vmem:[%s189_s7 + $0x10] sm:$0xff] %v217_v2  }
  0x13   : > { %222 = vst [vmem:[%s189_s7 + $0x18] sm:$0xff] %v221_v3  }
  0x14 PF: > { %p1173_p5 = scmp.ge.s32.totalorder %s1517_s20, 1  ;;  %p263_p6 = scmp.lt.s32.totalorder %s1517_s20, 3 }
  0x16   : > { %p264_p7 = pnand %p1173_p5, %p263_p6 }
  0x17   : > { %s270_s14 = sand.u32 (!%p264_p7), 1, %s1509_s18   ;;  %p303_p8 = scmp.lt.s32.totalorder (!%p264_p7), %s1166_s21, 1 }
  0x18   : > { %267 = sbr.rel (%p264_p7) target bundleno = 253 (0xfd), region = 69  ;;  %s1174_s24 = sshll.u32 (!%p264_p7), %s270_s14, 5 }
  0x19   : > { %s1611_s6 = scalar_lea.vmem (!%p264_p7), [#allocation2], %s1174_s24 }
  0x1d   : > { %v1434_v4 = vld [vmem:[%s1752_s1 + $0x18] sm:$0xff]  ;;  %v1431_v5 = vld [vmem:[%s1752_s1 + $0x8] sm:$0xff]  ;;  %v1433_v8 = vld [vmem:[%s1752_s1 + $0x10] sm:$0xff]  ;;  %vm346_vm0 = vcmask 261120   ;;  %s1761_s21 = smov (!%p303_p8, %s1166_s21), 1  ;;  %vm1008_vm1 = vcmask 519168  }
  0x1e   : > { %v1436_v6 = vld [vmem:[%s1752_s1 + $0x28] sm:$0xff]  ;;  %v1438_v7 = vld [vmem:[%s1752_s1 + $0x38] sm:$0xff]  ;;  %356 = vmatpush.bf16.msra.mxu0 %v1434_v4  ;;  %390 = vmatpush.bf16.msra.mxu1 %v1431_v5  ;;  %v1430_v9 = vld [vmem:[%s1752_s1] sm:$0xff]  ;;  %vm1010_vm2 = vcmask 517120   ;;  %vm1011_vm3 = vsmask.f32 1280  ;;  %s310_s30 = scalar_lea.vmem %s1755_s4, %s1761_s21  ;;  %s313_s9 = scalar_lea.vmem %s1756_s5, %s1761_s21 }
  0x1f   : > { %v1435_v10 = vld [vmem:[%s1752_s1 + $0x20] sm:$0xff]  ;;  %v1437_v11 = vld [vmem:[%s1752_s1 + $0x30] sm:$0xff]  ;;  %430 = vmatpush.bf16.msra.mxu2 %v1436_v6  ;;  %472 = vmatpush.bf16.msra.mxu3 %v1438_v7  ;;  %v1185_v12 = vld [vmem:[%s1611_s6 + $0x8] sm:$0xf]  ;;  %v1519_v7 = vmov 0   ;;  %vm1030_vm4 = vcmask 523264  }
  0x20   : > { %v1432_v13 = vld [vmem:[%s1611_s6 + $0x8] sm:$0x30]  ;;  %v1198_v14 = vld [vmem:[%s1611_s6] sm:$0xf]  ;;  %v1429_v16 = vld [vmem:[%s1611_s6] sm:$0x30]  ;;  %1494 = vset.pattern.permute.xlu0 %v1519_v7 }
  0x21   : > { %v1186_v15 = vor.u32 %v1432_v13, %v1185_v12  ;;  %v1446_v17 = vld [vmem:[%s1752_s1 + $0x68] sm:$0xff]  ;;  %v1199_v19 = vor.u32 %v1429_v16, %v1198_v14  ;;  %v1448_v22 = vld [vmem:[%s1752_s1 + $0x78] sm:$0xff]  ;;  %v1445_v27 = vld [vmem:[%s1752_s1 + $0x60] sm:$0xff]  ;;  %vm1032_vm6 = vcmask 518144   ;;  %vm1041_vm7 = vcmask 516096  }
  0x22   : > { %v1441_v18 = vld [vmem:[%s1752_s1 + $0x48] sm:$0xff]  ;;  %357 = vmatpush.bf16.msra.mxu0 %v1433_v8  ;;  %391 = vmatpush.bf16.msra.mxu1 %v1430_v9  ;;  %v1444_v23 = vld [vmem:[%s1752_s1 + $0x58] sm:$0xff]  ;;  %v1440_v28 = vld [vmem:[%s1752_s1 + $0x40] sm:$0xff] }
  0x23   : > { %v445_v20 = vshrl.u32 %v1186_v15, 16  ;;  %v447_v21 = vshll.u32 %v1186_v15, 16  ;;  %431 = vmatpush.bf16.msra.mxu2 %v1435_v10  ;;  %473 = vmatpush.bf16.msra.mxu3 %v1437_v11  ;;  %v403_v24 = vshrl.u32 %v1199_v19, 16  ;;  %v405_v25 = vshll.u32 %v1199_v19, 16  ;;  %v1447_v30 = vld [vmem:[%s1752_s1 + $0x70] sm:$0xff]  ;;  %v1456_v38 = vld [vmem:[%s1752_s1 + $0xa8] sm:$0xff]  ;;  %vm1012_vm5 = vmand %vm1010_vm2, %vm1011_vm3 }
  0x24   : > { %v1262_v31 = vld [vmem:[%s1611_s6 + $0x18] sm:$0xf]  ;;  %v1442_v32 = vld [vmem:[%s1611_s6 + $0x18] sm:$0x30]  ;;  %v1443_v34 = vld [vmem:[%s1752_s1 + $0x50] sm:$0xff] }
  0x25   : > { %v449_v26 = vrot.slane %v447_v21, 1  ;;  %1195 = vmatmul.msk.bf16.vlgmr.msra.gmra.mxu0 %vm346_vm0, %v1186_v15  ;;  %1208 = vmatmul.msk.bf16.vlgmr.msra.gmra.mxu1 %vm346_vm0, %v1199_v19  ;;  %v407_v29 = vrot.slane %v405_v25, 1  ;;  %v1243_v35 = vld [vmem:[%s1611_s6 + $0x10] sm:$0xf]  ;;  %v1439_v36 = vld [vmem:[%s1611_s6 + $0x10] sm:$0x30]  ;;  %v1263_v40 = vor.u32 %v1442_v32, %v1262_v31 }
  0x26   : > { %516 = vmatpush.bf16.msrb.mxu0 %v1441_v18  ;;  %560 = vmatpush.bf16.msrb.mxu1 %v1444_v23  ;;  %v1451_v39 = vld [vmem:[%s1752_s1 + $0x88] sm:$0xff]  ;;  %v1458_v41 = vld [vmem:[%s1752_s1 + $0xb8] sm:$0xff]  ;;  %v1244_v43 = vor.u32 %v1439_v36, %v1243_v35  ;;  %v1455_v44 = vld [vmem:[%s1752_s1 + $0xa0] sm:$0xff] }
  0x27   : > { %602 = vmatpush.bf16.msrb.mxu2 %v1446_v17  ;;  %v450_v33 = vor.u32 %v449_v26, %v445_v20  ;;  %644 = vmatpush.bf16.msrb.mxu3 %v1448_v22  ;;  %v408_v37 = vor.u32 %v407_v29, %v403_v24  ;;  %v1454_v42 = vld [vmem:[%s1752_s1 + $0x98] sm:$0xff]  ;;  %v1450_v45 = vld [vmem:[%s1752_s1 + $0x80] sm:$0xff]  ;;  %v619_v46 = vshll.u32 %v1263_v40, 16  ;;  %v1457_v47 = vld [vmem:[%s1752_s1 + $0xb0] sm:$0xff]  ;;  %v617_v50 = vshrl.u32 %v1263_v40, 16 }
  0x28   : > { %v1453_v48 = vld [vmem:[%s1752_s1 + $0x90] sm:$0xff]  ;;  %v577_v49 = vshll.u32 %v1244_v43, 16  ;;  %v575_v52 = vshrl.u32 %v1244_v43, 16  ;;  %v1461_v54 = vld [vmem:[%s1752_s1 + $0xc8] sm:$0xff]  ;;  %v1464_v55 = vld [vmem:[%s1752_s1 + $0xd8] sm:$0xff] }
  0x29   : > { %1234 = vmatmul.msk.bf16.vlgmr.msra.gmra.mxu3 %vm346_vm0, %v450_v33  ;;  %1221 = vmatmul.msk.bf16.vlgmr.msra.gmra.mxu2 %vm346_vm0, %v408_v37  ;;  %v621_v51 = vrot.slane %v619_v46, 1  ;;  %v1305_v57 = vld [vmem:[%s1611_s6] sm:$0xc]  ;;  %v1324_v59 = vld [vmem:[%s1611_s6 + $0x8] sm:$0xc]  ;;  %v1468_v61 = vld [vmem:[%s1752_s1 + $0xf8] sm:$0xff] }
  0x2a   : > { %517 = vmatpush.bf16.msrb.mxu0 %v1440_v28  ;;  %561 = vmatpush.bf16.msrb.mxu1 %v1443_v34  ;;  %v579_v53 = vrot.slane %v577_v49, 1  ;;  %v1452_v60 = vld [vmem:[%s1611_s6 + $0x8] sm:$0xf0]  ;;  %v1449_v62 = vld [vmem:[%s1611_s6] sm:$0xf0]  ;;  %v1463_v1 = vld [vmem:[%s1752_s1 + $0xd0] sm:$0xff] }
  0x2b   : > { %603 = vmatpush.bf16.msrb.mxu2 %v1445_v27  ;;  %645 = vmatpush.bf16.msrb.mxu3 %v1447_v30  ;;  %v622_v56 = vor.u32 %v621_v51, %v617_v50  ;;  %v1466_v63 = vld [vmem:[%s1752_s1 + $0xe8] sm:$0xff]  ;;  %v1460_v0 = vld [vmem:[%s1752_s1 + $0xc0] sm:$0xff]  ;;  %v1325_v2 = vor.u32 %v1452_v60, %v1324_v59  ;;  %v1306_v3 = vor.u32 %v1449_v62, %v1305_v57  ;;  %v1467_v4 = vld [vmem:[%s1752_s1 + $0xf0] sm:$0xff] }
  0x2c   : > { %v580_v58 = vor.u32 %v579_v53, %v575_v52  ;;  %v1016_v5 = vld [vmem:[%s1753_s2] sm:$0xff]  ;;  %v1017_v18 = vld [vmem:[%s1753_s2 + $0x8] sm:$0x7]  ;;  %v1388_v21 = vld [vmem:[%s1611_s6 + $0x18] sm:$0xc] }
  0x2d   : > { %v1465_v6 = vld [vmem:[%s1752_s1 + $0xe0] sm:$0xff]  ;;  %v792_v8 = vshrl.u32 %v1325_v2, 16  ;;  %v795_v9 = vshll.u32 %v1325_v2, 16  ;;  %1020 = vperm.xlu0 %1494, %v1016_v5   ;;  %v748_v10 = vshrl.u32 %v1306_v3, 16  ;;  %v751_v11 = vshll.u32 %v1306_v3, 16 }
  0x2e   : > { %688 = vmatpush.bf16.msra.mxu0 %v1451_v39  ;;  %732 = vmatpush.bf16.msra.mxu1 %v1454_v42  ;;  %v666_v14 = vrot.slane %v1306_v3, 2  ;;  %v710_v15 = vrot.slane %v1325_v2, 2  ;;  %v1462_v22 = vld [vmem:[%s1611_s6 + $0x18] sm:$0xf0]  ;;  %v1369_v23 = vld [vmem:[%s1611_s6 + $0x10] sm:$0xc] }
  0x2f   : > { %776 = vmatpush.bf16.msra.mxu2 %v1456_v38  ;;  %820 = vmatpush.bf16.msra.mxu3 %v1458_v41  ;;  %v794_v12 = vrot.slane %v792_v8, 2  ;;  %v797_v13 = vrot.slane %v795_v9, 3  ;;  %v750_v16 = vrot.slane %v748_v10, 2  ;;  %v753_v17 = vrot.slane %v751_v11, 3  ;;  %v1459_v24 = vld [vmem:[%s1611_s6 + $0x10] sm:$0xf0] }
  0x30   : > { %v1389_v25 = vor.u32 %v1462_v22, %v1388_v21  ;;  %v1370_v26 = vor.u32 %v1459_v24, %v1369_v23  ;;  %s1428_s6 = sshll.u32 %s1761_s21, 3 }
  0x31   : > { %v798_v19 = vor.u32 %v797_v13, %v794_v12  ;;  %v754_v20 = vor.u32 %v753_v17, %v750_v16  ;;  %s307_s29 = scalar_lea.vmem %s1754_s3, %s1428_s6 }
  0x32   : > { %689 = vmatpush.bf16.msra.mxu0 %v1450_v45  ;;  %733 = vmatpush.bf16.msra.mxu1 %v1453_v48  ;;  %v968_v27 = vshrl.u32 %v1389_v25, 16  ;;  %v971_v28 = vshll.u32 %v1389_v25, 16  ;;  %v924_v29 = vshrl.u32 %v1370_v26, 16  ;;  %v927_v30 = vshll.u32 %v1370_v26, 16 }
  0x33   : > { %777 = vmatpush.bf16.msra.mxu2 %v1455_v44  ;;  %821 = vmatpush.bf16.msra.mxu3 %v1457_v47  ;;  %v842_v33 = vrot.slane %v1370_v26, 2  ;;  %v886_v34 = vrot.slane %v1389_v25, 2 }
  0x34   : > { %v970_v31 = vrot.slane %v968_v27, 2  ;;  %v973_v32 = vrot.slane %v971_v28, 3  ;;  %v926_v35 = vrot.slane %v924_v29, 2  ;;  %v929_v36 = vrot.slane %v927_v30, 3 }
  0x35   : > { %1253 = vmatmul.msk.bf16.vlgmr.msrb.gmra.mxu0 %vm346_vm0, %v1244_v43  ;;  %1272 = vmatmul.msk.bf16.vlgmr.msrb.gmra.mxu1 %vm346_vm0, %v1263_v40 }
  0x36   : > { %864 = vmatpush.bf16.msrb.mxu0 %v1461_v54  ;;  %908 = vmatpush.bf16.msrb.mxu1 %v1464_v55  ;;  %v974_v37 = vor.u32 %v973_v32, %v970_v31  ;;  %v930_v38 = vor.u32 %v929_v36, %v926_v35 }
  0x37   : > { %1025 = vperm.xlu0 %1494, %v1017_v18  }
  0x39   : > { %1298 = vmatmul.msk.bf16.vlgmr.msrb.gmra.mxu3 %vm346_vm0, %v622_v56  ;;  %1285 = vmatmul.msk.bf16.vlgmr.msrb.gmra.mxu2 %vm346_vm0, %v580_v58 }
  0x3a   : > { %996 = vmatpush.bf16.msrb.mxu3 %v1468_v61  ;;  %952 = vmatpush.bf16.msrb.mxu2 %v1466_v63 }
  0x3b   : > { %865 = vmatpush.bf16.msrb.mxu0 %v1460_v0  ;;  %909 = vmatpush.bf16.msrb.mxu1 %v1463_v1 }
  0x3e   : > { %997 = vmatpush.bf16.msrb.mxu3 %v1467_v4  ;;  %953 = vmatpush.bf16.msrb.mxu2 %v1465_v6 }
  0x45   : > { %1315 = vmatmul.msk.bf16.vlgmr.msra.gmra.mxu0 %vm346_vm0, %v666_v14  ;;  %1334 = vmatmul.msk.bf16.vlgmr.msra.gmra.mxu1 %vm346_vm0, %v710_v15 }
  0x49   : > { %1360 = vmatmul.msk.bf16.vlgmr.msra.gmra.mxu3 %vm346_vm0, %v798_v19  ;;  %1347 = vmatmul.msk.bf16.vlgmr.msra.gmra.mxu2 %vm346_vm0, %v754_v20 }
  0x55   : > { %1379 = vmatmul.msk.bf16.vlgmr.msrb.gmra.mxu0 %vm346_vm0, %v842_v33  ;;  %1398 = vmatmul.msk.bf16.vlgmr.msrb.gmra.mxu1 %vm346_vm0, %v886_v34 }
  0x59   : > { %1424 = vmatmul.msk.bf16.vlgmr.msrb.gmra.mxu3 %vm346_vm0, %v974_v37  ;;  %1411 = vmatmul.msk.bf16.vlgmr.msrb.gmra.mxu2 %vm346_vm0, %v930_v38 }
  0x9f   : > { %v1021_v29 = vpop.permute.xlu0 %1020 }
  0xa2   : > { %v359_v39 = vpop.f32.mrf.mxu0  ;;  %v393_v40 = vpop.f32.mrf.mxu1 }
  0xa3   : > { %v394_v49 = vadd.f32 %v393_v40, %v359_v39 }
  0xa9   : > { %v1026_v40 = vpop.permute.xlu0 %1025 }
  0xaa   : > { %v361_v41 = vpop.f32.mrf.mxu0  ;;  %v395_v42 = vpop.f32.mrf.mxu1 }
  0xab   : > { %v396_v56 = vadd.f32 %v395_v42, %v361_v41  ;;  %v1013_v41 = vld [vmem:[%s307_s29 + $0x4] sm:$0x3] }
  0xac   : > { %v475_v43 = vpop.f32.mrf.mxu3  ;;  %v433_v44 = vpop.f32.mrf.mxu2 }
  0xad   : > { %v438_v50 = vadd.f32 %v433_v44, %v394_v49 }
  0xaf   : > { %v480_v55 = vadd.f32 %v475_v43, %v438_v50 }
  0xb2   : > { %v519_v45 = vpop.f32.mrf.mxu0  ;;  %v563_v46 = vpop.f32.mrf.mxu1 }
  0xb3   : > { %v524_v57 = vadd.f32 %v519_v45, %v480_v55 }
  0xb4   : > { %v477_v47 = vpop.f32.mrf.mxu3  ;;  %v435_v48 = vpop.f32.mrf.mxu2 }
  0xb5   : > { %v439_v58 = vadd.f32 %v435_v48, %v396_v56  ;;  %v568_v60 = vadd.f32 %v563_v46, %v524_v57 }
  0xb7   : > { %v481_v0 = vadd.f32 %v477_v47, %v439_v58 }
  0xba   : > { %v521_v51 = vpop.f32.mrf.mxu0  ;;  %v565_v52 = vpop.f32.mrf.mxu1 }
  0xbb   : > { %v525_v2 = vadd.f32 %v521_v51, %v481_v0 }
  0xbc   : > { %v647_v53 = vpop.f32.mrf.mxu3  ;;  %v605_v54 = vpop.f32.mrf.mxu2 }
  0xbd   : > { %v610_v1 = vadd.f32 %v605_v54, %v568_v60  ;;  %v569_v5 = vadd.f32 %v565_v52, %v525_v2 }
  0xbf   : > { %v652_v3 = vadd.f32 %v647_v53, %v610_v1 }
  0xc2   : > { %v691_v59 = vpop.f32.mrf.mxu0  ;;  %v735_v63 = vpop.f32.mrf.mxu1 }
  0xc3   : > { %v696_v6 = vadd.f32 %v691_v59, %v652_v3 }
  0xc4   : > { %v649_v61 = vpop.f32.mrf.mxu3  ;;  %v607_v62 = vpop.f32.mrf.mxu2 }
  0xc5   : > { %v611_v9 = vadd.f32 %v607_v62, %v569_v5  ;;  %v740_v11 = vadd.f32 %v735_v63, %v696_v6 }
  0xc7   : > { %v653_v12 = vadd.f32 %v649_v61, %v611_v9 }
  0xca   : > { %v693_v4 = vpop.f32.mrf.mxu0  ;;  %v737_v10 = vpop.f32.mrf.mxu1 }
  0xcb   : > { %v697_v15 = vadd.f32 %v693_v4, %v653_v12 }
  0xcc   : > { %v823_v7 = vpop.f32.mrf.mxu3  ;;  %v779_v8 = vpop.f32.mrf.mxu2 }
  0xcd   : > { %v784_v13 = vadd.f32 %v779_v8, %v740_v11  ;;  %v741_v19 = vadd.f32 %v737_v10, %v697_v15 }
  0xcf   : > { %v828_v18 = vadd.f32 %v823_v7, %v784_v13 }
  0xd2   : > { %v867_v14 = vpop.f32.mrf.mxu0  ;;  %v911_v21 = vpop.f32.mrf.mxu1 }
  0xd3   : > { %v872_v20 = vadd.f32 %v867_v14, %v828_v18 }
  0xd4   : > { %v825_v16 = vpop.f32.mrf.mxu3  ;;  %v781_v17 = vpop.f32.mrf.mxu2 }
  0xd5   : > { %v785_v22 = vadd.f32 %v781_v17, %v741_v19  ;;  %v916_v23 = vadd.f32 %v911_v21, %v872_v20 }
  0xd7   : > { %v829_v27 = vadd.f32 %v825_v16, %v785_v22 }
  0xda   : > { %v869_v24 = vpop.f32.mrf.mxu0  ;;  %v913_v33 = vpop.f32.mrf.mxu1 }
  0xdb   : > { %v873_v30 = vadd.f32 %v869_v24, %v829_v27 }
  0xdc   : > { %v955_v25 = vpop.f32.mrf.mxu2  ;;  %v999_v26 = vpop.f32.mrf.mxu3 }
  0xdd   : > { %v960_v28 = vadd.f32 %v955_v25, %v916_v23  ;;  %v917_v34 = vadd.f32 %v913_v33, %v873_v30 }
  0xdf   : > { %v1004_v31 = vadd.f32 %v999_v26, %v960_v28 }
  0xe1   : > { %v1006_v32 = vpack.c.bf16 %v1004_v31, %v1004_v31  ;;  %v1028_v36 = vmul.f32 %v1021_v29, %v1004_v31 }
  0xe3   : > { %1009 = vst.msk [vmem:[%s307_s29] sm:$0xf] %vm1008_vm1, %v1006_v32  ;;  %v1043_v42 = vmul.f32 %v1028_v36, %v1004_v31  ;;  %v1031_v45 = vsel %vm1030_vm4, %v1028_v36, 0.0 }
  0xe4   : > { %v957_v35 = vpop.f32.mrf.mxu2  ;;  %v1001_v38 = vpop.f32.mrf.mxu3 }
  0xe5   : > { %v961_v37 = vadd.f32 %v957_v35, %v917_v34  ;;  %v1045_v50 = vsel %vm1030_vm4, %v1043_v42, 0.0 }
  0xe7   : > { %v1005_v39 = vadd.f32 %v1001_v38, %v961_v37 }
  0xe9   : > { %v1007_v43 = vpack.c.bf16 %v1005_v39, %v1005_v39  ;;  %v1029_v44 = vmul.f32 %v1026_v40, %v1005_v39 }
  0xeb   : > { %v1014_v46 = vsel %vm1012_vm5, %v1007_v43, %v1013_v41  ;;  %v1033_v47 = vsel %vm1032_vm6, %v1029_v44, 0.0  ;;  %v1044_v48 = vmul.f32 %v1029_v44, %v1005_v39 }
  0xec   : > { %1015 = vst [vmem:[%s307_s29 + $0x4] sm:$0x3] %v1014_v46  ;;  %v1034_v49 = vadd.f32 %v1033_v47, %v1031_v45 }
  0xed   : > { %v1046_v51 = vsel %vm1032_vm6, %v1044_v48, 0.0 }
  0xee   : > { %v1035_v52 = vrot.slane %v1034_v49, 4  ;;  %v1047_v53 = vadd.f32 %v1046_v51, %v1045_v50 }
  0xf0   : > { %v1036_v54 = vadd.f32 %v1035_v52, %v1034_v49  ;;  %v1048_v55 = vrot.slane %v1047_v53, 4 }
  0xf2   : > { %v1037_v56 = vrot.slane %v1036_v54, 2  ;;  %v1049_v57 = vadd.f32 %v1048_v55, %v1047_v53 }
  0xf4   : > { %v1038_v58 = vadd.f32 %v1037_v56, %v1036_v54  ;;  %v1050_v59 = vrot.slane %v1049_v57, 2 }
  0xf6   : > { %v1039_v60 = vrot.slane %v1038_v58, 1  ;;  %v1051_v61 = vadd.f32 %v1050_v59, %v1049_v57 }
  0xf8   : > { %v1040_v62 = vadd.f32 %v1039_v60, %v1038_v58  ;;  %v1052_v63 = vrot.slane %v1051_v61, 1 }
  0xfa   : > { %1042 = vst.msk [vmem:[%s310_s30] sm:$0x1] %vm1041_vm7, %v1040_v62  ;;  %v1053_v0 = vadd.f32 %v1052_v63, %v1051_v61 }
  0xfc   : > { %1054 = vst.msk [vmem:[%s313_s9] sm:$0x1] %vm1041_vm7, %v1053_v0 }
  0xfd PF: > { %p13_p9 = scmp.ge.s32.totalorder %s1567_s22, 4   ;;  %s1757_s18 = smov %s1513_s19 }
  0xfe   : > { %s1758_s19 = smov %s1576_s25  ;;  %s1759_s20 = smov %s1567_s22 }
  0xff   :  { %15 = sbr.rel (!%p13_p9) target bundleno = 2 (0x2), region = 150 }

// kernel: nlayer_discriminator_forward.8
= control target key start
LH: loop header
LB: loop body
LE: loop exit
PB: predicated region body
PF: predicated region fallthrough
CT: control target
= control target key end

     0   :  { %s2209_s18 = smov 0   ;;  %s2579_s0 = inlined_call_operand.vmem [shape: bf16[1,2,49,64], index: 0, kind: input, shape index: {}]   ;;  %s2580_s1 = inlined_call_operand.vmem [shape: bf16[16,64,128], index: 1, kind: input, shape index: {}]   ;;  %s2581_s2 = inlined_call_operand.vmem [shape: f32[25,1], index: 2, kind: input, shape index: {}]   ;;  %s2582_s3 = inlined_call_operand.vmem [shape: bf16[2,25,128], index: 3, kind: output, shape index: {0}]   ;;  %s2583_s4 = inlined_call_operand.vmem [shape: f32[2,1,128], index: 4, kind: output, shape index: {1}]   ;;  %s2584_s5 = inlined_call_operand.vmem [shape: f32[2,1,128], index: 5, kind: output, shape index: {2}]  }
   0x1 LB: > { %s1646_s19 = sadd.s32 4294967295, %s2176_s18   ;;  %p1650_p0 = scmp.ge.s32.totalorder %s2176_s18, 1  ;;  %s2176_s18 = sphi %s2209_s18, %s16_s18  }
   0x2   : > { %p192_p1 = scmp.lt.s32.totalorder %s2176_s18, 3 }
   0x4   : > { %p193_p2 = pnand %p1650_p0, %p192_p1 }
   0x5   : > { %p226_p3 = scmp.lt.s32.totalorder (!%p193_p2), %s1646_s19, 1 }
   0x6   : > { %196 = sbr.rel (%p193_p2) target bundleno = 305 (0x131), region = 32 }
   0xb   : > { %v2080_v0 = vld [vmem:[%s2580_s1 + $0x38] sm:$0xff]  ;;  %v2079_v4 = vld [vmem:[%s2580_s1 + $0x30] sm:$0xff]  ;;  %s2586_s19 = smov (!%p226_p3, %s1646_s19), 1  ;;  %v2078_v8 = vld [vmem:[%s2580_s1 + $0x28] sm:$0xff]  ;;  %vm274_vm0 = vsmask.f32 7424 }
   0xc   : > { %v2076_v1 = vld [vmem:[%s2580_s1 + $0x18] sm:$0xff]  ;;  %325 = vmatpush.bf16.msra.mxu0 %v2080_v0  ;;  %v2075_v5 = vld [vmem:[%s2580_s1 + $0x10] sm:$0xff]  ;;  %s2158_s11 = smul.u32 28, %s2586_s19  ;;  %v2074_v9 = vld [vmem:[%s2580_s1 + $0x8] sm:$0xff]  ;;  %vm404_vm1 = vcmask 1046528   ;;  %vm314_vm2 = vcmask 523264   ;;  %s238_s7 = scalar_lea.vmem %s2583_s4, %s2586_s19 }
   0xd   : > { %v2084_v2 = vld [vmem:[%s2580_s1 + $0x58] sm:$0xff]  ;;  %372 = vmatpush.bf16.msra.mxu1 %v2076_v1  ;;  %v2083_v6 = vld [vmem:[%s2580_s1 + $0x50] sm:$0xff]  ;;  %v2082_v10 = vld [vmem:[%s2580_s1 + $0x48] sm:$0xff]  ;;  %vm470_vm3 = vsmask.f32 6400  ;;  %vm870_vm5 = vcmask 1044480   ;;  %s241_s10 = scalar_lea.vmem %s2584_s5, %s2586_s19 }
   0xe   : > { %v2088_v3 = vld [vmem:[%s2580_s1 + $0x78] sm:$0xff]  ;;  %442 = vmatpush.bf16.msra.mxu2 %v2084_v2  ;;  %v2087_v7 = vld [vmem:[%s2580_s1 + $0x70] sm:$0xff]  ;;  %v2086_v11 = vld [vmem:[%s2580_s1 + $0x68] sm:$0xff]  ;;  %s2259_s24 = scalar_lea.vmem %s2579_s0, %s2158_s11  ;;  %vm558_vm4 = vsmask.f32 4352  ;;  %vm1480_vm7 = vcmask 1040384  }
   0xf   : > { %522 = vmatpush.bf16.msra.mxu3 %v2088_v3  ;;  %v2262_v12 = vld [vmem:[%s2259_s24] sm:$0xff]   ;;  %v2265_v13 = vld [vmem:[%s2259_s24 + $0x8] sm:$0xff]   ;;  %v2100_v34 = vld [vmem:[%s2580_s1 + $0xd8] sm:$0xff]  ;;  %vm1174_vm6 = vsmask.f32 5376 }
  0x10   : > { %326 = vmatpush.bf16.msra.mxu0 %v2079_v4  ;;  %v246_v14 = vld [vmem:[%s2259_s24 + $0xc] sm:$0x1]  ;;  %v270_v15 = vunpack.c.l.b16 %v2265_v13  ;;  %v276_v17 = vshrl.u32 %v2262_v12, 16  ;;  %v278_v18 = vshll.u32 %v2262_v12, 16  ;;  %v387_v19 = vld [vmem:[%s2259_s24] sm:$0xe]  ;;  %v2142_v21 = vunpack.c.h.b16 %v2262_v12 }
  0x11   : > { %373 = vmatpush.bf16.msra.mxu1 %v2075_v5  ;;  %v271_v16 = vunpack.c.l.b16 %v246_v14  ;;  %v388_v20 = vld [vmem:[%s2259_s24 + $0xc] sm:$0x3]  ;;  %v400_v22 = vunpack.c.l.b16 %v387_v19  ;;  %v2077_v24 = vld [vmem:[%s2580_s1 + $0x20] sm:$0xff]  ;;  %v2092_v35 = vld [vmem:[%s2580_s1 + $0x98] sm:$0xff]  ;;  %vm1481_vm8 = vsmask.f32 256 }
  0x12   : > { %443 = vmatpush.bf16.msra.mxu2 %v2083_v6  ;;  %v401_v23 = vunpack.c.l.b16 %v388_v20  ;;  %v2073_v25 = vld [vmem:[%s2580_s1] sm:$0xff]  ;;  %v280_v27 = vrot.slane %v278_v18, 1  ;;  %v2104_v43 = vld [vmem:[%s2580_s1 + $0xf8] sm:$0xff]  ;;  %v2099_v51 = vld [vmem:[%s2580_s1 + $0xd0] sm:$0xff] }
  0x13   : > { %523 = vmatpush.bf16.msra.mxu3 %v2087_v7  ;;  %v2280_v26 = vpack.c.b16 %v271_v16, %v270_v15  ;;  %v2081_v28 = vld [vmem:[%s2580_s1 + $0x40] sm:$0xff]  ;;  %v402_v30 = vpack.c.b16 %v2142_v21, %v400_v22  ;;  %v2096_v47 = vld [vmem:[%s2580_s1 + $0xb8] sm:$0xff]  ;;  %v2091_v52 = vld [vmem:[%s2580_s1 + $0x90] sm:$0xff] }
  0x14   : > { %327 = vmatpush.bf16.msra.mxu0 %v2078_v8  ;;  %v2085_v29 = vld [vmem:[%s2580_s1 + $0x60] sm:$0xff]  ;;  %v2290_v31 = vpack.c.b16 %v401_v23, %v270_v15  ;;  %v281_v32 = vor.u32 %v280_v27, %v276_v17  ;;  %v2103_v55 = vld [vmem:[%s2580_s1 + $0xf0] sm:$0xff]  ;;  %v2098_v58 = vld [vmem:[%s2580_s1 + $0xc8] sm:$0xff] }
  0x15   : > { %374 = vmatpush.bf16.msra.mxu1 %v2074_v9  ;;  %v283_v33 = vshll.u32 %v2280_v26, 16  ;;  %v405_v36 = vrot.slane %v402_v30, 1  ;;  %v472_v38 = vshrl.u32 %v402_v30, 16  ;;  %v475_v39 = vshll.u32 %v402_v30, 16  ;;  %v2095_v56 = vld [vmem:[%s2580_s1 + $0xb0] sm:$0xff]  ;;  %v2090_v59 = vld [vmem:[%s2580_s1 + $0x88] sm:$0xff]  ;;  %vm1482_vm9 = vmand %vm1480_vm7, %vm1481_vm8 }
  0x16   : > { %444 = vmatpush.bf16.msra.mxu2 %v2082_v10  ;;  %v406_v37 = vrot.slane %v2290_v31, 1  ;;  %v480_v41 = vshrl.u32 %v2290_v31, 16  ;;  %v483_v42 = vshll.u32 %v2290_v31, 16  ;;  %v2102_v60 = vld [vmem:[%s2580_s1 + $0xe8] sm:$0xff]  ;;  %v2097_v62 = vld [vmem:[%s2580_s1 + $0xc0] sm:$0xff]  ;;  %v287_v3 = vshrl.u32 %v2280_v26, 16 }
  0x17   : > { %524 = vmatpush.bf16.msra.mxu3 %v2086_v11  ;;  %v285_v40 = vrot.slane %v283_v33, 1  ;;  %v474_v45 = vrot.slane %v472_v38, 1  ;;  %v477_v46 = vrot.slane %v475_v39, 2  ;;  %v2094_v61 = vld [vmem:[%s2580_s1 + $0xa8] sm:$0xff]  ;;  %v541_v63 = vld [vmem:[%s2259_s24] sm:$0x8] }
  0x18   : > { %328 = vmatpush.bf16.msra.mxu0 %v2077_v24  ;;  %v407_v44 = vsel %vm404_vm1, %v405_v36, %v406_v37  ;;  %v482_v49 = vrot.slane %v480_v41, 1  ;;  %v485_v50 = vrot.slane %v483_v42, 2  ;;  %v2089_v0 = vld [vmem:[%s2580_s1 + $0x80] sm:$0xff]  ;;  %v2353_v2 = vld [vmem:[%s2259_s24 + $0x8] sm:$0xff]   ;;  %v2116_v4 = vld [vmem:[%s2580_s1 + $0x158] sm:$0xff]  ;;  %v554_v7 = vunpack.c.l.b16 %v541_v63 }
  0x19   : > { %375 = vmatpush.bf16.msra.mxu1 %v2073_v25  ;;  %v286_v48 = vsel %vm274_vm0, %v281_v32, %v285_v40  ;;  %v478_v53 = vor.u32 %v477_v46, %v474_v45  ;;  %v629_v1 = vld [vmem:[%s2259_s24 + $0x4] sm:$0xf]  ;;  %v2108_v5 = vld [vmem:[%s2580_s1 + $0x118] sm:$0xff]  ;;  %v2369_v9 = vunpack.c.l.b16 %v2353_v2  ;;  %v632_v14 = vld [vmem:[%s2259_s24 + $0x10] sm:$0x1]  ;;  %v289_v16 = vor.u32 %v287_v3, %v285_v40 }
  0x1a   : > { %445 = vmatpush.bf16.msra.mxu2 %v2081_v28  ;;  %v2322_v54 = vor.u32 %v485_v50, %v482_v49  ;;  %v2101_v6 = vld [vmem:[%s2580_s1 + $0xe0] sm:$0xff]  ;;  %v646_v10 = vunpack.c.l.b16 %v629_v1  ;;  %v2120_v11 = vld [vmem:[%s2580_s1 + $0x178] sm:$0xff]  ;;  %v556_v17 = vpack.c.b16 %v2142_v21, %v554_v7  ;;  %v2107_v18 = vld [vmem:[%s2580_s1 + $0x110] sm:$0xff]  ;;  %v2384_v19 = vunpack.c.h.b16 %v2353_v2 }
  0x1b   : > { %525 = vmatpush.bf16.msra.mxu3 %v2085_v29  ;;  %1678 = vmatmul.msk.bf16.vlgmr.msra.gmra.mxu0 %vm314_vm2, %v286_v48  ;;  %v2093_v8 = vld [vmem:[%s2580_s1 + $0xa0] sm:$0xff]  ;;  %v2112_v15 = vld [vmem:[%s2580_s1 + $0x138] sm:$0xff]  ;;  %v649_v22 = vunpack.c.l.b16 %v632_v14  ;;  %v2115_v23 = vld [vmem:[%s2580_s1 + $0x150] sm:$0xff]  ;;  %v568_v24 = vshrl.u32 %v2265_v13, 16  ;;  %v571_v25 = vshll.u32 %v2265_v13, 16 }
  0x1c   : > { %610 = vmatpush.bf16.msrb.mxu0 %v2092_v35  ;;  %1696 = vmatmul.msk.bf16.vlgmr.msra.gmra.mxu1 %vm314_vm2, %v2262_v12  ;;  %v487_v57 = vsel %vm470_vm3, %v478_v53, %v2322_v54  ;;  %v650_v20 = vpack.c.b16 %v2369_v9, %v646_v10  ;;  %v2119_v12 = vld [vmem:[%s2580_s1 + $0x170] sm:$0xff]  ;;  %v560_v27 = vshrl.u32 %v556_v17, 16  ;;  %v563_v28 = vshll.u32 %v556_v17, 16  ;;  %v780_v32 = vld [vmem:[%s2259_s24 + $0x4] sm:$0xe]  ;;  %v2118_v35 = vld [vmem:[%s2580_s1 + $0x168] sm:$0xff] }
  0x1d   : > { %1722 = vmatmul.msk.bf16.vlgmr.msra.gmra.mxu2 %vm314_vm2, %v407_v44  ;;  %686 = vmatpush.bf16.msrb.mxu1 %v2096_v47  ;;  %v2111_v21 = vld [vmem:[%s2580_s1 + $0x130] sm:$0xff]  ;;  %v2405_v29 = vpack.c.b16 %v649_v22, %v2384_v19  ;;  %v570_v13 = vrot.slane %v568_v24, 3  ;;  %v573_v31 = vrot.slane %v571_v25, 4  ;;  %v2110_v36 = vld [vmem:[%s2580_s1 + $0x128] sm:$0xff]  ;;  %v793_v39 = vunpack.c.l.b16 %v780_v32  ;;  %v2113_v44 = vld [vmem:[%s2580_s1 + $0x140] sm:$0xff] }
  0x1e   : > { %761 = vmatpush.bf16.msrb.mxu2 %v2100_v34  ;;  %1748 = vmatmul.msk.bf16.vlgmr.msra.gmra.mxu3 %vm314_vm2, %v487_v57  ;;  %v716_v30 = vshll.u32 %v650_v20, 16  ;;  %v781_v33 = vld [vmem:[%s2259_s24 + $0x10] sm:$0x3]  ;;  %v2106_v34 = vld [vmem:[%s2580_s1 + $0x108] sm:$0xff]  ;;  %v565_v38 = vrot.slane %v563_v28, 4  ;;  %v714_v41 = vshrl.u32 %v650_v20, 16 }
  0x1f   : > { %834 = vmatpush.bf16.msrb.mxu3 %v2104_v43  ;;  %v794_v40 = vunpack.c.l.b16 %v781_v33  ;;  %v720_v43 = vshll.u32 %v2405_v29, 16  ;;  %v2105_v45 = vld [vmem:[%s2580_s1 + $0x100] sm:$0xff]  ;;  %v574_v49 = vor.u32 %v573_v31, %v570_v13  ;;  %v795_v50 = vpack.c.b16 %v2369_v9, %v793_v39  ;;  %v2462_v1 = vld [vmem:[%s2259_s24 + $0x10] sm:$0xff]   ;;  %v2122_v25 = vld [vmem:[%s2580_s1 + $0x188] sm:$0xff] }
  0x20   : > { %611 = vmatpush.bf16.msrb.mxu0 %v2091_v52  ;;  %v718_v42 = vrot.slane %v716_v30, 1  ;;  %v2117_v46 = vld [vmem:[%s2580_s1 + $0x160] sm:$0xff]  ;;  %v2123_v3 = vld [vmem:[%s2580_s1 + $0x190] sm:$0xff]  ;;  %v724_v7 = vshrl.u32 %v2405_v29, 16  ;;  %v2126_v28 = vld [vmem:[%s2580_s1 + $0x1a8] sm:$0xff]  ;;  %v1093_v32 = vshll.u32 %v2353_v2, 16 }
  0x21   : > { %687 = vmatpush.bf16.msrb.mxu1 %v2095_v56  ;;  %v2109_v47 = vld [vmem:[%s2580_s1 + $0x120] sm:$0xff]  ;;  %v722_v53 = vrot.slane %v720_v43, 1  ;;  %v1091_v39 = vshrl.u32 %v2353_v2, 16 }
  0x22   : > { %762 = vmatpush.bf16.msrb.mxu2 %v2099_v51  ;;  %v796_v51 = vpack.c.b16 %v794_v40, %v2384_v19  ;;  %v719_v52 = vor.u32 %v718_v42, %v714_v41  ;;  %v853_v63 = vld [vmem:[%s2259_s24 + $0x4] sm:$0x8]  ;;  %v1095_v40 = vrot.slane %v1093_v32, 1 }
  0x23   : > { %835 = vmatpush.bf16.msrb.mxu3 %v2103_v55  ;;  %v797_v55 = vrot.slane %v795_v50, 1  ;;  %v2121_v13 = vld [vmem:[%s2580_s1 + $0x180] sm:$0xff] }
  0x24   : > { %612 = vmatpush.bf16.msrb.mxu0 %v2090_v59  ;;  %v798_v56 = vrot.slane %v796_v51, 1  ;;  %v723_v57 = vsel %vm274_vm0, %v719_v52, %v722_v53  ;;  %v2132_v59 = vld [vmem:[%s2580_s1 + $0x1d8] sm:$0xff]  ;;  %v2135_v31 = vld [vmem:[%s2580_s1 + $0x1e0] sm:$0xff] }
  0x25   : > { %688 = vmatpush.bf16.msrb.mxu1 %v2094_v61  ;;  %v2138_v61 = vld [vmem:[%s2580_s1 + $0x1f8] sm:$0xff] }
  0x26   : > { %763 = vmatpush.bf16.msrb.mxu2 %v2098_v58  ;;  %v799_v58 = vsel %vm404_vm1, %v797_v55, %v798_v56 }
  0x27   : > { %836 = vmatpush.bf16.msrb.mxu3 %v2102_v60  ;;  %v2124_v60 = vld [vmem:[%s2580_s1 + $0x198] sm:$0xff] }
  0x28   : > { %613 = vmatpush.bf16.msrb.mxu0 %v2089_v0  ;;  %v2131_v0 = vld [vmem:[%s2580_s1 + $0x1d0] sm:$0xff] }
  0x29   : > { %689 = vmatpush.bf16.msrb.mxu1 %v2093_v8  ;;  %v867_v8 = vunpack.c.l.b16 %v2462_v1 }
  0x2a   : > { %764 = vmatpush.bf16.msrb.mxu2 %v2097_v62  ;;  %v2128_v62 = vld [vmem:[%s2580_s1 + $0x1b8] sm:$0xff] }
  0x2b   : > { %837 = vmatpush.bf16.msrb.mxu3 %v2101_v6  ;;  %1679 = vmatmul.msk.bf16.gmra.mxu0 %vm314_vm2, %v289_v16  ;;  %v866_v6 = vunpack.c.l.b16 %v853_v63  ;;  %v2477_v14 = vpack.c.b16 %v867_v8, %v2384_v19  ;;  %v1009_v16 = vld [vmem:[%s2259_s24 + $0x14] sm:$0x1] }
  0x2c   : > { %908 = vmatpush.bf16.msra.mxu0 %v2108_v5  ;;  %1697 = vmatmul.msk.bf16.gmra.mxu1 %vm314_vm2, %v2280_v26  ;;  %v2114_v26 = vld [vmem:[%s2580_s1 + $0x148] sm:$0xff]  ;;  %v2127_v5 = vld [vmem:[%s2580_s1 + $0x1b0] sm:$0xff] }
  0x2d   : > { %987 = vmatpush.bf16.msra.mxu1 %v2112_v15  ;;  %1723 = vmatmul.msk.bf16.gmra.mxu2 %vm314_vm2, %v406_v37  ;;  %v562_v37 = vrot.slane %v560_v27, 3  ;;  %v868_v10 = vpack.c.b16 %v2369_v9, %v866_v6  ;;  %v1008_v15 = vld [vmem:[%s2259_s24 + $0x10] sm:$0xf]  ;;  %v948_v22 = vshll.u32 %v2477_v14, 16  ;;  %v2136_v27 = vld [vmem:[%s2580_s1 + $0x1e8] sm:$0xff] }
  0x2e   : > { %1063 = vmatpush.bf16.msra.mxu2 %v2116_v4  ;;  %1749 = vmatmul.msk.bf16.gmra.mxu3 %vm314_vm2, %v2322_v54  ;;  %v2137_v4 = vld [vmem:[%s2580_s1 + $0x1f0] sm:$0xff]  ;;  %v1025_v9 = vunpack.c.l.b16 %v1008_v15 }
  0x2f   : > { %1138 = vmatpush.bf16.msra.mxu3 %v2120_v11  ;;  %v566_v48 = vor.u32 %v565_v38, %v562_v37  ;;  %v726_v11 = vor.u32 %v724_v7, %v722_v53  ;;  %v937_v17 = vshrl.u32 %v868_v10, 16  ;;  %v950_v30 = vrot.slane %v948_v22, 4 }
  0x30   : > { %909 = vmatpush.bf16.msra.mxu0 %v2107_v18  ;;  %v940_v18 = vshll.u32 %v868_v10, 16  ;;  %v1259_v53 = vunpack.c.h.b16 %v2462_v1 }
  0x31   : > { %988 = vmatpush.bf16.msra.mxu1 %v2111_v21  ;;  %v575_v54 = vsel %vm558_vm4, %v566_v48, %v574_v49  ;;  %v939_v21 = vrot.slane %v937_v17, 3  ;;  %v1158_v48 = vld [vmem:[%s2259_s24 + $0x14] sm:$0x7] }
  0x32   : > { %1064 = vmatpush.bf16.msra.mxu2 %v2115_v23  ;;  %v1026_v23 = vunpack.c.l.b16 %v1009_v16  ;;  %v942_v24 = vrot.slane %v940_v18, 4  ;;  %v1171_v51 = vunpack.c.l.b16 %v1158_v48 }
  0x33   : > { %1139 = vmatpush.bf16.msra.mxu3 %v2119_v12  ;;  %v2130_v12 = vld [vmem:[%s2580_s1 + $0x1c8] sm:$0xff] }
  0x34   : > { %910 = vmatpush.bf16.msra.mxu0 %v2106_v34  ;;  %v1028_v33 = vpack.c.b16 %v1026_v23, %v1025_v9  ;;  %v2125_v34 = vld [vmem:[%s2580_s1 + $0x1a0] sm:$0xff]  ;;  %v943_v37 = vor.u32 %v942_v24, %v939_v21 }
  0x35   : > { %989 = vmatpush.bf16.msra.mxu1 %v2110_v36  ;;  %v872_v36 = vrot.slane %v2477_v14, 3 }
  0x36   : > { %1065 = vmatpush.bf16.msra.mxu2 %v2114_v26  ;;  %v2129_v26 = vld [vmem:[%s2580_s1 + $0x1c0] sm:$0xff]  ;;  %v1097_v41 = vshll.u32 %v1028_v33, 16 }
  0x37   : > { %1140 = vmatpush.bf16.msra.mxu3 %v2118_v35  ;;  %v871_v35 = vrot.slane %v868_v10, 3  ;;  %v2178_v10 = vmov 0  }
  0x38   : > { %911 = vmatpush.bf16.msra.mxu0 %v2105_v45  ;;  %v1099_v45 = vrot.slane %v1097_v41, 1  ;;  %2168 = vset.pattern.permute.xlu0 %v2178_v10 }
  0x39   : > { %990 = vmatpush.bf16.msra.mxu1 %v2109_v47  ;;  %v873_v42 = vsel %vm870_vm5, %v871_v35, %v872_v36  ;;  %v1157_v47 = vld [vmem:[%s2259_s24 + $0x8] sm:$0xc]  ;;  %2169 = vset.pattern.permute.xlu1 %v2178_v10 }
  0x3a   : > { %1066 = vmatpush.bf16.msra.mxu2 %v2113_v44  ;;  %v1096_v44 = vor.u32 %v1095_v40, %v1091_v39  ;;  %v1170_v50 = vunpack.c.l.b16 %v1157_v47 }
  0x3b   : > { %1141 = vmatpush.bf16.msra.mxu3 %v2117_v46  ;;  %1774 = vmatmul.msk.bf16.vlgmr.msrb.gmra.mxu0 %vm314_vm2, %v575_v54  ;;  %v1101_v54 = vshrl.u32 %v1028_v33, 16 }
  0x3c   : > { %1800 = vmatmul.msk.bf16.vlgmr.msrb.gmra.mxu1 %vm314_vm2, %v650_v20  ;;  %1226 = vmatpush.bf16.msrb.mxu0 %v2124_v60  ;;  %v945_v20 = vshrl.u32 %v2477_v14, 16  ;;  %v1100_v46 = vsel %vm274_vm0, %v1096_v44, %v1099_v45  ;;  %v1172_v55 = vpack.c.b16 %v2384_v19, %v1170_v50 }
  0x3d   : > { %1826 = vmatmul.msk.bf16.vlgmr.msrb.gmra.mxu2 %vm314_vm2, %v723_v57  ;;  %1299 = vmatpush.bf16.msrb.mxu1 %v2128_v62 }
  0x3e   : > { %1378 = vmatpush.bf16.msrb.mxu2 %v2132_v59  ;;  %1852 = vmatmul.msk.bf16.vlgmr.msrb.gmra.mxu3 %vm314_vm2, %v799_v58  ;;  %v1261_v58 = vpack.c.b16 %v1259_v53, %v1025_v9  ;;  %v1176_v59 = vshrl.u32 %v1172_v55, 16  ;;  %v1179_v60 = vshll.u32 %v1172_v55, 16 }
  0x3f   : > { %1454 = vmatpush.bf16.msrb.mxu3 %v2138_v61 }
  0x40   : > { %1227 = vmatpush.bf16.msrb.mxu0 %v2123_v3  ;;  %v1336_v1 = vshrl.u32 %v1261_v58, 16  ;;  %v1339_v3 = vshll.u32 %v1261_v58, 16  ;;  %v1181_v6 = vrot.slane %v1179_v60, 3  ;;  %v1263_v22 = vrot.slane %v1261_v58, 3 }
  0x41   : > { %1300 = vmatpush.bf16.msrb.mxu1 %v2127_v5  ;;  %v1178_v5 = vrot.slane %v1176_v59, 2 }
  0x42   : > { %1379 = vmatpush.bf16.msrb.mxu2 %v2131_v0  ;;  %v1338_v15 = vrot.slane %v1336_v1, 3  ;;  %v1341_v16 = vrot.slane %v1339_v3, 4 }
  0x43   : > { %1455 = vmatpush.bf16.msrb.mxu3 %v2137_v4  ;;  %v1488_v4 = vld [vmem:[%s2581_s2 + $0x10] sm:$0xff]  ;;  %v1182_v17 = vor.u32 %v1181_v6, %v1178_v5 }
  0x44   : > { %1228 = vmatpush.bf16.msrb.mxu0 %v2122_v25  ;;  %1502 = vperm.xlu1 %2169, %v1488_v4   ;;  %v1342_v23 = vor.u32 %v1341_v16, %v1338_v15 }
  0x45   : > { %1301 = vmatpush.bf16.msrb.mxu1 %v2126_v28  ;;  %v1489_v28 = vld [vmem:[%s2581_s2 + $0x18] sm:$0x1] }
  0x46   : > { %1380 = vmatpush.bf16.msrb.mxu2 %v2130_v12  ;;  %v1487_v12 = vld [vmem:[%s2581_s2 + $0x8] sm:$0xff] }
  0x47   : > { %1456 = vmatpush.bf16.msrb.mxu3 %v2136_v27  ;;  %v2133_v27 = vld [vmem:[%s2259_s24 + $0xc] sm:$0xff] }
  0x48   : > { %1229 = vmatpush.bf16.msrb.mxu0 %v2121_v13 }
  0x49   : > { %1302 = vmatpush.bf16.msrb.mxu1 %v2125_v34 }
  0x4a   : > { %1381 = vmatpush.bf16.msrb.mxu2 %v2129_v26 }
  0x4b   : > { %1775 = vmatmul.msk.bf16.gmra.mxu0 %vm314_vm2, %v574_v49  ;;  %1457 = vmatpush.bf16.msrb.mxu3 %v2135_v31  ;;  %v1245_v49 = vld [vmem:[%s2259_s24 + $0x8] sm:$0x8] }
  0x4c   : > { %1801 = vmatmul.msk.bf16.gmra.mxu1 %vm314_vm2, %v2405_v29  ;;  %v947_v29 = vrot.slane %v945_v20, 3  ;;  %v1258_v52 = vunpack.c.l.b16 %v1245_v49  ;;  %1507 = vperm.xlu1 %2169, %v1489_v28  }
  0x4d   : > { %1827 = vmatmul.msk.bf16.gmra.mxu2 %vm314_vm2, %v726_v11 }
  0x4e   : > { %1853 = vmatmul.msk.bf16.gmra.mxu3 %vm314_vm2, %v798_v56  ;;  %v951_v38 = vor.u32 %v950_v30, %v947_v29  ;;  %v1173_v56 = vpack.c.b16 %v1171_v51, %v1025_v9  ;;  %v1260_v57 = vpack.c.b16 %v2384_v19, %v1258_v52  ;;  %v1486_v19 = vld [vmem:[%s2581_s2] sm:$0xff]  ;;  %v2050_v29 = vld [vmem:[%s2259_s24 + $0x14] sm:$0xf]  ;;  %v2134_v30 = vld [vmem:[%s2259_s24 + $0x14] sm:$0x10]  ;;  %s2072_s24 = sshll.u32 %s2586_s19, 4 }
  0x4f   : > { %1492 = vperm.xlu0 %2168, %v1486_v19   ;;  %v2051_v32 = vor.u32 %v2134_v30, %v2050_v29  ;;  %s2562_s29 = scalar_lea.vmem %s2582_s3, %s2072_s24 }
  0x50   : > { %v952_v43 = vsel %vm558_vm4, %v943_v37, %v951_v38  ;;  %v1184_v61 = vshrl.u32 %v1173_v56, 16  ;;  %v1187_v62 = vshll.u32 %v1173_v56, 16  ;;  %v1328_v63 = vshrl.u32 %v1260_v57, 16 }
  0x51   : > { %v1331_v0 = vshll.u32 %v1260_v57, 16  ;;  %v1262_v20 = vrot.slane %v1260_v57, 3 }
  0x52   : > { %v1186_v7 = vrot.slane %v1184_v61, 2  ;;  %v1189_v8 = vrot.slane %v1187_v62, 3  ;;  %v1330_v11 = vrot.slane %v1328_v63, 3 }
  0x53   : > { %v1333_v14 = vrot.slane %v1331_v0, 4  ;;  %v1264_v24 = vsel %vm870_vm5, %v1262_v20, %v1263_v22 }
  0x54   : > { %v1190_v18 = vor.u32 %v1189_v8, %v1186_v7 }
  0x55   : > { %v1334_v9 = vor.u32 %v1333_v14, %v1330_v11 }
  0x56   : > { %v1191_v21 = vsel %vm1174_vm6, %v1182_v17, %v1190_v18 }
  0x57   : > { %v1343_v25 = vsel %vm558_vm4, %v1334_v9, %v1342_v23  ;;  %1497 = vperm.xlu0 %2168, %v1487_v12  }
  0x5b   : > { %1878 = vmatmul.msk.bf16.vlgmr.msra.gmra.mxu0 %vm314_vm2, %v873_v42 }
  0x5c   : > { %1904 = vmatmul.msk.bf16.vlgmr.msra.gmra.mxu1 %vm314_vm2, %v952_v43 }
  0x5d   : > { %1930 = vmatmul.msk.bf16.vlgmr.msra.gmra.mxu2 %vm314_vm2, %v2353_v2  ;;  %v1103_v2 = vor.u32 %v1101_v54, %v1099_v45 }
  0x5e   : > { %1956 = vmatmul.msk.bf16.vlgmr.msra.gmra.mxu3 %vm314_vm2, %v1100_v46 }
  0x6b   : > { %1879 = vmatmul.msk.bf16.gmra.mxu0 %vm314_vm2, %v872_v36 }
  0x6c   : > { %1905 = vmatmul.msk.bf16.gmra.mxu1 %vm314_vm2, %v951_v38 }
  0x6d   : > { %1931 = vmatmul.msk.bf16.gmra.mxu2 %vm314_vm2, %v1028_v33 }
  0x6e   : > { %1957 = vmatmul.msk.bf16.gmra.mxu3 %vm314_vm2, %v1103_v2 }
  0x7b   : > { %1982 = vmatmul.msk.bf16.vlgmr.msrb.gmra.mxu0 %vm314_vm2, %v1191_v21 }
  0x7c   : > { %2008 = vmatmul.msk.bf16.vlgmr.msrb.gmra.mxu1 %vm314_vm2, %v1264_v24 }
  0x7d   : > { %2034 = vmatmul.msk.bf16.vlgmr.msrb.gmra.mxu2 %vm314_vm2, %v1343_v25 }
  0x7e   : > { %2068 = vmatmul.msk.bf16.vlgmr.msrb.gmra.mxu3 %vm314_vm2, %v2133_v27 }
  0x8b   : > { %1983 = vmatmul.msk.bf16.gmra.mxu0 %vm314_vm2, %v1190_v18 }
  0x8c   : > { %2009 = vmatmul.msk.bf16.gmra.mxu1 %vm314_vm2, %v1263_v22 }
  0x8d   : > { %2035 = vmatmul.msk.bf16.gmra.mxu2 %vm314_vm2, %v1342_v23 }
  0x8e   : > { %2069 = vmatmul.msk.bf16.gmra.mxu3 %vm314_vm2, %v2051_v32 }
  0x98   : > { %v330_v33 = vpop.f32.mrf.mxu0 }
  0x99   : > { %v377_v26 = vpop.f32.mrf.mxu1 }
  0x9a   : > { %v378_v13 = vadd.f32 %v377_v26, %v330_v33 }
  0xa0   : > { %v447_v31 = vpop.f32.mrf.mxu2  ;;  %v332_v35 = vpop.f32.mrf.mxu0 }
  0xa1   : > { %v457_v34 = vadd.f32 %v447_v31, %v378_v13  ;;  %v379_v36 = vpop.f32.mrf.mxu1  ;;  %v527_v38 = vpop.f32.mrf.mxu3 }
  0xa2   : > { %v380_v37 = vadd.f32 %v379_v36, %v332_v35 }
  0xa3   : > { %v537_v39 = vadd.f32 %v527_v38, %v457_v34 }
  0xa8   : > { %v449_v40 = vpop.f32.mrf.mxu2  ;;  %v335_v42 = vpop.f32.mrf.mxu0 }
  0xa9   : > { %v458_v41 = vadd.f32 %v449_v40, %v380_v37  ;;  %v382_v43 = vpop.f32.mrf.mxu1  ;;  %v529_v45 = vpop.f32.mrf.mxu3 }
  0xaa   : > { %v383_v44 = vadd.f32 %v382_v43, %v335_v42 }
  0xab   : > { %v538_v46 = vadd.f32 %v529_v45, %v458_v41 }
  0xb0   : > { %v452_v47 = vpop.f32.mrf.mxu2  ;;  %v337_v49 = vpop.f32.mrf.mxu0 }
  0xb1   : > { %v459_v48 = vadd.f32 %v452_v47, %v383_v44  ;;  %v384_v50 = vpop.f32.mrf.mxu1  ;;  %v532_v52 = vpop.f32.mrf.mxu3 }
  0xb2   : > { %v385_v51 = vadd.f32 %v384_v50, %v337_v49 }
  0xb3   : > { %v539_v53 = vadd.f32 %v532_v52, %v459_v48 }
  0xb8   : > { %v454_v54 = vpop.f32.mrf.mxu2  ;;  %v615_v56 = vpop.f32.mrf.mxu0 }
  0xb9   : > { %v460_v55 = vadd.f32 %v454_v54, %v385_v51  ;;  %v691_v57 = vpop.f32.mrf.mxu1  ;;  %v534_v58 = vpop.f32.mrf.mxu3  ;;  %v625_v18 = vadd.f32 %v615_v56, %v537_v39 }
  0xbb   : > { %v540_v2 = vadd.f32 %v534_v58, %v460_v55  ;;  %v701_v23 = vadd.f32 %v691_v57, %v625_v18 }
  0xc0   : > { %v766_v59 = vpop.f32.mrf.mxu2  ;;  %v617_v60 = vpop.f32.mrf.mxu0 }
  0xc1   : > { %v693_v61 = vpop.f32.mrf.mxu1  ;;  %v839_v62 = vpop.f32.mrf.mxu3  ;;  %v626_v12 = vadd.f32 %v617_v60, %v538_v46  ;;  %v776_v24 = vadd.f32 %v766_v59, %v701_v23 }
  0xc2   : > { %v1493_v55 = vpop.permute.xlu0 %1492 }
  0xc3   : > { %v702_v25 = vadd.f32 %v693_v61, %v626_v12  ;;  %v849_v27 = vadd.f32 %v839_v62, %v776_v24 }
  0xc8   : > { %v768_v63 = vpop.f32.mrf.mxu2  ;;  %v620_v0 = vpop.f32.mrf.mxu0 }
  0xc9   : > { %v696_v1 = vpop.f32.mrf.mxu1  ;;  %v841_v3 = vpop.f32.mrf.mxu3  ;;  %v777_v29 = vadd.f32 %v768_v63, %v702_v25  ;;  %v627_v26 = vadd.f32 %v620_v0, %v539_v53 }
  0xcb   : > { %v850_v31 = vadd.f32 %v841_v3, %v777_v29  ;;  %v703_v35 = vadd.f32 %v696_v1, %v627_v26 }
  0xd0   : > { %v771_v19 = vpop.f32.mrf.mxu2  ;;  %v622_v4 = vpop.f32.mrf.mxu0 }
  0xd1   : > { %v698_v5 = vpop.f32.mrf.mxu1  ;;  %v844_v6 = vpop.f32.mrf.mxu3  ;;  %v778_v39 = vadd.f32 %v771_v19, %v703_v35  ;;  %v628_v42 = vadd.f32 %v622_v4, %v540_v2 }
  0xd3   : > { %v851_v46 = vadd.f32 %v844_v6, %v778_v39  ;;  %v704_v49 = vadd.f32 %v698_v5, %v628_v42  ;;  %v1483_v42 = vld [vmem:[%s2562_s29 + $0xc] sm:$0x1] }
  0xd8   : > { %v773_v7 = vpop.f32.mrf.mxu2  ;;  %v913_v8 = vpop.f32.mrf.mxu0 }
  0xd9   : > { %v992_v10 = vpop.f32.mrf.mxu1  ;;  %v846_v11 = vpop.f32.mrf.mxu3  ;;  %v923_v33 = vadd.f32 %v913_v8, %v849_v27  ;;  %v779_v52 = vadd.f32 %v773_v7, %v704_v49 }
  0xdb   : > { %v1002_v34 = vadd.f32 %v992_v10, %v923_v33  ;;  %v852_v61 = vadd.f32 %v846_v11, %v779_v52  ;;  %v1498_v10 = vpop.permute.xlu0 %1497 }
  0xe0   : > { %v1068_v14 = vpop.f32.mrf.mxu2  ;;  %v915_v15 = vpop.f32.mrf.mxu0 }
  0xe1   : > { %v994_v16 = vpop.f32.mrf.mxu1  ;;  %v1143_v17 = vpop.f32.mrf.mxu3  ;;  %v924_v36 = vadd.f32 %v915_v15, %v850_v31  ;;  %v1078_v37 = vadd.f32 %v1068_v14, %v1002_v34 }
  0xe3   : > { %v1003_v43 = vadd.f32 %v994_v16, %v924_v36  ;;  %v1153_v45 = vadd.f32 %v1143_v17, %v1078_v37 }
  0xe8   : > { %v1070_v20 = vpop.f32.mrf.mxu2  ;;  %v918_v22 = vpop.f32.mrf.mxu0 }
  0xe9   : > { %v997_v9 = vpop.f32.mrf.mxu1  ;;  %v1145_v21 = vpop.f32.mrf.mxu3  ;;  %v1079_v47 = vadd.f32 %v1070_v20, %v1003_v43  ;;  %v925_v50 = vadd.f32 %v918_v22, %v851_v46 }
  0xeb   : > { %v1154_v53 = vadd.f32 %v1145_v21, %v1079_v47  ;;  %v1004_v58 = vadd.f32 %v997_v9, %v925_v50 }
  0xf0   : > { %v1073_v28 = vpop.f32.mrf.mxu2  ;;  %v920_v30 = vpop.f32.mrf.mxu0 }
  0xf1   : > { %v999_v32 = vpop.f32.mrf.mxu1  ;;  %v1148_v13 = vpop.f32.mrf.mxu3  ;;  %v1080_v62 = vadd.f32 %v1073_v28, %v1004_v58  ;;  %v926_v63 = vadd.f32 %v920_v30, %v852_v61 }
  0xf2   : > { %v1503_v28 = vpop.permute.xlu1 %1502 }
  0xf3   : > { %v1155_v19 = vadd.f32 %v1148_v13, %v1080_v62  ;;  %v1005_v6 = vadd.f32 %v999_v32, %v926_v63 }
  0xf8   : > { %v1075_v38 = vpop.f32.mrf.mxu2  ;;  %v1231_v40 = vpop.f32.mrf.mxu0 }
  0xf9   : > { %v1304_v41 = vpop.f32.mrf.mxu1  ;;  %v1150_v44 = vpop.f32.mrf.mxu3  ;;  %v1241_v48 = vadd.f32 %v1231_v40, %v1153_v45  ;;  %v1081_v17 = vadd.f32 %v1075_v38, %v1005_v6 }
  0xfb   : > { %v1314_v56 = vadd.f32 %v1304_v41, %v1241_v48  ;;  %v1156_v21 = vadd.f32 %v1150_v44, %v1081_v17  ;;  %v1508_v41 = vpop.permute.xlu1 %1507 }
 0x100   : > { %v1383_v51 = vpop.f32.mrf.mxu2  ;;  %v1233_v54 = vpop.f32.mrf.mxu0 }
 0x101   : > { %v1306_v57 = vpop.f32.mrf.mxu1  ;;  %v1459_v59 = vpop.f32.mrf.mxu3  ;;  %v1242_v60 = vadd.f32 %v1233_v54, %v1154_v53  ;;  %v1393_v2 = vadd.f32 %v1383_v51, %v1314_v56 }
 0x103   : > { %v1315_v0 = vadd.f32 %v1306_v57, %v1242_v60  ;;  %v1469_v1 = vadd.f32 %v1459_v59, %v1393_v2 }
 0x105   : > { %v1510_v14 = vmul.f32 %v1493_v55, %v1469_v1 }
 0x107   : > { %v1526_v22 = vmul.f32 %v1510_v14, %v1469_v1 }
 0x108   : > { %v1385_v3 = vpop.f32.mrf.mxu2  ;;  %v1236_v5 = vpop.f32.mrf.mxu0 }
 0x109   : > { %v1394_v4 = vadd.f32 %v1385_v3, %v1315_v0  ;;  %v1461_v7 = vpop.f32.mrf.mxu3  ;;  %v1243_v8 = vadd.f32 %v1236_v5, %v1155_v19  ;;  %v1309_v16 = vpop.f32.mrf.mxu1 }
 0x10b   : > { %v1470_v15 = vadd.f32 %v1461_v7, %v1394_v4  ;;  %v1316_v20 = vadd.f32 %v1309_v16, %v1243_v8 }
 0x10d   : > { %v2154_v11 = vpack.c.bf16 %v1470_v15, %v1469_v1  ;;  %v1511_v18 = vmul.f32 %v1498_v10, %v1470_v15 }
 0x10f   : > { %2155 = vst [vmem:[%s2562_s29] sm:$0xff] %v2154_v11   ;;  %v1514_v9 = vadd.f32 %v1511_v18, %v1510_v14  ;;  %v1527_v23 = vmul.f32 %v1511_v18, %v1470_v15 }
 0x110   : > { %v1388_v12 = vpop.f32.mrf.mxu2  ;;  %v1238_v25 = vpop.f32.mrf.mxu0 }
 0x111   : > { %v1395_v24 = vadd.f32 %v1388_v12, %v1316_v20  ;;  %v1530_v27 = vadd.f32 %v1527_v23, %v1526_v22  ;;  %v1464_v29 = vpop.f32.mrf.mxu3  ;;  %v1244_v30 = vadd.f32 %v1238_v25, %v1156_v21  ;;  %v1311_v13 = vpop.f32.mrf.mxu1 }
 0x113   : > { %v1471_v32 = vadd.f32 %v1464_v29, %v1395_v24  ;;  %v1317_v31 = vadd.f32 %v1311_v13, %v1244_v30 }
 0x115   : > { %v1475_v33 = vpack.c.bf16 %v1471_v32, %v1471_v32  ;;  %v1512_v26 = vmul.f32 %v1503_v28, %v1471_v32 }
 0x117   : > { %1479 = vst [vmem:[%s2562_s29 + $0x8] sm:$0xf] %v1475_v33  ;;  %v1515_v34 = vadd.f32 %v1514_v9, %v1512_v26  ;;  %v1528_v35 = vmul.f32 %v1512_v26, %v1471_v32 }
 0x118   : > { %v1390_v36 = vpop.f32.mrf.mxu2 }
 0x119   : > { %v1396_v37 = vadd.f32 %v1390_v36, %v1317_v31  ;;  %v1531_v38 = vadd.f32 %v1530_v27, %v1528_v35  ;;  %v1466_v39 = vpop.f32.mrf.mxu3 }
 0x11b   : > { %v1472_v40 = vadd.f32 %v1466_v39, %v1396_v37 }
 0x11d   : > { %v1476_v43 = vpack.c.bf16 %v1472_v40, %v1472_v40  ;;  %v1513_v44 = vmul.f32 %v1508_v41, %v1472_v40 }
 0x11f   : > { %v1484_v45 = vsel %vm1482_vm9, %v1476_v43, %v1483_v42  ;;  %v1517_v46 = vsel %vm1480_vm7, %v1513_v44, 0.0  ;;  %v1529_v47 = vmul.f32 %v1513_v44, %v1472_v40 }
 0x120   : > { %1485 = vst [vmem:[%s2562_s29 + $0xc] sm:$0x1] %v1484_v45  ;;  %v1518_v48 = vadd.f32 %v1517_v46, %v1515_v34 }
 0x121   : > { %v1532_v49 = vsel %vm1480_vm7, %v1529_v47, 0.0 }
 0x122   : > { %v1519_v50 = vrot.slane %v1518_v48, 4  ;;  %v1533_v51 = vadd.f32 %v1532_v49, %v1531_v38 }
 0x124   : > { %v1520_v52 = vadd.f32 %v1519_v50, %v1518_v48  ;;  %v1534_v53 = vrot.slane %v1533_v51, 4 }
 0x126   : > { %v1521_v54 = vrot.slane %v1520_v52, 2  ;;  %v1535_v55 = vadd.f32 %v1534_v53, %v1533_v51 }
 0x128   : > { %v1522_v56 = vadd.f32 %v1521_v54, %v1520_v52  ;;  %v1536_v57 = vrot.slane %v1535_v55, 2 }
 0x12a   : > { %v1523_v58 = vrot.slane %v1522_v56, 1  ;;  %v1537_v59 = vadd.f32 %v1536_v57, %v1535_v55 }
 0x12c   : > { %v1524_v60 = vadd.f32 %v1523_v58, %v1522_v56  ;;  %v1538_v2 = vrot.slane %v1537_v59, 1 }
 0x12e   : > { %1525 = vst [vmem:[%s238_s7] sm:$0x1] %v1524_v60  ;;  %v1539_v61 = vadd.f32 %v1538_v2, %v1537_v59 }
 0x130   : > { %1540 = vst [vmem:[%s241_s10] sm:$0x1] %v1539_v61 }
 0x131 PF: > { %s16_s18 = sadd.s32 1, %s2176_s18  }
 0x132   : > { %p13_p4 = scmp.ge.s32.totalorder %s16_s18, 4  }
 0x134   :  { %15 = sbr.rel (!%p13_p4) target bundleno = 1 (0x1), region = 101 }

// kernel: nlayer_discriminator_forward.9
= control target key start
LH: loop header
LB: loop body
LE: loop exit
PB: predicated region body
PF: predicated region fallthrough
CT: control target
= control target key end

     0   :  { %s3040_s12 = smov 0   ;;  %s3602_s0 = inlined_call_operand.vmem [shape: bf16[1,2,64,128], index: 0, kind: input, shape index: {}]   ;;  %s3603_s1 = inlined_call_operand.vmem [shape: bf16[16,128,128], index: 1, kind: input, shape index: {}]   ;;  %s3604_s2 = inlined_call_operand.vmem [shape: f32[1,128], index: 2, kind: input, shape index: {}]   ;;  %s3605_s3 = inlined_call_operand.vmem [shape: f32[2,37,1], index: 3, kind: output, shape index: {}]  }
   0x1 LB: > { %s2070_s13 = sadd.s32 4294967295, %s3018_s12   ;;  %p2074_p0 = scmp.ge.s32.totalorder %s3018_s12, 1  ;;  %s3018_s12 = sphi %s3040_s12, %s13_s12  }
   0x2   : > { %p137_p1 = scmp.lt.s32.totalorder %s3018_s12, 3 }
   0x4   : > { %p138_p2 = pnand %p2074_p0, %p137_p1 }
   0x5   : > { %p161_p3 = scmp.lt.s32.totalorder (!%p138_p2), %s2070_s13, 1 }
   0x6   : > { %141 = sbr.rel (%p138_p2) target bundleno = 362 (0x16a), region = 32 }
   0xb   : > { %v2865_v0 = vld [vmem:[%s3603_s1 + $0x78] sm:$0xff]  ;;  %v2864_v4 = vld [vmem:[%s3603_s1 + $0x70] sm:$0xff]  ;;  %s3607_s13 = smov (!%p161_p3, %s2070_s13), 1  ;;  %v2863_v8 = vld [vmem:[%s3603_s1 + $0x68] sm:$0xff]  ;;  %vm222_vm0 = vsmask.f32 7424 }
   0xc   : > { %v2857_v1 = vld [vmem:[%s3603_s1 + $0x38] sm:$0xff]  ;;  %297 = vmatpush.bf16.msra.mxu0 %v2865_v0  ;;  %v2856_v5 = vld [vmem:[%s3603_s1 + $0x30] sm:$0xff]  ;;  %v2855_v9 = vld [vmem:[%s3603_s1 + $0x28] sm:$0xff]  ;;  %s2848_s7 = sshll.u32 %s3607_s13, 5  ;;  %vm419_vm1 = vcmask 1046528   ;;  %vm2008_vm3 = vcmask 7168  }
   0xd   : > { %v2873_v2 = vld [vmem:[%s3603_s1 + $0xb8] sm:$0xff]  ;;  %371 = vmatpush.bf16.msra.mxu1 %v2857_v1  ;;  %v2872_v6 = vld [vmem:[%s3603_s1 + $0xb0] sm:$0xff]  ;;  %v2871_v10 = vld [vmem:[%s3603_s1 + $0xa8] sm:$0xff]  ;;  %s3090_s16 = scalar_lea.vmem %s3602_s0, %s2848_s7  ;;  %vm521_vm2 = vsmask.f32 6400  ;;  %vm2013_vm4 = vcmask 4096  }
   0xe   : > { %v2881_v3 = vld [vmem:[%s3603_s1 + $0xf8] sm:$0xff]  ;;  %476 = vmatpush.bf16.msra.mxu2 %v2873_v2  ;;  %v2880_v7 = vld [vmem:[%s3603_s1 + $0xf0] sm:$0xff]  ;;  %v2879_v11 = vld [vmem:[%s3603_s1 + $0xe8] sm:$0xff] }
   0xf   : > { %594 = vmatpush.bf16.msra.mxu3 %v2881_v3  ;;  %v2862_v12 = vld [vmem:[%s3603_s1 + $0x60] sm:$0xff]  ;;  %v2861_v18 = vld [vmem:[%s3603_s1 + $0x58] sm:$0xff]  ;;  %v3122_v23 = vld [vmem:[%s3090_s16 + $0x8] sm:$0xff] }
  0x10   : > { %298 = vmatpush.bf16.msra.mxu0 %v2864_v4  ;;  %v2854_v13 = vld [vmem:[%s3603_s1 + $0x20] sm:$0xff]  ;;  %v2853_v19 = vld [vmem:[%s3603_s1 + $0x18] sm:$0xff]  ;;  %v2860_v25 = vld [vmem:[%s3603_s1 + $0x50] sm:$0xff]  ;;  %v231_v30 = vshll.u32 %v3122_v23, 16  ;;  %v235_v31 = vshrl.u32 %v3122_v23, 16  ;;  %v421_v49 = vrot.slane %v3122_v23, 1 }
  0x11   : > { %372 = vmatpush.bf16.msra.mxu1 %v2856_v5  ;;  %v2870_v14 = vld [vmem:[%s3603_s1 + $0xa0] sm:$0xff]  ;;  %v2869_v20 = vld [vmem:[%s3603_s1 + $0x98] sm:$0xff]  ;;  %v2852_v26 = vld [vmem:[%s3603_s1 + $0x10] sm:$0xff] }
  0x12   : > { %477 = vmatpush.bf16.msra.mxu2 %v2872_v6  ;;  %v2878_v15 = vld [vmem:[%s3603_s1 + $0xe0] sm:$0xff]  ;;  %v2877_v21 = vld [vmem:[%s3603_s1 + $0xd8] sm:$0xff]  ;;  %v2868_v28 = vld [vmem:[%s3603_s1 + $0x90] sm:$0xff]  ;;  %v530_v42 = vrot.slane %v235_v31, 1  ;;  %v531_v43 = vrot.slane %v231_v30, 2  ;;  %v233_v48 = vrot.slane %v231_v30, 1 }
  0x13   : > { %595 = vmatpush.bf16.msra.mxu3 %v2880_v7  ;;  %v2989_v16 = vld [vmem:[%s3090_s16] sm:$0xf0]  ;;  %v2990_v17 = vld [vmem:[%s3090_s16] sm:$0xe]  ;;  %v2876_v29 = vld [vmem:[%s3603_s1 + $0xd0] sm:$0xff] }
  0x14   : > { %299 = vmatpush.bf16.msra.mxu0 %v2863_v8  ;;  %v3119_v22 = vld [vmem:[%s3090_s16] sm:$0xff]   ;;  %v2991_v24 = vor.u32 %v2990_v17, %v2989_v16  ;;  %v2859_v34 = vld [vmem:[%s3603_s1 + $0x48] sm:$0xff]  ;;  %v3155_v44 = vld [vmem:[%s3090_s16 + $0x10] sm:$0xff]   ;;  %v3170_v54 = vor.u32 %v531_v43, %v530_v42 }
  0x15   : > { %373 = vmatpush.bf16.msra.mxu1 %v2855_v9  ;;  %v226_v27 = vshll.u32 %v3119_v22, 16  ;;  %v2851_v35 = vld [vmem:[%s3603_s1 + $0x8] sm:$0xff]  ;;  %v224_v36 = vshrl.u32 %v3119_v22, 16  ;;  %v2858_v45 = vld [vmem:[%s3603_s1 + $0x40] sm:$0xff]  ;;  %v175_v55 = vld [vmem:[%s3090_s16 + $0x10] sm:$0x7]  ;;  %v416_v56 = vunpack.c.l.b16 %v3155_v44 }
  0x16   : > { %478 = vmatpush.bf16.msra.mxu2 %v2871_v10  ;;  %v523_v32 = vshrl.u32 %v2991_v24, 16  ;;  %v526_v33 = vshll.u32 %v2991_v24, 16  ;;  %v2867_v38 = vld [vmem:[%s3603_s1 + $0x88] sm:$0xff]  ;;  %v2850_v46 = vld [vmem:[%s3603_s1] sm:$0xff]  ;;  %v420_v52 = vrot.slane %v2991_v24, 1  ;;  %v2906_v57 = vld [vmem:[%s3603_s1 + $0x1b8] sm:$0xff]  ;;  %v218_v60 = vunpack.c.l.b16 %v175_v55 }
  0x17   : > { %596 = vmatpush.bf16.msra.mxu3 %v2879_v11  ;;  %v228_v37 = vrot.slane %v226_v27, 1  ;;  %v2875_v39 = vld [vmem:[%s3603_s1 + $0xc8] sm:$0xff]  ;;  %v2866_v50 = vld [vmem:[%s3603_s1 + $0x80] sm:$0xff]  ;;  %v2914_v58 = vld [vmem:[%s3603_s1 + $0x1f8] sm:$0xff]  ;;  %v3192_v1 = vpack.c.b16 %v416_v56, %v416_v56 }
  0x18   : > { %300 = vmatpush.bf16.msra.mxu0 %v2862_v12  ;;  %v525_v40 = vrot.slane %v523_v32, 1  ;;  %v528_v41 = vrot.slane %v526_v33, 2  ;;  %v2874_v51 = vld [vmem:[%s3603_s1 + $0xc0] sm:$0xff]  ;;  %v422_v61 = vsel %vm419_vm1, %v420_v52, %v421_v49  ;;  %v2890_v63 = vld [vmem:[%s3603_s1 + $0x138] sm:$0xff]  ;;  %v2905_v2 = vld [vmem:[%s3603_s1 + $0x1b0] sm:$0xff]  ;;  %v3201_v4 = vpack.c.b16 %v218_v60, %v218_v60 }
  0x19   : > { %374 = vmatpush.bf16.msra.mxu1 %v2854_v13  ;;  %v229_v47 = vor.u32 %v228_v37, %v224_v36  ;;  %v2898_v0 = vld [vmem:[%s3603_s1 + $0x178] sm:$0xff]  ;;  %v2913_v3 = vld [vmem:[%s3603_s1 + $0x1f0] sm:$0xff]  ;;  %v535_v7 = vshrl.u32 %v3192_v1, 16  ;;  %v538_v8 = vshll.u32 %v3192_v1, 16  ;;  %v2904_v9 = vld [vmem:[%s3603_s1 + $0x1a8] sm:$0xff] }
  0x1a   : > { %479 = vmatpush.bf16.msra.mxu2 %v2870_v14  ;;  %v529_v53 = vor.u32 %v528_v41, %v525_v40  ;;  %v2889_v5 = vld [vmem:[%s3603_s1 + $0x130] sm:$0xff]  ;;  %v2912_v10 = vld [vmem:[%s3603_s1 + $0x1e8] sm:$0xff]  ;;  %v239_v11 = vshll.u32 %v3201_v4, 16  ;;  %v2903_v16 = vld [vmem:[%s3603_s1 + $0x1a0] sm:$0xff] }
  0x1b   : > { %597 = vmatpush.bf16.msra.mxu3 %v2878_v15  ;;  %v234_v59 = vsel %vm222_vm0, %v229_v47, %v233_v48  ;;  %v2897_v6 = vld [vmem:[%s3603_s1 + $0x170] sm:$0xff]  ;;  %v2888_v12 = vld [vmem:[%s3603_s1 + $0x128] sm:$0xff]  ;;  %v537_v13 = vrot.slane %v535_v7, 1  ;;  %v540_v14 = vrot.slane %v538_v8, 2  ;;  %v2911_v17 = vld [vmem:[%s3603_s1 + $0x1e0] sm:$0xff] }
  0x1c   : > { %301 = vmatpush.bf16.msra.mxu0 %v2861_v18  ;;  %v533_v62 = vsel %vm521_vm2, %v529_v53, %v3170_v54  ;;  %v2896_v15 = vld [vmem:[%s3603_s1 + $0x168] sm:$0xff]  ;;  %v237_v18 = vor.u32 %v235_v31, %v233_v48  ;;  %v2895_v24 = vld [vmem:[%s3603_s1 + $0x160] sm:$0xff]  ;;  %v2886_v30 = vld [vmem:[%s3603_s1 + $0x118] sm:$0xff] }
  0x1d   : > { %375 = vmatpush.bf16.msra.mxu1 %v2853_v19  ;;  %v241_v19 = vrot.slane %v239_v11, 1  ;;  %v2894_v31 = vld [vmem:[%s3603_s1 + $0x158] sm:$0xff]  ;;  %v2901_v32 = vld [vmem:[%s3603_s1 + $0x190] sm:$0xff]  ;;  %v2908_v36 = vld [vmem:[%s3603_s1 + $0x1c8] sm:$0xff] }
  0x1e   : > { %480 = vmatpush.bf16.msra.mxu2 %v2869_v20  ;;  %v423_v20 = vrot.slane %v3192_v1, 1  ;;  %v2909_v33 = vld [vmem:[%s3603_s1 + $0x1d0] sm:$0xff]  ;;  %v2884_v37 = vld [vmem:[%s3603_s1 + $0x108] sm:$0xff]  ;;  %v2899_v41 = vld [vmem:[%s3603_s1 + $0x180] sm:$0xff] }
  0x1f   : > { %598 = vmatpush.bf16.msra.mxu3 %v2877_v21  ;;  %v3233_v21 = vor.u32 %v540_v14, %v537_v13  ;;  %v242_v27 = vsel %vm222_vm0, %v237_v18, %v241_v19  ;;  %v3006_v40 = vld [vmem:[%s3090_s16 + $0x4] sm:$0xf0]  ;;  %v2907_v42 = vld [vmem:[%s3603_s1 + $0x1c0] sm:$0xff]  ;;  %v2947_v47 = vld [vmem:[%s3603_s1 + $0x2f8] sm:$0xff] }
  0x20   : > { %302 = vmatpush.bf16.msra.mxu0 %v2860_v25  ;;  %v2902_v25 = vld [vmem:[%s3603_s1 + $0x198] sm:$0xff]  ;;  %v3007_v43 = vld [vmem:[%s3090_s16 + $0x4] sm:$0xe]  ;;  %v2938_v55 = vld [vmem:[%s3603_s1 + $0x2b0] sm:$0xff] }
  0x21   : > { %376 = vmatpush.bf16.msra.mxu1 %v2852_v26  ;;  %v2910_v26 = vld [vmem:[%s3603_s1 + $0x1d8] sm:$0xff]  ;;  %v2883_v48 = vld [vmem:[%s3603_s1 + $0x100] sm:$0xff]  ;;  %v3008_v53 = vor.u32 %v3007_v43, %v3006_v40  ;;  %v2946_v56 = vld [vmem:[%s3603_s1 + $0x2f0] sm:$0xff] }
  0x22   : > { %481 = vmatpush.bf16.msra.mxu2 %v2868_v28  ;;  %v424_v28 = vsel %vm419_vm1, %v421_v49, %v423_v20  ;;  %v2891_v49 = vld [vmem:[%s3603_s1 + $0x140] sm:$0xff]  ;;  %v2945_v1 = vld [vmem:[%s3603_s1 + $0x2e8] sm:$0xff] }
  0x23   : > { %599 = vmatpush.bf16.msra.mxu3 %v2876_v29  ;;  %v542_v29 = vsel %vm521_vm2, %v3170_v54, %v3233_v21  ;;  %v3318_v54 = vld [vmem:[%s3090_s16 + $0xc] sm:$0xff]  ;;  %v2944_v11 = vld [vmem:[%s3603_s1 + $0x2e0] sm:$0xff] }
  0x24   : > { %303 = vmatpush.bf16.msra.mxu0 %v2859_v34  ;;  %v2885_v34 = vld [vmem:[%s3603_s1 + $0x110] sm:$0xff]  ;;  %v761_v60 = vshll.u32 %v3318_v54, 16  ;;  %v2928_v13 = vld [vmem:[%s3603_s1 + $0x260] sm:$0xff]  ;;  %v2925_v40 = vld [vmem:[%s3603_s1 + $0x248] sm:$0xff] }
  0x25   : > { %377 = vmatpush.bf16.msra.mxu1 %v2851_v35  ;;  %v2893_v35 = vld [vmem:[%s3603_s1 + $0x150] sm:$0xff] }
  0x26   : > { %482 = vmatpush.bf16.msra.mxu2 %v2867_v38  ;;  %v2892_v38 = vld [vmem:[%s3603_s1 + $0x148] sm:$0xff] }
  0x27   : > { %600 = vmatpush.bf16.msra.mxu3 %v2875_v39  ;;  %v3288_v39 = vld [vmem:[%s3090_s16 + $0x4] sm:$0xff]  }
  0x28   : > { %304 = vmatpush.bf16.msra.mxu0 %v2858_v45  ;;  %v243_v45 = vshrl.u32 %v3201_v4, 16 }
  0x29   : > { %378 = vmatpush.bf16.msra.mxu1 %v2850_v46  ;;  %v2939_v46 = vld [vmem:[%s3603_s1 + $0x2b8] sm:$0xff] }
  0x2a   : > { %483 = vmatpush.bf16.msra.mxu2 %v2866_v50  ;;  %v2923_v50 = vld [vmem:[%s3603_s1 + $0x238] sm:$0xff]  ;;  %v245_v52 = vor.u32 %v243_v45, %v241_v19  ;;  %v2932_v45 = vld [vmem:[%s3603_s1 + $0x280] sm:$0xff] }
  0x2b   : > { %601 = vmatpush.bf16.msra.mxu3 %v2874_v51  ;;  %305 = vmatmul.bf16.vlgmr.msra.gmra.mxu0 %v234_v59  ;;  %v2931_v51 = vld [vmem:[%s3603_s1 + $0x278] sm:$0xff]  ;;  %v756_v59 = vshll.u32 %v3288_v39, 16 }
  0x2c   : > { %379 = vmatmul.bf16.vlgmr.msra.gmra.mxu1 %v3119_v22  ;;  %708 = vmatpush.bf16.msrb.mxu0 %v2890_v63  ;;  %v2887_v22 = vld [vmem:[%s3603_s1 + $0x120] sm:$0xff]  ;;  %v985_v63 = vshll.u32 %v3008_v53, 16 }
  0x2d   : > { %484 = vmatmul.bf16.vlgmr.msra.gmra.mxu2 %v422_v61  ;;  %827 = vmatpush.bf16.msrb.mxu1 %v2898_v0  ;;  %v765_v61 = vshrl.u32 %v3318_v54, 16  ;;  %v2937_v0 = vld [vmem:[%s3603_s1 + $0x2a8] sm:$0xff] }
  0x2e   : > { %936 = vmatpush.bf16.msrb.mxu2 %v2906_v57  ;;  %602 = vmatmul.bf16.vlgmr.msra.gmra.mxu3 %v533_v62  ;;  %v2922_v57 = vld [vmem:[%s3603_s1 + $0x230] sm:$0xff]  ;;  %v982_v62 = vshrl.u32 %v3008_v53, 16  ;;  %v987_v7 = vrot.slane %v985_v63, 2 }
  0x2f   : > { %1053 = vmatpush.bf16.msrb.mxu3 %v2914_v58  ;;  %v2930_v58 = vld [vmem:[%s3603_s1 + $0x270] sm:$0xff]  ;;  %v989_v8 = vrot.slane %v765_v61, 1 }
  0x30   : > { %709 = vmatpush.bf16.msrb.mxu0 %v2889_v5  ;;  %v758_v5 = vrot.slane %v756_v59, 1  ;;  %v2956_v59 = vld [vmem:[%s3603_s1 + $0x338] sm:$0xff]  ;;  %v2963_v63 = vld [vmem:[%s3603_s1 + $0x370] sm:$0xff] }
  0x31   : > { %828 = vmatpush.bf16.msrb.mxu1 %v2897_v6  ;;  %v984_v6 = vrot.slane %v982_v62, 1  ;;  %v2955_v62 = vld [vmem:[%s3603_s1 + $0x330] sm:$0xff] }
  0x32   : > { %937 = vmatpush.bf16.msrb.mxu2 %v2905_v2  ;;  %v2921_v2 = vld [vmem:[%s3603_s1 + $0x228] sm:$0xff] }
  0x33   : > { %1054 = vmatpush.bf16.msrb.mxu3 %v2913_v3  ;;  %v2929_v3 = vld [vmem:[%s3603_s1 + $0x268] sm:$0xff]  ;;  %v988_v18 = vor.u32 %v987_v7, %v984_v6 }
  0x34   : > { %710 = vmatpush.bf16.msrb.mxu0 %v2888_v12  ;;  %v2920_v12 = vld [vmem:[%s3603_s1 + $0x220] sm:$0xff]  ;;  %v2992_v7 = vld [vmem:[%s3090_s16 + $0x8] sm:$0xff]  }
  0x35   : > { %829 = vmatpush.bf16.msrb.mxu1 %v2896_v15  ;;  %v763_v15 = vrot.slane %v761_v60, 1 }
  0x36   : > { %938 = vmatpush.bf16.msrb.mxu2 %v2904_v9  ;;  %v990_v9 = vrot.slane %v761_v60, 2  ;;  %v2964_v60 = vld [vmem:[%s3603_s1 + $0x378] sm:$0xff] }
  0x37   : > { %1055 = vmatpush.bf16.msrb.mxu3 %v2912_v10  ;;  %v2936_v10 = vld [vmem:[%s3603_s1 + $0x2a0] sm:$0xff] }
  0x38   : > { %711 = vmatpush.bf16.msrb.mxu0 %v2887_v22  ;;  %v991_v19 = vor.u32 %v990_v9, %v989_v8  ;;  %v2935_v22 = vld [vmem:[%s3603_s1 + $0x298] sm:$0xff]  ;;  %v3473_v8 = vld [vmem:[%s3090_s16 + $0x10] sm:$0xff] }
  0x39   : > { %830 = vmatpush.bf16.msrb.mxu1 %v2895_v24  ;;  %v2943_v24 = vld [vmem:[%s3603_s1 + $0x2d8] sm:$0xff] }
  0x3a   : > { %939 = vmatpush.bf16.msrb.mxu2 %v2903_v16  ;;  %v880_v16 = vrot.slane %v3008_v53, 1 }
  0x3b   : > { %1056 = vmatpush.bf16.msrb.mxu3 %v2911_v17  ;;  %310 = vmatmul.bf16.gmra.mxu0 %v242_v27  ;;  %v881_v17 = vrot.slane %v3318_v54, 1 }
  0x3c   : > { %384 = vmatmul.bf16.gmra.mxu1 %v3122_v23  ;;  %712 = vmatpush.bf16.msrb.mxu0 %v2886_v30  ;;  %v2900_v23 = vld [vmem:[%s3603_s1 + $0x188] sm:$0xff] }
  0x3d   : > { %489 = vmatmul.bf16.gmra.mxu2 %v424_v28  ;;  %831 = vmatpush.bf16.msrb.mxu1 %v2894_v31  ;;  %v882_v28 = vsel %vm419_vm1, %v880_v16, %v881_v17  ;;  %v2934_v31 = vld [vmem:[%s3603_s1 + $0x290] sm:$0xff] }
  0x3e   : > { %940 = vmatpush.bf16.msrb.mxu2 %v2902_v25  ;;  %607 = vmatmul.bf16.gmra.mxu3 %v542_v29  ;;  %v2919_v25 = vld [vmem:[%s3603_s1 + $0x218] sm:$0xff]  ;;  %v992_v29 = vsel %vm521_vm2, %v988_v18, %v991_v19  ;;  %v2953_v18 = vld [vmem:[%s3603_s1 + $0x320] sm:$0xff] }
  0x3f   : > { %1057 = vmatpush.bf16.msrb.mxu3 %v2910_v26 }
  0x40   : > { %713 = vmatpush.bf16.msrb.mxu0 %v2885_v34  ;;  %v2918_v34 = vld [vmem:[%s3603_s1 + $0x210] sm:$0xff] }
  0x41   : > { %832 = vmatpush.bf16.msrb.mxu1 %v2893_v35  ;;  %v2926_v35 = vld [vmem:[%s3603_s1 + $0x250] sm:$0xff] }
  0x42   : > { %941 = vmatpush.bf16.msrb.mxu2 %v2901_v32  ;;  %v2942_v32 = vld [vmem:[%s3603_s1 + $0x2d0] sm:$0xff] }
  0x43   : > { %1058 = vmatpush.bf16.msrb.mxu3 %v2909_v33 }
  0x44   : > { %714 = vmatpush.bf16.msrb.mxu0 %v2884_v37  ;;  %v2933_v37 = vld [vmem:[%s3603_s1 + $0x288] sm:$0xff] }
  0x45   : > { %833 = vmatpush.bf16.msrb.mxu1 %v2892_v38  ;;  %v2941_v38 = vld [vmem:[%s3603_s1 + $0x2c8] sm:$0xff] }
  0x46   : > { %942 = vmatpush.bf16.msrb.mxu2 %v2900_v23 }
  0x47   : > { %1059 = vmatpush.bf16.msrb.mxu3 %v2908_v36 }
  0x48   : > { %715 = vmatpush.bf16.msrb.mxu0 %v2883_v48  ;;  %v2924_v48 = vld [vmem:[%s3603_s1 + $0x240] sm:$0xff] }
  0x49   : > { %834 = vmatpush.bf16.msrb.mxu1 %v2891_v49  ;;  %v767_v49 = vor.u32 %v765_v61, %v763_v15  ;;  %v2979_v61 = vld [vmem:[%s3603_s1 + $0x3f0] sm:$0xff] }
  0x4a   : > { %943 = vmatpush.bf16.msrb.mxu2 %v2899_v41 }
  0x4b   : > { %1060 = vmatpush.bf16.msrb.mxu3 %v2907_v42  ;;  %315 = vmatmul.bf16.gmra.mxu0 %v245_v52 }
  0x4c   : > { %1167 = vmatpush.bf16.msra.mxu0 %v2923_v50  ;;  %389 = vmatmul.bf16.gmra.mxu1 %v3201_v4  ;;  %v754_v4 = vshrl.u32 %v3288_v39, 16 }
  0x4d   : > { %1286 = vmatpush.bf16.msra.mxu1 %v2931_v51  ;;  %494 = vmatmul.bf16.gmra.mxu2 %v423_v20  ;;  %v626_v20 = vld [vmem:[%s3090_s16 + $0x14] sm:$0x7] }
  0x4e   : > { %1395 = vmatpush.bf16.msra.mxu2 %v2939_v46  ;;  %612 = vmatmul.bf16.gmra.mxu3 %v3233_v21  ;;  %v759_v14 = vor.u32 %v758_v5, %v754_v4  ;;  %v877_v21 = vunpack.c.h.b16 %v3155_v44  ;;  %v2927_v44 = vld [vmem:[%s3603_s1 + $0x258] sm:$0xff]  ;;  %v653_v27 = vunpack.c.l.b16 %v626_v20  ;;  %v2940_v46 = vld [vmem:[%s3603_s1 + $0x2c0] sm:$0xff]  ;;  %v2993_v4 = vld [vmem:[%s3090_s16 + $0x8] sm:$0xf0] }
  0x4f   : > { %1512 = vmatpush.bf16.msra.mxu3 %v2947_v47  ;;  %v2916_v47 = vld [vmem:[%s3603_s1 + $0x200] sm:$0xff]  ;;  %v2994_v5 = vld [vmem:[%s3090_s16 + $0x8] sm:$0xe]  ;;  %v2968_v20 = vld [vmem:[%s3603_s1 + $0x398] sm:$0xff] }
  0x50   : > { %1168 = vmatpush.bf16.msra.mxu0 %v2922_v57  ;;  %v764_v26 = vsel %vm222_vm0, %v759_v14, %v763_v15  ;;  %v3384_v30 = vpack.c.b16 %v877_v21, %v877_v21  ;;  %v3393_v33 = vpack.c.b16 %v653_v27, %v653_v27  ;;  %v2972_v57 = vld [vmem:[%s3603_s1 + $0x3b8] sm:$0xff]  ;;  %v2995_v9 = vor.u32 %v2994_v5, %v2993_v4  ;;  %v1540_v5 = vld [vmem:[%s3090_s16 + $0xc] sm:$0xff]  }
  0x51   : > { %1287 = vmatpush.bf16.msra.mxu1 %v2930_v58  ;;  %v2980_v58 = vld [vmem:[%s3603_s1 + $0x3f8] sm:$0xff]  ;;  %v1220_v14 = vshll.u32 %v3473_v8, 16  ;;  %v1224_v15 = vshrl.u32 %v3473_v8, 16 }
  0x52   : > { %1396 = vmatpush.bf16.msra.mxu2 %v2938_v55  ;;  %v994_v23 = vshrl.u32 %v3384_v30, 16  ;;  %v997_v36 = vshll.u32 %v3384_v30, 16  ;;  %v769_v41 = vshll.u32 %v3393_v33, 16  ;;  %v883_v51 = vrot.slane %v3384_v30, 1  ;;  %v2976_v21 = vld [vmem:[%s3603_s1 + $0x3d8] sm:$0xff] }
  0x53   : > { %1513 = vmatpush.bf16.msra.mxu3 %v2946_v56  ;;  %v1441_v16 = vshrl.u32 %v2995_v9, 16  ;;  %v1448_v27 = vrot.slane %v1224_v15, 1 }
  0x54   : > { %1169 = vmatpush.bf16.msra.mxu0 %v2921_v2  ;;  %v996_v42 = vrot.slane %v994_v23, 1  ;;  %v999_v43 = vrot.slane %v997_v36, 2  ;;  %v771_v50 = vrot.slane %v769_v41, 1  ;;  %v884_v55 = vsel %vm419_vm1, %v881_v17, %v883_v51  ;;  %v1085_v23 = vld [vmem:[%s3090_s16 + $0x18] sm:$0x7] }
  0x55   : > { %1288 = vmatpush.bf16.msra.mxu1 %v2929_v3  ;;  %v773_v2 = vshrl.u32 %v3393_v33, 16  ;;  %v2954_v3 = vld [vmem:[%s3603_s1 + $0x328] sm:$0xff]  ;;  %v1444_v17 = vshll.u32 %v2995_v9, 16 }
  0x56   : > { %1397 = vmatpush.bf16.msra.mxu2 %v2937_v0  ;;  %v1000_v52 = vor.u32 %v999_v43, %v996_v42  ;;  %v772_v53 = vsel %vm222_vm0, %v767_v49, %v771_v50  ;;  %v2970_v0 = vld [vmem:[%s3603_s1 + $0x3a8] sm:$0xff]  ;;  %v2960_v42 = vld [vmem:[%s3603_s1 + $0x358] sm:$0xff]  ;;  %v2967_v43 = vld [vmem:[%s3603_s1 + $0x390] sm:$0xff] }
  0x57   : > { %1514 = vmatpush.bf16.msra.mxu3 %v2945_v1  ;;  %v2978_v1 = vld [vmem:[%s3603_s1 + $0x3e8] sm:$0xff]  ;;  %v775_v6 = vor.u32 %v773_v2, %v771_v50  ;;  %v2959_v50 = vld [vmem:[%s3603_s1 + $0x350] sm:$0xff] }
  0x58   : > { %1170 = vmatpush.bf16.msra.mxu0 %v2920_v12  ;;  %v1001_v56 = vsel %vm521_vm2, %v991_v19, %v1000_v52  ;;  %v2969_v12 = vld [vmem:[%s3603_s1 + $0x3a0] sm:$0xff] }
  0x59   : > { %1289 = vmatpush.bf16.msra.mxu1 %v2928_v13  ;;  %v2977_v13 = vld [vmem:[%s3603_s1 + $0x3e0] sm:$0xff] }
  0x5a   : > { %1398 = vmatpush.bf16.msra.mxu2 %v2936_v10  ;;  %v1215_v10 = vshll.u32 %v2992_v7, 16  ;;  %v2961_v19 = vld [vmem:[%s3603_s1 + $0x360] sm:$0xff] }
  0x5b   : > { %1515 = vmatpush.bf16.msra.mxu3 %v2944_v11  ;;  %716 = vmatmul.bf16.vlgmr.msrb.gmra.mxu0 %v3288_v39  ;;  %v2917_v39 = vld [vmem:[%s3603_s1 + $0x208] sm:$0xff] }
  0x5c   : > { %1171 = vmatpush.bf16.msra.mxu0 %v2919_v25  ;;  %835 = vmatmul.bf16.vlgmr.msrb.gmra.mxu1 %v764_v26  ;;  %v2962_v11 = vld [vmem:[%s3603_s1 + $0x368] sm:$0xff]  ;;  %v1217_v25 = vrot.slane %v1215_v10, 1  ;;  %v1446_v26 = vrot.slane %v1444_v17, 2 }
  0x5d   : > { %1290 = vmatpush.bf16.msra.mxu1 %v2927_v44  ;;  %944 = vmatmul.bf16.vlgmr.msrb.gmra.mxu2 %v882_v28  ;;  %v1443_v44 = vrot.slane %v1441_v16, 1  ;;  %v1449_v28 = vrot.slane %v1220_v14, 2  ;;  %v1674_v16 = vshll.u32 %v1540_v5, 16 }
  0x5e   : > { %1399 = vmatpush.bf16.msra.mxu2 %v2935_v22  ;;  %1061 = vmatmul.bf16.vlgmr.msrb.gmra.mxu3 %v992_v29  ;;  %v2952_v22 = vld [vmem:[%s3603_s1 + $0x318] sm:$0xff] }
  0x5f   : > { %1516 = vmatpush.bf16.msra.mxu3 %v2943_v24  ;;  %v1213_v24 = vshrl.u32 %v2992_v7, 16  ;;  %v3503_v29 = vld [vmem:[%s3090_s16 + $0x18] sm:$0xff]  }
  0x60   : > { %1172 = vmatpush.bf16.msra.mxu0 %v2918_v34  ;;  %v1447_v34 = vor.u32 %v1446_v26, %v1443_v44  ;;  %v1336_v36 = vunpack.c.l.b16 %v3503_v29  ;;  %v1672_v44 = vshrl.u32 %v1540_v5, 16  ;;  %v1676_v26 = vrot.slane %v1674_v16, 1 }
  0x61   : > { %1291 = vmatpush.bf16.msra.mxu1 %v2926_v35  ;;  %v1218_v30 = vor.u32 %v1217_v25, %v1213_v24  ;;  %v1450_v35 = vor.u32 %v1449_v28, %v1448_v27 }
  0x62   : > { %1400 = vmatpush.bf16.msra.mxu2 %v2934_v31  ;;  %v1222_v31 = vrot.slane %v1220_v14, 1  ;;  %v1338_v41 = vpack.c.b16 %v1336_v36, %v1336_v36 }
  0x63   : > { %1517 = vmatpush.bf16.msra.mxu3 %v2942_v32  ;;  %v1339_v32 = vrot.slane %v2995_v9, 1 }
  0x64   : > { %1173 = vmatpush.bf16.msra.mxu0 %v2917_v39  ;;  %v1456_v49 = vshll.u32 %v1338_v41, 16 }
  0x65   : > { %1292 = vmatpush.bf16.msra.mxu1 %v2925_v40  ;;  %v1451_v40 = vsel %vm521_vm2, %v1447_v34, %v1450_v35  ;;  %v1677_v34 = vor.u32 %v1676_v26, %v1672_v44 }
  0x66   : > { %1401 = vmatpush.bf16.msra.mxu2 %v2933_v37  ;;  %v1223_v37 = vsel %vm222_vm0, %v1218_v30, %v1222_v31 }
  0x67   : > { %1518 = vmatpush.bf16.msra.mxu3 %v2941_v38  ;;  %v1112_v38 = vunpack.c.l.b16 %v1085_v23 }
  0x68   : > { %1174 = vmatpush.bf16.msra.mxu0 %v2916_v47  ;;  %v2951_v47 = vld [vmem:[%s3603_s1 + $0x310] sm:$0xff] }
  0x69   : > { %1293 = vmatpush.bf16.msra.mxu1 %v2924_v48  ;;  %v1453_v48 = vshrl.u32 %v1338_v41, 16 }
  0x6a   : > { %1402 = vmatpush.bf16.msra.mxu2 %v2932_v45  ;;  %v2975_v45 = vld [vmem:[%s3603_s1 + $0x3d0] sm:$0xff] }
  0x6b   : > { %1519 = vmatpush.bf16.msra.mxu3 %v2940_v46  ;;  %721 = vmatmul.bf16.gmra.mxu0 %v3318_v54  ;;  %v2971_v54 = vld [vmem:[%s3603_s1 + $0x3b0] sm:$0xff]  ;;  %v1115_v46 = vpack.c.b16 %v1112_v38, %v1112_v38 }
  0x6c   : > { %840 = vmatmul.bf16.gmra.mxu1 %v772_v53  ;;  %1626 = vmatpush.bf16.msrb.mxu0 %v2956_v59  ;;  %v1458_v53 = vrot.slane %v1456_v49, 2  ;;  %v1226_v59 = vor.u32 %v1224_v15, %v1222_v31  ;;  %v3558_v15 = vld [vmem:[%s3090_s16 + $0x14] sm:$0xff] }
  0x6d   : > { %949 = vmatmul.bf16.gmra.mxu2 %v884_v55  ;;  %1745 = vmatpush.bf16.msrb.mxu1 %v2964_v60  ;;  %v2966_v55 = vld [vmem:[%s3603_s1 + $0x388] sm:$0xff]  ;;  %v1232_v9 = vshrl.u32 %v1115_v46, 16  ;;  %v1679_v17 = vshll.u32 %v3558_v15, 16  ;;  %v1799_v36 = vrot.slane %v3558_v15, 1 }
  0x6e   : > { %1066 = vmatmul.bf16.gmra.mxu3 %v1001_v56  ;;  %1854 = vmatpush.bf16.msrb.mxu2 %v2972_v57  ;;  %v2974_v56 = vld [vmem:[%s3603_s1 + $0x3c8] sm:$0xff] }
  0x6f   : > { %1971 = vmatpush.bf16.msrb.mxu3 %v2980_v58  ;;  %v2950_v57 = vld [vmem:[%s3603_s1 + $0x308] sm:$0xff] }
  0x70   : > { %1627 = vmatpush.bf16.msrb.mxu0 %v2955_v62  ;;  %v2958_v58 = vld [vmem:[%s3603_s1 + $0x348] sm:$0xff]  ;;  %v1342_v62 = vrot.slane %v1338_v41, 1 }
  0x71   : > { %1746 = vmatpush.bf16.msrb.mxu1 %v2963_v63 }
  0x72   : > { %1855 = vmatpush.bf16.msrb.mxu2 %v2971_v54  ;;  %v2965_v54 = vld [vmem:[%s3603_s1 + $0x380] sm:$0xff] }
  0x73   : > { %1972 = vmatpush.bf16.msrb.mxu3 %v2979_v61  ;;  %v2973_v61 = vld [vmem:[%s3603_s1 + $0x3c0] sm:$0xff] }
  0x74   : > { %1628 = vmatpush.bf16.msrb.mxu0 %v2954_v3 }
  0x75   : > { %1747 = vmatpush.bf16.msrb.mxu1 %v2962_v11 }
  0x76   : > { %1856 = vmatpush.bf16.msrb.mxu2 %v2970_v0  ;;  %v2949_v0 = vld [vmem:[%s3603_s1 + $0x300] sm:$0xff] }
  0x77   : > { %1973 = vmatpush.bf16.msrb.mxu3 %v2978_v1  ;;  %v2957_v1 = vld [vmem:[%s3603_s1 + $0x340] sm:$0xff] }
  0x78   : > { %1629 = vmatpush.bf16.msrb.mxu0 %v2953_v18  ;;  %v1683_v18 = vshrl.u32 %v3558_v15, 16 }
  0x79   : > { %1748 = vmatpush.bf16.msrb.mxu1 %v2961_v19 }
  0x7a   : > { %1857 = vmatpush.bf16.msrb.mxu2 %v2969_v12  ;;  %v1907_v31 = vrot.slane %v1683_v18, 1 }
  0x7b   : > { %726 = vmatmul.bf16.gmra.mxu0 %v3393_v33  ;;  %1974 = vmatpush.bf16.msrb.mxu3 %v2977_v13  ;;  %v1340_v33 = vrot.slane %v3473_v8, 1 }
  0x7c   : > { %845 = vmatmul.bf16.gmra.mxu1 %v775_v6  ;;  %1630 = vmatpush.bf16.msrb.mxu0 %v2952_v22  ;;  %v3009_v6 = vld [vmem:[%s3090_s16 + $0xc] sm:$0xf0] }
  0x7d   : > { %954 = vmatmul.bf16.gmra.mxu2 %v883_v51  ;;  %v1341_v39 = vsel %vm419_vm1, %v1339_v32, %v1340_v33  ;;  %1749 = vmatpush.bf16.msrb.mxu1 %v2960_v42  ;;  %v1228_v51 = vshll.u32 %v1115_v46, 16  ;;  %v1343_v3 = vsel %vm419_vm1, %v1340_v33, %v1342_v62  ;;  %v1908_v32 = vrot.slane %v1679_v17, 2 }
  0x7e   : > { %1071 = vmatmul.bf16.gmra.mxu3 %v1000_v52  ;;  %1858 = vmatpush.bf16.msrb.mxu2 %v2968_v20  ;;  %v1455_v52 = vrot.slane %v1453_v48, 1 }
  0x7f   : > { %1975 = vmatpush.bf16.msrb.mxu3 %v2976_v21  ;;  %v1230_v60 = vrot.slane %v1228_v51, 1  ;;  %v1909_v38 = vor.u32 %v1908_v32, %v1907_v31 }
  0x80   : > { %1631 = vmatpush.bf16.msrb.mxu0 %v2951_v47  ;;  %v1459_v63 = vor.u32 %v1458_v53, %v1455_v52 }
  0x81   : > { %1750 = vmatpush.bf16.msrb.mxu1 %v2959_v50  ;;  %v1231_v2 = vsel %vm222_vm0, %v1226_v59, %v1230_v60  ;;  %v1234_v10 = vor.u32 %v1232_v9, %v1230_v60 }
  0x82   : > { %1859 = vmatpush.bf16.msrb.mxu2 %v2967_v43  ;;  %v1460_v4 = vsel %vm521_vm2, %v1450_v35, %v1459_v63  ;;  %v1681_v35 = vrot.slane %v1679_v17, 1 }
  0x83   : > { %1976 = vmatpush.bf16.msrb.mxu3 %v2975_v45 }
  0x84   : > { %1632 = vmatpush.bf16.msrb.mxu0 %v2950_v57  ;;  %v1682_v47 = vsel %vm222_vm0, %v1677_v34, %v1681_v35 }
  0x85   : > { %1751 = vmatpush.bf16.msrb.mxu1 %v2958_v58 }
  0x86   : > { %1860 = vmatpush.bf16.msrb.mxu2 %v2966_v55 }
  0x87   : > { %1977 = vmatpush.bf16.msrb.mxu3 %v2974_v56 }
  0x88   : > { %1633 = vmatpush.bf16.msrb.mxu0 %v2949_v0 }
  0x89   : > { %1752 = vmatpush.bf16.msrb.mxu1 %v2957_v1 }
  0x8a   : > { %1861 = vmatpush.bf16.msrb.mxu2 %v2965_v54 }
  0x8b   : > { %1175 = vmatmul.bf16.vlgmr.msra.gmra.mxu0 %v2992_v7  ;;  %1978 = vmatpush.bf16.msrb.mxu3 %v2973_v61  ;;  %v3010_v7 = vld [vmem:[%s3090_s16 + $0xc] sm:$0xe] }
  0x8c   : > { %1294 = vmatmul.bf16.vlgmr.msra.gmra.mxu1 %v1223_v37  ;;  %v3011_v13 = vor.u32 %v3010_v7, %v3009_v6 }
  0x8d   : > { %1403 = vmatmul.bf16.vlgmr.msra.gmra.mxu2 %v1341_v39  ;;  %v1544_v39 = vld [vmem:[%s3090_s16 + $0x1c] sm:$0x7]  ;;  %s2996_s16 = smul.u32 40, %s3607_s13 }
  0x8e   : > { %1520 = vmatmul.bf16.vlgmr.msra.gmra.mxu3 %v1451_v40  ;;  %v1903_v19 = vshll.u32 %v3011_v13, 16  ;;  %v1798_v23 = vrot.slane %v3011_v13, 1  ;;  %v1795_v40 = vunpack.c.h.b16 %v3503_v29  ;;  %v1571_v48 = vunpack.c.l.b16 %v1544_v39 }
  0x8f   : > { %s3586_s10 = scalar_lea.vmem %s3605_s3, %s2996_s16 }
  0x90   : > { %v1905_v30 = vrot.slane %v1903_v19, 2  ;;  %v1800_v50 = vsel %vm419_vm1, %v1798_v23, %v1799_v36  ;;  %v1797_v52 = vpack.c.b16 %v1795_v40, %v1795_v40  ;;  %v1574_v29 = vpack.c.b16 %v1571_v48, %v1571_v48 }
  0x92   : > { %v1912_v55 = vshrl.u32 %v1797_v52, 16  ;;  %v1915_v56 = vshll.u32 %v1797_v52, 16  ;;  %v1687_v61 = vshll.u32 %v1574_v29, 16 }
  0x94   : > { %v1917_v0 = vrot.slane %v1915_v56, 2 }
  0x9b   : > { %1180 = vmatmul.bf16.gmra.mxu0 %v3473_v8  ;;  %v1900_v8 = vshrl.u32 %v3011_v13, 16 }
  0x9c   : > { %1299 = vmatmul.bf16.gmra.mxu1 %v1231_v2  ;;  %v1685_v2 = vor.u32 %v1683_v18, %v1681_v35 }
  0x9d   : > { %1408 = vmatmul.bf16.gmra.mxu2 %v1343_v3  ;;  %v1902_v27 = vrot.slane %v1900_v8, 1  ;;  %v1689_v3 = vrot.slane %v1687_v61, 1 }
  0x9e   : > { %1525 = vmatmul.bf16.gmra.mxu3 %v1460_v4  ;;  %v1801_v4 = vrot.slane %v1797_v52, 1 }
  0x9f   : > { %v1906_v37 = vor.u32 %v1905_v30, %v1902_v27 }
  0xa1   : > { %v1910_v51 = vsel %vm521_vm2, %v1906_v37, %v1909_v38 }
  0xa8   : > { %v306_v11 = vpop.f32.mrf.mxu0 }
  0xa9   : > { %v380_v12 = vpop.f32.mrf.mxu1 }
  0xaa   : > { %v381_v14 = vadd.f32 %v380_v12, %v306_v11  ;;  %v1690_v12 = vsel %vm222_vm0, %v1685_v2, %v1689_v3 }
  0xab   : > { %1185 = vmatmul.bf16.gmra.mxu0 %v1115_v46 }
  0xac   : > { %1304 = vmatmul.bf16.gmra.mxu1 %v1234_v10 }
  0xad   : > { %1413 = vmatmul.bf16.gmra.mxu2 %v1342_v62 }
  0xae   : > { %1530 = vmatmul.bf16.gmra.mxu3 %v1459_v63  ;;  %v1914_v63 = vrot.slane %v1912_v55, 1 }
  0xb0   : > { %v485_v20 = vpop.f32.mrf.mxu2  ;;  %v308_v24 = vpop.f32.mrf.mxu0 }
  0xb1   : > { %v603_v21 = vpop.f32.mrf.mxu3  ;;  %v499_v22 = vadd.f32 %v485_v20, %v381_v14  ;;  %v382_v25 = vpop.f32.mrf.mxu1  ;;  %v1802_v14 = vsel %vm419_vm1, %v1799_v36, %v1801_v4 }
  0xb2   : > { %v383_v28 = vadd.f32 %v382_v25, %v308_v24  ;;  %v1691_v24 = vshrl.u32 %v1574_v29, 16 }
  0xb3   : > { %v3562_v33 = vadd.f32 %v603_v21, %v499_v22 }
  0xb4   : > { %v1693_v26 = vor.u32 %v1691_v24, %v1689_v3 }
  0xb8   : > { %v487_v41 = vpop.f32.mrf.mxu2  ;;  %v311_v45 = vpop.f32.mrf.mxu0 }
  0xb9   : > { %v605_v42 = vpop.f32.mrf.mxu3  ;;  %v500_v43 = vadd.f32 %v487_v41, %v383_v28  ;;  %v385_v46 = vpop.f32.mrf.mxu1 }
  0xba   : > { %v386_v49 = vadd.f32 %v385_v46, %v311_v45 }
  0xbb   : > { %v618_v53 = vadd.f32 %v605_v42, %v500_v43  ;;  %1634 = vmatmul.bf16.vlgmr.msrb.gmra.mxu0 %v1540_v5  ;;  %v1918_v5 = vor.u32 %v1917_v0, %v1914_v63 }
  0xbc   : > { %1753 = vmatmul.bf16.vlgmr.msrb.gmra.mxu1 %v1682_v47 }
  0xbd   : > { %1862 = vmatmul.bf16.vlgmr.msrb.gmra.mxu2 %v1800_v50  ;;  %v1919_v16 = vsel %vm521_vm2, %v1909_v38, %v1918_v5 }
  0xbe   : > { %1979 = vmatmul.bf16.vlgmr.msrb.gmra.mxu3 %v1910_v51 }
  0xc0   : > { %v490_v57 = vpop.f32.mrf.mxu2  ;;  %v313_v60 = vpop.f32.mrf.mxu0 }
  0xc1   : > { %v608_v58 = vpop.f32.mrf.mxu3  ;;  %v501_v59 = vadd.f32 %v490_v57, %v386_v49  ;;  %v387_v54 = vpop.f32.mrf.mxu1 }
  0xc2   : > { %v388_v62 = vadd.f32 %v387_v54, %v313_v60 }
  0xc3   : > { %v619_v1 = vadd.f32 %v608_v58, %v501_v59 }
  0xc8   : > { %v492_v6 = vpop.f32.mrf.mxu2  ;;  %v316_v10 = vpop.f32.mrf.mxu0 }
  0xc9   : > { %v610_v7 = vpop.f32.mrf.mxu3  ;;  %v502_v9 = vadd.f32 %v492_v6, %v388_v62  ;;  %v390_v11 = vpop.f32.mrf.mxu1 }
  0xca   : > { %v391_v13 = vadd.f32 %v390_v11, %v316_v10 }
  0xcb   : > { %v620_v8 = vadd.f32 %v610_v7, %v502_v9  ;;  %1639 = vmatmul.bf16.gmra.mxu0 %v3558_v15 }
  0xcc   : > { %1758 = vmatmul.bf16.gmra.mxu1 %v1690_v12 }
  0xcd   : > { %1867 = vmatmul.bf16.gmra.mxu2 %v1802_v14 }
  0xce   : > { %1984 = vmatmul.bf16.gmra.mxu3 %v1919_v16 }
  0xd0   : > { %v495_v17 = vpop.f32.mrf.mxu2  ;;  %v318_v20 = vpop.f32.mrf.mxu0 }
  0xd1   : > { %v613_v18 = vpop.f32.mrf.mxu3  ;;  %v503_v19 = vadd.f32 %v495_v17, %v391_v13  ;;  %v392_v21 = vpop.f32.mrf.mxu1 }
  0xd3   : > { %v621_v22 = vadd.f32 %v613_v18, %v503_v19 }
  0xd8   : > { %v497_v25 = vpop.f32.mrf.mxu2  ;;  %v717_v27 = vpop.f32.mrf.mxu0 }
  0xd9   : > { %v615_v44 = vpop.f32.mrf.mxu3  ;;  %v836_v28 = vpop.f32.mrf.mxu1  ;;  %v731_v30 = vadd.f32 %v717_v27, %v3562_v33 }
  0xdb   : > { %v850_v31 = vadd.f32 %v836_v28, %v731_v30  ;;  %1644 = vmatmul.bf16.gmra.mxu0 %v1574_v29 }
  0xdc   : > { %1763 = vmatmul.bf16.gmra.mxu1 %v1693_v26 }
  0xdd   : > { %1872 = vmatmul.bf16.gmra.mxu2 %v1801_v4 }
  0xde   : > { %1989 = vmatmul.bf16.gmra.mxu3 %v1918_v5 }
  0xe0   : > { %v945_v15 = vpop.f32.mrf.mxu2  ;;  %v719_v35 = vpop.f32.mrf.mxu0 }
  0xe1   : > { %v1062_v32 = vpop.f32.mrf.mxu3  ;;  %v959_v34 = vadd.f32 %v945_v15, %v850_v31  ;;  %v838_v23 = vpop.f32.mrf.mxu1  ;;  %v732_v36 = vadd.f32 %v719_v35, %v618_v53 }
  0xe3   : > { %v1076_v37 = vadd.f32 %v1062_v32, %v959_v34  ;;  %v851_v38 = vadd.f32 %v838_v23, %v732_v36 }
  0xe8   : > { %v947_v39 = vpop.f32.mrf.mxu2  ;;  %v722_v42 = vpop.f32.mrf.mxu0 }
  0xe9   : > { %v1064_v40 = vpop.f32.mrf.mxu3  ;;  %v960_v41 = vadd.f32 %v947_v39, %v851_v38  ;;  %v841_v43 = vpop.f32.mrf.mxu1  ;;  %v733_v45 = vadd.f32 %v722_v42, %v619_v1 }
  0xeb   : > { %v1077_v33 = vadd.f32 %v1064_v40, %v960_v41  ;;  %v852_v46 = vadd.f32 %v841_v43, %v733_v45 }
  0xf0   : > { %v950_v47 = vpop.f32.mrf.mxu2  ;;  %v724_v50 = vpop.f32.mrf.mxu0 }
  0xf1   : > { %v1067_v48 = vpop.f32.mrf.mxu3  ;;  %v961_v49 = vadd.f32 %v950_v47, %v852_v46  ;;  %v843_v51 = vpop.f32.mrf.mxu1  ;;  %v734_v52 = vadd.f32 %v724_v50, %v620_v8 }
  0xf3   : > { %v1078_v29 = vadd.f32 %v1067_v48, %v961_v49  ;;  %v853_v55 = vadd.f32 %v843_v51, %v734_v52  ;;  %v3005_v48 = vld [vmem:[%s3604_s2] ss:$0 sm:$0xff] }
  0xf8   : > { %v952_v56 = vpop.f32.mrf.mxu2  ;;  %v727_v58 = vpop.f32.mrf.mxu0 }
  0xf9   : > { %v1069_v53 = vpop.f32.mrf.mxu3  ;;  %v962_v57 = vadd.f32 %v952_v56, %v853_v55  ;;  %v846_v59 = vpop.f32.mrf.mxu1  ;;  %v735_v60 = vadd.f32 %v727_v58, %v621_v22 }
  0xfb   : > { %v1079_v54 = vadd.f32 %v1069_v53, %v962_v57  ;;  %v854_v61 = vadd.f32 %v846_v59, %v735_v60 }
 0x100   : > { %v955_v62 = vpop.f32.mrf.mxu2  ;;  %v729_v1 = vpop.f32.mrf.mxu0 }
 0x101   : > { %v1072_v63 = vpop.f32.mrf.mxu3  ;;  %v963_v0 = vadd.f32 %v955_v62, %v854_v61  ;;  %v848_v2 = vpop.f32.mrf.mxu1 }
 0x103   : > { %v3575_v3 = vadd.f32 %v1072_v63, %v963_v0 }
 0x108   : > { %v957_v4 = vpop.f32.mrf.mxu2  ;;  %v1176_v6 = vpop.f32.mrf.mxu0 }
 0x109   : > { %v1074_v5 = vpop.f32.mrf.mxu3  ;;  %v1295_v7 = vpop.f32.mrf.mxu1  ;;  %v1190_v44 = vadd.f32 %v1176_v6, %v1076_v37 }
 0x10b   : > { %v1309_v31 = vadd.f32 %v1295_v7, %v1190_v44 }
 0x110   : > { %v1404_v9 = vpop.f32.mrf.mxu2  ;;  %v1178_v11 = vpop.f32.mrf.mxu0 }
 0x111   : > { %v1521_v10 = vpop.f32.mrf.mxu3  ;;  %v1297_v12 = vpop.f32.mrf.mxu1  ;;  %v1418_v15 = vadd.f32 %v1404_v9, %v1309_v31  ;;  %v1191_v32 = vadd.f32 %v1178_v11, %v1077_v33 }
 0x113   : > { %v1535_v23 = vadd.f32 %v1521_v10, %v1418_v15  ;;  %v1310_v39 = vadd.f32 %v1297_v12, %v1191_v32 }
 0x118   : > { %v1406_v13 = vpop.f32.mrf.mxu2  ;;  %v1181_v16 = vpop.f32.mrf.mxu0 }
 0x119   : > { %v1523_v14 = vpop.f32.mrf.mxu3  ;;  %v1300_v8 = vpop.f32.mrf.mxu1  ;;  %v1419_v41 = vadd.f32 %v1406_v13, %v1310_v39  ;;  %v1192_v42 = vadd.f32 %v1181_v16, %v1078_v29 }
 0x11b   : > { %v1536_v46 = vadd.f32 %v1523_v14, %v1419_v41  ;;  %v1311_v50 = vadd.f32 %v1300_v8, %v1192_v42 }
 0x120   : > { %v1409_v17 = vpop.f32.mrf.mxu2  ;;  %v1183_v19 = vpop.f32.mrf.mxu0 }
 0x121   : > { %v1526_v18 = vpop.f32.mrf.mxu3  ;;  %v1302_v20 = vpop.f32.mrf.mxu1  ;;  %v1420_v29 = vadd.f32 %v1409_v17, %v1311_v50  ;;  %v1193_v56 = vadd.f32 %v1183_v19, %v1079_v54 }
 0x123   : > { %v1537_v59 = vadd.f32 %v1526_v18, %v1420_v29  ;;  %v1312_v63 = vadd.f32 %v1302_v20, %v1193_v56 }
 0x128   : > { %v1411_v21 = vpop.f32.mrf.mxu2  ;;  %v1186_v24 = vpop.f32.mrf.mxu0 }
 0x129   : > { %v1528_v22 = vpop.f32.mrf.mxu3  ;;  %v1305_v25 = vpop.f32.mrf.mxu1  ;;  %v1421_v2 = vadd.f32 %v1411_v21, %v1312_v63  ;;  %v1194_v5 = vadd.f32 %v1186_v24, %v3575_v3 }
 0x12b   : > { %v1538_v9 = vadd.f32 %v1528_v22, %v1421_v2  ;;  %v1313_v13 = vadd.f32 %v1305_v25, %v1194_v5 }
 0x130   : > { %v1414_v26 = vpop.f32.mrf.mxu2  ;;  %v1188_v28 = vpop.f32.mrf.mxu0 }
 0x131   : > { %v3577_v27 = vpop.f32.mrf.mxu3  ;;  %v1307_v30 = vpop.f32.mrf.mxu1  ;;  %v1422_v8 = vadd.f32 %v1414_v26, %v1313_v13 }
 0x133   : > { %v1539_v20 = vadd.f32 %v3577_v27, %v1422_v8 }
 0x138   : > { %v1416_v34 = vpop.f32.mrf.mxu2  ;;  %v1635_v36 = vpop.f32.mrf.mxu0 }
 0x139   : > { %v1533_v35 = vpop.f32.mrf.mxu3  ;;  %v1754_v38 = vpop.f32.mrf.mxu1  ;;  %v1649_v40 = vadd.f32 %v1635_v36, %v1535_v23 }
 0x13b   : > { %v1768_v43 = vadd.f32 %v1754_v38, %v1649_v40 }
 0x140   : > { %v1863_v37 = vpop.f32.mrf.mxu2  ;;  %v1637_v33 = vpop.f32.mrf.mxu0 }
 0x141   : > { %v1980_v45 = vpop.f32.mrf.mxu3  ;;  %v1877_v47 = vadd.f32 %v1863_v37, %v1768_v43  ;;  %v1756_v49 = vpop.f32.mrf.mxu1  ;;  %v1650_v52 = vadd.f32 %v1637_v33, %v1536_v46 }
 0x143   : > { %v1994_v51 = vadd.f32 %v1980_v45, %v1877_v47  ;;  %v1769_v53 = vadd.f32 %v1756_v49, %v1650_v52 }
 0x145   : > { %v2003_v55 = vadd.f32 %v3005_v48, %v1994_v51 }
 0x147   : > { %2009 = vst.msk [vmem:[%s3586_s10] sm:$0xff] %vm2008_vm3, %v2003_v55 }
 0x148   : > { %v1865_v57 = vpop.f32.mrf.mxu2  ;;  %v1640_v61 = vpop.f32.mrf.mxu0 }
 0x149   : > { %v1982_v58 = vpop.f32.mrf.mxu3  ;;  %v1878_v60 = vadd.f32 %v1865_v57, %v1769_v53  ;;  %v1759_v62 = vpop.f32.mrf.mxu1  ;;  %v1651_v1 = vadd.f32 %v1640_v61, %v1537_v59 }
 0x14b   : > { %v1995_v0 = vadd.f32 %v1982_v58, %v1878_v60  ;;  %v1770_v54 = vadd.f32 %v1759_v62, %v1651_v1 }
 0x14d   : > { %v2004_v4 = vadd.f32 %v3005_v48, %v1995_v0 }
 0x14f   : > { %2010 = vst.msk [vmem:[%s3586_s10 + $0x8] sm:$0xff] %vm2008_vm3, %v2004_v4 }
 0x150   : > { %v1868_v6 = vpop.f32.mrf.mxu2  ;;  %v1642_v11 = vpop.f32.mrf.mxu0 }
 0x151   : > { %v1985_v7 = vpop.f32.mrf.mxu3  ;;  %v1879_v10 = vadd.f32 %v1868_v6, %v1770_v54  ;;  %v1761_v12 = vpop.f32.mrf.mxu1  ;;  %v1652_v16 = vadd.f32 %v1642_v11, %v1538_v9 }
 0x153   : > { %v1996_v14 = vadd.f32 %v1985_v7, %v1879_v10  ;;  %v1771_v18 = vadd.f32 %v1761_v12, %v1652_v16 }
 0x155   : > { %v2005_v17 = vadd.f32 %v3005_v48, %v1996_v14 }
 0x157   : > { %2011 = vst.msk [vmem:[%s3586_s10 + $0x10] sm:$0xff] %vm2008_vm3, %v2005_v17 }
 0x158   : > { %v1870_v19 = vpop.f32.mrf.mxu2  ;;  %v1645_v24 = vpop.f32.mrf.mxu0 }
 0x159   : > { %v1987_v3 = vpop.f32.mrf.mxu3  ;;  %v1880_v21 = vadd.f32 %v1870_v19, %v1771_v18  ;;  %v1764_v22 = vpop.f32.mrf.mxu1  ;;  %v1653_v28 = vadd.f32 %v1645_v24, %v1539_v20 }
 0x15b   : > { %v1997_v44 = vadd.f32 %v1987_v3, %v1880_v21  ;;  %v1772_v25 = vadd.f32 %v1764_v22, %v1653_v28 }
 0x15d   : > { %v2006_v30 = vadd.f32 %v3005_v48, %v1997_v44 }
 0x15f   : > { %2012 = vst.msk [vmem:[%s3586_s10 + $0x18] sm:$0xff] %vm2008_vm3, %v2006_v30 }
 0x160   : > { %v1873_v31 = vpop.f32.mrf.mxu2  ;;  %v1647_v32 = vpop.f32.mrf.mxu0 }
 0x161   : > { %v1990_v26 = vpop.f32.mrf.mxu3  ;;  %v1881_v15 = vadd.f32 %v1873_v31, %v1772_v25  ;;  %v1766_v34 = vpop.f32.mrf.mxu1 }
 0x163   : > { %v1998_v35 = vadd.f32 %v1990_v26, %v1881_v15 }
 0x165   : > { %v2007_v23 = vadd.f32 %v3005_v48, %v1998_v35 }
 0x167   : > { %2014 = vst.msk [vmem:[%s3586_s10 + $0x20] sm:$0x1f] %vm2013_vm4, %v2007_v23 }
 0x168   : > { %v1875_v27 = vpop.f32.mrf.mxu2 }
 0x169   : > { %v1992_v36 = vpop.f32.mrf.mxu3 }
 0x16a PF: > { %s13_s12 = sadd.s32 1, %s3018_s12  }
 0x16b   : > { %p10_p4 = scmp.ge.s32.totalorder %s13_s12, 4  }
 0x16d   :  { %12 = sbr.rel (!%p10_p4) target bundleno = 1 (0x1), region = 77 }

</bundles_post_ra>
